<compile_context>
chip_gen: v5e
topology: v5e:2x2
jax: 0.10.0
libtpu: 0.0.40
codegen_flags: <defaults>
</compile_context>

<pallas_src>
import functools

import jax
import jax.numpy as jnp
import numpy as np
from jax.experimental import pallas as pl
from jax.experimental.pallas import tpu as pltpu

TRANS_B = (((1,), (1,)), ((), ()))   # contract last dims of both operands

# -inf padding geometry for the fused pool kernel (max radius = 13 // 2 = 6).
_PH = 6     # top/bottom pad rows
_PWL = 8    # left pad cols (sublane aligned)
_PWR = 8    # right pad cols


# ---------------------------------------------------------------------------
# Kernel 1: cv1 = 1x1 conv (BN scale pre-folded) + bias + SiLU.
#   Reads NCHW blocks (N, C1, HW-tile); writes spatial-major (HW-tile, c_)
#   so the pooling kernel gets channels on the lane dimension.
# ---------------------------------------------------------------------------
def _cv1_kernel(x_ref, w_ref, b_ref, o_ref):
    # x_ref: (1, C1, ts)  w_ref: (C1, c_) bf16 (scale folded)  b_ref: (1, c_) f32
    xb = x_ref[0].T.astype(jnp.bfloat16)                    # (ts, C1), in-VMEM
    y = jnp.dot(xb, w_ref[...], preferred_element_type=jnp.float32)
    y = y + b_ref[...]
    sig = pl.reciprocal(1.0 + jnp.exp(-y), approx=True)     # approx sigmoid (EUP)
    o_ref[0] = (y * sig).astype(o_ref.dtype)


def conv1x1_bn_silu_nchw_in(x_nc_hw, w, b, *, ts=2048):
    """x_nc_hw: (N, C1, HW); w: (C1, c_) bf16; b: (1, c_) f32 -> (N, HW, c_) bf16."""
    N, C1, HW = x_nc_hw.shape
    c_ = w.shape[1]
    ts = min(ts, HW)
    grid = (N, pl.cdiv(HW, ts))
    return pl.pallas_call(
        _cv1_kernel,
        out_shape=jax.ShapeDtypeStruct((N, HW, c_), jnp.bfloat16),
        grid=grid,
        in_specs=[
            pl.BlockSpec((1, C1, ts), lambda n, s: (n, 0, s)),
            pl.BlockSpec((C1, c_), lambda n, s: (0, 0)),
            pl.BlockSpec((1, c_), lambda n, s: (0, 0)),
        ],
        out_specs=pl.BlockSpec((1, ts, c_), lambda n, s: (n, s, 0)),
        compiler_params=pltpu.CompilerParams(
            dimension_semantics=("parallel", "parallel"),
            vmem_limit_bytes=48 * 1024 * 1024),
    )(x_nc_hw, w, b)


# ---------------------------------------------------------------------------
# Kernel 2: fused MaxPool(5/9/13, stride 1, same) + cv2 (split-K over the
#   virtual concat [x1|p5|p9|p13]) + bias + SiLU, output directly in NCHW-flat
#   (N, c2, H*W).  The pooled tensors and the concat never exist in HBM.
# ---------------------------------------------------------------------------
def _pool_cv2_kernel(x_ref, w_ref, b_ref, o_ref, xp_ref, acc_ref, *, ks, H, W):
    # x_ref:  (1, H, W, ct) bf16        x1 channel chunk (channels-last)
    # w_ref:  (len(ks)+1, c2, ct) bf16  cv2 weights, BN scale folded
    # b_ref:  (c2, 1) f32               cv2 bias
    # o_ref:  (1, c2, H*W)              NCHW-flat output
    # xp_ref: (H+2*_PH, W+_PWL+_PWR, ct) bf16  -inf padded image scratch
    # acc_ref:(c2, H*W) f32             split-K accumulator
    c = pl.program_id(1)
    ct = x_ref.shape[-1]
    hw = H * W
    wp = W + _PWL + _PWR

    @pl.when(c == 0)
    def _init():
        acc_ref[...] = jnp.zeros_like(acc_ref)

    # -inf border bands only (the interior is fully overwritten every step).
    xp_ref[0:_PH, :, :] = jnp.full((_PH, wp, ct), -jnp.inf, xp_ref.dtype)
    xp_ref[_PH + H:_PH + H + _PH, :, :] = jnp.full((_PH, wp, ct), -jnp.inf,
                                                   xp_ref.dtype)
    xp_ref[_PH:_PH + H, 0:_PWL, :] = jnp.full((H, _PWL, ct), -jnp.inf,
                                              xp_ref.dtype)
    xp_ref[_PH:_PH + H, _PWL + W:wp, :] = jnp.full((H, _PWR, ct), -jnp.inf,
                                                   xp_ref.dtype)
    xp_ref[_PH:_PH + H, _PWL:_PWL + W, :] = x_ref[0].astype(xp_ref.dtype)
    xp = xp_ref[...]

    def contract(chunk_hw_ct, w_slice):
        # (c2, hw) = W (c2, ct) @ chunk^T (ct, hw); rhs-transposed MXU dot.
        return jax.lax.dot_general(w_slice, chunk_hw_ct, TRANS_B,
                                   preferred_element_type=jnp.float32)

    # Identity branch of the virtual concat.
    part = contract(x_ref[0].reshape(hw, ct), w_ref[0])

    # Shared incrementally-extended row max (radius 2 -> 4 -> 6); per-k column
    # pass; each pooled chunk feeds its cv2 slice immediately (no HBM output).
    rm = xp[_PH:_PH + H]                                   # (H, Wp, ct)
    prev_r = 0
    for idx, k in enumerate(ks):
        r = k // 2
        for d in range(prev_r + 1, r + 1):
            rm = jnp.maximum(rm, xp[_PH - d:_PH - d + H])
            rm = jnp.maximum(rm, xp[_PH + d:_PH + d + H])
        prev_r = r
        cm = rm[:, _PWL:_PWL + W]
        for d in range(1, r + 1):
            cm = jnp.maximum(cm, rm[:, _PWL - d:_PWL - d + W])
            cm = jnp.maximum(cm, rm[:, _PWL + d:_PWL + d + W])
        part = part + contract(cm.reshape(hw, ct), w_ref[idx + 1])

    acc_ref[...] += part

    @pl.when(c == pl.num_programs(1) - 1)
    def _finish():
        y = acc_ref[...] + b_ref[...]
        sig = pl.reciprocal(1.0 + jnp.exp(-y), approx=True)
        o_ref[0] = (y * sig).astype(o_ref.dtype)


def pool_cat_cv2(x1_nhwc, w2, b2, *, ks=(5, 9, 13), out_dtype=jnp.float32):
    """x1_nhwc: (N, H, W, c_) bf16; w2: (len(ks)+1, c2, c_) bf16; b2: (c2, 1).
    Returns cv2(concat([x1] + pools)) in NCHW-flat form: (N, c2, H*W)."""
    assert all(k % 2 == 1 for k in ks) and tuple(ks) == tuple(sorted(ks))
    assert max(ks) // 2 <= _PH
    N, H, W, c_ = x1_nhwc.shape
    c2 = w2.shape[1]
    # Only tile channels when the tile divides c_ exactly (the channel axis is
    # a reduction here, so ragged chunks would pollute the accumulator).
    ct = 128 if (c_ > 128 and c_ % 128 == 0) else c_
    grid = (N, c_ // ct)
    kern = functools.partial(_pool_cv2_kernel, ks=tuple(ks), H=H, W=W)
    return pl.pallas_call(
        kern,
        out_shape=jax.ShapeDtypeStruct((N, c2, H * W), out_dtype),
        grid=grid,
        in_specs=[
            pl.BlockSpec((1, H, W, ct), lambda n, c: (n, 0, 0, c)),
            pl.BlockSpec((len(ks) + 1, c2, ct), lambda n, c: (0, 0, c)),
            pl.BlockSpec((c2, 1), lambda n, c: (0, 0)),
        ],
        out_specs=pl.BlockSpec((1, c2, H * W), lambda n, c: (n, 0, 0)),
        scratch_shapes=[
            pltpu.VMEM((H + 2 * _PH, W + _PWL + _PWR, ct), jnp.bfloat16),
            pltpu.VMEM((c2, H * W), jnp.float32),
        ],
        compiler_params=pltpu.CompilerParams(
            dimension_semantics=("parallel", "arbitrary"),
            vmem_limit_bytes=48 * 1024 * 1024),
    )(x1_nhwc, w2, b2)


# ---------------------------------------------------------------------------
# SPP module: parameters (inference BN folded into weights/bias) + forward.
# ---------------------------------------------------------------------------
def fold_bn(gamma, beta, mean, var, eps=1e-5):
    scale = gamma / jnp.sqrt(var + eps)
    bias = beta - mean * scale
    return scale, bias


def init_spp_params(key, c1, c2, ks=(5, 9, 13)):
    c_ = c1 // 2
    nb = len(ks) + 1
    keys = jax.random.split(key, 10)
    w1 = 0.1 * jax.random.normal(keys[0], (c1, c_), jnp.float32)
    w2 = 0.1 * jax.random.normal(keys[1], (nb * c_, c2), jnp.float32)
    # Synthetic inference-mode BatchNorm statistics.
    g1 = 1.0 + 0.1 * jax.random.normal(keys[2], (c_,), jnp.float32)
    be1 = 0.1 * jax.random.normal(keys[3], (c_,), jnp.float32)
    m1 = 0.05 * jax.random.normal(keys[4], (c_,), jnp.float32)
    v1 = 1.0 + 0.1 * jax.random.uniform(keys[5], (c_,), jnp.float32)
    g2 = 1.0 + 0.1 * jax.random.normal(keys[6], (c2,), jnp.float32)
    be2 = 0.1 * jax.random.normal(keys[7], (c2,), jnp.float32)
    m2 = 0.05 * jax.random.normal(keys[8], (c2,), jnp.float32)
    v2 = 1.0 + 0.1 * jax.random.uniform(keys[9], (c2,), jnp.float32)
    s1, b1 = fold_bn(g1, be1, m1, v1)
    s2, b2 = fold_bn(g2, be2, m2, v2)
    # Fold BN scale into the conv weights -> bias-only epilogues in-kernel.
    w1f = (w1 * s1[None, :]).astype(jnp.bfloat16)               # (C1, c_)
    w2f = (w2 * s2[None, :]).reshape(nb, c_, c2)                # (4, c_, c2)
    w2f = jnp.transpose(w2f, (0, 2, 1)).astype(jnp.bfloat16)    # (4, c2, c_)
    return dict(w1=w1f, bias1=b1[None, :], w2=w2f, bias2=b2[:, None])


@jax.jit
def spp_forward(x_nchw, params):
    N, C1, H, W = x_nchw.shape
    c_ = params["w1"].shape[1]
    c2 = params["w2"].shape[1]
    hw = H * W
    # cv1: NCHW in -> spatial-major x1 out (only free reshapes on HBM).
    x1 = conv1x1_bn_silu_nchw_in(x_nchw.reshape(N, C1, hw),
                                 params["w1"], params["bias1"])
    # fused pools + cv2 over the virtual concat, output already NCHW-flat.
    y = pool_cat_cv2(x1.reshape(N, H, W, c_), params["w2"], params["bias2"],
                     out_dtype=x_nchw.dtype)
    return y.reshape(N, c2, H, W)


# ---------------------------------------------------------------------------
# Pure-JAX reference (mirrors the bf16 / folded-weight numerics).
# ---------------------------------------------------------------------------
def spp_reference(x_nchw, params, ks=(5, 9, 13)):
    x = jnp.transpose(x_nchw, (0, 2, 3, 1)).astype(jnp.bfloat16)
    c2 = params["w2"].shape[1]

    def act(y):
        return y * jax.nn.sigmoid(y)

    y1 = jnp.einsum("nhwc,cd->nhwd", x, params["w1"],
                    preferred_element_type=jnp.float32) + params["bias1"][0]
    x1 = act(y1).astype(jnp.bfloat16)

    def pool(v, k):
        p = k // 2
        return jax.lax.reduce_window(
            v.astype(jnp.float32), -jnp.inf, jax.lax.max,
            (1, k, k, 1), (1, 1, 1, 1),
            ((0, 0), (p, p), (p, p), (0, 0))).astype(jnp.bfloat16)

    cat = jnp.concatenate([x1] + [pool(x1, k) for k in ks], axis=-1)
    w2_full = jnp.transpose(params["w2"], (0, 2, 1)).reshape(-1, c2)
    y2 = jnp.einsum("nhwc,cd->nhwd", cat, w2_full,
                    preferred_element_type=jnp.float32) + params["bias2"][:, 0]
    y = act(y2)
    return jnp.transpose(y, (0, 3, 1, 2)).astype(x_nchw.dtype)


if __name__ == "__main__":
    key = jax.random.PRNGKey(0)
    k_x, k_p = jax.random.split(key)

    N, C1, H, W = 2, 8, 16, 16
    C2 = 16
    x = jax.random.normal(k_x, (N, C1, H, W), jnp.float32)
    params = init_spp_params(k_p, C1, C2)

    out = jax.block_until_ready(spp_forward(x, params))
    assert out.shape == (N, C2, H, W), out.shape

    ref = jax.block_until_ready(spp_reference(x, params))
    # Loose-ish tolerance: approx-reciprocal sigmoid in-kernel vs exact in ref.
    np.testing.assert_allclose(np.asarray(out), np.asarray(ref),
                               rtol=2e-2, atol=5e-3)
    print("KERNEL_OK")
</pallas_src>

<mosaic_0001>
module attributes {stable_mosaic.version = 11 : i64} {
  func.func @_pool_cv2_kernel(%arg0: i32, %arg1: i32, %arg2: memref<1x16x16x4xbf16, #tpu.memory_space<vmem>>, %arg3: memref<4x16x4xbf16, #tpu.memory_space<vmem>>, %arg4: memref<16x1xf32, #tpu.memory_space<vmem>>, %arg5: memref<1x16x256xf32, #tpu.memory_space<vmem>>, %arg6: memref<28x32x4xbf16, #tpu.memory_space<vmem>>, %arg7: memref<16x256xf32, #tpu.memory_space<vmem>>) attributes {dimension_semantics = [#tpu.dimension_semantics<parallel>, #tpu.dimension_semantics<arbitrary>], iteration_bounds = array<i64: 2, 1>, scalar_prefetch = 0 : i64, scratch_operands = 2 : i64, tpu.core_type = #tpu.core_type<tc>, window_params = [{transform_indices = @transform_0, window_bounds = array<i64: 1, 16, 16, 4>}, {transform_indices = @transform_1, window_bounds = array<i64: 4, 16, 4>}, {pipeline_mode = #tpu.pipeline_mode<synchronous>, transform_indices = @transform_2, window_bounds = array<i64: 16, 1>}, {transform_indices = @transform_3, window_bounds = array<i64: 1, 16, 256>}]} {
    %c0_i32 = arith.constant 0 : i32
    %0 = arith.cmpi eq, %arg1, %c0_i32 : i32
    %1 = arith.extui %0 : i1 to i32
    %c0_i32_0 = arith.constant 0 : i32
    %2 = arith.cmpi ne, %1, %c0_i32_0 : i32
    scf.if %2 {
      %cst_44 = arith.constant 0.000000e+00 : f32
      %118 = vector.broadcast %cst_44 : f32 to vector<16x256xf32>
      %c0_45 = arith.constant 0 : index
      %c0_46 = arith.constant 0 : index
      %119 = vector.load %arg7[%c0_45, %c0_46] : memref<16x256xf32, #tpu.memory_space<vmem>>, vector<16x256xf32>
      tpu.vector_store %arg7[%c0_45, %c0_46], %118 {strides = array<i32>} : memref<16x256xf32, #tpu.memory_space<vmem>>, vector<16x256xf32>,
    } else {
    }
    %cst = arith.constant 0xFF80 : bf16
    %3 = vector.broadcast %cst : bf16 to vector<6x32x4xbf16>
    %c0 = arith.constant 0 : index
    %c0_1 = arith.constant 0 : index
    %c0_2 = arith.constant 0 : index
    %4 = vector.load %arg6[%c0, %c0_1, %c0_2] : memref<28x32x4xbf16, #tpu.memory_space<vmem>>, vector<6x32x4xbf16>
    tpu.vector_store %arg6[%c0, %c0_1, %c0_2], %3 {strides = array<i32>} : memref<28x32x4xbf16, #tpu.memory_space<vmem>>, vector<6x32x4xbf16>,
    %cst_3 = arith.constant 0xFF80 : bf16
    %5 = vector.broadcast %cst_3 : bf16 to vector<6x32x4xbf16>
    %c22 = arith.constant 22 : index
    %c0_4 = arith.constant 0 : index
    %c0_5 = arith.constant 0 : index
    %6 = vector.load %arg6[%c22, %c0_4, %c0_5] : memref<28x32x4xbf16, #tpu.memory_space<vmem>>, vector<6x32x4xbf16>
    tpu.vector_store %arg6[%c22, %c0_4, %c0_5], %5 {strides = array<i32>} : memref<28x32x4xbf16, #tpu.memory_space<vmem>>, vector<6x32x4xbf16>,
    %cst_6 = arith.constant 0xFF80 : bf16
    %7 = vector.broadcast %cst_6 : bf16 to vector<16x8x4xbf16>
    %c6 = arith.constant 6 : index
    %c0_7 = arith.constant 0 : index
    %c0_8 = arith.constant 0 : index
    %8 = vector.load %arg6[%c6, %c0_7, %c0_8] : memref<28x32x4xbf16, #tpu.memory_space<vmem>>, vector<16x8x4xbf16>
    tpu.vector_store %arg6[%c6, %c0_7, %c0_8], %7 {strides = array<i32>} : memref<28x32x4xbf16, #tpu.memory_space<vmem>>, vector<16x8x4xbf16>,
    %cst_9 = arith.constant 0xFF80 : bf16
    %9 = vector.broadcast %cst_9 : bf16 to vector<16x8x4xbf16>
    %c6_10 = arith.constant 6 : index
    %c24 = arith.constant 24 : index
    %c0_11 = arith.constant 0 : index
    %10 = vector.load %arg6[%c6_10, %c24, %c0_11] : memref<28x32x4xbf16, #tpu.memory_space<vmem>>, vector<16x8x4xbf16>
    tpu.vector_store %arg6[%c6_10, %c24, %c0_11], %9 {strides = array<i32>} : memref<28x32x4xbf16, #tpu.memory_space<vmem>>, vector<16x8x4xbf16>,
    %c0_12 = arith.constant 0 : index
    %c0_13 = arith.constant 0 : index
    %c0_14 = arith.constant 0 : index
    %c0_15 = arith.constant 0 : index
    %11 = vector.load %arg2[%c0_12, %c0_13, %c0_14, %c0_15] : memref<1x16x16x4xbf16, #tpu.memory_space<vmem>>, vector<1x16x16x4xbf16>
    %12 = vector.shape_cast %11 : vector<1x16x16x4xbf16> to vector<16x16x4xbf16>
    %c6_16 = arith.constant 6 : index
    %c8 = arith.constant 8 : index
    %c0_17 = arith.constant 0 : index
    %13 = vector.load %arg6[%c6_16, %c8, %c0_17] : memref<28x32x4xbf16, #tpu.memory_space<vmem>>, vector<16x16x4xbf16>
    tpu.vector_store %arg6[%c6_16, %c8, %c0_17], %12 {strides = array<i32>} : memref<28x32x4xbf16, #tpu.memory_space<vmem>>, vector<16x16x4xbf16>,
    %c0_18 = arith.constant 0 : index
    %c0_19 = arith.constant 0 : index
    %c0_20 = arith.constant 0 : index
    %14 = vector.load %arg6[%c0_18, %c0_19, %c0_20] : memref<28x32x4xbf16, #tpu.memory_space<vmem>>, vector<28x32x4xbf16>
    %c0_21 = arith.constant 0 : index
    %c0_22 = arith.constant 0 : index
    %c0_23 = arith.constant 0 : index
    %c0_24 = arith.constant 0 : index
    %15 = vector.load %arg2[%c0_21, %c0_22, %c0_23, %c0_24] : memref<1x16x16x4xbf16, #tpu.memory_space<vmem>>, vector<1x16x16x4xbf16>
    %16 = vector.shape_cast %15 : vector<1x16x16x4xbf16> to vector<16x16x4xbf16>
    %17 = vector.shape_cast %16 : vector<16x16x4xbf16> to vector<256x4xbf16>
    %c0_25 = arith.constant 0 : index
    %c0_26 = arith.constant 0 : index
    %c0_27 = arith.constant 0 : index
    %18 = vector.load %arg3[%c0_25, %c0_26, %c0_27] : memref<4x16x4xbf16, #tpu.memory_space<vmem>>, vector<1x16x4xbf16>
    %19 = vector.shape_cast %18 : vector<1x16x4xbf16> to vector<16x4xbf16>
    %cst_28 = arith.constant dense<0.000000e+00> : vector<16x256xf32>
    %20 = tpu.matmul %19, %17, %cst_28 {dimension_numbers = #tpu.dot_dimension_numbers<[1], [1], [0], [0], [0, 0, 1, 0], [], []>} : vector<16x4xbf16>, vector<256x4xbf16>, vector<16x256xf32> -> vector<16x256xf32>
    %21 = vector.extract_strided_slice %14 {offsets = [6, 0, 0], sizes = [16, 32, 4], strides = [1, 1, 1]} : vector<28x32x4xbf16> to vector<16x32x4xbf16>
    %22 = vector.extract_strided_slice %14 {offsets = [5, 0, 0], sizes = [16, 32, 4], strides = [1, 1, 1]} : vector<28x32x4xbf16> to vector<16x32x4xbf16>
    %23 = arith.maximumf %21, %22 : vector<16x32x4xbf16>
    %24 = vector.extract_strided_slice %14 {offsets = [7, 0, 0], sizes = [16, 32, 4], strides = [1, 1, 1]} : vector<28x32x4xbf16> to vector<16x32x4xbf16>
    %25 = arith.maximumf %23, %24 : vector<16x32x4xbf16>
    %26 = vector.extract_strided_slice %14 {offsets = [4, 0, 0], sizes = [16, 32, 4], strides = [1, 1, 1]} : vector<28x32x4xbf16> to vector<16x32x4xbf16>
    %27 = arith.maximumf %25, %26 : vector<16x32x4xbf16>
    %28 = vector.extract_strided_slice %14 {offsets = [8, 0, 0], sizes = [16, 32, 4], strides = [1, 1, 1]} : vector<28x32x4xbf16> to vector<16x32x4xbf16>
    %29 = arith.maximumf %27, %28 : vector<16x32x4xbf16>
    %30 = vector.extract_strided_slice %29 {offsets = [0, 8, 0], sizes = [16, 16, 4], strides = [1, 1, 1]} : vector<16x32x4xbf16> to vector<16x16x4xbf16>
    %31 = vector.extract_strided_slice %29 {offsets = [0, 7, 0], sizes = [16, 16, 4], strides = [1, 1, 1]} : vector<16x32x4xbf16> to vector<16x16x4xbf16>
    %32 = arith.maximumf %30, %31 : vector<16x16x4xbf16>
    %33 = vector.extract_strided_slice %29 {offsets = [0, 9, 0], sizes = [16, 16, 4], strides = [1, 1, 1]} : vector<16x32x4xbf16> to vector<16x16x4xbf16>
    %34 = arith.maximumf %32, %33 : vector<16x16x4xbf16>
    %35 = vector.extract_strided_slice %29 {offsets = [0, 6, 0], sizes = [16, 16, 4], strides = [1, 1, 1]} : vector<16x32x4xbf16> to vector<16x16x4xbf16>
    %36 = arith.maximumf %34, %35 : vector<16x16x4xbf16>
    %37 = vector.extract_strided_slice %29 {offsets = [0, 10, 0], sizes = [16, 16, 4], strides = [1, 1, 1]} : vector<16x32x4xbf16> to vector<16x16x4xbf16>
    %38 = arith.maximumf %36, %37 : vector<16x16x4xbf16>
    %39 = vector.shape_cast %38 : vector<16x16x4xbf16> to vector<256x4xbf16>
    %c1 = arith.constant 1 : index
    %c0_29 = arith.constant 0 : index
    %c0_30 = arith.constant 0 : index
    %40 = vector.load %arg3[%c1, %c0_29, %c0_30] : memref<4x16x4xbf16, #tpu.memory_space<vmem>>, vector<1x16x4xbf16>
    %41 = vector.shape_cast %40 : vector<1x16x4xbf16> to vector<16x4xbf16>
    %cst_31 = arith.constant dense<0.000000e+00> : vector<16x256xf32>
    %42 = tpu.matmul %41, %39, %cst_31 {dimension_numbers = #tpu.dot_dimension_numbers<[1], [1], [0], [0], [0, 0, 1, 0], [], []>} : vector<16x4xbf16>, vector<256x4xbf16>, vector<16x256xf32> -> vector<16x256xf32>
    %43 = arith.addf %20, %42 : vector<16x256xf32>
    %44 = vector.extract_strided_slice %14 {offsets = [3, 0, 0], sizes = [16, 32, 4], strides = [1, 1, 1]} : vector<28x32x4xbf16> to vector<16x32x4xbf16>
    %45 = arith.maximumf %29, %44 : vector<16x32x4xbf16>
    %46 = vector.extract_strided_slice %14 {offsets = [9, 0, 0], sizes = [16, 32, 4], strides = [1, 1, 1]} : vector<28x32x4xbf16> to vector<16x32x4xbf16>
    %47 = arith.maximumf %45, %46 : vector<16x32x4xbf16>
    %48 = vector.extract_strided_slice %14 {offsets = [2, 0, 0], sizes = [16, 32, 4], strides = [1, 1, 1]} : vector<28x32x4xbf16> to vector<16x32x4xbf16>
    %49 = arith.maximumf %47, %48 : vector<16x32x4xbf16>
    %50 = vector.extract_strided_slice %14 {offsets = [10, 0, 0], sizes = [16, 32, 4], strides = [1, 1, 1]} : vector<28x32x4xbf16> to vector<16x32x4xbf16>
    %51 = arith.maximumf %49, %50 : vector<16x32x4xbf16>
    %52 = vector.extract_strided_slice %51 {offsets = [0, 8, 0], sizes = [16, 16, 4], strides = [1, 1, 1]} : vector<16x32x4xbf16> to vector<16x16x4xbf16>
    %53 = vector.extract_strided_slice %51 {offsets = [0, 7, 0], sizes = [16, 16, 4], strides = [1, 1, 1]} : vector<16x32x4xbf16> to vector<16x16x4xbf16>
    %54 = arith.maximumf %52, %53 : vector<16x16x4xbf16>
    %55 = vector.extract_strided_slice %51 {offsets = [0, 9, 0], sizes = [16, 16, 4], strides = [1, 1, 1]} : vector<16x32x4xbf16> to vector<16x16x4xbf16>
    %56 = arith.maximumf %54, %55 : vector<16x16x4xbf16>
    %57 = vector.extract_strided_slice %51 {offsets = [0, 6, 0], sizes = [16, 16, 4], strides = [1, 1, 1]} : vector<16x32x4xbf16> to vector<16x16x4xbf16>
    %58 = arith.maximumf %56, %57 : vector<16x16x4xbf16>
    %59 = vector.extract_strided_slice %51 {offsets = [0, 10, 0], sizes = [16, 16, 4], strides = [1, 1, 1]} : vector<16x32x4xbf16> to vector<16x16x4xbf16>
    %60 = arith.maximumf %58, %59 : vector<16x16x4xbf16>
    %61 = vector.extract_strided_slice %51 {offsets = [0, 5, 0], sizes = [16, 16, 4], strides = [1, 1, 1]} : vector<16x32x4xbf16> to vector<16x16x4xbf16>
    %62 = arith.maximumf %60, %61 : vector<16x16x4xbf16>
    %63 = vector.extract_strided_slice %51 {offsets = [0, 11, 0], sizes = [16, 16, 4], strides = [1, 1, 1]} : vector<16x32x4xbf16> to vector<16x16x4xbf16>
    %64 = arith.maximumf %62, %63 : vector<16x16x4xbf16>
    %65 = vector.extract_strided_slice %51 {offsets = [0, 4, 0], sizes = [16, 16, 4], strides = [1, 1, 1]} : vector<16x32x4xbf16> to vector<16x16x4xbf16>
    %66 = arith.maximumf %64, %65 : vector<16x16x4xbf16>
    %67 = vector.extract_strided_slice %51 {offsets = [0, 12, 0], sizes = [16, 16, 4], strides = [1, 1, 1]} : vector<16x32x4xbf16> to vector<16x16x4xbf16>
    %68 = arith.maximumf %66, %67 : vector<16x16x4xbf16>
    %69 = vector.shape_cast %68 : vector<16x16x4xbf16> to vector<256x4xbf16>
    %c2 = arith.constant 2 : index
    %c0_32 = arith.constant 0 : index
    %c0_33 = arith.constant 0 : index
    %70 = vector.load %arg3[%c2, %c0_32, %c0_33] : memref<4x16x4xbf16, #tpu.memory_space<vmem>>, vector<1x16x4xbf16>
    %71 = vector.shape_cast %70 : vector<1x16x4xbf16> to vector<16x4xbf16>
    %cst_34 = arith.constant dense<0.000000e+00> : vector<16x256xf32>
    %72 = tpu.matmul %71, %69, %cst_34 {dimension_numbers = #tpu.dot_dimension_numbers<[1], [1], [0], [0], [0, 0, 1, 0], [], []>} : vector<16x4xbf16>, vector<256x4xbf16>, vector<16x256xf32> -> vector<16x256xf32>
    %73 = arith.addf %43, %72 : vector<16x256xf32>
    %74 = vector.extract_strided_slice %14 {offsets = [1, 0, 0], sizes = [16, 32, 4], strides = [1, 1, 1]} : vector<28x32x4xbf16> to vector<16x32x4xbf16>
    %75 = arith.maximumf %51, %74 : vector<16x32x4xbf16>
    %76 = vector.extract_strided_slice %14 {offsets = [11, 0, 0], sizes = [16, 32, 4], strides = [1, 1, 1]} : vector<28x32x4xbf16> to vector<16x32x4xbf16>
    %77 = arith.maximumf %75, %76 : vector<16x32x4xbf16>
    %78 = vector.extract_strided_slice %14 {offsets = [0, 0, 0], sizes = [16, 32, 4], strides = [1, 1, 1]} : vector<28x32x4xbf16> to vector<16x32x4xbf16>
    %79 = arith.maximumf %77, %78 : vector<16x32x4xbf16>
    %80 = vector.extract_strided_slice %14 {offsets = [12, 0, 0], sizes = [16, 32, 4], strides = [1, 1, 1]} : vector<28x32x4xbf16> to vector<16x32x4xbf16>
    %81 = arith.maximumf %79, %80 : vector<16x32x4xbf16>
    %82 = vector.extract_strided_slice %81 {offsets = [0, 8, 0], sizes = [16, 16, 4], strides = [1, 1, 1]} : vector<16x32x4xbf16> to vector<16x16x4xbf16>
    %83 = vector.extract_strided_slice %81 {offsets = [0, 7, 0], sizes = [16, 16, 4], strides = [1, 1, 1]} : vector<16x32x4xbf16> to vector<16x16x4xbf16>
    %84 = arith.maximumf %82, %83 : vector<16x16x4xbf16>
    %85 = vector.extract_strided_slice %81 {offsets = [0, 9, 0], sizes = [16, 16, 4], strides = [1, 1, 1]} : vector<16x32x4xbf16> to vector<16x16x4xbf16>
    %86 = arith.maximumf %84, %85 : vector<16x16x4xbf16>
    %87 = vector.extract_strided_slice %81 {offsets = [0, 6, 0], sizes = [16, 16, 4], strides = [1, 1, 1]} : vector<16x32x4xbf16> to vector<16x16x4xbf16>
    %88 = arith.maximumf %86, %87 : vector<16x16x4xbf16>
    %89 = vector.extract_strided_slice %81 {offsets = [0, 10, 0], sizes = [16, 16, 4], strides = [1, 1, 1]} : vector<16x32x4xbf16> to vector<16x16x4xbf16>
    %90 = arith.maximumf %88, %89 : vector<16x16x4xbf16>
    %91 = vector.extract_strided_slice %81 {offsets = [0, 5, 0], sizes = [16, 16, 4], strides = [1, 1, 1]} : vector<16x32x4xbf16> to vector<16x16x4xbf16>
    %92 = arith.maximumf %90, %91 : vector<16x16x4xbf16>
    %93 = vector.extract_strided_slice %81 {offsets = [0, 11, 0], sizes = [16, 16, 4], strides = [1, 1, 1]} : vector<16x32x4xbf16> to vector<16x16x4xbf16>
    %94 = arith.maximumf %92, %93 : vector<16x16x4xbf16>
    %95 = vector.extract_strided_slice %81 {offsets = [0, 4, 0], sizes = [16, 16, 4], strides = [1, 1, 1]} : vector<16x32x4xbf16> to vector<16x16x4xbf16>
    %96 = arith.maximumf %94, %95 : vector<16x16x4xbf16>
    %97 = vector.extract_strided_slice %81 {offsets = [0, 12, 0], sizes = [16, 16, 4], strides = [1, 1, 1]} : vector<16x32x4xbf16> to vector<16x16x4xbf16>
    %98 = arith.maximumf %96, %97 : vector<16x16x4xbf16>
    %99 = vector.extract_strided_slice %81 {offsets = [0, 3, 0], sizes = [16, 16, 4], strides = [1, 1, 1]} : vector<16x32x4xbf16> to vector<16x16x4xbf16>
    %100 = arith.maximumf %98, %99 : vector<16x16x4xbf16>
    %101 = vector.extract_strided_slice %81 {offsets = [0, 13, 0], sizes = [16, 16, 4], strides = [1, 1, 1]} : vector<16x32x4xbf16> to vector<16x16x4xbf16>
    %102 = arith.maximumf %100, %101 : vector<16x16x4xbf16>
    %103 = vector.extract_strided_slice %81 {offsets = [0, 2, 0], sizes = [16, 16, 4], strides = [1, 1, 1]} : vector<16x32x4xbf16> to vector<16x16x4xbf16>
    %104 = arith.maximumf %102, %103 : vector<16x16x4xbf16>
    %105 = vector.extract_strided_slice %81 {offsets = [0, 14, 0], sizes = [16, 16, 4], strides = [1, 1, 1]} : vector<16x32x4xbf16> to vector<16x16x4xbf16>
    %106 = arith.maximumf %104, %105 : vector<16x16x4xbf16>
    %107 = vector.shape_cast %106 : vector<16x16x4xbf16> to vector<256x4xbf16>
    %c3 = arith.constant 3 : index
    %c0_35 = arith.constant 0 : index
    %c0_36 = arith.constant 0 : index
    %108 = vector.load %arg3[%c3, %c0_35, %c0_36] : memref<4x16x4xbf16, #tpu.memory_space<vmem>>, vector<1x16x4xbf16>
    %109 = vector.shape_cast %108 : vector<1x16x4xbf16> to vector<16x4xbf16>
    %cst_37 = arith.constant dense<0.000000e+00> : vector<16x256xf32>
    %110 = tpu.matmul %109, %107, %cst_37 {dimension_numbers = #tpu.dot_dimension_numbers<[1], [1], [0], [0], [0, 0, 1, 0], [], []>} : vector<16x4xbf16>, vector<256x4xbf16>, vector<16x256xf32> -> vector<16x256xf32>
    %111 = arith.addf %73, %110 : vector<16x256xf32>
    %c0_38 = arith.constant 0 : index
    %c0_39 = arith.constant 0 : index
    %112 = vector.load %arg7[%c0_38, %c0_39] : memref<16x256xf32, #tpu.memory_space<vmem>>, vector<16x256xf32>
    %113 = arith.addf %112, %111 : vector<16x256xf32>
    %c0_40 = arith.constant 0 : index
    %c0_41 = arith.constant 0 : index
    %114 = vector.load %arg7[%c0_40, %c0_41] : memref<16x256xf32, #tpu.memory_space<vmem>>, vector<16x256xf32>
    tpu.vector_store %arg7[%c0_40, %c0_41], %113 {strides = array<i32>} : memref<16x256xf32, #tpu.memory_space<vmem>>, vector<16x256xf32>,
    %c0_i32_42 = arith.constant 0 : i32
    %115 = arith.cmpi eq, %arg1, %c0_i32_42 : i32
    %116 = arith.extui %115 : i1 to i32
    %c0_i32_43 = arith.constant 0 : i32
    %117 = arith.cmpi ne, %116, %c0_i32_43 : i32
    scf.if %117 {
      %c0_44 = arith.constant 0 : index
      %c0_45 = arith.constant 0 : index
      %118 = vector.load %arg7[%c0_44, %c0_45] : memref<16x256xf32, #tpu.memory_space<vmem>>, vector<16x256xf32>
      %c0_46 = arith.constant 0 : index
      %c0_47 = arith.constant 0 : index
      %119 = vector.load %arg4[%c0_46, %c0_47] : memref<16x1xf32, #tpu.memory_space<vmem>>, vector<16x1xf32>
      %120 = vector.broadcast %119 : vector<16x1xf32> to vector<16x256xf32>
      %121 = arith.addf %118, %120 : vector<16x256xf32>
      %cst_48 = arith.constant 0.000000e+00 : f32
      %122 = vector.broadcast %cst_48 : f32 to vector<16x256xf32>
      %123 = arith.subf %122, %121 : vector<16x256xf32>
      %124 = math.exp %123 : vector<16x256xf32>
      %cst_49 = arith.constant 1.000000e+00 : f32
      %125 = vector.broadcast %cst_49 : f32 to vector<16x256xf32>
      %126 = arith.addf %125, %124 : vector<16x256xf32>
      %127 = tpu.reciprocal %126 {approx = true} : vector<16x256xf32> -> vector<16x256xf32>
      %128 = arith.mulf %121, %127 : vector<16x256xf32>
      %c0_50 = arith.constant 0 : index
      %c0_51 = arith.constant 0 : index
      %c0_52 = arith.constant 0 : index
      %129 = vector.load %arg5[%c0_50, %c0_51, %c0_52] : memref<1x16x256xf32, #tpu.memory_space<vmem>>, vector<1x16x256xf32>
      %130 = vector.shape_cast %129 : vector<1x16x256xf32> to vector<16x256xf32>
      %131 = vector.shape_cast %128 : vector<16x256xf32> to vector<1x16x256xf32>
      tpu.vector_store %arg5[%c0_50, %c0_51, %c0_52], %131 {strides = array<i32>} : memref<1x16x256xf32, #tpu.memory_space<vmem>>, vector<1x16x256xf32>,
    } else {
    }
    return
  }
  func.func @transform_0(%arg0: i32, %arg1: i32) -> (i32, i32, i32, i32) {
    %c0_i32 = arith.constant 0 : i32
    %c0_i32_0 = arith.constant 0 : i32
    %c0_i32_1 = arith.constant 0 : i32
    return %arg0, %c0_i32, %c0_i32_0, %arg1 : i32, i32, i32, i32
  }
  func.func @transform_1(%arg0: i32, %arg1: i32) -> (i32, i32, i32) {
    %c0_i32 = arith.constant 0 : i32
    %c0_i32_0 = arith.constant 0 : i32
    %c0_i32_1 = arith.constant 0 : i32
    return %c0_i32, %c0_i32_0, %arg1 : i32, i32, i32
  }
  func.func @transform_2(%arg0: i32, %arg1: i32) -> (i32, i32) {
    %c0_i32 = arith.constant 0 : i32
    %c0_i32_0 = arith.constant 0 : i32
    %c0_i32_1 = arith.constant 0 : i32
    return %c0_i32, %c0_i32_0 : i32, i32
  }
  func.func @transform_3(%arg0: i32, %arg1: i32) -> (i32, i32, i32) {
    %c0_i32 = arith.constant 0 : i32
    %c0_i32_0 = arith.constant 0 : i32
    %c0_i32_1 = arith.constant 0 : i32
    return %arg0, %c0_i32, %c0_i32_0 : i32, i32, i32
  }
}

module attributes {stable_mosaic.version = 11 : i64} {
  func.func @_cv1_kernel(%arg0: i32, %arg1: i32, %arg2: memref<1x8x256xf32, #tpu.memory_space<vmem>>, %arg3: memref<8x4xbf16, #tpu.memory_space<vmem>>, %arg4: memref<1x4xf32, #tpu.memory_space<vmem>>, %arg5: memref<1x256x4xbf16, #tpu.memory_space<vmem>>) attributes {dimension_semantics = [#tpu.dimension_semantics<parallel>, #tpu.dimension_semantics<parallel>], iteration_bounds = array<i64: 2, 1>, scalar_prefetch = 0 : i64, scratch_operands = 0 : i64, tpu.core_type = #tpu.core_type<tc>, window_params = [{transform_indices = @transform_0, window_bounds = array<i64: 1, 8, 256>}, {pipeline_mode = #tpu.pipeline_mode<synchronous>, transform_indices = @transform_1, window_bounds = array<i64: 8, 4>}, {pipeline_mode = #tpu.pipeline_mode<synchronous>, transform_indices = @transform_2, window_bounds = array<i64: 1, 4>}, {transform_indices = @transform_3, window_bounds = array<i64: 1, 256, 4>}]} {
    %c0 = arith.constant 0 : index
    %c0_0 = arith.constant 0 : index
    %c0_1 = arith.constant 0 : index
    %0 = vector.load %arg2[%c0, %c0_0, %c0_1] : memref<1x8x256xf32, #tpu.memory_space<vmem>>, vector<1x8x256xf32>
    %1 = vector.shape_cast %0 : vector<1x8x256xf32> to vector<8x256xf32>
    %2 = tpu.transpose %1, [1, 0] : vector<8x256xf32> -> vector<256x8xf32>
    %3 = arith.truncf %2 : vector<256x8xf32> to vector<256x8xbf16>
    %c0_2 = arith.constant 0 : index
    %c0_3 = arith.constant 0 : index
    %4 = vector.load %arg3[%c0_2, %c0_3] : memref<8x4xbf16, #tpu.memory_space<vmem>>, vector<8x4xbf16>
    %cst = arith.constant dense<0.000000e+00> : vector<256x4xf32>
    %5 = tpu.matmul %3, %4, %cst {dimension_numbers = #tpu.dot_dimension_numbers<[1], [0], [0], [1], [0, 0, 1, 1], [], []>} : vector<256x8xbf16>, vector<8x4xbf16>, vector<256x4xf32> -> vector<256x4xf32>
    %c0_4 = arith.constant 0 : index
    %c0_5 = arith.constant 0 : index
    %6 = vector.load %arg4[%c0_4, %c0_5] : memref<1x4xf32, #tpu.memory_space<vmem>>, vector<1x4xf32>
    %7 = vector.broadcast %6 : vector<1x4xf32> to vector<256x4xf32>
    %8 = arith.addf %5, %7 : vector<256x4xf32>
    %cst_6 = arith.constant 0.000000e+00 : f32
    %9 = vector.broadcast %cst_6 : f32 to vector<256x4xf32>
    %10 = arith.subf %9, %8 : vector<256x4xf32>
    %11 = math.exp %10 : vector<256x4xf32>
    %cst_7 = arith.constant 1.000000e+00 : f32
    %12 = vector.broadcast %cst_7 : f32 to vector<256x4xf32>
    %13 = arith.addf %12, %11 : vector<256x4xf32>
    %14 = tpu.reciprocal %13 {approx = true} : vector<256x4xf32> -> vector<256x4xf32>
    %15 = arith.mulf %8, %14 : vector<256x4xf32>
    %16 = arith.truncf %15 : vector<256x4xf32> to vector<256x4xbf16>
    %c0_8 = arith.constant 0 : index
    %c0_9 = arith.constant 0 : index
    %c0_10 = arith.constant 0 : index
    %17 = vector.load %arg5[%c0_8, %c0_9, %c0_10] : memref<1x256x4xbf16, #tpu.memory_space<vmem>>, vector<1x256x4xbf16>
    %18 = vector.shape_cast %17 : vector<1x256x4xbf16> to vector<256x4xbf16>
    %19 = vector.shape_cast %16 : vector<256x4xbf16> to vector<1x256x4xbf16>
    tpu.vector_store %arg5[%c0_8, %c0_9, %c0_10], %19 {strides = array<i32>} : memref<1x256x4xbf16, #tpu.memory_space<vmem>>, vector<1x256x4xbf16>,
    return
  }
  func.func @transform_0(%arg0: i32, %arg1: i32) -> (i32, i32, i32) {
    %c0_i32 = arith.constant 0 : i32
    %c0_i32_0 = arith.constant 0 : i32
    return %arg0, %c0_i32, %arg1 : i32, i32, i32
  }
  func.func @transform_1(%arg0: i32, %arg1: i32) -> (i32, i32) {
    %c0_i32 = arith.constant 0 : i32
    %c0_i32_0 = arith.constant 0 : i32
    %c0_i32_1 = arith.constant 0 : i32
    return %c0_i32, %c0_i32_0 : i32, i32
  }
  func.func @transform_2(%arg0: i32, %arg1: i32) -> (i32, i32) {
    %c0_i32 = arith.constant 0 : i32
    %c0_i32_0 = arith.constant 0 : i32
    %c0_i32_1 = arith.constant 0 : i32
    return %c0_i32, %c0_i32_0 : i32, i32
  }
  func.func @transform_3(%arg0: i32, %arg1: i32) -> (i32, i32, i32) {
    %c0_i32 = arith.constant 0 : i32
    %c0_i32_0 = arith.constant 0 : i32
    return %arg0, %arg1, %c0_i32 : i32, i32, i32
  }
}

</mosaic_0001>

<bundles_post_ra>
// kernel: spp_forward.2
= control target key start
LH: loop header
LB: loop body
LE: loop exit
PB: predicated region body
PF: predicated region fallthrough
CT: control target
= control target key end

     0   :  { %s1096_s12 = smov 0   ;;  %s1098_s13 = smov 0   ;;  %s1303_s0 = inlined_call_operand.vmem [shape: f32[2,8,256], index: 0, kind: input, shape index: {}]   ;;  %s1304_s1 = inlined_call_operand.vmem [shape: bf16[8,4], index: 1, kind: input, shape index: {}]   ;;  %s1305_s2 = inlined_call_operand.vmem [shape: f32[1,4], index: 2, kind: input, shape index: {}]   ;;  %s1306_s3 = inlined_call_operand.vmem [shape: bf16[2,256,4], index: 3, kind: output, shape index: {}]  }
   0x1   :  { %s1100_s14 = smov 0  }
   0x2 LB: > { %s25_s15 = sadd.s32 1, %s1070_s13  ;;  %p788_p0 = scmp.ge.s32.totalorder %s1074_s14, 1  ;;  %s1074_s14 = sphi %s1100_s14, %s13_s14   ;;  %s1070_s13 = sphi %s1098_s13, %s1308_s13   ;;  %s1066_s12 = sphi %s1096_s12, %s1307_s12  }
   0x3   : > { %p27_p1 = scmp.ge.s32.totalorder %s25_s15, 2  ;;  %p158_p2 = scmp.lt.s32.totalorder %s1074_s14, 3 }
   0x5   : > { %s1310_s15 = smov (%p27_p1, %s25_s15), 0  ;;  %p159_p3 = pnand %p788_p0, %p158_p2 }
   0x6   : > { %p191_p4 = scmp.lt.s32.totalorder (!%p159_p3), %s1066_s12, 1 }
   0x7   : > { %162 = sbr.rel (%p159_p3) target bundleno = 474 (0x1da), region = 32 }
   0xc   : > { %s1312_s12 = smov (!%p191_p4, %s1066_s12), 1  ;;  %v293_v3 = vld [vmem:[%s1304_s1] sm:$0xf]  ;;  %vm347_vm0 = vcmask 1043456   ;;  %vm298_vm1 = vcmask 64512   ;;  %vm664_vm2 = vcmask 27648  }
   0xd   : > { %s811_s16 = sshll.u32 %s1312_s12, 4  ;;  %v349_v4 = vsel %vm347_vm0, %v293_v3, 0  ;;  %s812_s24 = sshll.u32 %s1312_s12, 7 }
   0xe   : > { %s198_s19 = scalar_lea.vmem %s1303_s0, %s811_s16  ;;  %358 = vmatpush.bf16.msra.mxu0 %v349_v4  ;;  %814 = vmatpush.bf16.msra.mxu2 %v349_v4  ;;  %s1156_s27 = scalar_lea.vmem %s1306_s3, %s812_s24 }
   0xf   : > { %v211_v0 = vld [vmem:[%s198_s19] sm:$0xff]  ;;  %v212_v1 = vld [vmem:[%s198_s19 + $0x8] sm:$0xff]  ;;  %813 = vmatpush.bf16.msra.mxu1 %v349_v4  ;;  %815 = vmatpush.bf16.msra.mxu3 %v349_v4 }
  0x10   : > { %v841_v2 = vpack.i.bf16 %v211_v0, %v212_v1 }
  0x12   : > { %842 = vxpose.xlu0.b32.start.end [1/1] (short) %v841_v2, 128 }
  0xb6   : > { %v843_v5 = vpop.trf.xlu0 }
  0xb7   : > { %v847_v6 = vunpack.i.h.bf16 %v843_v5  ;;  %v844_v7 = vunpack.i.l.bf16 %v843_v5  ;;  %v1142_v5 = vld [vmem:[%s1305_s2] ss:$0 sm:$0xff] }
  0xbe   : > { %v848_v8 = vpop.trf.xlu0 }
  0xbf   : > { %v852_v9 = vunpack.i.h.bf16 %v848_v8  ;;  %v849_v10 = vunpack.i.l.bf16 %v848_v8 }
  0xc1   : > { %v277_v11 = vpack.c.bf16 %v852_v9, %v847_v6  ;;  %v285_v12 = vpack.c.bf16 %v849_v10, %v844_v7 }
  0xc3   : > { %793 = vmatmul.msk.bf16.vlgmr.msra.gmra.mxu0 %vm298_vm1, %v277_v11  ;;  %801 = vmatmul.msk.bf16.vlgmr.msra.gmra.mxu2 %vm298_vm1, %v285_v12 }
  0xc6   : > { %v853_v13 = vpop.trf.xlu0 }
  0xc7   : > { %v857_v14 = vunpack.i.h.bf16 %v853_v13  ;;  %v854_v15 = vunpack.i.l.bf16 %v853_v13 }
  0xce   : > { %v858_v16 = vpop.trf.xlu0 }
  0xcf   : > { %v862_v17 = vunpack.i.h.bf16 %v858_v16  ;;  %v859_v18 = vunpack.i.l.bf16 %v858_v16 }
  0xd1   : > { %v278_v19 = vpack.c.bf16 %v862_v17, %v857_v14  ;;  %v286_v20 = vpack.c.bf16 %v859_v18, %v854_v15 }
  0xd3   : > { %794 = vmatmul.msk.bf16.gmra.mxu0 %vm298_vm1, %v278_v19  ;;  %802 = vmatmul.msk.bf16.gmra.mxu2 %vm298_vm1, %v286_v20 }
  0xd6   : > { %v863_v21 = vpop.trf.xlu0 }
  0xd7   : > { %v867_v22 = vunpack.i.h.bf16 %v863_v21  ;;  %v864_v23 = vunpack.i.l.bf16 %v863_v21 }
  0xde   : > { %v868_v24 = vpop.trf.xlu0 }
  0xdf   : > { %v872_v25 = vunpack.i.h.bf16 %v868_v24  ;;  %v869_v26 = vunpack.i.l.bf16 %v868_v24 }
  0xe1   : > { %v279_v27 = vpack.c.bf16 %v872_v25, %v867_v22  ;;  %v287_v28 = vpack.c.bf16 %v869_v26, %v864_v23 }
  0xe3   : > { %795 = vmatmul.msk.bf16.gmra.mxu0 %vm298_vm1, %v279_v27  ;;  %803 = vmatmul.msk.bf16.gmra.mxu2 %vm298_vm1, %v287_v28 }
  0xe6   : > { %v873_v29 = vpop.trf.xlu0 }
  0xe7   : > { %v877_v30 = vunpack.i.h.bf16 %v873_v29  ;;  %v874_v31 = vunpack.i.l.bf16 %v873_v29 }
  0xee   : > { %v878_v32 = vpop.trf.xlu0 }
  0xef   : > { %v882_v33 = vunpack.i.h.bf16 %v878_v32  ;;  %v879_v34 = vunpack.i.l.bf16 %v878_v32 }
  0xf1   : > { %v280_v35 = vpack.c.bf16 %v882_v33, %v877_v30  ;;  %v288_v36 = vpack.c.bf16 %v879_v34, %v874_v31 }
  0xf3   : > { %796 = vmatmul.msk.bf16.gmra.mxu0 %vm298_vm1, %v280_v35  ;;  %804 = vmatmul.msk.bf16.gmra.mxu2 %vm298_vm1, %v288_v36 }
  0xf6   : > { %v883_v37 = vpop.trf.xlu0 }
  0xf7   : > { %v887_v38 = vunpack.i.h.bf16 %v883_v37  ;;  %v884_v39 = vunpack.i.l.bf16 %v883_v37 }
  0xfe   : > { %v888_v40 = vpop.trf.xlu0 }
  0xff   : > { %v892_v41 = vunpack.i.h.bf16 %v888_v40  ;;  %v889_v42 = vunpack.i.l.bf16 %v888_v40 }
 0x101   : > { %v281_v43 = vpack.c.bf16 %v892_v41, %v887_v38  ;;  %v289_v44 = vpack.c.bf16 %v889_v42, %v884_v39 }
 0x103   : > { %797 = vmatmul.msk.bf16.vlgmr.msra.gmra.mxu1 %vm298_vm1, %v281_v43  ;;  %805 = vmatmul.msk.bf16.vlgmr.msra.gmra.mxu3 %vm298_vm1, %v289_v44 }
 0x106   : > { %v893_v45 = vpop.trf.xlu0 }
 0x107   : > { %v897_v46 = vunpack.i.h.bf16 %v893_v45  ;;  %v894_v47 = vunpack.i.l.bf16 %v893_v45 }
 0x10e   : > { %v898_v48 = vpop.trf.xlu0 }
 0x10f   : > { %v902_v49 = vunpack.i.h.bf16 %v898_v48  ;;  %v899_v50 = vunpack.i.l.bf16 %v898_v48 }
 0x111   : > { %v282_v51 = vpack.c.bf16 %v902_v49, %v897_v46  ;;  %v290_v52 = vpack.c.bf16 %v899_v50, %v894_v47 }
 0x113   : > { %798 = vmatmul.msk.bf16.gmra.mxu1 %vm298_vm1, %v282_v51  ;;  %806 = vmatmul.msk.bf16.gmra.mxu3 %vm298_vm1, %v290_v52 }
 0x116   : > { %v903_v53 = vpop.trf.xlu0 }
 0x117   : > { %v907_v54 = vunpack.i.h.bf16 %v903_v53  ;;  %v904_v55 = vunpack.i.l.bf16 %v903_v53 }
 0x11e   : > { %v908_v56 = vpop.trf.xlu0 }
 0x11f   : > { %v912_v57 = vunpack.i.h.bf16 %v908_v56  ;;  %v909_v58 = vunpack.i.l.bf16 %v908_v56 }
 0x121   : > { %v283_v59 = vpack.c.bf16 %v912_v57, %v907_v54  ;;  %v291_v60 = vpack.c.bf16 %v909_v58, %v904_v55 }
 0x123   : > { %799 = vmatmul.msk.bf16.gmra.mxu1 %vm298_vm1, %v283_v59  ;;  %807 = vmatmul.msk.bf16.gmra.mxu3 %vm298_vm1, %v291_v60 }
 0x126   : > { %v913_v61 = vpop.trf.xlu0 }
 0x127   : > { %v917_v62 = vunpack.i.h.bf16 %v913_v61  ;;  %v914_v63 = vunpack.i.l.bf16 %v913_v61 }
 0x12e   : > { %v918_v0 = vpop.trf.xlu0 }
 0x12f   : > { %v922_v1 = vunpack.i.h.bf16 %v918_v0  ;;  %v919_v2 = vunpack.i.l.bf16 %v918_v0 }
 0x131   : > { %v284_v3 = vpack.c.bf16 %v922_v1, %v917_v62  ;;  %v292_v4 = vpack.c.bf16 %v919_v2, %v914_v63 }
 0x133   : > { %800 = vmatmul.msk.bf16.gmra.mxu1 %vm298_vm1, %v284_v3  ;;  %808 = vmatmul.msk.bf16.gmra.mxu3 %vm298_vm1, %v292_v4 }
 0x140   : > { %v360_v6 = vpop.f32.mrf.mxu0 }
 0x141   : > { %v361_v7 = vadd.f32 %v1142_v5, %v360_v6 }
 0x143   : > { %v440_v8 = vsub.f32 0.0, %v361_v7 }
 0x145   : > { %v472_v9 = vmul.f32 1.442695, %v440_v8 }
 0x146   : > { %v400_v10 = vpop.f32.mrf.mxu2 }
 0x147   : > { %924 = vpow2.f32 %v472_v9  ;;  %v401_v11 = vadd.f32 %v1142_v5, %v400_v10 }
 0x148   : > { %v362_v12 = vpop.f32.mrf.mxu0 }
 0x149   : > { %v456_v13 = vsub.f32 0.0, %v401_v11  ;;  %v363_v14 = vadd.f32 %v1142_v5, %v362_v12 }
 0x14b   : > { %v504_v15 = vmul.f32 1.442695, %v456_v13  ;;  %v441_v16 = vsub.f32 0.0, %v363_v14 }
 0x14d   : > { %v925_v17 = vpop.eup %924  ;;  %926 = vpow2.f32 %v504_v15  ;;  %v474_v18 = vmul.f32 1.442695, %v441_v16 }
 0x14e   : > { %v536_v19 = vadd.f32 1.0, %v925_v17  ;;  %v402_v20 = vpop.f32.mrf.mxu2 }
 0x14f   : > { %928 = vpow2.f32 %v474_v18  ;;  %v403_v21 = vadd.f32 %v1142_v5, %v402_v20 }
 0x150   : > { %930 = vrcp.f32 %v536_v19  ;;  %v365_v22 = vpop.f32.mrf.mxu0 }
 0x151   : > { %v457_v23 = vsub.f32 0.0, %v403_v21  ;;  %v366_v24 = vadd.f32 %v1142_v5, %v365_v22 }
 0x153   : > { %v927_v25 = vpop.eup %926  ;;  %v506_v26 = vmul.f32 1.442695, %v457_v23  ;;  %v442_v27 = vsub.f32 0.0, %v366_v24 }
 0x154   : > { %v552_v28 = vadd.f32 1.0, %v927_v25 }
 0x155   : > { %v929_v29 = vpop.eup %928  ;;  %932 = vpow2.f32 %v506_v26  ;;  %v476_v30 = vmul.f32 1.442695, %v442_v27 }
 0x156   : > { %v931_v31 = vpop.eup %930  ;;  %934 = vrcp.f32 %v552_v28  ;;  %v537_v32 = vadd.f32 1.0, %v929_v29  ;;  %v405_v33 = vpop.f32.mrf.mxu2 }
 0x157   : > { %v600_v34 = vmul.f32 %v931_v31, %v361_v7  ;;  %936 = vpow2.f32 %v476_v30  ;;  %v1151_v35 = vadd.f32 %v1142_v5, %v405_v33 }
 0x158   : > { %938 = vrcp.f32 %v537_v32  ;;  %v367_v36 = vpop.f32.mrf.mxu0 }
 0x159   : > { %v632_v37 = vpack.c.bf16 %v600_v34, %v600_v34  ;;  %v458_v38 = vsub.f32 0.0, %v1151_v35  ;;  %v1160_v39 = vadd.f32 %v1142_v5, %v367_v36 }
 0x15b   : > { %v933_v40 = vpop.eup %932  ;;  %665 = vst.msk [vmem:[%s1156_s27] sm:$0xf] %vm664_vm2, %v632_v37  ;;  %v508_v41 = vmul.f32 1.442695, %v458_v38  ;;  %v443_v42 = vsub.f32 0.0, %v1160_v39 }
 0x15c   : > { %v935_v43 = vpop.eup %934  ;;  %v553_v44 = vadd.f32 1.0, %v933_v40 }
 0x15d   : > { %v937_v45 = vpop.eup %936  ;;  %v616_v46 = vmul.f32 %v935_v43, %v401_v11  ;;  %940 = vpow2.f32 %v508_v41  ;;  %v478_v47 = vmul.f32 1.442695, %v443_v42 }
 0x15e   : > { %v939_v48 = vpop.eup %938  ;;  %942 = vrcp.f32 %v553_v44  ;;  %v538_v49 = vadd.f32 1.0, %v937_v45  ;;  %v407_v50 = vpop.f32.mrf.mxu2 }
 0x15f   : > { %v648_v51 = vpack.c.bf16 %v616_v46, %v616_v46  ;;  %v601_v52 = vmul.f32 %v939_v48, %v363_v14  ;;  %944 = vpow2.f32 %v478_v47  ;;  %v408_v53 = vadd.f32 %v1142_v5, %v407_v50 }
 0x160   : > { %946 = vrcp.f32 %v538_v49  ;;  %v370_v54 = vpop.f32.mrf.mxu0 }
 0x161   : > { %681 = vst.msk [vmem:[%s1156_s27 + $0x40] sm:$0xf] %vm664_vm2, %v648_v51  ;;  %v633_v55 = vpack.c.bf16 %v601_v52, %v601_v52  ;;  %v459_v56 = vsub.f32 0.0, %v408_v53  ;;  %v1169_v57 = vadd.f32 %v1142_v5, %v370_v54 }
 0x163   : > { %v941_v58 = vpop.eup %940  ;;  %666 = vst.msk [vmem:[%s1156_s27 + $0x4] sm:$0xf] %vm664_vm2, %v633_v55  ;;  %v510_v59 = vmul.f32 1.442695, %v459_v56  ;;  %v444_v60 = vsub.f32 0.0, %v1169_v57 }
 0x164   : > { %v943_v61 = vpop.eup %942  ;;  %v554_v62 = vadd.f32 1.0, %v941_v58 }
 0x165   : > { %v945_v63 = vpop.eup %944  ;;  %v617_v0 = vmul.f32 %v943_v61, %v403_v21  ;;  %948 = vpow2.f32 %v510_v59  ;;  %v480_v1 = vmul.f32 1.442695, %v444_v60 }
 0x166   : > { %v947_v2 = vpop.eup %946  ;;  %950 = vrcp.f32 %v554_v62  ;;  %v539_v3 = vadd.f32 1.0, %v945_v63  ;;  %v410_v4 = vpop.f32.mrf.mxu2 }
 0x167   : > { %v649_v6 = vpack.c.bf16 %v617_v0, %v617_v0  ;;  %v602_v7 = vmul.f32 %v947_v2, %v366_v24  ;;  %952 = vpow2.f32 %v480_v1  ;;  %v411_v8 = vadd.f32 %v1142_v5, %v410_v4 }
 0x168   : > { %954 = vrcp.f32 %v539_v3  ;;  %v372_v9 = vpop.f32.mrf.mxu0 }
 0x169   : > { %682 = vst.msk [vmem:[%s1156_s27 + $0x44] sm:$0xf] %vm664_vm2, %v649_v6  ;;  %v634_v10 = vpack.c.bf16 %v602_v7, %v602_v7  ;;  %v460_v11 = vsub.f32 0.0, %v411_v8  ;;  %v1178_v12 = vadd.f32 %v1142_v5, %v372_v9 }
 0x16b   : > { %v949_v13 = vpop.eup %948  ;;  %667 = vst.msk [vmem:[%s1156_s27 + $0x8] sm:$0xf] %vm664_vm2, %v634_v10  ;;  %v512_v14 = vmul.f32 1.442695, %v460_v11  ;;  %v445_v15 = vsub.f32 0.0, %v1178_v12 }
 0x16c   : > { %v951_v16 = vpop.eup %950  ;;  %v555_v17 = vadd.f32 1.0, %v949_v13 }
 0x16d   : > { %v953_v18 = vpop.eup %952  ;;  %v618_v19 = vmul.f32 %v951_v16, %v1151_v35  ;;  %956 = vpow2.f32 %v512_v14  ;;  %v482_v20 = vmul.f32 1.442695, %v445_v15 }
 0x16e   : > { %v955_v21 = vpop.eup %954  ;;  %958 = vrcp.f32 %v555_v17  ;;  %v540_v22 = vadd.f32 1.0, %v953_v18  ;;  %v412_v23 = vpop.f32.mrf.mxu2 }
 0x16f   : > { %v650_v24 = vpack.c.bf16 %v618_v19, %v618_v19  ;;  %v603_v25 = vmul.f32 %v955_v21, %v1160_v39  ;;  %960 = vpow2.f32 %v482_v20  ;;  %v413_v26 = vadd.f32 %v1142_v5, %v412_v23 }
 0x170   : > { %962 = vrcp.f32 %v540_v22  ;;  %v375_v27 = vpop.f32.mrf.mxu0 }
 0x171   : > { %683 = vst.msk [vmem:[%s1156_s27 + $0x48] sm:$0xf] %vm664_vm2, %v650_v24  ;;  %v635_v28 = vpack.c.bf16 %v603_v25, %v603_v25  ;;  %v461_v29 = vsub.f32 0.0, %v413_v26  ;;  %v1189_v30 = vadd.f32 %v1142_v5, %v375_v27 }
 0x173   : > { %v957_v31 = vpop.eup %956  ;;  %668 = vst.msk [vmem:[%s1156_s27 + $0xc] sm:$0xf] %vm664_vm2, %v635_v28  ;;  %v514_v32 = vmul.f32 1.442695, %v461_v29  ;;  %v446_v33 = vsub.f32 0.0, %v1189_v30 }
 0x174   : > { %v959_v34 = vpop.eup %958  ;;  %v556_v35 = vadd.f32 1.0, %v957_v31 }
 0x175   : > { %v961_v36 = vpop.eup %960  ;;  %v619_v37 = vmul.f32 %v959_v34, %v408_v53  ;;  %964 = vpow2.f32 %v514_v32  ;;  %v484_v38 = vmul.f32 1.442695, %v446_v33 }
 0x176   : > { %v963_v39 = vpop.eup %962  ;;  %966 = vrcp.f32 %v556_v35  ;;  %v541_v40 = vadd.f32 1.0, %v961_v36  ;;  %v415_v41 = vpop.f32.mrf.mxu2 }
 0x177   : > { %v651_v42 = vpack.c.bf16 %v619_v37, %v619_v37  ;;  %v604_v43 = vmul.f32 %v963_v39, %v1169_v57  ;;  %968 = vpow2.f32 %v484_v38  ;;  %v416_v44 = vadd.f32 %v1142_v5, %v415_v41 }
 0x178   : > { %970 = vrcp.f32 %v541_v40  ;;  %v377_v45 = vpop.f32.mrf.mxu0 }
 0x179   : > { %684 = vst.msk [vmem:[%s1156_s27 + $0x4c] sm:$0xf] %vm664_vm2, %v651_v42  ;;  %v636_v46 = vpack.c.bf16 %v604_v43, %v604_v43  ;;  %v462_v47 = vsub.f32 0.0, %v416_v44  ;;  %v1199_v48 = vadd.f32 %v1142_v5, %v377_v45 }
 0x17b   : > { %v965_v49 = vpop.eup %964  ;;  %669 = vst.msk [vmem:[%s1156_s27 + $0x10] sm:$0xf] %vm664_vm2, %v636_v46  ;;  %v516_v50 = vmul.f32 1.442695, %v462_v47  ;;  %v447_v51 = vsub.f32 0.0, %v1199_v48 }
 0x17c   : > { %v967_v52 = vpop.eup %966  ;;  %v557_v53 = vadd.f32 1.0, %v965_v49 }
 0x17d   : > { %v969_v54 = vpop.eup %968  ;;  %v620_v55 = vmul.f32 %v967_v52, %v411_v8  ;;  %972 = vpow2.f32 %v516_v50  ;;  %v486_v56 = vmul.f32 1.442695, %v447_v51 }
 0x17e   : > { %v971_v57 = vpop.eup %970  ;;  %974 = vrcp.f32 %v557_v53  ;;  %v542_v58 = vadd.f32 1.0, %v969_v54  ;;  %v417_v59 = vpop.f32.mrf.mxu2 }
 0x17f   : > { %v652_v60 = vpack.c.bf16 %v620_v55, %v620_v55  ;;  %v605_v61 = vmul.f32 %v971_v57, %v1178_v12  ;;  %976 = vpow2.f32 %v486_v56  ;;  %v418_v62 = vadd.f32 %v1142_v5, %v417_v59 }
 0x180   : > { %978 = vrcp.f32 %v542_v58  ;;  %v380_v63 = vpop.f32.mrf.mxu1 }
 0x181   : > { %685 = vst.msk [vmem:[%s1156_s27 + $0x50] sm:$0xf] %vm664_vm2, %v652_v60  ;;  %v637_v0 = vpack.c.bf16 %v605_v61, %v605_v61  ;;  %v463_v1 = vsub.f32 0.0, %v418_v62  ;;  %v1209_v2 = vadd.f32 %v1142_v5, %v380_v63 }
 0x183   : > { %v973_v3 = vpop.eup %972  ;;  %670 = vst.msk [vmem:[%s1156_s27 + $0x14] sm:$0xf] %vm664_vm2, %v637_v0  ;;  %v518_v4 = vmul.f32 1.442695, %v463_v1  ;;  %v448_v6 = vsub.f32 0.0, %v1209_v2 }
 0x184   : > { %v975_v7 = vpop.eup %974  ;;  %v558_v8 = vadd.f32 1.0, %v973_v3 }
 0x185   : > { %v977_v9 = vpop.eup %976  ;;  %v621_v10 = vmul.f32 %v975_v7, %v413_v26  ;;  %980 = vpow2.f32 %v518_v4  ;;  %v488_v11 = vmul.f32 1.442695, %v448_v6 }
 0x186   : > { %v979_v12 = vpop.eup %978  ;;  %982 = vrcp.f32 %v558_v8  ;;  %v543_v13 = vadd.f32 1.0, %v977_v9  ;;  %v420_v14 = vpop.f32.mrf.mxu3 }
 0x187   : > { %v653_v15 = vpack.c.bf16 %v621_v10, %v621_v10  ;;  %v606_v16 = vmul.f32 %v979_v12, %v1189_v30  ;;  %984 = vpow2.f32 %v488_v11  ;;  %v421_v17 = vadd.f32 %v1142_v5, %v420_v14 }
 0x188   : > { %986 = vrcp.f32 %v543_v13  ;;  %v382_v18 = vpop.f32.mrf.mxu1 }
 0x189   : > { %686 = vst.msk [vmem:[%s1156_s27 + $0x54] sm:$0xf] %vm664_vm2, %v653_v15  ;;  %v638_v19 = vpack.c.bf16 %v606_v16, %v606_v16  ;;  %v464_v20 = vsub.f32 0.0, %v421_v17  ;;  %v1219_v21 = vadd.f32 %v1142_v5, %v382_v18 }
 0x18b   : > { %v981_v22 = vpop.eup %980  ;;  %671 = vst.msk [vmem:[%s1156_s27 + $0x18] sm:$0xf] %vm664_vm2, %v638_v19  ;;  %v520_v23 = vmul.f32 1.442695, %v464_v20  ;;  %v449_v24 = vsub.f32 0.0, %v1219_v21 }
 0x18c   : > { %v983_v25 = vpop.eup %982  ;;  %v559_v26 = vadd.f32 1.0, %v981_v22 }
 0x18d   : > { %v985_v27 = vpop.eup %984  ;;  %v622_v28 = vmul.f32 %v983_v25, %v416_v44  ;;  %988 = vpow2.f32 %v520_v23  ;;  %v490_v29 = vmul.f32 1.442695, %v449_v24 }
 0x18e   : > { %v987_v30 = vpop.eup %986  ;;  %990 = vrcp.f32 %v559_v26  ;;  %v544_v31 = vadd.f32 1.0, %v985_v27  ;;  %v422_v32 = vpop.f32.mrf.mxu3 }
 0x18f   : > { %v654_v33 = vpack.c.bf16 %v622_v28, %v622_v28  ;;  %v607_v34 = vmul.f32 %v987_v30, %v1199_v48  ;;  %992 = vpow2.f32 %v490_v29  ;;  %v423_v35 = vadd.f32 %v1142_v5, %v422_v32 }
 0x190   : > { %994 = vrcp.f32 %v544_v31  ;;  %v385_v36 = vpop.f32.mrf.mxu1 }
 0x191   : > { %687 = vst.msk [vmem:[%s1156_s27 + $0x58] sm:$0xf] %vm664_vm2, %v654_v33  ;;  %v639_v37 = vpack.c.bf16 %v607_v34, %v607_v34  ;;  %v465_v38 = vsub.f32 0.0, %v423_v35  ;;  %v1229_v39 = vadd.f32 %v1142_v5, %v385_v36 }
 0x193   : > { %v989_v40 = vpop.eup %988  ;;  %672 = vst.msk [vmem:[%s1156_s27 + $0x1c] sm:$0xf] %vm664_vm2, %v639_v37  ;;  %v522_v41 = vmul.f32 1.442695, %v465_v38  ;;  %v450_v42 = vsub.f32 0.0, %v1229_v39 }
 0x194   : > { %v991_v43 = vpop.eup %990  ;;  %v560_v44 = vadd.f32 1.0, %v989_v40 }
 0x195   : > { %v993_v45 = vpop.eup %992  ;;  %v623_v46 = vmul.f32 %v991_v43, %v418_v62  ;;  %996 = vpow2.f32 %v522_v41  ;;  %v492_v47 = vmul.f32 1.442695, %v450_v42 }
 0x196   : > { %v995_v48 = vpop.eup %994  ;;  %998 = vrcp.f32 %v560_v44  ;;  %v545_v49 = vadd.f32 1.0, %v993_v45  ;;  %v425_v50 = vpop.f32.mrf.mxu3 }
 0x197   : > { %v655_v51 = vpack.c.bf16 %v623_v46, %v623_v46  ;;  %v608_v52 = vmul.f32 %v995_v48, %v1209_v2  ;;  %1000 = vpow2.f32 %v492_v47  ;;  %v426_v53 = vadd.f32 %v1142_v5, %v425_v50 }
 0x198   : > { %1002 = vrcp.f32 %v545_v49  ;;  %v387_v54 = vpop.f32.mrf.mxu1 }
 0x199   : > { %688 = vst.msk [vmem:[%s1156_s27 + $0x5c] sm:$0xf] %vm664_vm2, %v655_v51  ;;  %v640_v55 = vpack.c.bf16 %v608_v52, %v608_v52  ;;  %v466_v56 = vsub.f32 0.0, %v426_v53  ;;  %v1239_v57 = vadd.f32 %v1142_v5, %v387_v54 }
 0x19b   : > { %v997_v58 = vpop.eup %996  ;;  %673 = vst.msk [vmem:[%s1156_s27 + $0x20] sm:$0xf] %vm664_vm2, %v640_v55  ;;  %v524_v59 = vmul.f32 1.442695, %v466_v56  ;;  %v451_v60 = vsub.f32 0.0, %v1239_v57 }
 0x19c   : > { %v999_v61 = vpop.eup %998  ;;  %v561_v62 = vadd.f32 1.0, %v997_v58 }
 0x19d   : > { %v1001_v63 = vpop.eup %1000  ;;  %v624_v0 = vmul.f32 %v999_v61, %v421_v17  ;;  %1004 = vpow2.f32 %v524_v59  ;;  %v494_v1 = vmul.f32 1.442695, %v451_v60 }
 0x19e   : > { %v1003_v2 = vpop.eup %1002  ;;  %1006 = vrcp.f32 %v561_v62  ;;  %v546_v3 = vadd.f32 1.0, %v1001_v63  ;;  %v427_v4 = vpop.f32.mrf.mxu3 }
 0x19f   : > { %v656_v6 = vpack.c.bf16 %v624_v0, %v624_v0  ;;  %v609_v7 = vmul.f32 %v1003_v2, %v1219_v21  ;;  %1008 = vpow2.f32 %v494_v1  ;;  %v428_v8 = vadd.f32 %v1142_v5, %v427_v4 }
 0x1a0   : > { %1010 = vrcp.f32 %v546_v3  ;;  %v390_v9 = vpop.f32.mrf.mxu1 }
 0x1a1   : > { %689 = vst.msk [vmem:[%s1156_s27 + $0x60] sm:$0xf] %vm664_vm2, %v656_v6  ;;  %v641_v10 = vpack.c.bf16 %v609_v7, %v609_v7  ;;  %v467_v11 = vsub.f32 0.0, %v428_v8  ;;  %v1249_v12 = vadd.f32 %v1142_v5, %v390_v9 }
 0x1a3   : > { %v1005_v13 = vpop.eup %1004  ;;  %674 = vst.msk [vmem:[%s1156_s27 + $0x24] sm:$0xf] %vm664_vm2, %v641_v10  ;;  %v526_v14 = vmul.f32 1.442695, %v467_v11  ;;  %v452_v15 = vsub.f32 0.0, %v1249_v12 }
 0x1a4   : > { %v1007_v16 = vpop.eup %1006  ;;  %v562_v17 = vadd.f32 1.0, %v1005_v13 }
 0x1a5   : > { %v1009_v18 = vpop.eup %1008  ;;  %v625_v19 = vmul.f32 %v1007_v16, %v423_v35  ;;  %1012 = vpow2.f32 %v526_v14  ;;  %v496_v20 = vmul.f32 1.442695, %v452_v15 }
 0x1a6   : > { %v1011_v21 = vpop.eup %1010  ;;  %1014 = vrcp.f32 %v562_v17  ;;  %v547_v22 = vadd.f32 1.0, %v1009_v18  ;;  %v430_v23 = vpop.f32.mrf.mxu3 }
 0x1a7   : > { %v657_v24 = vpack.c.bf16 %v625_v19, %v625_v19  ;;  %v610_v25 = vmul.f32 %v1011_v21, %v1229_v39  ;;  %1016 = vpow2.f32 %v496_v20  ;;  %v431_v26 = vadd.f32 %v1142_v5, %v430_v23 }
 0x1a8   : > { %1018 = vrcp.f32 %v547_v22  ;;  %v392_v27 = vpop.f32.mrf.mxu1 }
 0x1a9   : > { %690 = vst.msk [vmem:[%s1156_s27 + $0x64] sm:$0xf] %vm664_vm2, %v657_v24  ;;  %v642_v28 = vpack.c.bf16 %v610_v25, %v610_v25  ;;  %v468_v29 = vsub.f32 0.0, %v431_v26  ;;  %v1259_v30 = vadd.f32 %v1142_v5, %v392_v27 }
 0x1ab   : > { %v1013_v31 = vpop.eup %1012  ;;  %675 = vst.msk [vmem:[%s1156_s27 + $0x28] sm:$0xf] %vm664_vm2, %v642_v28  ;;  %v528_v32 = vmul.f32 1.442695, %v468_v29  ;;  %v453_v33 = vsub.f32 0.0, %v1259_v30 }
 0x1ac   : > { %v1015_v34 = vpop.eup %1014  ;;  %v563_v35 = vadd.f32 1.0, %v1013_v31 }
 0x1ad   : > { %v1017_v36 = vpop.eup %1016  ;;  %v626_v37 = vmul.f32 %v1015_v34, %v426_v53  ;;  %1020 = vpow2.f32 %v528_v32  ;;  %v498_v38 = vmul.f32 1.442695, %v453_v33 }
 0x1ae   : > { %v1019_v39 = vpop.eup %1018  ;;  %1022 = vrcp.f32 %v563_v35  ;;  %v548_v40 = vadd.f32 1.0, %v1017_v36  ;;  %v432_v41 = vpop.f32.mrf.mxu3 }
 0x1af   : > { %v658_v42 = vpack.c.bf16 %v626_v37, %v626_v37  ;;  %v611_v43 = vmul.f32 %v1019_v39, %v1239_v57  ;;  %1024 = vpow2.f32 %v498_v38  ;;  %v433_v44 = vadd.f32 %v1142_v5, %v432_v41 }
 0x1b0   : > { %1026 = vrcp.f32 %v548_v40  ;;  %v395_v45 = vpop.f32.mrf.mxu1 }
 0x1b1   : > { %691 = vst.msk [vmem:[%s1156_s27 + $0x68] sm:$0xf] %vm664_vm2, %v658_v42  ;;  %v643_v46 = vpack.c.bf16 %v611_v43, %v611_v43  ;;  %v469_v47 = vsub.f32 0.0, %v433_v44  ;;  %v396_v48 = vadd.f32 %v1142_v5, %v395_v45 }
 0x1b3   : > { %v1021_v49 = vpop.eup %1020  ;;  %676 = vst.msk [vmem:[%s1156_s27 + $0x2c] sm:$0xf] %vm664_vm2, %v643_v46  ;;  %v530_v50 = vmul.f32 1.442695, %v469_v47  ;;  %v454_v51 = vsub.f32 0.0, %v396_v48 }
 0x1b4   : > { %v1023_v52 = vpop.eup %1022  ;;  %v564_v53 = vadd.f32 1.0, %v1021_v49 }
 0x1b5   : > { %v1025_v54 = vpop.eup %1024  ;;  %v627_v55 = vmul.f32 %v1023_v52, %v428_v8  ;;  %1028 = vpow2.f32 %v530_v50  ;;  %v500_v56 = vmul.f32 1.442695, %v454_v51 }
 0x1b6   : > { %v1027_v57 = vpop.eup %1026  ;;  %1030 = vrcp.f32 %v564_v53  ;;  %v549_v58 = vadd.f32 1.0, %v1025_v54  ;;  %v435_v59 = vpop.f32.mrf.mxu3 }
 0x1b7   : > { %v659_v60 = vpack.c.bf16 %v627_v55, %v627_v55  ;;  %v612_v61 = vmul.f32 %v1027_v57, %v1249_v12  ;;  %1032 = vpow2.f32 %v500_v56  ;;  %v436_v62 = vadd.f32 %v1142_v5, %v435_v59 }
 0x1b8   : > { %1034 = vrcp.f32 %v549_v58  ;;  %v397_v63 = vpop.f32.mrf.mxu1 }
 0x1b9   : > { %692 = vst.msk [vmem:[%s1156_s27 + $0x6c] sm:$0xf] %vm664_vm2, %v659_v60  ;;  %v644_v0 = vpack.c.bf16 %v612_v61, %v612_v61  ;;  %v470_v1 = vsub.f32 0.0, %v436_v62  ;;  %v398_v2 = vadd.f32 %v1142_v5, %v397_v63 }
 0x1bb   : > { %v1029_v3 = vpop.eup %1028  ;;  %677 = vst.msk [vmem:[%s1156_s27 + $0x30] sm:$0xf] %vm664_vm2, %v644_v0  ;;  %v532_v4 = vmul.f32 1.442695, %v470_v1  ;;  %v455_v6 = vsub.f32 0.0, %v398_v2 }
 0x1bc   : > { %v1031_v7 = vpop.eup %1030  ;;  %v565_v8 = vadd.f32 1.0, %v1029_v3 }
 0x1bd   : > { %v1033_v9 = vpop.eup %1032  ;;  %v628_v10 = vmul.f32 %v1031_v7, %v431_v26  ;;  %1036 = vpow2.f32 %v532_v4  ;;  %v502_v11 = vmul.f32 1.442695, %v455_v6 }
 0x1be   : > { %v1035_v12 = vpop.eup %1034  ;;  %1038 = vrcp.f32 %v565_v8  ;;  %v550_v13 = vadd.f32 1.0, %v1033_v9  ;;  %v437_v14 = vpop.f32.mrf.mxu3 }
 0x1bf   : > { %v660_v15 = vpack.c.bf16 %v628_v10, %v628_v10  ;;  %v613_v16 = vmul.f32 %v1035_v12, %v1259_v30  ;;  %1040 = vpow2.f32 %v502_v11  ;;  %v438_v17 = vadd.f32 %v1142_v5, %v437_v14 }
 0x1c0   : > { %1042 = vrcp.f32 %v550_v13 }
 0x1c1   : > { %693 = vst.msk [vmem:[%s1156_s27 + $0x70] sm:$0xf] %vm664_vm2, %v660_v15  ;;  %v645_v18 = vpack.c.bf16 %v613_v16, %v613_v16  ;;  %v471_v19 = vsub.f32 0.0, %v438_v17 }
 0x1c3   : > { %v1037_v20 = vpop.eup %1036  ;;  %678 = vst.msk [vmem:[%s1156_s27 + $0x34] sm:$0xf] %vm664_vm2, %v645_v18  ;;  %v534_v21 = vmul.f32 1.442695, %v471_v19 }
 0x1c4   : > { %v1039_v22 = vpop.eup %1038  ;;  %v566_v23 = vadd.f32 1.0, %v1037_v20 }
 0x1c5   : > { %v1041_v24 = vpop.eup %1040  ;;  %v629_v25 = vmul.f32 %v1039_v22, %v433_v44  ;;  %1044 = vpow2.f32 %v534_v21 }
 0x1c6   : > { %v1043_v26 = vpop.eup %1042  ;;  %1046 = vrcp.f32 %v566_v23  ;;  %v551_v5 = vadd.f32 1.0, %v1041_v24 }
 0x1c7   : > { %v661_v27 = vpack.c.bf16 %v629_v25, %v629_v25  ;;  %v614_v28 = vmul.f32 %v1043_v26, %v396_v48 }
 0x1c8   : > { %1048 = vrcp.f32 %v551_v5 }
 0x1c9   : > { %694 = vst.msk [vmem:[%s1156_s27 + $0x74] sm:$0xf] %vm664_vm2, %v661_v27  ;;  %v646_v29 = vpack.c.bf16 %v614_v28, %v614_v28 }
 0x1cb   : > { %v1045_v30 = vpop.eup %1044  ;;  %679 = vst.msk [vmem:[%s1156_s27 + $0x38] sm:$0xf] %vm664_vm2, %v646_v29 }
 0x1cc   : > { %v1047_v31 = vpop.eup %1046  ;;  %v567_v32 = vadd.f32 1.0, %v1045_v30 }
 0x1cd   : > { %v630_v33 = vmul.f32 %v1047_v31, %v436_v62 }
 0x1ce   : > { %v1049_v34 = vpop.eup %1048  ;;  %1050 = vrcp.f32 %v567_v32 }
 0x1cf   : > { %v662_v35 = vpack.c.bf16 %v630_v33, %v630_v33  ;;  %v615_v36 = vmul.f32 %v1049_v34, %v398_v2 }
 0x1d1   : > { %695 = vst.msk [vmem:[%s1156_s27 + $0x78] sm:$0xf] %vm664_vm2, %v662_v35  ;;  %v647_v37 = vpack.c.bf16 %v615_v36, %v615_v36 }
 0x1d3   : > { %680 = vst.msk [vmem:[%s1156_s27 + $0x3c] sm:$0xf] %vm664_vm2, %v647_v37 }
 0x1d4   : > { %v1051_v38 = vpop.eup %1050 }
 0x1d5   : > { %v631_v39 = vmul.f32 %v1051_v38, %v438_v17 }
 0x1d7   : > { %v663_v40 = vpack.c.bf16 %v631_v39, %v631_v39 }
 0x1d9   : > { %696 = vst.msk [vmem:[%s1156_s27 + $0x7c] sm:$0xf] %vm664_vm2, %v663_v40 }
 0x1da PF: > { %s13_s14 = sadd.s32 1, %s1074_s14   ;;  %s1307_s12 = smov %s1070_s13 }
 0x1db   : > { %p10_p5 = scmp.ge.s32.totalorder %s13_s14, 4   ;;  %s1308_s13 = smov %s1310_s15 }
 0x1dd   :  { %12 = sbr.rel (!%p10_p5) target bundleno = 2 (0x2), region = 62 }

// kernel: spp_forward.3
= control target key start
LH: loop header
LB: loop body
LE: loop exit
PB: predicated region body
PF: predicated region fallthrough
CT: control target
= control target key end

     0   :  { %s8958_s12 = smov 0   ;;  %s8960_s13 = smov 0   ;;  %s12578_s0 = inlined_call_operand.vmem [shape: bf16[2,16,16,4], index: 0, kind: input, shape index: {}]   ;;  %s12579_s1 = inlined_call_operand.vmem [shape: bf16[4,16,4], index: 1, kind: input, shape index: {}]   ;;  %s12580_s2 = inlined_call_operand.vmem [shape: f32[16,1], index: 2, kind: input, shape index: {}]   ;;  %s12581_s3 = inlined_call_operand.vmem [shape: f32[2,16,256], index: 3, kind: output, shape index: {}]  }
   0x1   :  { %s8962_s14 = smov 0  }
   0x2 LB: > { %s25_s15 = sadd.s32 1, %s8930_s13  ;;  %p8467_p0 = scmp.ge.s32.totalorder %s8934_s14, 1  ;;  %s8934_s14 = sphi %s8962_s14, %s13_s14   ;;  %s8930_s13 = sphi %s8960_s13, %s13495_s13   ;;  %s8926_s12 = sphi %s8958_s12, %s13494_s12  }
   0x3   : > { %p27_p1 = scmp.ge.s32.totalorder %s25_s15, 2  ;;  %p163_p2 = scmp.lt.s32.totalorder %s8934_s14, 3 }
   0x5   : > { %s13497_s15 = smov (%p27_p1, %s25_s15), 0  ;;  %p164_p3 = pnand %p8467_p0, %p163_p2 }
   0x7   : > { %167 = sbr.rel (%p164_p3) target bundleno = 1228 (0x4cc), region = 32 }
   0xc   : > { %p194_p4 = scmp.lt.s32.totalorder %s8926_s12, 1  ;;  %vm220_vm0 = vcmask 27648   ;;  %v8936_v0 = vmov 4286644096   ;;  %vm2317_vm1 = vcmask 31744   ;;  %vm1393_vm2 = vcmask 1040384  }
   0xd   : > { %274 = vst.msk [vmem:[#allocation2 + $0x90] sm:$0xf] %vm220_vm0, %v8936_v0  ;;  %vm1634_vm3 = vcmask 1046528   ;;  %vm1843_vm4 = vcmask 1041408   ;;  %vm2052_vm5 = vcmask 1045504   ;;  %vm4241_vm6 = vcmask 1042432  }
   0xe   : > { %s13499_s12 = smov (!%p194_p4, %s8926_s12), 1  ;;  %275 = vst.msk [vmem:[#allocation2 + $0xa0] sm:$0xf] %vm220_vm0, %v8936_v0  ;;  %vm4450_vm7 = vcmask 1044480   ;;  %vm4659_vm8 = vcmask 1043456  }
   0xf   : > { %276 = vst.msk [vmem:[#allocation2 + $0xb0] sm:$0xf] %vm220_vm0, %v8936_v0  ;;  %s8568_s16 = sshll.u32 %s13499_s12, 7  ;;  %s8569_s5 = sshll.u32 %s13499_s12, 5 }
  0x10   : > { %277 = vst.msk [vmem:[#allocation2 + $0xc0] sm:$0xf] %vm220_vm0, %v8936_v0  ;;  %s8990_s19 = scalar_lea.vmem %s12578_s0, %s8568_s16  ;;  %s210_s8 = scalar_lea.vmem %s12581_s3, %s8569_s5 }
  0x11   : > { %278 = vst.msk [vmem:[#allocation2 + $0xd0] sm:$0xf] %vm220_vm0, %v8936_v0  ;;  %v8577_v1 = vld [vmem:[%s8990_s19 + $0x38] sm:$0xff]  ;;  %v8576_v5 = vld [vmem:[%s8990_s19 + $0x30] sm:$0xff]  ;;  %v311_v11 = vld [vmem:[%s8990_s19 + $0x20] sm:$0xf] }
  0x12   : > { %v8585_v2 = vld [vmem:[%s8990_s19 + $0x78] sm:$0xff]  ;;  %279 = vst.msk [vmem:[#allocation2 + $0xe0] sm:$0xf] %vm220_vm0, %v8936_v0  ;;  %v2507_v3 = vsel %vm2317_vm1, %v8577_v1, 0  ;;  %v8584_v6 = vld [vmem:[%s8990_s19 + $0x70] sm:$0xff]  ;;  %v2504_v7 = vsel %vm2317_vm1, %v8576_v5, 0 }
  0x13   : > { %280 = vst.msk [vmem:[#allocation2 + $0xf0] sm:$0xf] %vm220_vm0, %v8936_v0  ;;  %v2531_v4 = vsel %vm2317_vm1, %v8585_v2, 0  ;;  %2533 = vmatpush.bf16.xpose.msra.mxu2 %v2507_v3  ;;  %v2528_v8 = vsel %vm2317_vm1, %v8584_v6, 0  ;;  %v309_v9 = vld [vmem:[%s8990_s19 + $0x18] sm:$0xf] }
  0x14   : > { %281 = vst.msk [vmem:[#allocation2 + $0x100] sm:$0xf] %vm220_vm0, %v8936_v0  ;;  %2547 = vmatpush.bf16.xpose.msra.mxu3 %v2531_v4  ;;  %v310_v10 = vld [vmem:[%s8990_s19 + $0x1c] sm:$0xf]  ;;  %v312_v12 = vld [vmem:[%s8990_s19 + $0x24] sm:$0xf] }
  0x15   : > { %282 = vst.msk [vmem:[#allocation2 + $0x110] sm:$0xf] %vm220_vm0, %v8936_v0  ;;  %v313_v13 = vld [vmem:[%s8990_s19 + $0x28] sm:$0xf]  ;;  %v314_v14 = vld [vmem:[%s8990_s19 + $0x2c] sm:$0xf] }
  0x16   : > { %290 = vst.msk [vmem:[#allocation2 + $0x9c] sm:$0xf] %vm220_vm0, %v8936_v0  ;;  %v315_v15 = vld [vmem:[%s8990_s19 + $0x30] sm:$0xf]  ;;  %v316_v16 = vld [vmem:[%s8990_s19 + $0x34] sm:$0xf] }
  0x17   : > { %291 = vst.msk [vmem:[#allocation2 + $0xac] sm:$0xf] %vm220_vm0, %v8936_v0  ;;  %v317_v17 = vld [vmem:[%s8990_s19 + $0x38] sm:$0xf]  ;;  %v318_v18 = vld [vmem:[%s8990_s19 + $0x3c] sm:$0xf] }
  0x18   : > { %292 = vst.msk [vmem:[#allocation2 + $0xbc] sm:$0xf] %vm220_vm0, %v8936_v0  ;;  %v319_v19 = vld [vmem:[%s8990_s19 + $0x40] sm:$0xf]  ;;  %v320_v20 = vld [vmem:[%s8990_s19 + $0x44] sm:$0xf] }
  0x19   : > { %293 = vst.msk [vmem:[#allocation2 + $0xcc] sm:$0xf] %vm220_vm0, %v8936_v0  ;;  %v321_v21 = vld [vmem:[%s8990_s19 + $0x48] sm:$0xf]  ;;  %v322_v22 = vld [vmem:[%s8990_s19 + $0x4c] sm:$0xf] }
  0x1a   : > { %294 = vst.msk [vmem:[#allocation2 + $0xdc] sm:$0xf] %vm220_vm0, %v8936_v0  ;;  %v323_v23 = vld [vmem:[%s8990_s19 + $0x50] sm:$0xf]  ;;  %v324_v24 = vld [vmem:[%s8990_s19 + $0x54] sm:$0xf] }
  0x1b   : > { %295 = vst.msk [vmem:[#allocation2 + $0xec] sm:$0xf] %vm220_vm0, %v8936_v0  ;;  %2534 = vmatpush.bf16.xpose.msra.mxu2 %v2504_v7  ;;  %v325_v25 = vld [vmem:[%s8990_s19 + $0x58] sm:$0xf]  ;;  %v326_v28 = vld [vmem:[%s8990_s19 + $0x5c] sm:$0xf] }
  0x1c   : > { %296 = vst.msk [vmem:[#allocation2 + $0xfc] sm:$0xf] %vm220_vm0, %v8936_v0  ;;  %2548 = vmatpush.bf16.xpose.msra.mxu3 %v2528_v8 }
  0x1d   : > { %297 = vst.msk [vmem:[#allocation2 + $0x10c] sm:$0xf] %vm220_vm0, %v8936_v0 }
  0x1e   : > { %298 = vst.msk [vmem:[#allocation2 + $0x11c] sm:$0xf] %vm220_vm0, %v8936_v0 }
  0x1f   : > { %341 = vst.msk [vmem:[#allocation2 + $0x94] sm:$0xf] %vm220_vm0, %v309_v9 }
  0x20   : > { %342 = vst.msk [vmem:[#allocation2 + $0x98] sm:$0xf] %vm220_vm0, %v310_v10 }
  0x21   : > { %343 = vst.msk [vmem:[#allocation2 + $0xa4] sm:$0xf] %vm220_vm0, %v311_v11 }
  0x22   : > { %344 = vst.msk [vmem:[#allocation2 + $0xa8] sm:$0xf] %vm220_vm0, %v312_v12 }
  0x23   : > { %345 = vst.msk [vmem:[#allocation2 + $0xb4] sm:$0xf] %vm220_vm0, %v313_v13 }
  0x24   : > { %346 = vst.msk [vmem:[#allocation2 + $0xb8] sm:$0xf] %vm220_vm0, %v314_v14 }
  0x25   : > { %347 = vst.msk [vmem:[#allocation2 + $0xc4] sm:$0xf] %vm220_vm0, %v315_v15 }
  0x26   : > { %348 = vst.msk [vmem:[#allocation2 + $0xc8] sm:$0xf] %vm220_vm0, %v316_v16 }
  0x27   : > { %349 = vst.msk [vmem:[#allocation2 + $0xd4] sm:$0xf] %vm220_vm0, %v317_v17 }
  0x28   : > { %350 = vst.msk [vmem:[#allocation2 + $0xd8] sm:$0xf] %vm220_vm0, %v318_v18 }
  0x29   : > { %351 = vst.msk [vmem:[#allocation2 + $0xe4] sm:$0xf] %vm220_vm0, %v319_v19 }
  0x2a   : > { %352 = vst.msk [vmem:[#allocation2 + $0xe8] sm:$0xf] %vm220_vm0, %v320_v20  ;;  %v8835_v26 = vld [vmem:[#allocation2 + $0xb0] sm:$0xff]  }
  0x2b   : > { %353 = vst.msk [vmem:[#allocation2 + $0xf4] sm:$0xf] %vm220_vm0, %v321_v21  ;;  %v8836_v29 = vld [vmem:[#allocation2 + $0xb8] sm:$0xff]   ;;  %v9071_v36 = vunpack.c.l.bf16 %v8835_v26  ;;  %v9073_v37 = vunpack.c.h.bf16 %v8835_v26 }
  0x2c   : > { %354 = vst.msk [vmem:[#allocation2 + $0xf8] sm:$0xf] %vm220_vm0, %v322_v22  ;;  %v8837_v27 = vld [vmem:[#allocation2 + $0xc0] sm:$0xff]   ;;  %v9080_v41 = vunpack.c.l.bf16 %v8836_v29  ;;  %v9082_v42 = vunpack.c.h.bf16 %v8836_v29 }
  0x2d   : > { %355 = vst.msk [vmem:[#allocation2 + $0x104] sm:$0xf] %vm220_vm0, %v323_v23  ;;  %v9061_v30 = vunpack.c.l.bf16 %v8837_v27  ;;  %v9063_v31 = vunpack.c.h.bf16 %v8837_v27  ;;  %v8838_v32 = vld [vmem:[#allocation2 + $0xc8] sm:$0xff]  }
  0x2e   : > { %356 = vst.msk [vmem:[#allocation2 + $0x108] sm:$0xf] %vm220_vm0, %v324_v24  ;;  %v9066_v33 = vunpack.c.l.bf16 %v8838_v32  ;;  %v9068_v34 = vunpack.c.h.bf16 %v8838_v32  ;;  %v8839_v35 = vld [vmem:[#allocation2 + $0xd0] sm:$0xff]  }
  0x2f   : > { %12909 = vst [vmem:[#allocation4_spill] sm:$0xff] %v9061_v30  ;;  %v9075_v38 = vunpack.c.l.bf16 %v8839_v35  ;;  %v9077_v39 = vunpack.c.h.bf16 %v8839_v35  ;;  %v8840_v40 = vld [vmem:[#allocation2 + $0xd8] sm:$0xff]  }
  0x30   : > { %12910 = vst [vmem:[#allocation5_spill] sm:$0xff] %v9063_v31  ;;  %v9084_v43 = vunpack.c.l.bf16 %v8840_v40  ;;  %v9086_v44 = vunpack.c.h.bf16 %v8840_v40  ;;  %v8841_v45 = vld [vmem:[#allocation2 + $0xe0] sm:$0xff]  }
  0x31   : > { %12911 = vst [vmem:[#allocation6_spill] sm:$0xff] %v9066_v33  ;;  %v9088_v46 = vunpack.c.l.bf16 %v8841_v45  ;;  %v9090_v47 = vunpack.c.h.bf16 %v8841_v45  ;;  %v8842_v48 = vld [vmem:[#allocation2 + $0xe8] sm:$0xff]   ;;  %v609_v49 = vmax.f32 %v9075_v38, %v9061_v30  ;;  %v610_v50 = vmax.f32 %v9077_v39, %v9063_v31 }
  0x32   : > { %12912 = vst [vmem:[#allocation7_spill] sm:$0xff] %v9068_v34  ;;  %v9098_v51 = vunpack.c.l.bf16 %v8842_v48  ;;  %v9100_v52 = vunpack.c.h.bf16 %v8842_v48  ;;  %v8843_v53 = vld [vmem:[#allocation2 + $0xf0] sm:$0xff]   ;;  %v611_v54 = vmax.f32 %v9084_v43, %v9066_v33  ;;  %v612_v55 = vmax.f32 %v9086_v44, %v9068_v34 }
  0x33   : > { %357 = vst.msk [vmem:[#allocation2 + $0x114] sm:$0xf] %vm220_vm0, %v325_v25  ;;  %v9108_v56 = vunpack.c.l.bf16 %v8843_v53  ;;  %v9110_v57 = vunpack.c.h.bf16 %v8843_v53  ;;  %v8844_v58 = vld [vmem:[#allocation2 + $0xf8] sm:$0xff]   ;;  %v805_v59 = vmax.f32 %v609_v49, %v9088_v46  ;;  %v806_v60 = vmax.f32 %v610_v50, %v9090_v47 }
  0x34   : > { %12913 = vst [vmem:[#allocation8_spill] sm:$0xff] %v9071_v36  ;;  %v9116_v61 = vunpack.c.l.bf16 %v8844_v58  ;;  %v9118_v62 = vunpack.c.h.bf16 %v8844_v58  ;;  %v807_v63 = vmax.f32 %v611_v54, %v9098_v51  ;;  %v808_v1 = vmax.f32 %v612_v55, %v9100_v52 }
  0x35   : > { %12914 = vst [vmem:[#allocation9_spill] sm:$0xff] %v9073_v37  ;;  %v1001_v2 = vmax.f32 %v805_v59, %v9071_v36  ;;  %v1002_v3 = vmax.f32 %v806_v60, %v9073_v37 }
  0x36   : > { %12915 = vst [vmem:[#allocation10_spill] sm:$0xff] %v9075_v38  ;;  %v1003_v4 = vmax.f32 %v807_v63, %v9080_v41  ;;  %v1004_v5 = vmax.f32 %v808_v1, %v9082_v42  ;;  %v8833_v1 = vld [vmem:[#allocation2 + $0xa0] sm:$0xff]  }
  0x37   : > { %12916 = vst [vmem:[#allocation11_spill] sm:$0xff] %v9077_v39  ;;  %v9133_v6 = vmax.f32 %v1001_v2, %v9108_v56  ;;  %v9136_v7 = vmax.f32 %v1002_v3, %v9110_v57  ;;  %v8834_v2 = vld [vmem:[#allocation2 + $0xa8] sm:$0xff]   ;;  %v8845_v3 = vld [vmem:[#allocation2 + $0x100] sm:$0xff]  }
  0x38   : > { %358 = vst.msk [vmem:[#allocation2 + $0x118] sm:$0xf] %vm220_vm0, %v326_v28  ;;  %v9141_v8 = vmax.f32 %v1003_v4, %v9116_v61  ;;  %v9144_v9 = vmax.f32 %v1004_v5, %v9118_v62  ;;  %v9243_v4 = vunpack.c.l.bf16 %v8833_v1  ;;  %v9245_v5 = vunpack.c.h.bf16 %v8833_v1 }
  0x39   : > { %12917 = vst [vmem:[#allocation12_spill] sm:$0xff] %v9080_v41  ;;  %v1429_v10 = vrot.slane %v9133_v6, 7  ;;  %v1430_v11 = vrot.slane %v9136_v7, 7  ;;  %v1670_v12 = vrot.slane %v9136_v7, 1  ;;  %v1879_v13 = vrot.slane %v9133_v6, 6 }
  0x3a   : > { %12918 = vst [vmem:[#allocation13_spill] sm:$0xff] %v9082_v42  ;;  %v1432_v14 = vrot.slane %v9141_v8, 7  ;;  %v1671_v15 = vrot.slane %v9141_v8, 1  ;;  %v1673_v16 = vrot.slane %v9144_v9, 1  ;;  %v1880_v17 = vrot.slane %v9136_v7, 6 }
  0x3b   : > { %12919 = vst [vmem:[#allocation14_spill] sm:$0xff] %v9084_v43  ;;  %v1431_v18 = vsel %vm1393_vm2, %v1429_v10, %v1430_v11  ;;  %v1882_v19 = vrot.slane %v9141_v8, 6  ;;  %v2088_v20 = vrot.slane %v9136_v7, 2  ;;  %v2089_v21 = vrot.slane %v9141_v8, 2 }
  0x3c   : > { %12920 = vst [vmem:[#allocation15_spill] sm:$0xff] %v9086_v44  ;;  %v1433_v22 = vsel %vm1393_vm2, %v1430_v11, %v1432_v14  ;;  %v1520_v23 = vmax.f32 %v9136_v7, %v1431_v18  ;;  %v1672_v24 = vsel %vm1634_vm3, %v1670_v12, %v1671_v15  ;;  %v1674_v25 = vsel %vm1634_vm3, %v1671_v15, %v1673_v16  ;;  %v8846_v12 = vld [vmem:[#allocation2 + $0x108] sm:$0xff]  }
  0x3d   : > { %12921 = vst [vmem:[#allocation16_spill] sm:$0xff] %v9088_v46  ;;  %v1521_v26 = vmax.f32 %v9141_v8, %v1433_v22  ;;  %v1881_v27 = vsel %vm1843_vm4, %v1879_v13, %v1880_v17  ;;  %v1883_v29 = vsel %vm1843_vm4, %v1880_v17, %v1882_v19  ;;  %v2091_v32 = vrot.slane %v9144_v9, 2  ;;  %v8832_v22 = vld [vmem:[#allocation2 + $0x98] sm:$0xff]  }
  0x3e   : > { %12922 = vst [vmem:[#allocation17_spill] sm:$0xff] %v9090_v47  ;;  %v1761_v28 = vmax.f32 %v1520_v23, %v1672_v24  ;;  %v2090_v40 = vsel %vm2052_vm5, %v2088_v20, %v2089_v21  ;;  %v9249_v10 = vunpack.c.l.bf16 %v8834_v2  ;;  %v9251_v11 = vunpack.c.h.bf16 %v8834_v2 }
  0x3f   : > { %221 = vst.msk [vmem:[#allocation2] sm:$0xf] %vm220_vm0, %v8936_v0  ;;  %v1762_v35 = vmax.f32 %v1521_v26, %v1674_v25  ;;  %v2092_v48 = vsel %vm2052_vm5, %v2089_v21, %v2091_v32  ;;  %v9255_v13 = vunpack.c.l.bf16 %v8845_v3  ;;  %v9257_v14 = vunpack.c.h.bf16 %v8845_v3  ;;  %v8847_v25 = vld [vmem:[#allocation2 + $0x110] sm:$0xff]   ;;  %v8848_v32 = vld [vmem:[#allocation2 + $0x118] sm:$0xff]  }
  0x40   : > { %12923 = vst [vmem:[#allocation18_spill] sm:$0xff] %v9098_v51  ;;  %v1970_v45 = vmax.f32 %v1761_v28, %v1881_v27  ;;  %v2593_v15 = vmax.f32 %v9133_v6, %v9243_v4  ;;  %v2594_v16 = vmax.f32 %v9136_v7, %v9245_v5  ;;  %v9267_v17 = vunpack.c.l.bf16 %v8846_v12  ;;  %v8831_v6 = vld [vmem:[#allocation2 + $0x90] sm:$0xff]  }
  0x41   : > { %12924 = vst [vmem:[#allocation19_spill] sm:$0xff] %v9100_v52  ;;  %v1971_v49 = vmax.f32 %v1762_v35, %v1883_v29  ;;  %v9269_v18 = vunpack.c.h.bf16 %v8846_v12  ;;  %v2595_v19 = vmax.f32 %v9141_v8, %v9249_v10  ;;  %v2596_v20 = vmax.f32 %v9144_v9, %v9251_v11  ;;  %v327_v12 = vld [vmem:[%s8990_s19 + $0x60] sm:$0xf] }
  0x42   : > { %222 = vst.msk [vmem:[#allocation2 + $0x4] sm:$0xf] %vm220_vm0, %v8936_v0  ;;  %v2179_v50 = vmax.f32 %v1970_v45, %v2090_v40  ;;  %v2789_v7 = vmax.f32 %v2593_v15, %v9255_v13  ;;  %v2790_v21 = vmax.f32 %v2594_v16, %v9257_v14  ;;  %v9285_v8 = vunpack.c.l.bf16 %v8831_v6 }
  0x43   : > { %12925 = vst [vmem:[#allocation20_spill] sm:$0xff] %v9108_v56  ;;  %v2180_v53 = vmax.f32 %v1971_v49, %v2092_v48  ;;  %v9287_v9 = vunpack.c.h.bf16 %v8831_v6  ;;  %v2791_v23 = vmax.f32 %v2595_v19, %v9267_v17  ;;  %v2792_v24 = vmax.f32 %v2596_v20, %v9269_v18 }
  0x44   : > { %12926 = vst [vmem:[#allocation21_spill] sm:$0xff] %v9110_v57  ;;  %v2211_v54 = vpack.c.bf16 %v2179_v50, %v2179_v50  ;;  %v9295_v26 = vunpack.c.l.bf16 %v8832_v22  ;;  %v9297_v27 = vunpack.c.h.bf16 %v8832_v22  ;;  %v2985_v28 = vmax.f32 %v2789_v7, %v9285_v8 }
  0x45   : > { %223 = vst.msk [vmem:[#allocation2 + $0x8] sm:$0xf] %vm220_vm0, %v8936_v0  ;;  %v2212_v55 = vpack.c.bf16 %v2180_v53, %v2180_v53  ;;  %v2986_v29 = vmax.f32 %v2790_v21, %v9287_v9  ;;  %v605_v35 = vmax.f32 %v9061_v30, %v9071_v36  ;;  %v606_v40 = vmax.f32 %v9063_v31, %v9073_v37 }
  0x46   : > { %12927 = vst [vmem:[#allocation22_spill] sm:$0xff] %v9116_v61  ;;  %v2283_v58 = vunpack.c.l.b16 %v2211_v54  ;;  %v607_v45 = vmax.f32 %v9066_v33, %v9080_v41  ;;  %v9311_v48 = vunpack.c.l.bf16 %v8847_v25  ;;  %v9313_v49 = vunpack.c.h.bf16 %v8847_v25 }
  0x47   : > { %12928 = vst [vmem:[#allocation23_spill] sm:$0xff] %v9118_v62  ;;  %v2284_v59 = vunpack.c.l.b16 %v2212_v55  ;;  %v2987_v50 = vmax.f32 %v2791_v23, %v9295_v26  ;;  %v2988_v53 = vmax.f32 %v2792_v24, %v9297_v27  ;;  %v608_v55 = vmax.f32 %v9068_v34, %v9082_v42  ;;  %v328_v23 = vld [vmem:[%s8990_s19 + $0x64] sm:$0xf]  ;;  %v8575_v42 = vld [vmem:[%s8990_s19 + $0x28] sm:$0xff] }
  0x48   : > { %224 = vst.msk [vmem:[#allocation2 + $0xc] sm:$0xf] %vm220_vm0, %v8936_v0  ;;  %v9328_v1 = vunpack.c.h.bf16 %v8848_v32  ;;  %v9331_v2 = vmax.f32 %v2985_v28, %v9311_v48  ;;  %v9334_v3 = vmax.f32 %v2986_v29, %v9313_v49  ;;  %v329_v28 = vld [vmem:[%s8990_s19 + $0x68] sm:$0xf]  ;;  %v331_v29 = vld [vmem:[%s8990_s19 + $0x70] sm:$0xf] }
  0x49   : > { %225 = vst.msk [vmem:[#allocation2 + $0x10] sm:$0xf] %vm220_vm0, %v8936_v0  ;;  %v2308_v60 = vpack.c.b16 %v2284_v59, %v2283_v58  ;;  %v801_v58 = vmax.f32 %v605_v35, %v9075_v38  ;;  %v802_v59 = vmax.f32 %v606_v40, %v9077_v39  ;;  %v804_v19 = vmax.f32 %v608_v55, %v9086_v44  ;;  %v332_v55 = vld [vmem:[%s8990_s19 + $0x74] sm:$0xf] }
  0x4a   : > { %226 = vst.msk [vmem:[#allocation2 + $0x14] sm:$0xf] %vm220_vm0, %v8936_v0  ;;  %v9349_v22 = vmax.f32 %v2988_v53, %v9328_v1  ;;  %v2501_v36 = vsel %vm2317_vm1, %v8575_v42, 0 }
  0x4b   : > { %227 = vst.msk [vmem:[#allocation2 + $0x18] sm:$0xf] %vm220_vm0, %v8936_v0  ;;  %v2343_v63 = vsel %vm2317_vm1, %v2308_v60, 0  ;;  %v803_v60 = vmax.f32 %v607_v45, %v9084_v43  ;;  %v997_v20 = vmax.f32 %v801_v58, %v9243_v4  ;;  %v998_v6 = vmax.f32 %v802_v59, %v9245_v5  ;;  %2535 = vmatpush.bf16.xpose.msra.mxu2 %v2501_v36 }
  0x4c   : > { %228 = vst.msk [vmem:[#allocation2 + $0x1c] sm:$0xf] %vm220_vm0, %v8936_v0  ;;  %2369 = vmatpush.bf16.xpose.msra.mxu0 %v2343_v63  ;;  %v9326_v63 = vunpack.c.l.bf16 %v8848_v32  ;;  %v1000_v40 = vmax.f32 %v804_v19, %v9251_v11 }
  0x4d   : > { %229 = vst.msk [vmem:[#allocation2 + $0x20] sm:$0xf] %vm220_vm0, %v8936_v0  ;;  %v999_v7 = vmax.f32 %v803_v60, %v9249_v10  ;;  %v9364_v45 = vmax.f32 %v997_v20, %v9088_v46 }
  0x4e   : > { %230 = vst.msk [vmem:[#allocation2 + $0x24] sm:$0xf] %vm220_vm0, %v8936_v0  ;;  %v9346_v21 = vmax.f32 %v2987_v50, %v9326_v63  ;;  %v9367_v50 = vmax.f32 %v998_v6, %v9090_v47  ;;  %v9385_v20 = vmax.f32 %v1000_v40, %v9100_v52 }
  0x4f   : > { %231 = vst.msk [vmem:[#allocation2 + $0x28] sm:$0xf] %vm220_vm0, %v8936_v0  ;;  %v9370_v53 = vmax.f32 %v999_v7, %v9098_v51  ;;  %v1424_v6 = vrot.slane %v9364_v45, 7 }
  0x50   : > { %232 = vst.msk [vmem:[#allocation2 + $0x2c] sm:$0xf] %vm220_vm0, %v8936_v0  ;;  %v1425_v7 = vrot.slane %v9367_v50, 7  ;;  %v1665_v51 = vrot.slane %v9367_v50, 1  ;;  %v1875_v44 = vrot.slane %v9367_v50, 6  ;;  %v2083_v31 = vrot.slane %v9367_v50, 2 }
  0x51   : > { %233 = vst.msk [vmem:[#allocation2 + $0x30] sm:$0xf] %vm220_vm0, %v8936_v0  ;;  %v1666_v47 = vrot.slane %v9370_v53, 1  ;;  %v2590_v42 = vmax.f32 %v9367_v50, %v9287_v9 }
  0x52   : > { %234 = vst.msk [vmem:[#allocation2 + $0x34] sm:$0xf] %vm220_vm0, %v8936_v0 }
  0x53   : > { %235 = vst.msk [vmem:[#allocation2 + $0x38] sm:$0xf] %vm220_vm0, %v8936_v0 }
  0x54   : > { %236 = vst.msk [vmem:[#allocation2 + $0x3c] sm:$0xf] %vm220_vm0, %v8936_v0 }
  0x55   : > { %237 = vst.msk [vmem:[#allocation2 + $0x40] sm:$0xf] %vm220_vm0, %v8936_v0 }
  0x56   : > { %238 = vst.msk [vmem:[#allocation2 + $0x44] sm:$0xf] %vm220_vm0, %v8936_v0 }
  0x57   : > { %239 = vst.msk [vmem:[#allocation2 + $0x48] sm:$0xf] %vm220_vm0, %v8936_v0 }
  0x58   : > { %240 = vst.msk [vmem:[#allocation2 + $0x4c] sm:$0xf] %vm220_vm0, %v8936_v0 }
  0x59   : > { %241 = vst.msk [vmem:[#allocation2 + $0x50] sm:$0xf] %vm220_vm0, %v8936_v0 }
  0x5a   : > { %242 = vst.msk [vmem:[#allocation2 + $0x54] sm:$0xf] %vm220_vm0, %v8936_v0 }
  0x5b   : > { %243 = vst.msk [vmem:[#allocation2 + $0x58] sm:$0xf] %vm220_vm0, %v8936_v0 }
  0x5c   : > { %244 = vst.msk [vmem:[#allocation2 + $0x5c] sm:$0xf] %vm220_vm0, %v8936_v0 }
  0x5d   : > { %246 = vst.msk [vmem:[#allocation2 + $0x160] sm:$0xf] %vm220_vm0, %v8936_v0 }
  0x5e   : > { %247 = vst.msk [vmem:[#allocation2 + $0x164] sm:$0xf] %vm220_vm0, %v8936_v0 }
  0x5f   : > { %248 = vst.msk [vmem:[#allocation2 + $0x168] sm:$0xf] %vm220_vm0, %v8936_v0 }
  0x60   : > { %249 = vst.msk [vmem:[#allocation2 + $0x16c] sm:$0xf] %vm220_vm0, %v8936_v0 }
  0x61   : > { %250 = vst.msk [vmem:[#allocation2 + $0x170] sm:$0xf] %vm220_vm0, %v8936_v0 }
  0x62   : > { %251 = vst.msk [vmem:[#allocation2 + $0x174] sm:$0xf] %vm220_vm0, %v8936_v0 }
  0x63   : > { %252 = vst.msk [vmem:[#allocation2 + $0x178] sm:$0xf] %vm220_vm0, %v8936_v0 }
  0x64   : > { %253 = vst.msk [vmem:[#allocation2 + $0x17c] sm:$0xf] %vm220_vm0, %v8936_v0 }
  0x65   : > { %254 = vst.msk [vmem:[#allocation2 + $0x180] sm:$0xf] %vm220_vm0, %v8936_v0  ;;  %v8857_v54 = vld [vmem:[#allocation2 + $0x160] sm:$0xff]  }
  0x66   : > { %255 = vst.msk [vmem:[#allocation2 + $0x184] sm:$0xf] %vm220_vm0, %v8936_v0  ;;  %v9354_v24 = vunpack.c.l.bf16 %v8857_v54  ;;  %v9356_v25 = vunpack.c.h.bf16 %v8857_v54  ;;  %v330_v54 = vld [vmem:[%s8990_s19 + $0x6c] sm:$0xf] }
  0x67   : > { %256 = vst.msk [vmem:[#allocation2 + $0x188] sm:$0xf] %vm220_vm0, %v8936_v0  ;;  %v8858_v15 = vld [vmem:[#allocation2 + $0x168] sm:$0xff]  }
  0x68   : > { %257 = vst.msk [vmem:[#allocation2 + $0x18c] sm:$0xf] %vm220_vm0, %v8936_v0  ;;  %v9377_v58 = vunpack.c.h.bf16 %v8858_v15 }
  0x69   : > { %258 = vst.msk [vmem:[#allocation2 + $0x190] sm:$0xf] %vm220_vm0, %v8936_v0  ;;  %v8859_v16 = vld [vmem:[#allocation2 + $0x170] sm:$0xff]  }
  0x6a   : > { %259 = vst.msk [vmem:[#allocation2 + $0x194] sm:$0xf] %vm220_vm0, %v8936_v0  ;;  %v9379_v59 = vunpack.c.l.bf16 %v8859_v16  ;;  %v9381_v60 = vunpack.c.h.bf16 %v8859_v16 }
  0x6b   : > { %260 = vst.msk [vmem:[#allocation2 + $0x198] sm:$0xf] %vm220_vm0, %v8936_v0  ;;  %v8860_v32 = vld [vmem:[#allocation2 + $0x178] sm:$0xff]  }
  0x6c   : > { %261 = vst.msk [vmem:[#allocation2 + $0x19c] sm:$0xf] %vm220_vm0, %v8936_v0  ;;  %v9395_v16 = vunpack.c.h.bf16 %v8860_v32 }
  0x6d   : > { %262 = vst.msk [vmem:[#allocation2 + $0x1a0] sm:$0xf] %vm220_vm0, %v8936_v0  ;;  %v8861_v35 = vld [vmem:[#allocation2 + $0x180] sm:$0xff]  }
  0x6e   : > { %263 = vst.msk [vmem:[#allocation2 + $0x1a4] sm:$0xf] %vm220_vm0, %v8936_v0 }
  0x6f   : > { %264 = vst.msk [vmem:[#allocation2 + $0x1a8] sm:$0xf] %vm220_vm0, %v8936_v0  ;;  %v8862_v19 = vld [vmem:[#allocation2 + $0x188] sm:$0xff]  }
  0x70   : > { %265 = vst.msk [vmem:[#allocation2 + $0x1ac] sm:$0xf] %vm220_vm0, %v8936_v0  ;;  %v9421_v43 = vunpack.c.h.bf16 %v8862_v19 }
  0x71   : > { %12929 = vst [vmem:[#allocation24_spill] sm:$0xff] %v9243_v4  ;;  %v8863_v40 = vld [vmem:[#allocation2 + $0x190] sm:$0xff]  }
  0x72   : > { %12930 = vst [vmem:[#allocation25_spill] sm:$0xff] %v9245_v5 }
  0x73   : > { %266 = vst.msk [vmem:[#allocation2 + $0x1b0] sm:$0xf] %vm220_vm0, %v8936_v0 }
  0x74   : > { %12931 = vst [vmem:[#allocation26_spill] sm:$0xff] %v9249_v10 }
  0x75   : > { %12932 = vst [vmem:[#allocation27_spill] sm:$0xff] %v9251_v11  ;;  %v8583_v11 = vld [vmem:[%s8990_s19 + $0x68] sm:$0xff] }
  0x76   : > { %267 = vst.msk [vmem:[#allocation2 + $0x1b4] sm:$0xf] %vm220_vm0, %v8936_v0  ;;  %v2525_v4 = vsel %vm2317_vm1, %v8583_v11, 0 }
  0x77   : > { %12933 = vst [vmem:[#allocation28_spill] sm:$0xff] %v9255_v13  ;;  %2549 = vmatpush.bf16.xpose.msra.mxu3 %v2525_v4 }
  0x78   : > { %12934 = vst [vmem:[#allocation29_spill] sm:$0xff] %v9257_v14 }
  0x79   : > { %268 = vst.msk [vmem:[#allocation2 + $0x1b8] sm:$0xf] %vm220_vm0, %v8936_v0 }
  0x7a   : > { %269 = vst.msk [vmem:[#allocation2 + $0x1bc] sm:$0xf] %vm220_vm0, %v8936_v0 }
  0x7b   : > { %12935 = vst [vmem:[#allocation30_spill] sm:$0xff] %v9267_v17 }
  0x7c   : > { %12936 = vst [vmem:[#allocation31_spill] sm:$0xff] %v9269_v18 }
  0x7d   : > { %271 = vst.msk [vmem:[#allocation2 + $0x60] sm:$0xf] %vm220_vm0, %v8936_v0 }
  0x7e   : > { %272 = vst.msk [vmem:[#allocation2 + $0x70] sm:$0xf] %vm220_vm0, %v8936_v0 }
  0x7f   : > { %273 = vst.msk [vmem:[#allocation2 + $0x80] sm:$0xf] %vm220_vm0, %v8936_v0 }
  0x80   : > { %283 = vst.msk [vmem:[#allocation2 + $0x120] sm:$0xf] %vm220_vm0, %v8936_v0 }
  0x81   : > { %12937 = vst [vmem:[#allocation32_spill] sm:$0xff] %v9285_v8 }
  0x82   : > { %12938 = vst [vmem:[#allocation33_spill] sm:$0xff] %v9287_v9 }
  0x83   : > { %284 = vst.msk [vmem:[#allocation2 + $0x130] sm:$0xf] %vm220_vm0, %v8936_v0 }
  0x84   : > { %285 = vst.msk [vmem:[#allocation2 + $0x140] sm:$0xf] %vm220_vm0, %v8936_v0 }
  0x85   : > { %12939 = vst [vmem:[#allocation34_spill] sm:$0xff] %v9295_v26 }
  0x86   : > { %12940 = vst [vmem:[#allocation35_spill] sm:$0xff] %v9297_v27 }
  0x87   : > { %286 = vst.msk [vmem:[#allocation2 + $0x150] sm:$0xf] %vm220_vm0, %v8936_v0 }
  0x88   : > { %287 = vst.msk [vmem:[#allocation2 + $0x6c] sm:$0xf] %vm220_vm0, %v8936_v0 }
  0x89   : > { %12941 = vst [vmem:[#allocation36_spill] sm:$0xff] %v9311_v48 }
  0x8a   : > { %12942 = vst [vmem:[#allocation37_spill] sm:$0xff] %v9313_v49 }
  0x8b   : > { %288 = vst.msk [vmem:[#allocation2 + $0x7c] sm:$0xf] %vm220_vm0, %v8936_v0 }
  0x8c   : > { %289 = vst.msk [vmem:[#allocation2 + $0x8c] sm:$0xf] %vm220_vm0, %v8936_v0 }
  0x8d   : > { %12943 = vst [vmem:[#allocation38_spill] sm:$0xff] %v9326_v63 }
  0x8e   : > { %12944 = vst [vmem:[#allocation39_spill] sm:$0xff] %v9328_v1 }
  0x8f   : > { %12945 = vst [vmem:[#allocation40_spill] sm:$0xff] %v9331_v2  ;;  %v1426_v2 = vsel %vm1393_vm2, %v1424_v6, %v1425_v7  ;;  %v9414_v6 = vld [vmem:[#allocation2 + $0x198] sm:$0xff]  }
  0x90   : > { %12946 = vst [vmem:[#allocation41_spill] sm:$0xff] %v9334_v3  ;;  %v9399_v3 = vunpack.c.h.bf16 %v8861_v35 }
  0x91   : > { %299 = vst.msk [vmem:[#allocation2 + $0x12c] sm:$0xf] %vm220_vm0, %v8936_v0 }
  0x92   : > { %300 = vst.msk [vmem:[#allocation2 + $0x13c] sm:$0xf] %vm220_vm0, %v8936_v0 }
  0x93   : > { %12947 = vst [vmem:[#allocation42_spill] sm:$0xff] %v9346_v21  ;;  %v9393_v21 = vunpack.c.l.bf16 %v8860_v32  ;;  %v307_v32 = vld [vmem:[%s8990_s19 + $0x10] sm:$0xf] }
  0x94   : > { %12948 = vst [vmem:[#allocation43_spill] sm:$0xff] %v9349_v22  ;;  %v333_v22 = vld [vmem:[%s8990_s19 + $0x78] sm:$0xf] }
  0x95   : > { %301 = vst.msk [vmem:[#allocation2 + $0x14c] sm:$0xf] %vm220_vm0, %v8936_v0 }
  0x96   : > { %12949 = vst [vmem:[#allocation44_spill] sm:$0xff] %v9354_v24 }
  0x97   : > { %12950 = vst [vmem:[#allocation45_spill] sm:$0xff] %v9356_v25 }
  0x98   : > { %302 = vst.msk [vmem:[#allocation2 + $0x15c] sm:$0xf] %vm220_vm0, %v8936_v0  ;;  %v9375_v0 = vunpack.c.l.bf16 %v8858_v15  ;;  %v334_v15 = vld [vmem:[%s8990_s19 + $0x7c] sm:$0xf] }
  0x99   : > { %359 = vst.msk [vmem:[#allocation2 + $0x124] sm:$0xf] %vm220_vm0, %v327_v12  ;;  %v1427_v12 = vrot.slane %v9370_v53, 7 }
  0x9a   : > { %12951 = vst [vmem:[#allocation46_spill] sm:$0xff] %v9375_v0 }
  0x9b   : > { %12952 = vst [vmem:[#allocation47_spill] sm:$0xff] %v9377_v58  ;;  %v1428_v52 = vsel %vm1393_vm2, %v1425_v7, %v1427_v12  ;;  %v1667_v7 = vsel %vm1634_vm3, %v1665_v51, %v1666_v47  ;;  %v1874_v12 = vrot.slane %v9364_v45, 6 }
  0x9c   : > { %12953 = vst [vmem:[#allocation48_spill] sm:$0xff] %v9379_v59  ;;  %v1519_v46 = vmax.f32 %v9370_v53, %v1428_v52  ;;  %v308_v52 = vld [vmem:[%s8990_s19 + $0x14] sm:$0xf] }
  0x9d   : > { %12954 = vst [vmem:[#allocation49_spill] sm:$0xff] %v9381_v60  ;;  %v1876_v34 = vsel %vm1843_vm4, %v1874_v12, %v1875_v44 }
  0x9e   : > { %360 = vst.msk [vmem:[#allocation2 + $0x128] sm:$0xf] %vm220_vm0, %v328_v23  ;;  %v9397_v23 = vunpack.c.l.bf16 %v8861_v35  ;;  %v1518_v35 = vmax.f32 %v9367_v50, %v1426_v2  ;;  %v9423_v2 = vunpack.c.l.bf16 %v8863_v40 }
  0x9f   : > { %361 = vst.msk [vmem:[#allocation2 + $0x134] sm:$0xf] %vm220_vm0, %v329_v28  ;;  %v9407_v28 = vunpack.c.l.bf16 %v8862_v19  ;;  %v9434_v19 = vunpack.c.l.bf16 %v9414_v6 }
  0xa0   : > { %12955 = vst [vmem:[#allocation50_spill] sm:$0xff] %v9393_v21  ;;  %v8849_v38 = vld [vmem:[#allocation2 + $0x120] sm:$0xff]  }
  0xa1   : > { %12956 = vst [vmem:[#allocation51_spill] sm:$0xff] %v9395_v16 }
  0xa2   : > { %12957 = vst [vmem:[#allocation52_spill] sm:$0xff] %v9397_v23 }
  0xa3   : > { %12958 = vst [vmem:[#allocation53_spill] sm:$0xff] %v9399_v3 }
  0xa4   : > { %362 = vst.msk [vmem:[#allocation2 + $0x138] sm:$0xf] %vm220_vm0, %v330_v54  ;;  %v1668_v54 = vrot.slane %v9385_v20, 1 }
  0xa5   : > { %363 = vst.msk [vmem:[#allocation2 + $0x144] sm:$0xf] %vm220_vm0, %v331_v29  ;;  %v1877_v29 = vrot.slane %v9370_v53, 6  ;;  %v8850_v30 = vld [vmem:[#allocation2 + $0x128] sm:$0xff]  }
  0xa6   : > { %12959 = vst [vmem:[#allocation54_spill] sm:$0xff] %v9407_v28  ;;  %v1669_v39 = vsel %vm1634_vm3, %v1666_v47, %v1668_v54  ;;  %v9444_v54 = vunpack.c.l.bf16 %v8850_v30 }
  0xa7   : > { %364 = vst.msk [vmem:[#allocation2 + $0x148] sm:$0xf] %vm220_vm0, %v332_v55  ;;  %v1759_v55 = vmax.f32 %v1518_v35, %v1667_v7  ;;  %v1760_v51 = vmax.f32 %v1519_v46, %v1669_v39  ;;  %v1878_v33 = vsel %vm1843_vm4, %v1875_v44, %v1877_v29  ;;  %v9438_v39 = vunpack.c.l.bf16 %v8849_v38  ;;  %v8851_v44 = vld [vmem:[#allocation2 + $0x130] sm:$0xff]  }
  0xa8   : > { %365 = vst.msk [vmem:[#allocation2 + $0x154] sm:$0xf] %vm220_vm0, %v333_v22  ;;  %v9431_v22 = vunpack.c.h.bf16 %v8863_v40  ;;  %v9440_v46 = vunpack.c.h.bf16 %v8849_v38  ;;  %v2086_v40 = vrot.slane %v9385_v20, 2  ;;  %v9446_v7 = vunpack.c.h.bf16 %v8850_v30 }
  0xa9   : > { %12960 = vst [vmem:[#allocation55_spill] sm:$0xff] %v9421_v43  ;;  %v1968_v47 = vmax.f32 %v1759_v55, %v1876_v34  ;;  %v1969_v35 = vmax.f32 %v1760_v51, %v1878_v33  ;;  %v9451_v29 = vunpack.c.h.bf16 %v8851_v44 }
  0xaa   : > { %12961 = vst [vmem:[#allocation56_spill] sm:$0xff] %v9423_v2 }
  0xab   : > { %366 = vst.msk [vmem:[#allocation2 + $0x158] sm:$0xf] %vm220_vm0, %v334_v15  ;;  %v2084_v15 = vrot.slane %v9370_v53, 2  ;;  %v8852_v34 = vld [vmem:[#allocation2 + $0x138] sm:$0xff]  }
  0xac   : > { %12962 = vst [vmem:[#allocation57_spill] sm:$0xff] %v9431_v22  ;;  %v9453_v55 = vunpack.c.l.bf16 %v8852_v34  ;;  %v8853_v38 = vld [vmem:[#allocation2 + $0x140] sm:$0xff]   ;;  %v9458_v51 = vunpack.c.h.bf16 %v8852_v34 }
  0xad   : > { %12963 = vst [vmem:[#allocation58_spill] sm:$0xff] %v9434_v19  ;;  %v2085_v12 = vsel %vm2052_vm5, %v2083_v31, %v2084_v15  ;;  %v2087_v33 = vsel %vm2052_vm5, %v2084_v15, %v2086_v40  ;;  %v9460_v41 = vunpack.c.l.bf16 %v8853_v38  ;;  %v9462_v30 = vunpack.c.h.bf16 %v8853_v38 }
  0xae   : > { %339 = vst.msk [vmem:[#allocation2 + $0x84] sm:$0xf] %vm220_vm0, %v307_v32  ;;  %v9448_v32 = vunpack.c.l.bf16 %v8851_v44  ;;  %v8854_v10 = vld [vmem:[#allocation2 + $0x148] sm:$0xff]   ;;  %v2178_v37 = vmax.f32 %v1969_v35, %v2087_v33  ;;  %v2589_v38 = vmax.f32 %v9364_v45, %v9285_v8  ;;  %v2591_v33 = vmax.f32 %v9370_v53, %v9295_v26 }
  0xaf   : > { %12964 = vst [vmem:[#allocation59_spill] sm:$0xff] %v9438_v39  ;;  %v9464_v5 = vunpack.c.l.bf16 %v8854_v10  ;;  %v9466_v31 = vunpack.c.h.bf16 %v8854_v10  ;;  %v8855_v44 = vld [vmem:[#allocation2 + $0x150] sm:$0xff]   ;;  %v2592_v26 = vmax.f32 %v9385_v20, %v9297_v27 }
  0xb0   : > { %12965 = vst [vmem:[#allocation60_spill] sm:$0xff] %v9440_v46  ;;  %v9470_v19 = vunpack.c.l.bf16 %v8855_v44  ;;  %v2210_v34 = vpack.c.bf16 %v2178_v37, %v2178_v37  ;;  %v2787_v20 = vmax.f32 %v2591_v33, %v9116_v61 }
  0xb1   : > { %340 = vst.msk [vmem:[#allocation2 + $0x88] sm:$0xf] %vm220_vm0, %v308_v52  ;;  %v2177_v52 = vmax.f32 %v1968_v47, %v2085_v12  ;;  %v9472_v47 = vunpack.c.h.bf16 %v8855_v44 }
  0xb2   : > { %12966 = vst [vmem:[#allocation61_spill] sm:$0xff] %v9444_v54  ;;  %v8856_v15 = vld [vmem:[#allocation2 + $0x158] sm:$0xff]   ;;  %v641_v11 = vmax.f32 %v9470_v19, %v9460_v41 }
  0xb3   : > { %12967 = vst [vmem:[#allocation62_spill] sm:$0xff] %v9446_v7  ;;  %v2209_v40 = vpack.c.bf16 %v2177_v52, %v2177_v52  ;;  %v9474_v12 = vunpack.c.l.bf16 %v8856_v15  ;;  %v9476_v35 = vunpack.c.h.bf16 %v8856_v15  ;;  %v642_v36 = vmax.f32 %v9472_v47, %v9462_v30 }
  0xb4   : > { %12968 = vst [vmem:[#allocation63_spill] sm:$0xff] %v9448_v32  ;;  %v837_v15 = vmax.f32 %v641_v11, %v9354_v24 }
  0xb5   : > { %12969 = vst [vmem:[#allocation64_spill] sm:$0xff] %v9451_v29  ;;  %v8829_v10 = vld [vmem:[#allocation2 + $0x80] sm:$0xff]   ;;  %v643_v45 = vmax.f32 %v9474_v12, %v9464_v5  ;;  %v644_v50 = vmax.f32 %v9476_v35, %v9466_v31  ;;  %v838_v9 = vmax.f32 %v642_v36, %v9356_v25  ;;  %v2281_v8 = vunpack.c.l.b16 %v2209_v40 }
  0xb6   : > { %12970 = vst [vmem:[#allocation65_spill] sm:$0xff] %v9453_v55  ;;  %v9486_v4 = vunpack.c.l.bf16 %v8829_v10  ;;  %v9494_v52 = vunpack.c.h.bf16 %v8829_v10  ;;  %v305_v10 = vld [vmem:[%s8990_s19 + $0x8] sm:$0xf]  ;;  %v2786_v40 = vmax.f32 %v2590_v42, %v9110_v57 }
  0xb7   : > { %12971 = vst [vmem:[#allocation66_spill] sm:$0xff] %v9458_v51  ;;  %v840_v53 = vmax.f32 %v644_v50, %v9377_v58  ;;  %v1034_v11 = vmax.f32 %v838_v9, %v9451_v29  ;;  %v2788_v9 = vmax.f32 %v2592_v26, %v9118_v62 }
  0xb8   : > { %12972 = vst [vmem:[#allocation67_spill] sm:$0xff] %v9460_v41  ;;  %v8830_v37 = vld [vmem:[#allocation2 + $0x88] sm:$0xff]  }
  0xb9   : > { %12973 = vst [vmem:[#allocation68_spill] sm:$0xff] %v9462_v30  ;;  %v9496_v44 = vunpack.c.l.bf16 %v8830_v37  ;;  %v1036_v36 = vmax.f32 %v840_v53, %v9458_v51  ;;  %v1230_v50 = vmax.f32 %v1034_v11, %v9381_v60 }
  0xba   : > { %12974 = vst [vmem:[#allocation69_spill] sm:$0xff] %v9464_v5 }
  0xbb   : > { %12975 = vst [vmem:[#allocation70_spill] sm:$0xff] %v9466_v31  ;;  %v1033_v31 = vmax.f32 %v837_v15, %v9448_v32  ;;  %v1710_v15 = vrot.slane %v1230_v50, 1 }
  0xbc   : > { %12976 = vst [vmem:[#allocation71_spill] sm:$0xff] %v9470_v19  ;;  %v839_v19 = vmax.f32 %v643_v45, %v9375_v0  ;;  %v9515_v45 = vunpack.c.h.bf16 %v8830_v37  ;;  %v2982_v37 = vmax.f32 %v2786_v40, %v9494_v52 }
  0xbd   : > { %12977 = vst [vmem:[#allocation72_spill] sm:$0xff] %v9472_v47  ;;  %v2282_v47 = vunpack.c.l.b16 %v2210_v34 }
  0xbe   : > { %12978 = vst [vmem:[#allocation73_spill] sm:$0xff] %v9474_v12  ;;  %v9505_v12 = vmax.f32 %v2589_v38, %v9108_v56  ;;  %v1035_v34 = vmax.f32 %v839_v19, %v9453_v55  ;;  %v1229_v38 = vmax.f32 %v1033_v31, %v9379_v59  ;;  %v1232_v19 = vmax.f32 %v1036_v36, %v9395_v16 }
  0xbf   : > { %12979 = vst [vmem:[#allocation74_spill] sm:$0xff] %v9476_v35  ;;  %v306_v35 = vld [vmem:[%s8990_s19 + $0xc] sm:$0xf]  ;;  %v2307_v24 = vpack.c.b16 %v2282_v47, %v2281_v8 }
  0xc0   : > { %12980 = vst [vmem:[#allocation75_spill] sm:$0xff] %v9486_v4  ;;  %v1231_v47 = vmax.f32 %v1035_v34, %v9393_v21  ;;  %v2981_v42 = vmax.f32 %v9505_v12, %v9486_v4  ;;  %v1469_v33 = vrot.slane %v1229_v38, 7  ;;  %v1919_v31 = vrot.slane %v1229_v38, 6 }
  0xc1   : > { %12981 = vst [vmem:[#allocation76_spill] sm:$0xff] %v9494_v52  ;;  %v2340_v8 = vsel %vm2317_vm1, %v2307_v24, 0  ;;  %v1713_v11 = vrot.slane %v1232_v19, 1  ;;  %v1920_v24 = vrot.slane %v1230_v50, 6  ;;  %v2128_v34 = vrot.slane %v1230_v50, 2 }
  0xc2   : > { %12982 = vst [vmem:[#allocation77_spill] sm:$0xff] %v9496_v44  ;;  %2370 = vmatpush.bf16.xpose.msra.mxu0 %v2340_v8  ;;  %v1472_v53 = vrot.slane %v1231_v47, 7  ;;  %v1922_v62 = vrot.slane %v1231_v47, 6  ;;  %v2129_v61 = vrot.slane %v1231_v47, 2  ;;  %v2983_v4 = vmax.f32 %v2787_v20, %v9496_v44 }
  0xc3   : > { %337 = vst.msk [vmem:[#allocation2 + $0x74] sm:$0xf] %vm220_vm0, %v305_v10  ;;  %v1711_v10 = vrot.slane %v1231_v47, 1  ;;  %v1921_v56 = vsel %vm1843_vm4, %v1919_v31, %v1920_v24  ;;  %v2131_v16 = vrot.slane %v1232_v19, 2  ;;  %v2626_v21 = vmax.f32 %v1230_v50, %v9440_v46 }
  0xc4   : > { %12983 = vst [vmem:[#allocation78_spill] sm:$0xff] %v9515_v45  ;;  %v1923_v52 = vsel %vm1843_vm4, %v1920_v24, %v1922_v62  ;;  %v8582_v24 = vld [vmem:[%s8990_s19 + $0x60] sm:$0xff] }
  0xc5   : > { %338 = vst.msk [vmem:[#allocation2 + $0x78] sm:$0xf] %vm220_vm0, %v306_v35  ;;  %v1470_v35 = vrot.slane %v1230_v50, 7  ;;  %v1712_v12 = vsel %vm1634_vm3, %v1710_v15, %v1711_v10  ;;  %v1714_v40 = vsel %vm1634_vm3, %v1711_v10, %v1713_v11  ;;  %v2627_v15 = vmax.f32 %v1231_v47, %v9444_v54 }
  0xc6   : > { %v2132_v31 = vsel %vm2052_vm5, %v2129_v61, %v2131_v16  ;;  %v2822_v20 = vmax.f32 %v2626_v21, %v9399_v3  ;;  %v9553_v21 = vmax.f32 %v2981_v42, %v9255_v13 }
  0xc7   : > { %v1471_v26 = vsel %vm1393_vm2, %v1469_v33, %v1470_v35  ;;  %v1473_v36 = vsel %vm1393_vm2, %v1470_v35, %v1472_v53  ;;  %v2625_v33 = vmax.f32 %v1229_v38, %v9438_v39  ;;  %v2130_v35 = vsel %vm2052_vm5, %v2128_v34, %v2129_v61 }
  0xc8   : > { %v1536_v8 = vmax.f32 %v1230_v50, %v1471_v26  ;;  %v1537_v57 = vmax.f32 %v1231_v47, %v1473_v36  ;;  %v2628_v53 = vmax.f32 %v1232_v19, %v9446_v7  ;;  %v2823_v38 = vmax.f32 %v2627_v15, %v9407_v28  ;;  %12985 = vst [vmem:[#allocation80_spill] sm:$0xff] %v9553_v21  ;;  %v13007_v21 = vld [vmem:[#allocation27_spill] sm:$0xff] }
  0xc9   : > { %v2821_v62 = vmax.f32 %v2625_v33, %v9397_v23  ;;  %v2984_v50 = vmax.f32 %v2788_v9, %v9515_v45  ;;  %v9547_v47 = vunpack.c.h.bf16 %v9414_v6  ;;  %v3018_v61 = vmax.f32 %v2822_v20, %v9313_v49 }
  0xca   : > { %v1777_v27 = vmax.f32 %v1536_v8, %v1712_v12  ;;  %v1778_v60 = vmax.f32 %v1537_v57, %v1714_v40  ;;  %v2824_v57 = vmax.f32 %v2628_v53, %v9421_v43  ;;  %v3019_v16 = vmax.f32 %v2823_v38, %v9326_v63  ;;  %v12992_v53 = vld [vmem:[#allocation71_spill] sm:$0xff]  ;;  %v9584_v20 = vld [vmem:[#allocation2 + $0x70] sm:$0xff]  }
  0xcb   : > { %12984 = vst [vmem:[#allocation79_spill] sm:$0xff] %v9547_v47  ;;  %v9565_v34 = vmax.f32 %v2983_v4, %v9267_v17  ;;  %v9568_v8 = vmax.f32 %v3018_v61, %v9431_v22  ;;  %v9571_v42 = vmax.f32 %v2984_v50, %v9269_v18  ;;  %v638_v40 = vmax.f32 %v9462_v30, %v9451_v29  ;;  %v12991_v4 = vld [vmem:[#allocation70_spill] sm:$0xff] }
  0xcc   : > { %v1986_v10 = vmax.f32 %v1777_v27, %v1921_v56  ;;  %v1987_v11 = vmax.f32 %v1778_v60, %v1923_v52  ;;  %v3017_v56 = vmax.f32 %v2821_v62, %v9311_v48  ;;  %v9556_v60 = vmax.f32 %v2982_v37, %v9257_v14  ;;  %v8574_v52 = vld [vmem:[%s8990_s19 + $0x20] sm:$0xff] }
  0xcd   : > { %v3020_v6 = vmax.f32 %v2824_v57, %v9328_v1  ;;  %12988 = vst [vmem:[#allocation83_spill] sm:$0xff] %v9565_v34  ;;  %v637_v37 = vmax.f32 %v9460_v41, %v9448_v32  ;;  %v639_v33 = vmax.f32 %v9464_v5, %v9453_v55  ;;  %v2522_v62 = vsel %vm2317_vm1, %v8582_v24, 0  ;;  %v12994_v57 = vld [vmem:[#allocation73_spill] sm:$0xff] }
  0xce   : > { %v2195_v19 = vmax.f32 %v1986_v10, %v2130_v35  ;;  %v2196_v27 = vmax.f32 %v1987_v11, %v2132_v31  ;;  %12986 = vst [vmem:[#allocation81_spill] sm:$0xff] %v9556_v60  ;;  %v9562_v26 = vmax.f32 %v3017_v56, %v9423_v2  ;;  %v640_v35 = vmax.f32 %v12991_v4, %v9458_v51  ;;  %v12993_v11 = vld [vmem:[#allocation72_spill] sm:$0xff] }
  0xcf   : > { %12989 = vst [vmem:[#allocation84_spill] sm:$0xff] %v9568_v8  ;;  %v833_v10 = vmax.f32 %v637_v37, %v12992_v53  ;;  %v2498_v31 = vsel %vm2317_vm1, %v8574_v52, 0  ;;  %v834_v38 = vmax.f32 %v638_v40, %v12993_v11  ;;  %v835_v50 = vmax.f32 %v639_v33, %v12994_v57  ;;  %2550 = vmatpush.bf16.xpose.msra.mxu3 %v2522_v62 }
  0xd0   : > { %v2227_v9 = vpack.c.bf16 %v2195_v19, %v2195_v19  ;;  %12987 = vst [vmem:[#allocation82_spill] sm:$0xff] %v9562_v26  ;;  %v2228_v36 = vpack.c.bf16 %v2196_v27, %v2196_v27  ;;  %v12995_v19 = vld [vmem:[#allocation74_spill] sm:$0xff]  ;;  %2536 = vmatpush.bf16.xpose.msra.mxu2 %v2498_v31  ;;  %v9600_v33 = vunpack.c.l.bf16 %v9584_v20  ;;  %v13002_v31 = vld [vmem:[#allocation8_spill] sm:$0xff] }
  0xd1   : > { %12990 = vst [vmem:[#allocation85_spill] sm:$0xff] %v9571_v42  ;;  %v836_v56 = vmax.f32 %v640_v35, %v12995_v19  ;;  %v12996_v27 = vld [vmem:[#allocation58_spill] sm:$0xff]  ;;  %v1029_v52 = vmax.f32 %v833_v10, %v9438_v39  ;;  %v1030_v24 = vmax.f32 %v834_v38, %v9440_v46  ;;  %v1031_v37 = vmax.f32 %v835_v50, %v9444_v54  ;;  %v13006_v42 = vld [vmem:[#allocation12_spill] sm:$0xff] }
  0xd2   : > { %v2299_v12 = vunpack.c.l.b16 %v2227_v9  ;;  %v2300_v15 = vunpack.c.l.b16 %v2228_v36  ;;  %v9590_v9 = vmax.f32 %v3019_v16, %v12996_v27  ;;  %v9593_v36 = vmax.f32 %v3020_v6, %v9547_v47  ;;  %12999 = vst [vmem:[#allocation88_spill] sm:$0xff] %v9600_v33  ;;  %v13001_v16 = vld [vmem:[#allocation24_spill] sm:$0xff]  ;;  %v13003_v6 = vld [vmem:[#allocation25_spill] sm:$0xff] }
  0xd3   : > { %v1032_v40 = vmax.f32 %v836_v56, %v9446_v7  ;;  %v601_v62 = vmax.f32 %v13002_v31, %v13001_v16  ;;  %v13004_v47 = vld [vmem:[#allocation9_spill] sm:$0xff]  ;;  %v1226_v10 = vmax.f32 %v1030_v24, %v9356_v25  ;;  %v1227_v38 = vmax.f32 %v1031_v37, %v9375_v0  ;;  %v13005_v56 = vld [vmem:[#allocation26_spill] sm:$0xff] }
  0xd4   : > { %v2316_v61 = vpack.c.b16 %v2300_v15, %v2299_v12  ;;  %12997 = vst [vmem:[#allocation86_spill] sm:$0xff] %v9590_v9  ;;  %v13000_v12 = vld [vmem:[#allocation44_spill] sm:$0xff]  ;;  %v602_v2 = vmax.f32 %v13004_v47, %v13003_v6  ;;  %v603_v34 = vmax.f32 %v13006_v42, %v13005_v56  ;;  %v13008_v27 = vld [vmem:[#allocation13_spill] sm:$0xff] }
  0xd5   : > { %12998 = vst [vmem:[#allocation87_spill] sm:$0xff] %v9593_v36  ;;  %v1225_v15 = vmax.f32 %v1029_v52, %v13000_v12  ;;  %v1228_v50 = vmax.f32 %v1032_v40, %v9377_v58  ;;  %v604_v22 = vmax.f32 %v13008_v27, %v13007_v21  ;;  %v1465_v36 = vrot.slane %v1226_v10, 7  ;;  %v304_v12 = vld [vmem:[%s8990_s19 + $0x4] sm:$0xf] }
  0xd6   : > { %v2367_v35 = vsel %vm2317_vm1, %v2316_v61, 0  ;;  %v1467_v9 = vrot.slane %v1227_v38, 7  ;;  %v1705_v8 = vrot.slane %v1226_v10, 1  ;;  %v1915_v24 = vrot.slane %v1226_v10, 6  ;;  %336 = vst.msk [vmem:[#allocation2 + $0x68] sm:$0xf] %vm220_vm0, %v304_v12 }
  0xd7   : > { %2383 = vmatpush.bf16.xpose.msra.mxu1 %v2367_v35  ;;  %v1464_v60 = vrot.slane %v1225_v15, 7  ;;  %v1914_v61 = vrot.slane %v1225_v15, 6  ;;  %v2621_v52 = vmax.f32 %v1225_v15, %v9311_v48  ;;  %v1706_v35 = vrot.slane %v1227_v38, 1  ;;  %v13018_v12 = vld [vmem:[#allocation33_spill] sm:$0xff] }
  0xd8   : > { %v1708_v26 = vrot.slane %v1228_v50, 1  ;;  %v1917_v47 = vrot.slane %v1227_v38, 6  ;;  %v2123_v37 = vrot.slane %v1226_v10, 2  ;;  %v1468_v31 = vsel %vm1393_vm2, %v1465_v36, %v1467_v9 }
  0xd9   : > { %v1466_v40 = vsel %vm1393_vm2, %v1464_v60, %v1465_v36  ;;  %v1707_v42 = vsel %vm1634_vm3, %v1705_v8, %v1706_v35  ;;  %v2124_v56 = vrot.slane %v1227_v38, 2  ;;  %v1535_v15 = vmax.f32 %v1227_v38, %v1468_v31 }
  0xda   : > { %v1534_v6 = vmax.f32 %v1226_v10, %v1466_v40  ;;  %v1709_v27 = vsel %vm1634_vm3, %v1706_v35, %v1708_v26  ;;  %v1916_v21 = vsel %vm1843_vm4, %v1914_v61, %v1915_v24  ;;  %v1918_v16 = vsel %vm1843_vm4, %v1915_v24, %v1917_v47  ;;  %v13009_v35 = vld [vmem:[#allocation49_spill] sm:$0xff]  ;;  %v8828_v61 = vld [vmem:[#allocation2 + $0x78] sm:$0xff]   ;;  %v13010_v47 = vld [vmem:[#allocation4_spill] sm:$0xff] }
  0xdb   : > { %v2125_v58 = vsel %vm2052_vm5, %v2123_v37, %v2124_v56  ;;  %v2126_v0 = vrot.slane %v1228_v50, 2  ;;  %v2622_v60 = vmax.f32 %v1226_v10, %v9313_v49  ;;  %v1776_v9 = vmax.f32 %v1535_v15, %v1709_v27  ;;  %v303_v37 = vld [vmem:[%s8990_s19] sm:$0xf] }
  0xdc   : > { %v1775_v25 = vmax.f32 %v1534_v6, %v1707_v42  ;;  %v2623_v8 = vmax.f32 %v1227_v38, %v9326_v63  ;;  %v2624_v36 = vmax.f32 %v1228_v50, %v9328_v1  ;;  %v2817_v26 = vmax.f32 %v2621_v52, %v9379_v59  ;;  %v13011_v42 = vld [vmem:[#allocation50_spill] sm:$0xff]  ;;  %v13012_v6 = vld [vmem:[#allocation51_spill] sm:$0xff]  ;;  %335 = vst.msk [vmem:[#allocation2 + $0x64] sm:$0xf] %vm220_vm0, %v303_v37 }
  0xdd   : > { %v2127_v31 = vsel %vm2052_vm5, %v2124_v56, %v2126_v0  ;;  %v9629_v40 = vmax.f32 %v2622_v60, %v13009_v35  ;;  %v797_v24 = vmax.f32 %v601_v62, %v13010_v47  ;;  %v1985_v10 = vmax.f32 %v1776_v9, %v1918_v16  ;;  %v13013_v56 = vld [vmem:[#allocation5_spill] sm:$0xff]  ;;  %v13014_v62 = vld [vmem:[#allocation6_spill] sm:$0xff] }
  0xde   : > { %v1984_v19 = vmax.f32 %v1775_v25, %v1916_v21  ;;  %v9635_v27 = vmax.f32 %v2623_v8, %v13011_v42  ;;  %v9638_v38 = vmax.f32 %v2624_v36, %v13012_v6  ;;  %v3013_v0 = vmax.f32 %v2817_v26, %v9255_v13  ;;  %v13016_v26 = vld [vmem:[#allocation32_spill] sm:$0xff]  ;;  %v13021_v42 = vld [vmem:[#allocation10_spill] sm:$0xff] }
  0xdf   : > { %v9643_v50 = vunpack.c.h.bf16 %v9584_v20  ;;  %v798_v52 = vmax.f32 %v602_v2, %v13013_v56  ;;  %v799_v15 = vmax.f32 %v603_v34, %v13014_v62  ;;  %v2194_v21 = vmax.f32 %v1985_v10, %v2127_v31  ;;  %v13015_v20 = vld [vmem:[#allocation7_spill] sm:$0xff] }
  0xe0   : > { %v2193_v25 = vmax.f32 %v1984_v19, %v2125_v58  ;;  %v9648_v16 = vunpack.c.l.bf16 %v8828_v61  ;;  %v9650_v60 = vunpack.c.h.bf16 %v8828_v61  ;;  %v3014_v9 = vmax.f32 %v9629_v40, %v9257_v14  ;;  %v13019_v61 = vld [vmem:[#allocation34_spill] sm:$0xff]  ;;  %v13020_v40 = vld [vmem:[#allocation35_spill] sm:$0xff] }
  0xe1   : > { %v3015_v8 = vmax.f32 %v9635_v27, %v9267_v17  ;;  %v800_v36 = vmax.f32 %v604_v22, %v13015_v20  ;;  %v993_v2 = vmax.f32 %v797_v24, %v13016_v26  ;;  %v2226_v34 = vpack.c.bf16 %v2194_v21, %v2194_v21 }
  0xe2   : > { %v2225_v37 = vpack.c.bf16 %v2193_v25, %v2193_v25  ;;  %v3016_v58 = vmax.f32 %v9638_v38, %v9269_v18  ;;  %v9661_v19 = vmax.f32 %v3013_v0, %v9397_v23  ;;  %v994_v31 = vmax.f32 %v798_v52, %v13018_v12  ;;  %v13022_v38 = vld [vmem:[#allocation11_spill] sm:$0xff]  ;;  %v13023_v0 = vld [vmem:[#allocation14_spill] sm:$0xff] }
  0xe3   : > { %v995_v10 = vmax.f32 %v799_v15, %v13019_v61  ;;  %v996_v6 = vmax.f32 %v800_v36, %v13020_v40  ;;  %v1189_v27 = vmax.f32 %v993_v2, %v13021_v42  ;;  %v2298_v22 = vunpack.c.l.b16 %v2226_v34  ;;  %v13025_v36 = vld [vmem:[#allocation75_spill] sm:$0xff] }
  0xe4   : > { %13017 = vst [vmem:[#allocation89_spill] sm:$0xff] %v9661_v19  ;;  %v2297_v35 = vunpack.c.l.b16 %v2225_v37  ;;  %v633_v24 = vmax.f32 %v9448_v32, %v9438_v39  ;;  %v634_v25 = vmax.f32 %v9451_v29, %v9440_v46  ;;  %v1190_v21 = vmax.f32 %v994_v31, %v13022_v38  ;;  %v13024_v19 = vld [vmem:[#allocation15_spill] sm:$0xff] }
  0xe5   : > { %v1191_v23 = vmax.f32 %v995_v10, %v13023_v0  ;;  %v1192_v52 = vmax.f32 %v996_v6, %v13024_v19  ;;  %v1419_v20 = vrot.slane %v1189_v27, 7  ;;  %v1869_v62 = vrot.slane %v1189_v27, 6 }
  0xe6   : > { %v2315_v15 = vpack.c.b16 %v2298_v22, %v2297_v35  ;;  %v2585_v56 = vmax.f32 %v1189_v27, %v13025_v36  ;;  %v635_v2 = vmax.f32 %v9453_v55, %v9444_v54  ;;  %v1420_v37 = vrot.slane %v1190_v21, 7  ;;  %v13026_v36 = vld [vmem:[#allocation76_spill] sm:$0xff] }
  0xe7   : > { %v1422_v34 = vrot.slane %v1191_v23, 7  ;;  %v1660_v42 = vrot.slane %v1190_v21, 1  ;;  %v1661_v32 = vrot.slane %v1191_v23, 1  ;;  %v1663_v47 = vrot.slane %v1192_v52, 1 }
  0xe8   : > { %v2364_v29 = vsel %vm2317_vm1, %v2315_v15, 0  ;;  %v1870_v31 = vrot.slane %v1190_v21, 6  ;;  %v1872_v38 = vrot.slane %v1191_v23, 6  ;;  %v1421_v6 = vsel %vm1393_vm2, %v1419_v20, %v1420_v37 }
  0xe9   : > { %2384 = vmatpush.bf16.xpose.msra.mxu1 %v2364_v29  ;;  %v1423_v35 = vsel %vm1393_vm2, %v1420_v37, %v1422_v34  ;;  %v1662_v10 = vsel %vm1634_vm3, %v1660_v42, %v1661_v32  ;;  %v2078_v27 = vrot.slane %v1190_v21, 2  ;;  %v1516_v22 = vmax.f32 %v1190_v21, %v1421_v6 }
  0xea   : > { %v1517_v19 = vmax.f32 %v1191_v23, %v1423_v35  ;;  %v1664_v0 = vsel %vm1634_vm3, %v1661_v32, %v1663_v47  ;;  %v1871_v55 = vsel %vm1843_vm4, %v1869_v62, %v1870_v31  ;;  %v1873_v54 = vsel %vm1843_vm4, %v1870_v31, %v1872_v38  ;;  %v13027_v32 = vld [vmem:[#allocation16_spill] sm:$0xff]  ;;  %v13028_v62 = vld [vmem:[#allocation17_spill] sm:$0xff]  ;;  %v13029_v35 = vld [vmem:[#allocation18_spill] sm:$0xff] }
  0xeb   : > { %v2079_v15 = vrot.slane %v1191_v23, 2  ;;  %v2081_v46 = vrot.slane %v1192_v52, 2  ;;  %v2586_v39 = vmax.f32 %v1190_v21, %v13026_v36  ;;  %v1757_v29 = vmax.f32 %v1516_v22, %v1662_v10  ;;  %v13030_v10 = vld [vmem:[#allocation19_spill] sm:$0xff] }
  0xec   : > { %v1758_v59 = vmax.f32 %v1517_v19, %v1664_v0  ;;  %v2587_v20 = vmax.f32 %v1191_v23, %v9496_v44  ;;  %v2588_v37 = vmax.f32 %v1192_v52, %v9515_v45  ;;  %v2781_v47 = vmax.f32 %v2585_v56, %v13027_v32 }
  0xed   : > { %v2080_v42 = vsel %vm2052_vm5, %v2078_v27, %v2079_v15  ;;  %v2082_v34 = vsel %vm2052_vm5, %v2079_v15, %v2081_v46  ;;  %v2782_v38 = vmax.f32 %v2586_v39, %v13028_v62  ;;  %v1966_v31 = vmax.f32 %v1757_v29, %v1871_v55  ;;  %v8573_v55 = vld [vmem:[%s8990_s19 + $0x18] sm:$0xff] }
  0xee   : > { %v1967_v6 = vmax.f32 %v1758_v59, %v1873_v54  ;;  %v2783_v21 = vmax.f32 %v2587_v20, %v13029_v35  ;;  %v2784_v19 = vmax.f32 %v2588_v37, %v13030_v10  ;;  %v9694_v23 = vmax.f32 %v3014_v9, %v9399_v3  ;;  %v8581_v27 = vld [vmem:[%s8990_s19 + $0x58] sm:$0xff]  ;;  %v13034_v37 = vld [vmem:[#allocation20_spill] sm:$0xff] }
  0xef   : > { %v2977_v0 = vmax.f32 %v2781_v47, %v9600_v33  ;;  %v636_v52 = vmax.f32 %v9458_v51, %v9446_v7  ;;  %v829_v46 = vmax.f32 %v633_v24, %v9460_v41  ;;  %v9701_v56 = vmax.f32 %v3015_v8, %v9407_v28  ;;  %v13062_v10 = vld [vmem:[#allocation75_spill] sm:$0xff] }
  0xf0   : > { %13031 = vst [vmem:[#allocation90_spill] sm:$0xff] %v9694_v23  ;;  %v9704_v39 = vmax.f32 %v3016_v58, %v9421_v43  ;;  %v2175_v59 = vmax.f32 %v1966_v31, %v2080_v42  ;;  %v2176_v54 = vmax.f32 %v1967_v6, %v2082_v34  ;;  %v2978_v9 = vmax.f32 %v2782_v38, %v9643_v50 }
  0xf1   : > { %13032 = vst [vmem:[#allocation91_spill] sm:$0xff] %v9701_v56  ;;  %v2979_v22 = vmax.f32 %v2783_v21, %v9648_v16  ;;  %v830_v15 = vmax.f32 %v634_v25, %v9462_v30  ;;  %v831_v29 = vmax.f32 %v635_v2, %v9464_v5  ;;  %v2980_v8 = vmax.f32 %v2784_v19, %v9650_v60  ;;  %v8825_v56 = vld [vmem:[#allocation2 + $0x60] sm:$0xff]  }
  0xf2   : > { %13033 = vst [vmem:[#allocation92_spill] sm:$0xff] %v9704_v39  ;;  %v2207_v20 = vpack.c.bf16 %v2175_v59, %v2175_v59  ;;  %v2208_v24 = vpack.c.bf16 %v2176_v54, %v2176_v54  ;;  %v9714_v47 = vmax.f32 %v2977_v0, %v13034_v37  ;;  %v832_v58 = vmax.f32 %v636_v52, %v12991_v4  ;;  %v13036_v59 = vld [vmem:[#allocation21_spill] sm:$0xff] }
  0xf3   : > { %v1025_v42 = vmax.f32 %v829_v46, %v9311_v48  ;;  %v1026_v34 = vmax.f32 %v830_v15, %v9313_v49  ;;  %v1027_v38 = vmax.f32 %v831_v29, %v9326_v63  ;;  %v2495_v25 = vsel %vm2317_vm1, %v8573_v55, 0  ;;  %v13038_v15 = vld [vmem:[#allocation22_spill] sm:$0xff] }
  0xf4   : > { %13035 = vst [vmem:[#allocation93_spill] sm:$0xff] %v9714_v47  ;;  %v2279_v31 = vunpack.c.l.b16 %v2207_v20  ;;  %v2280_v6 = vunpack.c.l.b16 %v2208_v24  ;;  %v2519_v2 = vsel %vm2317_vm1, %v8581_v27, 0  ;;  %v1028_v21 = vmax.f32 %v832_v58, %v9328_v1  ;;  %2537 = vmatpush.bf16.xpose.msra.mxu2 %v2495_v25  ;;  %v13040_v20 = vld [vmem:[#allocation23_spill] sm:$0xff]  ;;  %v13042_v27 = vld [vmem:[#allocation74_spill] sm:$0xff] }
  0xf5   : > { %v1221_v19 = vmax.f32 %v1025_v42, %v12992_v53  ;;  %v1222_v0 = vmax.f32 %v1026_v34, %v12993_v11  ;;  %v1223_v52 = vmax.f32 %v1027_v38, %v12994_v57  ;;  %v9727_v54 = vmax.f32 %v2978_v9, %v13036_v59  ;;  %2551 = vmatpush.bf16.xpose.msra.mxu3 %v2519_v2 }
  0xf6   : > { %v2306_v46 = vpack.c.b16 %v2280_v6, %v2279_v31  ;;  %v9730_v29 = vmax.f32 %v2979_v22, %v13038_v15  ;;  %v9733_v55 = vmax.f32 %v2980_v8, %v13040_v20  ;;  %v1224_v24 = vmax.f32 %v1028_v21, %v13042_v27 }
  0xf7   : > { %13037 = vst [vmem:[#allocation94_spill] sm:$0xff] %v9727_v54  ;;  %v1459_v58 = vrot.slane %v1221_v19, 7  ;;  %v1460_v42 = vrot.slane %v1222_v0, 7  ;;  %v1462_v43 = vrot.slane %v1223_v52, 7  ;;  %v1700_v38 = vrot.slane %v1222_v0, 1 }
  0xf8   : > { %13039 = vst [vmem:[#allocation95_spill] sm:$0xff] %v9730_v29  ;;  %v2337_v34 = vsel %vm2317_vm1, %v2306_v46, 0  ;;  %v1701_v25 = vrot.slane %v1223_v52, 1  ;;  %v1909_v31 = vrot.slane %v1221_v19, 6  ;;  %v1703_v6 = vrot.slane %v1224_v24, 1 }
  0xf9   : > { %13041 = vst [vmem:[#allocation96_spill] sm:$0xff] %v9733_v55  ;;  %2371 = vmatpush.bf16.xpose.msra.mxu0 %v2337_v34  ;;  %v1461_v9 = vsel %vm1393_vm2, %v1459_v58, %v1460_v42  ;;  %v1463_v22 = vsel %vm1393_vm2, %v1460_v42, %v1462_v43  ;;  %v1910_v28 = vrot.slane %v1222_v0, 6  ;;  %v1912_v21 = vrot.slane %v1223_v52, 6 }
  0xfa   : > { %v1532_v8 = vmax.f32 %v1222_v0, %v1461_v9  ;;  %v1533_v3 = vmax.f32 %v1223_v52, %v1463_v22  ;;  %v1702_v2 = vsel %vm1634_vm3, %v1700_v38, %v1701_v25  ;;  %v1704_v55 = vsel %vm1634_vm3, %v1701_v25, %v1703_v6 }
  0xfb   : > { %v1911_v29 = vsel %vm1843_vm4, %v1909_v31, %v1910_v28  ;;  %v2118_v46 = vrot.slane %v1222_v0, 2  ;;  %v2119_v54 = vrot.slane %v1223_v52, 2  ;;  %v1913_v34 = vsel %vm1843_vm4, %v1910_v28, %v1912_v21  ;;  %v13044_v28 = vld [vmem:[#allocation45_spill] sm:$0xff]  ;;  %v13045_v21 = vld [vmem:[#allocation46_spill] sm:$0xff] }
  0xfc   : > { %v1773_v47 = vmax.f32 %v1532_v8, %v1702_v2  ;;  %v1774_v39 = vmax.f32 %v1533_v3, %v1704_v55  ;;  %v2121_v58 = vrot.slane %v1224_v24, 2  ;;  %v2617_v42 = vmax.f32 %v1221_v19, %v9255_v13  ;;  %v8826_v8 = vld [vmem:[#allocation2 + $0x68] sm:$0xff]   ;;  %v13043_v3 = vld [vmem:[#allocation44_spill] sm:$0xff] }
  0xfd   : > { %v2120_v43 = vsel %vm2052_vm5, %v2118_v46, %v2119_v54  ;;  %v2618_v9 = vmax.f32 %v1222_v0, %v9257_v14  ;;  %v2619_v38 = vmax.f32 %v1223_v52, %v9267_v17  ;;  %v2620_v6 = vmax.f32 %v1224_v24, %v9269_v18  ;;  %v13047_v52 = vld [vmem:[#allocation47_spill] sm:$0xff] }
  0xfe   : > { %v1982_v22 = vmax.f32 %v1773_v47, %v1911_v29  ;;  %v1983_v25 = vmax.f32 %v1774_v39, %v1913_v34  ;;  %v2122_v31 = vsel %vm2052_vm5, %v2119_v54, %v2121_v58  ;;  %v2813_v55 = vmax.f32 %v2617_v42, %v13043_v3  ;;  %v13048_v39 = vld [vmem:[#allocation24_spill] sm:$0xff]  ;;  %v13051_v58 = vld [vmem:[#allocation25_spill] sm:$0xff] }
  0xff   : > { %v9751_v2 = vmax.f32 %v2618_v9, %v13044_v28  ;;  %v9754_v46 = vmax.f32 %v2619_v38, %v13045_v21  ;;  %v9756_v19 = vunpack.c.l.bf16 %v8825_v56  ;;  %v9759_v47 = vmax.f32 %v2620_v6, %v13047_v52  ;;  %v13054_v6 = vld [vmem:[#allocation27_spill] sm:$0xff] }
 0x100   : > { %v2191_v0 = vmax.f32 %v1982_v22, %v2120_v43  ;;  %v2192_v23 = vmax.f32 %v1983_v25, %v2122_v31  ;;  %v597_v54 = vmax.f32 %v13048_v39, %v13016_v26  ;;  %v3009_v29 = vmax.f32 %v2813_v55, %v13034_v37  ;;  %v13053_v43 = vld [vmem:[#allocation26_spill] sm:$0xff]  ;;  %v13060_v26 = vld [vmem:[#allocation13_spill] sm:$0xff]  ;;  %v13061_v31 = vld [vmem:[#allocation59_spill] sm:$0xff] }
 0x101   : > { %13046 = vst [vmem:[#allocation97_spill] sm:$0xff] %v9756_v19  ;;  %v9764_v24 = vunpack.c.h.bf16 %v8825_v56  ;;  %v9766_v34 = vunpack.c.l.bf16 %v8826_v8  ;;  %v598_v42 = vmax.f32 %v13051_v58, %v13018_v12  ;;  %v9770_v21 = vunpack.c.h.bf16 %v8826_v8  ;;  %v13057_v58 = vld [vmem:[#allocation8_spill] sm:$0xff] }
 0x102   : > { %v2223_v9 = vpack.c.bf16 %v2191_v0, %v2191_v0  ;;  %v2224_v38 = vpack.c.bf16 %v2192_v23, %v2192_v23  ;;  %v599_v22 = vmax.f32 %v13053_v43, %v13019_v61  ;;  %v600_v55 = vmax.f32 %v13054_v6, %v13020_v40  ;;  %v13055_v23 = vld [vmem:[#allocation48_spill] sm:$0xff]  ;;  %v13058_v43 = vld [vmem:[#allocation9_spill] sm:$0xff] }
 0x103   : > { %13049 = vst [vmem:[#allocation98_spill] sm:$0xff] %v9764_v24  ;;  %v9783_v8 = vmax.f32 %v3009_v29, %v13055_v23  ;;  %v793_v39 = vmax.f32 %v597_v54, %v13057_v58  ;;  %v794_v61 = vmax.f32 %v598_v42, %v13058_v43  ;;  %v13059_v12 = vld [vmem:[#allocation12_spill] sm:$0xff]  ;;  %v629_v3 = vmax.f32 %v13061_v31, %v9311_v48  ;;  %v13064_v29 = vld [vmem:[#allocation61_spill] sm:$0xff]  ;;  %v13070_v31 = vld [vmem:[#allocation7_spill] sm:$0xff] }
 0x104   : > { %13050 = vst [vmem:[#allocation99_spill] sm:$0xff] %v9766_v34  ;;  %v2295_v52 = vunpack.c.l.b16 %v2223_v9  ;;  %v2296_v0 = vunpack.c.l.b16 %v2224_v38  ;;  %v795_v25 = vmax.f32 %v599_v22, %v13059_v12  ;;  %v796_v28 = vmax.f32 %v600_v55, %v13060_v26  ;;  %v13063_v9 = vld [vmem:[#allocation60_spill] sm:$0xff]  ;;  %v13068_v58 = vld [vmem:[#allocation5_spill] sm:$0xff] }
 0x105   : > { %13052 = vst [vmem:[#allocation100_spill] sm:$0xff] %v9770_v21  ;;  %v989_v35 = vmax.f32 %v793_v39, %v13062_v10  ;;  %v630_v38 = vmax.f32 %v13063_v9, %v9313_v49  ;;  %v631_v23 = vmax.f32 %v13064_v29, %v9326_v63  ;;  %v990_v54 = vmax.f32 %v794_v61, %v13026_v36  ;;  %v13066_v39 = vld [vmem:[#allocation63_spill] sm:$0xff]  ;;  %v13067_v12 = vld [vmem:[#allocation64_spill] sm:$0xff]  ;;  %v13069_v9 = vld [vmem:[#allocation6_spill] sm:$0xff] }
 0x106   : > { %13056 = vst [vmem:[#allocation101_spill] sm:$0xff] %v9783_v8  ;;  %v2314_v56 = vpack.c.b16 %v2296_v0, %v2295_v52  ;;  %v991_v42 = vmax.f32 %v795_v25, %v9496_v44  ;;  %v992_v22 = vmax.f32 %v796_v28, %v9515_v45  ;;  %v632_v55 = vmax.f32 %v9446_v7, %v9328_v1  ;;  %v13065_v52 = vld [vmem:[#allocation4_spill] sm:$0xff]  ;;  %v13071_v6 = vld [vmem:[#allocation65_spill] sm:$0xff] }
 0x107   : > { %v1185_v0 = vmax.f32 %v989_v35, %v13065_v52  ;;  %v825_v26 = vmax.f32 %v629_v3, %v13066_v39  ;;  %v826_v43 = vmax.f32 %v630_v38, %v13067_v12  ;;  %v1186_v29 = vmax.f32 %v990_v54, %v13068_v58 }
 0x108   : > { %v2361_v8 = vsel %vm2317_vm1, %v2314_v56, 0  ;;  %v1187_v61 = vmax.f32 %v991_v42, %v13069_v9  ;;  %v1188_v25 = vmax.f32 %v992_v22, %v13070_v31  ;;  %v827_v28 = vmax.f32 %v631_v23, %v13071_v6 }
 0x109   : > { %2385 = vmatpush.bf16.xpose.msra.mxu1 %v2361_v8  ;;  %v1414_v63 = vrot.slane %v1185_v0, 7  ;;  %v1864_v49 = vrot.slane %v1185_v0, 6  ;;  %v2581_v7 = vmax.f32 %v1185_v0, %v9600_v33  ;;  %v828_v56 = vmax.f32 %v632_v55, %v9458_v51 }
 0x10a   : > { %v1415_v35 = vrot.slane %v1186_v29, 7  ;;  %v1417_v52 = vrot.slane %v1187_v61, 7  ;;  %v1655_v3 = vrot.slane %v1186_v29, 1  ;;  %v1656_v39 = vrot.slane %v1187_v61, 1 }
 0x10b   : > { %v1658_v38 = vrot.slane %v1188_v25, 1  ;;  %v1865_v8 = vrot.slane %v1186_v29, 6  ;;  %v1867_v12 = vrot.slane %v1187_v61, 6  ;;  %v2073_v54 = vrot.slane %v1186_v29, 2 }
 0x10c   : > { %v1416_v42 = vsel %vm1393_vm2, %v1414_v63, %v1415_v35  ;;  %v1418_v22 = vsel %vm1393_vm2, %v1415_v35, %v1417_v52  ;;  %v1657_v23 = vsel %vm1634_vm3, %v1655_v3, %v1656_v39  ;;  %v2074_v6 = vrot.slane %v1187_v61, 2 }
 0x10d   : > { %v1514_v31 = vmax.f32 %v1186_v29, %v1416_v42  ;;  %v1515_v9 = vmax.f32 %v1187_v61, %v1418_v22  ;;  %v1659_v0 = vsel %vm1634_vm3, %v1656_v39, %v1658_v38  ;;  %v1866_v55 = vsel %vm1843_vm4, %v1864_v49, %v1865_v8  ;;  %v13072_v42 = vld [vmem:[#allocation10_spill] sm:$0xff]  ;;  %v13073_v39 = vld [vmem:[#allocation11_spill] sm:$0xff] }
 0x10e   : > { %v1868_v51 = vsel %vm1843_vm4, %v1865_v8, %v1867_v12  ;;  %v2075_v58 = vsel %vm2052_vm5, %v2073_v54, %v2074_v6  ;;  %v2076_v1 = vrot.slane %v1188_v25, 2  ;;  %v2582_v33 = vmax.f32 %v1186_v29, %v9643_v50  ;;  %v13074_v54 = vld [vmem:[#allocation14_spill] sm:$0xff]  ;;  %v13076_v29 = vld [vmem:[#allocation49_spill] sm:$0xff] }
 0x10f   : > { %v1755_v48 = vmax.f32 %v1514_v31, %v1657_v23  ;;  %v1756_v63 = vmax.f32 %v1515_v9, %v1659_v0  ;;  %v2583_v52 = vmax.f32 %v1187_v61, %v9648_v16  ;;  %v2584_v35 = vmax.f32 %v1188_v25, %v9650_v60  ;;  %v13075_v31 = vld [vmem:[#allocation15_spill] sm:$0xff] }
 0x110   : > { %v2077_v3 = vsel %vm2052_vm5, %v2074_v6, %v2076_v1  ;;  %v2777_v22 = vmax.f32 %v2581_v7, %v13072_v42  ;;  %v9824_v38 = vmax.f32 %v2582_v33, %v13073_v39  ;;  %v1021_v49 = vmax.f32 %v825_v26, %v9255_v13  ;;  %v13082_v25 = vld [vmem:[#allocation51_spill] sm:$0xff] }
 0x111   : > { %v1964_v12 = vmax.f32 %v1755_v48, %v1866_v55  ;;  %v1965_v8 = vmax.f32 %v1756_v63, %v1868_v51  ;;  %v9828_v40 = vmax.f32 %v2583_v52, %v13074_v54  ;;  %v9831_v9 = vmax.f32 %v2584_v35, %v13075_v31  ;;  %v13079_v48 = vld [vmem:[#allocation50_spill] sm:$0xff] }
 0x112   : > { %v13077_v61 = vmax.f32 %v9751_v2, %v13036_v59  ;;  %v2973_v7 = vmax.f32 %v2777_v22, %v9756_v19  ;;  %v1022_v33 = vmax.f32 %v826_v43, %v9257_v14  ;;  %v1023_v26 = vmax.f32 %v827_v28, %v9267_v17 }
 0x113   : > { %v13080_v51 = vmax.f32 %v9754_v46, %v13038_v15  ;;  %v13083_v23 = vmax.f32 %v9759_v47, %v13040_v20  ;;  %v2173_v2 = vmax.f32 %v1964_v12, %v2075_v58  ;;  %v2174_v55 = vmax.f32 %v1965_v8, %v2077_v3 }
 0x114   : > { %v9837_v1 = vmax.f32 %v13077_v61, %v13076_v29  ;;  %v2974_v63 = vmax.f32 %v9824_v38, %v9764_v24  ;;  %v2975_v43 = vmax.f32 %v9828_v40, %v9766_v34  ;;  %v1024_v28 = vmax.f32 %v828_v56, %v9269_v18 }
 0x115   : > { %v9846_v6 = vmax.f32 %v13080_v51, %v13079_v48  ;;  %v9852_v0 = vmax.f32 %v13083_v23, %v13082_v25  ;;  %v1217_v46 = vmax.f32 %v1021_v49, %v9460_v41  ;;  %v2205_v52 = vpack.c.bf16 %v2173_v2, %v2173_v2 }
 0x116   : > { %13078 = vst [vmem:[#allocation102_spill] sm:$0xff] %v9837_v1  ;;  %v2206_v35 = vpack.c.bf16 %v2174_v55, %v2174_v55  ;;  %v2976_v22 = vmax.f32 %v9831_v9, %v9770_v21  ;;  %v9863_v47 = vmax.f32 %v2973_v7, %v13027_v32  ;;  %v1218_v58 = vmax.f32 %v1022_v33, %v9462_v30 }
 0x117   : > { %13081 = vst [vmem:[#allocation103_spill] sm:$0xff] %v9846_v6  ;;  %v1219_v3 = vmax.f32 %v1023_v26, %v9464_v5  ;;  %v1220_v38 = vmax.f32 %v1024_v28, %v12991_v4  ;;  %v1454_v12 = vrot.slane %v1217_v46, 7  ;;  %v2277_v40 = vunpack.c.l.b16 %v2205_v52  ;;  %v8572_v6 = vld [vmem:[%s8990_s19 + $0x10] sm:$0xff] }
 0x118   : > { %13084 = vst [vmem:[#allocation104_spill] sm:$0xff] %v9852_v0  ;;  %v2278_v8 = vunpack.c.l.b16 %v2206_v35  ;;  %v1904_v56 = vrot.slane %v1217_v46, 6  ;;  %v2613_v49 = vmax.f32 %v1217_v46, %v13034_v37  ;;  %v1455_v61 = vrot.slane %v1218_v58, 7 }
 0x119   : > { %13085 = vst [vmem:[#allocation105_spill] sm:$0xff] %v9863_v47  ;;  %v1457_v51 = vrot.slane %v1219_v3, 7  ;;  %v1695_v23 = vrot.slane %v1218_v58, 1  ;;  %v1696_v2 = vrot.slane %v1219_v3, 1  ;;  %v1698_v55 = vrot.slane %v1220_v38, 1 }
 0x11a   : > { %v2305_v9 = vpack.c.b16 %v2278_v8, %v2277_v40  ;;  %v1905_v7 = vrot.slane %v1218_v58, 6  ;;  %v1907_v33 = vrot.slane %v1219_v3, 6  ;;  %v1456_v26 = vsel %vm1393_vm2, %v1454_v12, %v1455_v61  ;;  %v8580_v12 = vld [vmem:[%s8990_s19 + $0x50] sm:$0xff] }
 0x11b   : > { %v1458_v28 = vsel %vm1393_vm2, %v1455_v61, %v1457_v51  ;;  %v1697_v52 = vsel %vm1634_vm3, %v1695_v23, %v1696_v2  ;;  %v2113_v35 = vrot.slane %v1218_v58, 2  ;;  %v1530_v46 = vmax.f32 %v1218_v58, %v1456_v26 }
 0x11c   : > { %v2334_v25 = vsel %vm2317_vm1, %v2305_v9, 0  ;;  %v1531_v48 = vmax.f32 %v1219_v3, %v1458_v28  ;;  %v1699_v29 = vsel %vm1634_vm3, %v1696_v2, %v1698_v55  ;;  %v1906_v40 = vsel %vm1843_vm4, %v1904_v56, %v1905_v7 }
 0x11d   : > { %2372 = vmatpush.bf16.xpose.msra.mxu0 %v2334_v25  ;;  %v1908_v8 = vsel %vm1843_vm4, %v1905_v7, %v1907_v33  ;;  %v2114_v47 = vrot.slane %v1219_v3, 2  ;;  %v2116_v0 = vrot.slane %v1220_v38, 2  ;;  %v1771_v1 = vmax.f32 %v1530_v46, %v1697_v52  ;;  %v13089_v46 = vld [vmem:[#allocation19_spill] sm:$0xff] }
 0x11e   : > { %v1772_v61 = vmax.f32 %v1531_v48, %v1699_v29  ;;  %v2614_v51 = vmax.f32 %v1218_v58, %v13036_v59  ;;  %v2615_v23 = vmax.f32 %v1219_v3, %v13038_v15  ;;  %v2616_v25 = vmax.f32 %v1220_v38, %v13040_v20 }
 0x11f   : > { %v2115_v9 = vsel %vm2052_vm5, %v2113_v35, %v2114_v47  ;;  %v2117_v26 = vsel %vm2052_vm5, %v2114_v47, %v2116_v0  ;;  %v2809_v56 = vmax.f32 %v2613_v49, %v12992_v53  ;;  %v1980_v2 = vmax.f32 %v1771_v1, %v1906_v40  ;;  %v8823_v0 = vld [vmem:[#allocation2 + $0x50] sm:$0xff]  }
 0x120   : > { %v1981_v55 = vmax.f32 %v1772_v61, %v1908_v8  ;;  %v2810_v7 = vmax.f32 %v2614_v51, %v12993_v11  ;;  %v2811_v33 = vmax.f32 %v2615_v23, %v12994_v57  ;;  %v9887_v29 = vmax.f32 %v2616_v25, %v13042_v27  ;;  %v13086_v1 = vld [vmem:[#allocation18_spill] sm:$0xff]  ;;  %v13091_v61 = vld [vmem:[#allocation44_spill] sm:$0xff] }
 0x121   : > { %v3005_v48 = vmax.f32 %v2809_v56, %v13027_v32  ;;  %v2492_v58 = vsel %vm2317_vm1, %v8572_v6, 0  ;;  %v2516_v3 = vsel %vm2317_vm1, %v8580_v12, 0  ;;  %v2189_v47 = vmax.f32 %v1980_v2, %v2115_v9  ;;  %v13094_v9 = vld [vmem:[#allocation45_spill] sm:$0xff] }
 0x122   : > { %v2190_v38 = vmax.f32 %v1981_v55, %v2117_v26  ;;  %v3006_v49 = vmax.f32 %v2810_v7, %v13028_v62  ;;  %v3007_v28 = vmax.f32 %v2811_v33, %v13086_v1  ;;  %2538 = vmatpush.bf16.xpose.msra.mxu2 %v2492_v58  ;;  %v9895_v52 = vmax.f32 %v2974_v63, %v13028_v62  ;;  %v13096_v26 = vld [vmem:[#allocation46_spill] sm:$0xff]  ;;  %v13099_v7 = vld [vmem:[#allocation33_spill] sm:$0xff] }
 0x123   : > { %v9898_v35 = vmax.f32 %v2975_v43, %v13086_v1  ;;  %v9901_v40 = vmax.f32 %v2976_v22, %v13089_v46  ;;  %2552 = vmatpush.bf16.xpose.msra.mxu3 %v2516_v3  ;;  %v2221_v8 = vpack.c.bf16 %v2189_v47, %v2189_v47  ;;  %v9906_v51 = vmax.f32 %v3005_v48, %v13091_v61  ;;  %v13098_v22 = vld [vmem:[#allocation32_spill] sm:$0xff]  ;;  %v13100_v48 = vld [vmem:[#allocation34_spill] sm:$0xff]  ;;  %v13101_v3 = vld [vmem:[#allocation35_spill] sm:$0xff] }
 0x124   : > { %13087 = vst [vmem:[#allocation106_spill] sm:$0xff] %v9895_v52  ;;  %v2222_v12 = vpack.c.bf16 %v2190_v38, %v2190_v38  ;;  %v9908_v23 = vunpack.c.l.bf16 %v8823_v0  ;;  %v9911_v63 = vmax.f32 %v3006_v49, %v13094_v9  ;;  %v9914_v43 = vmax.f32 %v3007_v28, %v13096_v26  ;;  %v13102_v38 = vld [vmem:[#allocation24_spill] sm:$0xff]  ;;  %v13104_v6 = vld [vmem:[#allocation37_spill] sm:$0xff]  ;;  %v13106_v61 = vld [vmem:[#allocation26_spill] sm:$0xff] }
 0x125   : > { %13088 = vst [vmem:[#allocation107_spill] sm:$0xff] %v9898_v35  ;;  %v9916_v25 = vunpack.c.h.bf16 %v8823_v0  ;;  %v593_v56 = vmax.f32 %v13098_v22, %v13062_v10  ;;  %v2293_v2 = vunpack.c.l.b16 %v2221_v8  ;;  %v594_v33 = vmax.f32 %v13099_v7, %v13026_v36  ;;  %v13103_v28 = vld [vmem:[#allocation36_spill] sm:$0xff]  ;;  %v13105_v8 = vld [vmem:[#allocation25_spill] sm:$0xff] }
 0x126   : > { %13090 = vst [vmem:[#allocation108_spill] sm:$0xff] %v9901_v40  ;;  %v2294_v55 = vunpack.c.l.b16 %v2222_v12  ;;  %v595_v58 = vmax.f32 %v13100_v48, %v9496_v44  ;;  %v596_v47 = vmax.f32 %v13101_v3, %v9515_v45  ;;  %v625_v0 = vmax.f32 %v13103_v28, %v9255_v13  ;;  %v13108_v40 = vld [vmem:[#allocation27_spill] sm:$0xff]  ;;  %v13109_v52 = vld [vmem:[#allocation88_spill] sm:$0xff] }
 0x127   : > { %13092 = vst [vmem:[#allocation109_spill] sm:$0xff] %v9906_v51  ;;  %v789_v49 = vmax.f32 %v593_v56, %v13102_v38  ;;  %v626_v26 = vmax.f32 %v13104_v6, %v9257_v14  ;;  %v790_v12 = vmax.f32 %v594_v33, %v13105_v8  ;;  %v13110_v56 = vld [vmem:[#allocation39_spill] sm:$0xff]  ;;  %v13112_v33 = vld [vmem:[#allocation60_spill] sm:$0xff] }
 0x128   : > { %13093 = vst [vmem:[#allocation110_spill] sm:$0xff] %v9908_v23  ;;  %v2313_v9 = vpack.c.b16 %v2294_v55, %v2293_v2  ;;  %v792_v35 = vmax.f32 %v596_v47, %v13108_v40  ;;  %v628_v57 = vmax.f32 %v13110_v56, %v9269_v18  ;;  %v13111_v38 = vld [vmem:[#allocation59_spill] sm:$0xff]  ;;  %v13113_v8 = vld [vmem:[#allocation8_spill] sm:$0xff]  ;;  %v13114_v40 = vld [vmem:[#allocation61_spill] sm:$0xff] }
 0x129   : > { %13095 = vst [vmem:[#allocation111_spill] sm:$0xff] %v9911_v63  ;;  %v13107_v63 = vld [vmem:[#allocation38_spill] sm:$0xff]  ;;  %v985_v27 = vmax.f32 %v789_v49, %v13109_v52  ;;  %v821_v28 = vmax.f32 %v625_v0, %v13111_v38  ;;  %v986_v2 = vmax.f32 %v790_v12, %v9643_v50  ;;  %v13116_v56 = vld [vmem:[#allocation9_spill] sm:$0xff]  ;;  %v13117_v0 = vld [vmem:[#allocation12_spill] sm:$0xff] }
 0x12a   : > { %13097 = vst [vmem:[#allocation112_spill] sm:$0xff] %v9914_v43  ;;  %v791_v43 = vmax.f32 %v595_v58, %v13106_v61  ;;  %v627_v51 = vmax.f32 %v13107_v63, %v9267_v17  ;;  %v2358_v3 = vsel %vm2317_vm1, %v2313_v9, 0  ;;  %v822_v58 = vmax.f32 %v626_v26, %v13112_v33  ;;  %v13115_v63 = vld [vmem:[#allocation62_spill] sm:$0xff] }
 0x12b   : > { %2386 = vmatpush.bf16.xpose.msra.mxu1 %v2358_v3  ;;  %v988_v61 = vmax.f32 %v792_v35, %v9650_v60  ;;  %v1181_v47 = vmax.f32 %v985_v27, %v13113_v8  ;;  %v824_v6 = vmax.f32 %v628_v57, %v13115_v63  ;;  %v1182_v18 = vmax.f32 %v986_v2, %v13116_v56 }
 0x12c   : > { %v987_v55 = vmax.f32 %v791_v43, %v9648_v16  ;;  %v823_v49 = vmax.f32 %v627_v51, %v13114_v40  ;;  %v1017_v9 = vmax.f32 %v821_v28, %v13034_v37  ;;  %v1018_v12 = vmax.f32 %v822_v58, %v13036_v59  ;;  %v13118_v43 = vld [vmem:[#allocation13_spill] sm:$0xff]  ;;  %v8824_v59 = vld [vmem:[#allocation2 + $0x58] sm:$0xff]  }
 0x12d   : > { %v1184_v48 = vmax.f32 %v988_v61, %v13118_v43  ;;  %v1409_v26 = vrot.slane %v1181_v47, 7  ;;  %v1859_v3 = vrot.slane %v1181_v47, 6  ;;  %v2577_v35 = vmax.f32 %v1181_v47, %v9756_v19 }
 0x12e   : > { %v1183_v38 = vmax.f32 %v987_v55, %v13117_v0  ;;  %v1410_v33 = vrot.slane %v1182_v18, 7  ;;  %v1650_v8 = vrot.slane %v1182_v18, 1  ;;  %v1860_v57 = vrot.slane %v1182_v18, 6 }
 0x12f   : > { %v1653_v40 = vrot.slane %v1184_v48, 1  ;;  %v2068_v2 = vrot.slane %v1182_v18, 2  ;;  %v2071_v17 = vrot.slane %v1184_v48, 2  ;;  %v2578_v14 = vmax.f32 %v1182_v18, %v9764_v24 }
 0x130   : > { %v1412_v27 = vrot.slane %v1183_v38, 7  ;;  %v1651_v51 = vrot.slane %v1183_v38, 1  ;;  %v1862_v63 = vrot.slane %v1183_v38, 6  ;;  %v1411_v55 = vsel %vm1393_vm2, %v1409_v26, %v1410_v33 }
 0x131   : > { %v2069_v0 = vrot.slane %v1183_v38, 2  ;;  %v1512_v61 = vmax.f32 %v1182_v18, %v1411_v55  ;;  %v1861_v47 = vsel %vm1843_vm4, %v1859_v3, %v1860_v57  ;;  %v13119_v55 = vld [vmem:[#allocation4_spill] sm:$0xff] }
 0x132   : > { %v1413_v28 = vsel %vm1393_vm2, %v1410_v33, %v1412_v27  ;;  %v1652_v58 = vsel %vm1634_vm3, %v1650_v8, %v1651_v51  ;;  %v1654_v56 = vsel %vm1634_vm3, %v1651_v51, %v1653_v40  ;;  %v1863_v19 = vsel %vm1843_vm4, %v1860_v57, %v1862_v63  ;;  %v13120_v51 = vld [vmem:[#allocation5_spill] sm:$0xff] }
 0x133   : > { %v1513_v43 = vmax.f32 %v1183_v38, %v1413_v28  ;;  %v2070_v7 = vsel %vm2052_vm5, %v2068_v2, %v2069_v0  ;;  %v1753_v26 = vmax.f32 %v1512_v61, %v1652_v58  ;;  %v2579_v33 = vmax.f32 %v1183_v38, %v9766_v34  ;;  %v13121_v28 = vld [vmem:[#allocation6_spill] sm:$0xff]  ;;  %v13122_v58 = vld [vmem:[#allocation7_spill] sm:$0xff] }
 0x134   : > { %v2580_v8 = vmax.f32 %v1184_v48, %v9770_v21  ;;  %v2072_v27 = vsel %vm2052_vm5, %v2069_v0, %v2071_v17  ;;  %v2773_v40 = vmax.f32 %v2577_v35, %v13119_v55  ;;  %v9967_v3 = vmax.f32 %v2578_v14, %v13120_v51  ;;  %v13124_v0 = vld [vmem:[#allocation63_spill] sm:$0xff] }
 0x135   : > { %v1754_v13 = vmax.f32 %v1513_v43, %v1654_v56  ;;  %v1019_v63 = vmax.f32 %v823_v49, %v13038_v15  ;;  %v1962_v57 = vmax.f32 %v1753_v26, %v1861_v47  ;;  %v9971_v18 = vmax.f32 %v2579_v33, %v13121_v28  ;;  %v13125_v14 = vld [vmem:[#allocation47_spill] sm:$0xff]  ;;  %v13129_v33 = vld [vmem:[#allocation64_spill] sm:$0xff] }
 0x136   : > { %v9974_v56 = vmax.f32 %v2580_v8, %v13122_v58  ;;  %v9976_v38 = vunpack.c.l.bf16 %v8824_v59  ;;  %v2969_v48 = vmax.f32 %v2773_v40, %v9908_v23  ;;  %v1020_v17 = vmax.f32 %v824_v6, %v13040_v20  ;;  %v13130_v8 = vld [vmem:[#allocation65_spill] sm:$0xff] }
 0x137   : > { %v1963_v2 = vmax.f32 %v1754_v13, %v1863_v19  ;;  %v1213_v43 = vmax.f32 %v1017_v9, %v13124_v0  ;;  %v13126_v49 = vmax.f32 %v9887_v29, %v13089_v46  ;;  %v9987_v13 = vunpack.c.h.bf16 %v8824_v59  ;;  %v8571_v0 = vld [vmem:[%s8990_s19 + $0x8] sm:$0xff] }
 0x138   : > { %13123 = vst [vmem:[#allocation88_spill] sm:$0xff] %v9976_v38  ;;  %v2171_v19 = vmax.f32 %v1962_v57, %v2070_v7  ;;  %v2970_v47 = vmax.f32 %v9967_v3, %v9916_v25  ;;  %v2971_v26 = vmax.f32 %v9971_v18, %v9976_v38  ;;  %v1214_v6 = vmax.f32 %v1018_v12, %v13129_v33  ;;  %v13132_v7 = vld [vmem:[#allocation66_spill] sm:$0xff] }
 0x139   : > { %v9985_v35 = vmax.f32 %v13126_v49, %v13125_v14  ;;  %13128 = vst [vmem:[#allocation114_spill] sm:$0xff] %v9987_v13  ;;  %v2172_v61 = vmax.f32 %v1963_v2, %v2072_v27  ;;  %v1215_v9 = vmax.f32 %v1019_v63, %v13130_v8  ;;  %v2972_v29 = vmax.f32 %v9974_v56, %v9987_v13 }
 0x13a   : > { %v2203_v40 = vpack.c.bf16 %v2171_v19, %v2171_v19  ;;  %v9998_v59 = vmax.f32 %v2969_v48, %v13072_v42  ;;  %v1216_v27 = vmax.f32 %v1020_v17, %v13132_v7  ;;  %v1449_v57 = vrot.slane %v1213_v43, 7 }
 0x13b   : > { %13127 = vst [vmem:[#allocation113_spill] sm:$0xff] %v9985_v35  ;;  %v2204_v58 = vpack.c.bf16 %v2172_v61, %v2172_v61  ;;  %v1450_v2 = vrot.slane %v1214_v6, 7  ;;  %v1452_v3 = vrot.slane %v1215_v9, 7  ;;  %v1690_v18 = vrot.slane %v1214_v6, 1 }
 0x13c   : > { %13131 = vst [vmem:[#allocation115_spill] sm:$0xff] %v9998_v59  ;;  %v2275_v49 = vunpack.c.l.b16 %v2203_v40  ;;  %v1691_v35 = vrot.slane %v1215_v9, 1  ;;  %v1693_v19 = vrot.slane %v1216_v27, 1  ;;  %v1899_v61 = vrot.slane %v1213_v43, 6 }
 0x13d   : > { %v2276_v14 = vunpack.c.l.b16 %v2204_v58  ;;  %v1451_v12 = vsel %vm1393_vm2, %v1449_v57, %v1450_v2  ;;  %v1453_v63 = vsel %vm1393_vm2, %v1450_v2, %v1452_v3  ;;  %v1900_v7 = vrot.slane %v1214_v6, 6 }
 0x13e   : > { %v1528_v28 = vmax.f32 %v1214_v6, %v1451_v12  ;;  %v1529_v48 = vmax.f32 %v1215_v9, %v1453_v63  ;;  %v1692_v17 = vsel %vm1634_vm3, %v1690_v18, %v1691_v35  ;;  %v1694_v59 = vsel %vm1634_vm3, %v1691_v35, %v1693_v19  ;;  %v8579_v18 = vld [vmem:[%s8990_s19 + $0x48] sm:$0xff] }
 0x13f   : > { %v2304_v56 = vpack.c.b16 %v2276_v14, %v2275_v49  ;;  %v1902_v40 = vrot.slane %v1215_v9, 6  ;;  %v2108_v58 = vrot.slane %v1214_v6, 2  ;;  %v2109_v33 = vrot.slane %v1215_v9, 2 }
 0x140   : > { %v1769_v8 = vmax.f32 %v1528_v28, %v1692_v17  ;;  %v1770_v57 = vmax.f32 %v1529_v48, %v1694_v59  ;;  %v1901_v2 = vsel %vm1843_vm4, %v1899_v61, %v1900_v7  ;;  %v2111_v3 = vrot.slane %v1216_v27, 2 }
 0x141   : > { %v2331_v51 = vsel %vm2317_vm1, %v2304_v56, 0  ;;  %v1903_v14 = vsel %vm1843_vm4, %v1900_v7, %v1902_v40  ;;  %v2609_v49 = vmax.f32 %v1213_v43, %v13027_v32  ;;  %v2110_v63 = vsel %vm2052_vm5, %v2108_v58, %v2109_v33 }
 0x142   : > { %2373 = vmatpush.bf16.xpose.msra.mxu0 %v2331_v51  ;;  %v1978_v12 = vmax.f32 %v1769_v8, %v1901_v2  ;;  %v1979_v35 = vmax.f32 %v1770_v57, %v1903_v14  ;;  %v2610_v19 = vmax.f32 %v1214_v6, %v13028_v62  ;;  %v2112_v28 = vsel %vm2052_vm5, %v2109_v33, %v2111_v3  ;;  %v8821_v8 = vld [vmem:[#allocation2 + $0x40] sm:$0xff]   ;;  %v13147_v3 = vld [vmem:[#allocation35_spill] sm:$0xff] }
 0x143   : > { %v2611_v59 = vmax.f32 %v1215_v9, %v13086_v1  ;;  %v2612_v51 = vmax.f32 %v1216_v27, %v13089_v46  ;;  %v2805_v61 = vmax.f32 %v2609_v49, %v9460_v41  ;;  %v2489_v43 = vsel %vm2317_vm1, %v8571_v0, 0  ;;  %v10031_v0 = vld [vmem:[#allocation2 + $0x48] sm:$0xff]  }
 0x144   : > { %v2187_v56 = vmax.f32 %v1978_v12, %v2110_v63  ;;  %v2188_v7 = vmax.f32 %v1979_v35, %v2112_v28  ;;  %v2806_v48 = vmax.f32 %v2610_v19, %v9462_v30  ;;  %2539 = vmatpush.bf16.xpose.msra.mxu2 %v2489_v43  ;;  %v2513_v9 = vsel %vm2317_vm1, %v8579_v18, 0  ;;  %v13142_v43 = vld [vmem:[#allocation21_spill] sm:$0xff] }
 0x145   : > { %v10020_v17 = vmax.f32 %v2611_v59, %v9464_v5  ;;  %v10023_v6 = vmax.f32 %v2612_v51, %v12991_v4  ;;  %v3001_v33 = vmax.f32 %v2805_v61, %v13072_v42  ;;  %v10028_v27 = vmax.f32 %v2970_v47, %v13073_v39  ;;  %2553 = vmatpush.bf16.xpose.msra.mxu3 %v2513_v9  ;;  %v13144_v9 = vld [vmem:[#allocation30_spill] sm:$0xff] }
 0x146   : > { %v2219_v40 = vpack.c.bf16 %v2187_v56, %v2187_v56  ;;  %v2220_v58 = vpack.c.bf16 %v2188_v7, %v2188_v7  ;;  %v3002_v57 = vmax.f32 %v2806_v48, %v13073_v39  ;;  %v10034_v2 = vmax.f32 %v2971_v26, %v13074_v54  ;;  %v13141_v7 = vld [vmem:[#allocation28_spill] sm:$0xff] }
 0x147   : > { %13133 = vst [vmem:[#allocation116_spill] sm:$0xff] %v10028_v27  ;;  %v10037_v14 = vmax.f32 %v2972_v29, %v13075_v31  ;;  %v10041_v49 = vunpack.c.l.bf16 %v8821_v8  ;;  %v10046_v35 = vmax.f32 %v3001_v33, %v12992_v53  ;;  %v10051_v26 = vunpack.c.h.bf16 %v8821_v8  ;;  %v13143_v8 = vld [vmem:[#allocation29_spill] sm:$0xff] }
 0x148   : > { %13134 = vst [vmem:[#allocation117_spill] sm:$0xff] %v10034_v2  ;;  %v2291_v47 = vunpack.c.l.b16 %v2219_v40  ;;  %v2292_v18 = vunpack.c.l.b16 %v2220_v58  ;;  %v10049_v63 = vmax.f32 %v3002_v57, %v12993_v11  ;;  %v10054_v29 = vunpack.c.l.bf16 %v10031_v0  ;;  %v13145_v57 = vld [vmem:[#allocation33_spill] sm:$0xff] }
 0x149   : > { %13135 = vst [vmem:[#allocation118_spill] sm:$0xff] %v10037_v14  ;;  %v589_v19 = vmax.f32 %v13062_v10, %v13109_v52  ;;  %v590_v59 = vmax.f32 %v13026_v36, %v9643_v50  ;;  %v591_v51 = vmax.f32 %v9496_v44, %v9648_v16  ;;  %v592_v61 = vmax.f32 %v9515_v45, %v9650_v60  ;;  %v13148_v53 = vld [vmem:[#allocation97_spill] sm:$0xff]  ;;  %v13150_v14 = vld [vmem:[#allocation36_spill] sm:$0xff] }
 0x14a   : > { %13136 = vst [vmem:[#allocation119_spill] sm:$0xff] %v10041_v49  ;;  %v2312_v28 = vpack.c.b16 %v2292_v18, %v2291_v47  ;;  %v621_v48 = vmax.f32 %v13141_v7, %v13034_v37  ;;  %v622_v33 = vmax.f32 %v13143_v8, %v13142_v43  ;;  %v623_v40 = vmax.f32 %v13144_v9, %v13038_v15  ;;  %v13146_v18 = vld [vmem:[#allocation34_spill] sm:$0xff]  ;;  %v13151_v2 = vld [vmem:[#allocation37_spill] sm:$0xff] }
 0x14b   : > { %13137 = vst [vmem:[#allocation120_spill] sm:$0xff] %v10046_v35  ;;  %v785_v56 = vmax.f32 %v589_v19, %v13098_v22  ;;  %v786_v47 = vmax.f32 %v590_v59, %v13145_v57  ;;  %v787_v12 = vmax.f32 %v591_v51, %v13146_v18  ;;  %v788_v11 = vmax.f32 %v592_v61, %v13147_v3  ;;  %v13152_v57 = vld [vmem:[#allocation38_spill] sm:$0xff]  ;;  %v13153_v18 = vld [vmem:[#allocation24_spill] sm:$0xff] }
 0x14c   : > { %13138 = vst [vmem:[#allocation121_spill] sm:$0xff] %v10049_v63  ;;  %v2355_v58 = vsel %vm2317_vm1, %v2312_v28, 0  ;;  %v13149_v63 = vld [vmem:[#allocation31_spill] sm:$0xff]  ;;  %v817_v22 = vmax.f32 %v621_v48, %v13150_v14  ;;  %v818_v27 = vmax.f32 %v622_v33, %v13151_v2  ;;  %v819_v51 = vmax.f32 %v623_v40, %v13152_v57  ;;  %v13156_v14 = vld [vmem:[#allocation26_spill] sm:$0xff] }
 0x14d   : > { %13139 = vst [vmem:[#allocation122_spill] sm:$0xff] %v10051_v26  ;;  %2387 = vmatpush.bf16.xpose.msra.mxu1 %v2355_v58  ;;  %v981_v19 = vmax.f32 %v785_v56, %v13148_v53  ;;  %v624_v35 = vmax.f32 %v13149_v63, %v13040_v20  ;;  %v982_v37 = vmax.f32 %v786_v47, %v9764_v24  ;;  %v13154_v58 = vld [vmem:[#allocation39_spill] sm:$0xff]  ;;  %v13155_v20 = vld [vmem:[#allocation25_spill] sm:$0xff] }
 0x14e   : > { %13140 = vst [vmem:[#allocation123_spill] sm:$0xff] %v10054_v29  ;;  %v983_v28 = vmax.f32 %v787_v12, %v9766_v34  ;;  %v984_v59 = vmax.f32 %v788_v11, %v9770_v21  ;;  %v1013_v56 = vmax.f32 %v817_v22, %v13027_v32  ;;  %v1014_v53 = vmax.f32 %v818_v27, %v13028_v62  ;;  %v13157_v2 = vld [vmem:[#allocation27_spill] sm:$0xff]  ;;  %v13161_v62 = vld [vmem:[#allocation12_spill] sm:$0xff] }
 0x14f   : > { %v1177_v61 = vmax.f32 %v981_v19, %v13153_v18  ;;  %v820_v3 = vmax.f32 %v624_v35, %v13154_v58  ;;  %v1178_v48 = vmax.f32 %v982_v37, %v13155_v20  ;;  %v1015_v12 = vmax.f32 %v819_v51, %v13086_v1 }
 0x150   : > { %v1179_v33 = vmax.f32 %v983_v28, %v13156_v14  ;;  %v1180_v47 = vmax.f32 %v984_v59, %v13157_v2 }
 0x151   : > { %v1404_v34 = vrot.slane %v1177_v61, 7  ;;  %v1854_v11 = vrot.slane %v1177_v61, 6  ;;  %v2573_v40 = vmax.f32 %v1177_v61, %v9908_v23  ;;  %v1016_v19 = vmax.f32 %v820_v3, %v13089_v46 }
 0x152   : > { %v1405_v57 = vrot.slane %v1178_v48, 7  ;;  %v1407_v35 = vrot.slane %v1179_v33, 7  ;;  %v1645_v58 = vrot.slane %v1178_v48, 1  ;;  %v1646_v22 = vrot.slane %v1179_v33, 1 }
 0x153   : > { %v1648_v32 = vrot.slane %v1180_v47, 1  ;;  %v1855_v27 = vrot.slane %v1178_v48, 6  ;;  %v1857_v18 = vrot.slane %v1179_v33, 6  ;;  %v2063_v37 = vrot.slane %v1178_v48, 2 }
 0x154   : > { %v1406_v28 = vsel %vm1393_vm2, %v1404_v34, %v1405_v57  ;;  %v1408_v59 = vsel %vm1393_vm2, %v1405_v57, %v1407_v35  ;;  %v1647_v51 = vsel %vm1634_vm3, %v1645_v58, %v1646_v22  ;;  %v2064_v2 = vrot.slane %v1179_v33, 2 }
 0x155   : > { %v1510_v14 = vmax.f32 %v1178_v48, %v1406_v28  ;;  %v1511_v20 = vmax.f32 %v1179_v33, %v1408_v59  ;;  %v1649_v61 = vsel %vm1634_vm3, %v1646_v22, %v1648_v32  ;;  %v1856_v3 = vsel %vm1843_vm4, %v1854_v11, %v1855_v27  ;;  %v13158_v28 = vld [vmem:[#allocation8_spill] sm:$0xff]  ;;  %v13159_v32 = vld [vmem:[#allocation9_spill] sm:$0xff]  ;;  %v13160_v11 = vld [vmem:[#allocation59_spill] sm:$0xff] }
 0x156   : > { %v1858_v46 = vsel %vm1843_vm4, %v1855_v27, %v1857_v18  ;;  %v2065_v23 = vsel %vm2052_vm5, %v2063_v37, %v2064_v2  ;;  %v2066_v21 = vrot.slane %v1180_v47, 2  ;;  %v2574_v24 = vmax.f32 %v1178_v48, %v9916_v25  ;;  %v13163_v48 = vld [vmem:[#allocation73_spill] sm:$0xff] }
 0x157   : > { %v1751_v1 = vmax.f32 %v1510_v14, %v1647_v51  ;;  %v1752_v34 = vmax.f32 %v1511_v20, %v1649_v61  ;;  %v2575_v57 = vmax.f32 %v1179_v33, %v9976_v38  ;;  %v2576_v58 = vmax.f32 %v1180_v47, %v9987_v13  ;;  %v13162_v14 = vld [vmem:[#allocation13_spill] sm:$0xff] }
 0x158   : > { %v2067_v35 = vsel %vm2052_vm5, %v2064_v2, %v2066_v21  ;;  %v2769_v59 = vmax.f32 %v2573_v40, %v13158_v28  ;;  %v10107_v22 = vmax.f32 %v2574_v24, %v13159_v32  ;;  %v1209_v18 = vmax.f32 %v1013_v56, %v13160_v11  ;;  %v13166_v24 = vld [vmem:[#allocation60_spill] sm:$0xff]  ;;  %v13167_v40 = vld [vmem:[#allocation61_spill] sm:$0xff] }
 0x159   : > { %v1960_v27 = vmax.f32 %v1751_v1, %v1856_v3  ;;  %v1961_v37 = vmax.f32 %v1752_v34, %v1858_v46  ;;  %v10111_v63 = vmax.f32 %v2575_v57, %v13161_v62  ;;  %v10114_v20 = vmax.f32 %v2576_v58, %v13162_v14  ;;  %v13168_v1 = vld [vmem:[#allocation74_spill] sm:$0xff]  ;;  %v8570_v62 = vld [vmem:[%s8990_s19] sm:$0xff] }
 0x15a   : > { %v13164_v33 = vmax.f32 %v10020_v17, %v13074_v54  ;;  %v2965_v2 = vmax.f32 %v2769_v59, %v10041_v49  ;;  %v1210_v47 = vmax.f32 %v1014_v53, %v13166_v24  ;;  %v1211_v56 = vmax.f32 %v1015_v12, %v13167_v40  ;;  %v13172_v53 = vld [vmem:[#allocation62_spill] sm:$0xff] }
 0x15b   : > { %v13169_v46 = vmax.f32 %v10023_v6, %v13075_v31  ;;  %v10132_v61 = vunpack.c.h.bf16 %v10031_v0  ;;  %v2169_v3 = vmax.f32 %v1960_v27, %v2065_v23  ;;  %v2170_v34 = vmax.f32 %v1961_v37, %v2067_v35 }
 0x15c   : > { %v10120_v21 = vmax.f32 %v13164_v33, %v13163_v48  ;;  %v2966_v17 = vmax.f32 %v10107_v22, %v10051_v26  ;;  %v2967_v57 = vmax.f32 %v10111_v63, %v10054_v29  ;;  %v1212_v58 = vmax.f32 %v1016_v19, %v13172_v53 }
 0x15d   : > { %v10129_v51 = vmax.f32 %v13169_v46, %v13168_v1  ;;  %13171 = vst [vmem:[#allocation126_spill] sm:$0xff] %v10132_v61  ;;  %v1444_v12 = vrot.slane %v1209_v18, 7  ;;  %v2201_v59 = vpack.c.bf16 %v2169_v3, %v2169_v3  ;;  %v2202_v33 = vpack.c.bf16 %v2170_v34, %v2170_v34 }
 0x15e   : > { %13165 = vst [vmem:[#allocation124_spill] sm:$0xff] %v10120_v21  ;;  %v2968_v6 = vmax.f32 %v10114_v20, %v10132_v61  ;;  %v10142_v46 = vmax.f32 %v2965_v2, %v13119_v55  ;;  %v1445_v0 = vrot.slane %v1210_v47, 7  ;;  %v1447_v23 = vrot.slane %v1211_v56, 7 }
 0x15f   : > { %13170 = vst [vmem:[#allocation125_spill] sm:$0xff] %v10129_v51  ;;  %v1685_v35 = vrot.slane %v1210_v47, 1  ;;  %v1686_v27 = vrot.slane %v1211_v56, 1  ;;  %v2273_v37 = vunpack.c.l.b16 %v2201_v59  ;;  %v2274_v22 = vunpack.c.l.b16 %v2202_v33 }
 0x160   : > { %13173 = vst [vmem:[#allocation127_spill] sm:$0xff] %v10142_v46  ;;  %v1688_v1 = vrot.slane %v1212_v58, 1  ;;  %v1894_v63 = vrot.slane %v1209_v18, 6  ;;  %v1446_v19 = vsel %vm1393_vm2, %v1444_v12, %v1445_v0  ;;  %v1448_v3 = vsel %vm1393_vm2, %v1445_v0, %v1447_v23  ;;  %v8578_v23 = vld [vmem:[%s8990_s19 + $0x40] sm:$0xff] }
 0x161   : > { %v1687_v34 = vsel %vm1634_vm3, %v1685_v35, %v1686_v27  ;;  %v1895_v20 = vrot.slane %v1210_v47, 6  ;;  %v2303_v48 = vpack.c.b16 %v2274_v22, %v2273_v37  ;;  %v1526_v2 = vmax.f32 %v1210_v47, %v1446_v19 }
 0x162   : > { %v1527_v46 = vmax.f32 %v1211_v56, %v1448_v3  ;;  %v1689_v51 = vsel %vm1634_vm3, %v1686_v27, %v1688_v1  ;;  %v1897_v59 = vrot.slane %v1211_v56, 6  ;;  %v2103_v14 = vrot.slane %v1210_v47, 2 }
 0x163   : > { %v1896_v21 = vsel %vm1843_vm4, %v1894_v63, %v1895_v20  ;;  %v2104_v33 = vrot.slane %v1211_v56, 2  ;;  %v2328_v32 = vsel %vm2317_vm1, %v2303_v48, 0  ;;  %v1767_v12 = vmax.f32 %v1526_v2, %v1687_v34  ;;  %v13175_v34 = vld [vmem:[#allocation64_spill] sm:$0xff] }
 0x164   : > { %v1768_v28 = vmax.f32 %v1527_v46, %v1689_v51  ;;  %v2106_v0 = vrot.slane %v1212_v58, 2  ;;  %2374 = vmatpush.bf16.xpose.msra.mxu0 %v2328_v32  ;;  %v1898_v35 = vsel %vm1843_vm4, %v1895_v20, %v1897_v59  ;;  %v2605_v22 = vmax.f32 %v1209_v18, %v13072_v42  ;;  %v13174_v51 = vld [vmem:[#allocation63_spill] sm:$0xff]  ;;  %v13176_v59 = vld [vmem:[#allocation65_spill] sm:$0xff] }
 0x165   : > { %v2105_v37 = vsel %vm2052_vm5, %v2103_v14, %v2104_v33  ;;  %v2606_v1 = vmax.f32 %v1210_v47, %v13073_v39  ;;  %v1976_v27 = vmax.f32 %v1767_v12, %v1896_v21  ;;  %v2607_v3 = vmax.f32 %v1211_v56, %v13074_v54 }
 0x166   : > { %v1977_v63 = vmax.f32 %v1768_v28, %v1898_v35  ;;  %v2107_v19 = vsel %vm2052_vm5, %v2104_v33, %v2106_v0  ;;  %v2608_v48 = vmax.f32 %v1212_v58, %v13075_v31  ;;  %v2801_v46 = vmax.f32 %v2605_v22, %v13174_v51  ;;  %v13177_v28 = vld [vmem:[#allocation5_spill] sm:$0xff]  ;;  %v13179_v33 = vld [vmem:[#allocation66_spill] sm:$0xff] }
 0x167   : > { %v2802_v32 = vmax.f32 %v2606_v1, %v13175_v34  ;;  %v2486_v20 = vsel %vm2317_vm1, %v8570_v62, 0  ;;  %v2185_v2 = vmax.f32 %v1976_v27, %v2105_v37  ;;  %v2803_v18 = vmax.f32 %v2607_v3, %v13176_v59  ;;  %v13180_v0 = vld [vmem:[#allocation6_spill] sm:$0xff]  ;;  %v13182_v1 = vld [vmem:[#allocation7_spill] sm:$0xff] }
 0x168   : > { %v2186_v14 = vmax.f32 %v1977_v63, %v2107_v19  ;;  %2540 = vmatpush.bf16.xpose.msra.mxu2 %v2486_v20  ;;  %v2510_v21 = vsel %vm2317_vm1, %v8578_v23, 0  ;;  %v10165_v47 = vmax.f32 %v2966_v17, %v13177_v28  ;;  %v2804_v56 = vmax.f32 %v2608_v48, %v13179_v33  ;;  %v10184_v19 = vld [vmem:[#allocation2 + $0x1a0] sm:$0xff]  }
 0x169   : > { %v2997_v58 = vmax.f32 %v2801_v46, %v13119_v55  ;;  %v2998_v12 = vmax.f32 %v2802_v32, %v13177_v28  ;;  %2554 = vmatpush.bf16.xpose.msra.mxu3 %v2510_v21  ;;  %v10171_v35 = vmax.f32 %v2967_v57, %v13180_v0  ;;  %v2217_v62 = vpack.c.bf16 %v2185_v2, %v2185_v2  ;;  %v13187_v46 = vld [vmem:[#allocation40_spill] sm:$0xff]  ;;  %v13189_v2 = vld [vmem:[#allocation41_spill] sm:$0xff]  ;;  %v13208_v55 = vld [vmem:[#allocation18_spill] sm:$0xff] }
 0x16a   : > { %13178 = vst [vmem:[#allocation128_spill] sm:$0xff] %v10165_v47  ;;  %v2218_v37 = vpack.c.bf16 %v2186_v14, %v2186_v14  ;;  %v2999_v22 = vmax.f32 %v2803_v18, %v13180_v0  ;;  %v10175_v27 = vmax.f32 %v2968_v6, %v13182_v1  ;;  %v3000_v17 = vmax.f32 %v2804_v56, %v13182_v1  ;;  %v10191_v6 = vld [vmem:[#allocation2 + $0x1a8] sm:$0xff]   ;;  %v13190_v18 = vld [vmem:[#allocation42_spill] sm:$0xff]  ;;  %v13191_v56 = vld [vmem:[#allocation43_spill] sm:$0xff] }
 0x16b   : > { %13181 = vst [vmem:[#allocation129_spill] sm:$0xff] %v10171_v35  ;;  %v10179_v23 = vmax.f32 %v2997_v58, %v9460_v41  ;;  %v10182_v63 = vmax.f32 %v2998_v12, %v9462_v30  ;;  %v2289_v3 = vunpack.c.l.b16 %v2217_v62  ;;  %v5183_v32 = vmax.f32 %v13187_v46, %v13062_v10  ;;  %v10202_v12 = vld [vmem:[#allocation2 + $0x1b0] sm:$0xff]  }
 0x16c   : > { %13183 = vst [vmem:[#allocation130_spill] sm:$0xff] %v10175_v27  ;;  %v2290_v57 = vunpack.c.l.b16 %v2218_v37  ;;  %v10187_v48 = vmax.f32 %v2999_v22, %v9464_v5  ;;  %v10194_v20 = vmax.f32 %v3000_v17, %v12991_v4  ;;  %v5184_v14 = vmax.f32 %v13189_v2, %v13026_v36 }
 0x16d   : > { %13184 = vst [vmem:[#allocation131_spill] sm:$0xff] %v10179_v23  ;;  %v5185_v21 = vmax.f32 %v13190_v18, %v9496_v44  ;;  %v5186_v58 = vmax.f32 %v13191_v56, %v9515_v45  ;;  %v5379_v37 = vmax.f32 %v5183_v32, %v13160_v11 }
 0x16e   : > { %13185 = vst [vmem:[#allocation132_spill] sm:$0xff] %v10182_v63  ;;  %v2311_v62 = vpack.c.b16 %v2290_v57, %v2289_v3  ;;  %v5380_v17 = vmax.f32 %v5184_v14, %v13166_v24  ;;  %v13192_v57 = vld [vmem:[#allocation90_spill] sm:$0xff] }
 0x16f   : > { %13186 = vst [vmem:[#allocation133_spill] sm:$0xff] %v10187_v48  ;;  %v5381_v4 = vmax.f32 %v5185_v21, %v13167_v40  ;;  %v5382_v30 = vmax.f32 %v5186_v58, %v13172_v53  ;;  %v5575_v3 = vmax.f32 %v5379_v37, %v13109_v52 }
 0x170   : > { %13188 = vst [vmem:[#allocation134_spill] sm:$0xff] %v10194_v20  ;;  %v10211_v20 = vld [vmem:[#allocation2 + $0x1b8] sm:$0xff]   ;;  %v2352_v48 = vsel %vm2317_vm1, %v2311_v62, 0  ;;  %v5576_v14 = vmax.f32 %v5380_v17, %v9643_v50 }
 0x171   : > { %2388 = vmatpush.bf16.xpose.msra.mxu1 %v2352_v48  ;;  %v5577_v21 = vmax.f32 %v5381_v4, %v9648_v16  ;;  %v5578_v58 = vmax.f32 %v5382_v30, %v9650_v60  ;;  %v10222_v5 = vmax.f32 %v5575_v3, %v13174_v51  ;;  %v13193_v17 = vld [vmem:[#allocation91_spill] sm:$0xff] }
 0x172   : > { %v5772_v48 = vmax.f32 %v5576_v14, %v13175_v34 }
 0x173   : > { %v10230_v4 = vmax.f32 %v5577_v21, %v13176_v59  ;;  %v5774_v30 = vmax.f32 %v5578_v58, %v13179_v33  ;;  %v6002_v3 = vrot.slane %v10222_v5, 7  ;;  %v6450_v62 = vrot.slane %v10222_v5, 6 }
 0x174   : > { %v6866_v37 = vrot.slane %v10222_v5, 5  ;;  %v7282_v22 = vrot.slane %v10222_v5, 4  ;;  %v6003_v32 = vrot.slane %v5772_v48, 7  ;;  %v6242_v14 = vrot.slane %v5772_v48, 1 }
 0x175   : > { %v6005_v63 = vrot.slane %v10230_v4, 7  ;;  %v6243_v21 = vrot.slane %v10230_v4, 1  ;;  %v6245_v23 = vrot.slane %v5774_v30, 1  ;;  %v6451_v27 = vrot.slane %v5772_v48, 6 }
 0x176   : > { %v6453_v58 = vrot.slane %v10230_v4, 6  ;;  %v6658_v56 = vrot.slane %v5772_v48, 2  ;;  %v6004_v41 = vsel %vm1393_vm2, %v6002_v3, %v6003_v32  ;;  %v6659_v46 = vrot.slane %v10230_v4, 2 }
 0x177   : > { %v6006_v18 = vsel %vm1393_vm2, %v6003_v32, %v6005_v63  ;;  %v6244_v2 = vsel %vm1634_vm3, %v6242_v14, %v6243_v21  ;;  %v6093_v35 = vmax.f32 %v5772_v48, %v6004_v41  ;;  %v6246_v33 = vsel %vm1634_vm3, %v6243_v21, %v6245_v23 }
 0x178   : > { %v6094_v47 = vmax.f32 %v10230_v4, %v6006_v18  ;;  %v6452_v59 = vsel %vm1843_vm4, %v6450_v62, %v6451_v27  ;;  %v10250_v34 = vsel %vm1843_vm4, %v6451_v27, %v6453_v58  ;;  %v10253_v51 = vsel %vm2052_vm5, %v6658_v56, %v6659_v46 }
 0x179   : > { %v6661_v3 = vrot.slane %v5774_v30, 2  ;;  %v6867_v53 = vrot.slane %v5772_v48, 5  ;;  %v6333_v63 = vmax.f32 %v6093_v35, %v6244_v2  ;;  %v6869_v14 = vrot.slane %v10230_v4, 5 }
 0x17a   : > { %v6334_v32 = vmax.f32 %v6094_v47, %v6246_v33  ;;  %v7074_v40 = vrot.slane %v5772_v48, 3  ;;  %v7075_v23 = vrot.slane %v10230_v4, 3  ;;  %v7077_v62 = vrot.slane %v5774_v30, 3 }
 0x17b   : > { %v6662_v41 = vsel %vm2052_vm5, %v6659_v46, %v6661_v3  ;;  %v6868_v18 = vsel %vm4241_vm6, %v6866_v37, %v6867_v53  ;;  %v6541_v21 = vmax.f32 %v6333_v63, %v6452_v59  ;;  %v6870_v24 = vsel %vm4241_vm6, %v6867_v53, %v6869_v14 }
 0x17c   : > { %v6542_v27 = vmax.f32 %v6334_v32, %v10250_v34  ;;  %v7283_v11 = vrot.slane %v5772_v48, 4  ;;  %v7076_v1 = vsel %vm4450_vm7, %v7074_v40, %v7075_v23  ;;  %v7078_v47 = vsel %vm4450_vm7, %v7075_v23, %v7077_v62 }
 0x17d   : > { %v7285_v33 = vrot.slane %v10230_v4, 4  ;;  %v7469_v35 = vrot.slane %v5774_v30, 4  ;;  %v6749_v46 = vmax.f32 %v6541_v21, %v10253_v51  ;;  %v7613_v3 = vrot.slane %v10222_v5, 3 }
 0x17e   : > { %v6750_v2 = vmax.f32 %v6542_v27, %v6662_v41  ;;  %v7284_v37 = vsel %vm4659_vm8, %v7282_v22, %v7283_v11  ;;  %v7757_v53 = vrot.slane %v5774_v30, 5  ;;  %v7901_v48 = vrot.slane %v10222_v5, 2  ;;  %v13194_v22 = vld [vmem:[#allocation82_spill] sm:$0xff]  ;;  %v13195_v27 = vld [vmem:[#allocation84_spill] sm:$0xff] }
 0x17f   : > { %v7286_v59 = vsel %vm4659_vm8, %v7283_v11, %v7285_v33  ;;  %v7470_v63 = vsel %vm4659_vm8, %v7285_v33, %v7469_v35  ;;  %v6957_v32 = vmax.f32 %v6749_v46, %v6868_v18  ;;  %v7614_v23 = vsel %vm4450_vm7, %v7613_v3, %v7074_v40  ;;  %v13196_v5 = vld [vmem:[#allocation86_spill] sm:$0xff]  ;;  %v13197_v46 = vld [vmem:[#allocation31_spill] sm:$0xff] }
 0x180   : > { %v6958_v0 = vmax.f32 %v6750_v2, %v6870_v24  ;;  %v8045_v4 = vrot.slane %v5774_v30, 6  ;;  %v7758_v62 = vsel %vm4241_vm6, %v6869_v14, %v7757_v53  ;;  %v7902_v41 = vsel %vm2052_vm5, %v7901_v48, %v6658_v56  ;;  %v13198_v40 = vld [vmem:[#allocation87_spill] sm:$0xff]  ;;  %v13199_v2 = vld [vmem:[#allocation57_spill] sm:$0xff]  ;;  %v13201_v3 = vld [vmem:[#allocation58_spill] sm:$0xff] }
 0x181   : > { %v5215_v21 = vmax.f32 %v13194_v22, %v13141_v7  ;;  %v5216_v11 = vmax.f32 %v13195_v27, %v13143_v8  ;;  %v7165_v28 = vmax.f32 %v6957_v32, %v7076_v1  ;;  %v5217_v18 = vmax.f32 %v13196_v5, %v13144_v9 }
 0x182   : > { %v7166_v33 = vmax.f32 %v6958_v0, %v7078_v47  ;;  %v8046_v35 = vsel %vm1843_vm4, %v6453_v58, %v8045_v4  ;;  %v5218_v30 = vmax.f32 %v13198_v40, %v13197_v46  ;;  %v13200_v56 = vmax.f32 %v13192_v57, %v13142_v43 }
 0x183   : > { %v13202_v53 = vmax.f32 %v13193_v17, %v13038_v15  ;;  %v13203_v0 = vunpack.c.l.bf16 %v10184_v19  ;;  %v7373_v58 = vmax.f32 %v7165_v28, %v7284_v37  ;;  %v13204_v4 = vunpack.c.h.bf16 %v10184_v19  ;;  %v13209_v17 = vld [vmem:[#allocation20_spill] sm:$0xff] }
 0x184   : > { %v5408_v14 = vmax.f32 %v13200_v56, %v13199_v2  ;;  %v7374_v32 = vmax.f32 %v7166_v33, %v7286_v59  ;;  %v13205_v40 = vunpack.c.l.bf16 %v10191_v6  ;;  %v13206_v22 = vunpack.c.h.bf16 %v10191_v6  ;;  %v13207_v56 = vld [vmem:[#allocation17_spill] sm:$0xff] }
 0x185   : > { %v5409_v48 = vmax.f32 %v13202_v53, %v13201_v3  ;;  %v5411_v47 = vmax.f32 %v5215_v21, %v13203_v0  ;;  %v5412_v5 = vmax.f32 %v5216_v11, %v13204_v4  ;;  %v7517_v3 = vmax.f32 %v7373_v58, %v7286_v59  ;;  %v13210_v21 = vld [vmem:[#allocation23_spill] sm:$0xff] }
 0x186   : > { %v5413_v27 = vmax.f32 %v5217_v18, %v13205_v40  ;;  %v5414_v57 = vmax.f32 %v5218_v30, %v13206_v22  ;;  %v5604_v2 = vmax.f32 %v5408_v14, %v13207_v56  ;;  %v7518_v54 = vmax.f32 %v7374_v32, %v7470_v63 }
 0x187   : > { %v5605_v31 = vmax.f32 %v5409_v48, %v13208_v55  ;;  %v5607_v53 = vmax.f32 %v5411_v47, %v13209_v17  ;;  %v5608_v28 = vmax.f32 %v5412_v5, %v13142_v43  ;;  %v13211_v33 = vmov %v13204_v4 }
 0x188   : > { %v5609_v37 = vmax.f32 %v5413_v27, %v13038_v15  ;;  %v5610_v11 = vmax.f32 %v5414_v57, %v13210_v21  ;;  %v10306_v18 = vmax.f32 %v5604_v2, %v13211_v33  ;;  %v13212_v22 = vmov %v13205_v40 }
 0x189   : > { %v10310_v40 = vmax.f32 %v5605_v31, %v13212_v22  ;;  %v13213_v30 = vunpack.c.l.bf16 %v10202_v12  ;;  %v7661_v59 = vmax.f32 %v7517_v3, %v7614_v23  ;;  %v7662_v63 = vmax.f32 %v7518_v54, %v7076_v1 }
 0x18a   : > { %v13214_v5 = vunpack.c.h.bf16 %v10202_v12  ;;  %v13215_v57 = vunpack.c.l.bf16 %v10211_v20  ;;  %v13216_v2 = vunpack.c.h.bf16 %v10211_v20 }
 0x18b   : > { %v10314_v14 = vmax.f32 %v5607_v53, %v13213_v30  ;;  %v7805_v23 = vmax.f32 %v7661_v59, %v6870_v24  ;;  %v7806_v54 = vmax.f32 %v7662_v63, %v7758_v62 }
 0x18c   : > { %v10318_v48 = vmax.f32 %v5608_v28, %v13214_v5  ;;  %v10322_v27 = vmax.f32 %v5609_v37, %v13215_v57  ;;  %v10326_v0 = vmax.f32 %v5610_v11, %v13216_v2 }
 0x18d   : > { %v6042_v31 = vrot.slane %v10314_v14, 7  ;;  %v6490_v47 = vrot.slane %v10314_v14, 6  ;;  %v6906_v58 = vrot.slane %v10314_v14, 5  ;;  %v7949_v53 = vmax.f32 %v7805_v23, %v7902_v41 }
 0x18e   : > { %v6043_v1 = vrot.slane %v10318_v48, 7  ;;  %v6045_v12 = vrot.slane %v10322_v27, 7  ;;  %v6282_v3 = vrot.slane %v10318_v48, 1  ;;  %v6283_v32 = vrot.slane %v10322_v27, 1 }
 0x18f   : > { %v6285_v20 = vrot.slane %v10326_v0, 1  ;;  %v6491_v4 = vrot.slane %v10318_v48, 6  ;;  %v7950_v28 = vmax.f32 %v7806_v54, %v10253_v51  ;;  %v8093_v30 = vmax.f32 %v7949_v53, %v10250_v34 }
 0x190   : > { %v6044_v37 = vsel %vm1393_vm2, %v6042_v31, %v6043_v1  ;;  %v6046_v24 = vsel %vm1393_vm2, %v6043_v1, %v6045_v12  ;;  %v6284_v33 = vsel %vm1634_vm3, %v6282_v3, %v6283_v32  ;;  %v6493_v41 = vrot.slane %v10322_v27, 6 }
 0x191   : > { %v6109_v62 = vmax.f32 %v10318_v48, %v6044_v37  ;;  %v6110_v11 = vmax.f32 %v10322_v27, %v6046_v24  ;;  %v6286_v22 = vsel %vm1634_vm3, %v6283_v32, %v6285_v20  ;;  %v8094_v59 = vmax.f32 %v7950_v28, %v8046_v35 }
 0x192   : > { %v6492_v63 = vsel %vm1843_vm4, %v6490_v47, %v6491_v4  ;;  %v6698_v57 = vrot.slane %v10318_v48, 2  ;;  %v6699_v2 = vrot.slane %v10322_v27, 2  ;;  %v8125_v31 = vpack.c.bf16 %v8093_v30, %v8093_v30 }
 0x193   : > { %v6349_v51 = vmax.f32 %v6109_v62, %v6284_v33  ;;  %v6350_v5 = vmax.f32 %v6110_v11, %v6286_v22  ;;  %v8126_v23 = vpack.c.bf16 %v8094_v59, %v8094_v59  ;;  %v10350_v54 = vsel %vm1843_vm4, %v6491_v4, %v6493_v41 }
 0x194   : > { %v6701_v1 = vrot.slane %v10326_v0, 2  ;;  %v10355_v35 = vsel %vm2052_vm5, %v6698_v57, %v6699_v2  ;;  %v6907_v47 = vrot.slane %v10318_v48, 5  ;;  %v8197_v3 = vunpack.c.l.b16 %v8125_v31 }
 0x195   : > { %v6557_v12 = vmax.f32 %v6349_v51, %v6492_v63  ;;  %v6558_v34 = vmax.f32 %v6350_v5, %v10350_v54  ;;  %v8198_v32 = vunpack.c.l.b16 %v8126_v23  ;;  %v6909_v53 = vrot.slane %v10322_v27, 5 }
 0x196   : > { %v6702_v20 = vsel %vm2052_vm5, %v6699_v2, %v6701_v1  ;;  %v6908_v37 = vsel %vm4241_vm6, %v6906_v58, %v6907_v47  ;;  %v7114_v24 = vrot.slane %v10318_v48, 3  ;;  %v7115_v33 = vrot.slane %v10322_v27, 3 }
 0x197   : > { %v6765_v28 = vmax.f32 %v6557_v12, %v10355_v35  ;;  %v6766_v4 = vmax.f32 %v6558_v34, %v6702_v20  ;;  %v8222_v62 = vpack.c.b16 %v8198_v32, %v8197_v3  ;;  %v6910_v11 = vsel %vm4241_vm6, %v6907_v47, %v6909_v53  ;;  %v8819_v47 = vld [vmem:[#allocation2 + $0x30] sm:$0xff]  }
 0x198   : > { %v7117_v22 = vrot.slane %v10326_v0, 3  ;;  %v7322_v63 = vrot.slane %v10314_v14, 4  ;;  %v7323_v51 = vrot.slane %v10318_v48, 4  ;;  %v7116_v2 = vsel %vm4450_vm7, %v7114_v24, %v7115_v33 }
 0x199   : > { %v6973_v30 = vmax.f32 %v6765_v28, %v6908_v37  ;;  %v6974_v59 = vmax.f32 %v6766_v4, %v6910_v11  ;;  %v8256_v5 = vsel %vm2317_vm1, %v8222_v62, 0  ;;  %v7325_v31 = vrot.slane %v10322_v27, 4  ;;  %v8820_v62 = vld [vmem:[#allocation2 + $0x38] sm:$0xff]  }
 0x19a   : > { %v7118_v58 = vsel %vm4450_vm7, %v7115_v33, %v7117_v22  ;;  %8282 = vmatpush.bf16.xpose.msrb.mxu2 %v8256_v5  ;;  %v7324_v12 = vsel %vm4659_vm8, %v7322_v63, %v7323_v51  ;;  %v7485_v34 = vrot.slane %v10326_v0, 4  ;;  %v7629_v48 = vrot.slane %v10314_v14, 3 }
 0x19b   : > { %v7181_v23 = vmax.f32 %v6973_v30, %v7116_v2  ;;  %v7182_v1 = vmax.f32 %v6974_v59, %v7118_v58  ;;  %v7326_v3 = vsel %vm4659_vm8, %v7323_v51, %v7325_v31  ;;  %v7773_v32 = vrot.slane %v10326_v0, 5 }
 0x19c   : > { %v7917_v20 = vrot.slane %v10314_v14, 2  ;;  %v7486_v27 = vsel %vm4659_vm8, %v7325_v31, %v7485_v34  ;;  %v8061_v37 = vrot.slane %v10326_v0, 6  ;;  %v7630_v33 = vsel %vm4450_vm7, %v7629_v48, %v7114_v24  ;;  %v13221_v0 = vld [vmem:[#allocation97_spill] sm:$0xff]  ;;  %v13222_v24 = vld [vmem:[#allocation98_spill] sm:$0xff] }
 0x19d   : > { %v7389_v28 = vmax.f32 %v7181_v23, %v7324_v12  ;;  %v7390_v4 = vmax.f32 %v7182_v1, %v7326_v3  ;;  %v7774_v22 = vsel %vm4241_vm6, %v6909_v53, %v7773_v32  ;;  %v10383_v59 = vunpack.c.l.bf16 %v8819_v47  ;;  %v13223_v12 = vld [vmem:[#allocation99_spill] sm:$0xff]  ;;  %v13225_v32 = vld [vmem:[#allocation116_spill] sm:$0xff] }
 0x19e   : > { %v7918_v30 = vsel %vm2052_vm5, %v7917_v20, %v6698_v57  ;;  %v8062_v5 = vsel %vm1843_vm4, %v6493_v41, %v8061_v37  ;;  %v10386_v14 = vunpack.c.h.bf16 %v8819_v47  ;;  %v10388_v58 = vunpack.c.l.bf16 %v8820_v62 }
 0x19f   : > { %13217 = vst [vmem:[#allocation20_spill] sm:$0xff] %v10383_v59  ;;  %v7533_v63 = vmax.f32 %v7389_v28, %v7326_v3  ;;  %v7534_v51 = vmax.f32 %v7390_v4, %v7486_v27  ;;  %v10390_v31 = vunpack.c.h.bf16 %v8820_v62  ;;  %v585_v23 = vmax.f32 %v13109_v52, %v13221_v0  ;;  %v13224_v3 = vld [vmem:[#allocation100_spill] sm:$0xff]  ;;  %v13226_v28 = vld [vmem:[#allocation117_spill] sm:$0xff] }
 0x1a0   : > { %13218 = vst [vmem:[#allocation135_spill] sm:$0xff] %v10386_v14  ;;  %v586_v53 = vmax.f32 %v9643_v50, %v13222_v24  ;;  %v587_v34 = vmax.f32 %v9648_v16, %v13223_v12  ;;  %v588_v41 = vmax.f32 %v9650_v60, %v13224_v3  ;;  %v5168_v20 = vmax.f32 %v13225_v32, %v10051_v26 }
 0x1a1   : > { %13219 = vst [vmem:[#allocation136_spill] sm:$0xff] %v10388_v58  ;;  %v7677_v1 = vmax.f32 %v7533_v63, %v7630_v33  ;;  %v7678_v57 = vmax.f32 %v7534_v51, %v7116_v2  ;;  %v781_v47 = vmax.f32 %v585_v23, %v13062_v10  ;;  %v5169_v4 = vmax.f32 %v13226_v28, %v10054_v29  ;;  %v13227_v33 = vld [vmem:[#allocation110_spill] sm:$0xff] }
 0x1a2   : > { %13220 = vst [vmem:[#allocation137_spill] sm:$0xff] %v10390_v31  ;;  %v782_v48 = vmax.f32 %v586_v53, %v13026_v36  ;;  %v783_v2 = vmax.f32 %v587_v34, %v9496_v44  ;;  %v784_v62 = vmax.f32 %v588_v41, %v9515_v45  ;;  %v10411_v23 = vmax.f32 %v5168_v20, %v13207_v56  ;;  %v13231_v34 = vld [vmem:[#allocation33_spill] sm:$0xff] }
 0x1a3   : > { %v7821_v27 = vmax.f32 %v7677_v1, %v6910_v11  ;;  %v7822_v37 = vmax.f32 %v7678_v57, %v7774_v22  ;;  %v977_v63 = vmax.f32 %v781_v47, %v13227_v33  ;;  %v10414_v53 = vmax.f32 %v5169_v4, %v13208_v55  ;;  %v13230_v1 = vld [vmem:[#allocation32_spill] sm:$0xff] }
 0x1a4   : > { %v978_v51 = vmax.f32 %v782_v48, %v9916_v25  ;;  %13228 = vst [vmem:[#allocation97_spill] sm:$0xff] %v10411_v23  ;;  %v979_v11 = vmax.f32 %v783_v2, %v9976_v38  ;;  %v980_v22 = vmax.f32 %v784_v62, %v9987_v13 }
 0x1a5   : > { %13229 = vst [vmem:[#allocation98_spill] sm:$0xff] %v10414_v53  ;;  %v7965_v32 = vmax.f32 %v7821_v27, %v7918_v30  ;;  %v7966_v36 = vmax.f32 %v7822_v37, %v10355_v35  ;;  %v1173_v57 = vmax.f32 %v977_v63, %v13230_v1  ;;  %v13232_v30 = vld [vmem:[#allocation34_spill] sm:$0xff]  ;;  %v13233_v35 = vld [vmem:[#allocation35_spill] sm:$0xff] }
 0x1a6   : > { %v1174_v41 = vmax.f32 %v978_v51, %v13231_v34  ;;  %v1175_v27 = vmax.f32 %v979_v11, %v13232_v30  ;;  %v1176_v37 = vmax.f32 %v980_v22, %v13233_v35 }
 0x1a7   : > { %v8109_v20 = vmax.f32 %v7965_v32, %v10350_v54  ;;  %v8110_v4 = vmax.f32 %v7966_v36, %v8062_v5  ;;  %v1399_v2 = vrot.slane %v1173_v57, 7  ;;  %v1849_v45 = vrot.slane %v1173_v57, 6 }
 0x1a8   : > { %v1400_v28 = vrot.slane %v1174_v41, 7  ;;  %v1640_v62 = vrot.slane %v1174_v41, 1  ;;  %v1402_v51 = vrot.slane %v1175_v27, 7  ;;  %v1641_v34 = vrot.slane %v1175_v27, 1 }
 0x1a9   : > { %v8141_v63 = vpack.c.bf16 %v8109_v20, %v8109_v20  ;;  %v8142_v1 = vpack.c.bf16 %v8110_v4, %v8110_v4  ;;  %v1643_v23 = vrot.slane %v1176_v37, 1  ;;  %v1850_v44 = vrot.slane %v1174_v41, 6 }
 0x1aa   : > { %v1401_v47 = vsel %vm1393_vm2, %v1399_v2, %v1400_v28  ;;  %v1852_v48 = vrot.slane %v1175_v27, 6  ;;  %v1403_v36 = vsel %vm1393_vm2, %v1400_v28, %v1402_v51  ;;  %v1642_v11 = vsel %vm1634_vm3, %v1640_v62, %v1641_v34 }
 0x1ab   : > { %v8213_v53 = vunpack.c.l.b16 %v8141_v63  ;;  %v8214_v54 = vunpack.c.l.b16 %v8142_v1  ;;  %v1508_v5 = vmax.f32 %v1174_v41, %v1401_v47  ;;  %v1509_v32 = vmax.f32 %v1175_v27, %v1403_v36  ;;  %v13236_v36 = vld [vmem:[#allocation26_spill] sm:$0xff] }
 0x1ac   : > { %v1644_v22 = vsel %vm1634_vm3, %v1641_v34, %v1643_v23  ;;  %v1851_v20 = vsel %vm1843_vm4, %v1849_v45, %v1850_v44  ;;  %v1853_v30 = vsel %vm1843_vm4, %v1850_v44, %v1852_v48  ;;  %v2058_v2 = vrot.slane %v1174_v41, 2  ;;  %v13234_v48 = vld [vmem:[#allocation24_spill] sm:$0xff] }
 0x1ad   : > { %v8230_v4 = vpack.c.b16 %v8214_v54, %v8213_v53  ;;  %v1749_v35 = vmax.f32 %v1508_v5, %v1642_v11  ;;  %v1750_v10 = vmax.f32 %v1509_v32, %v1644_v22  ;;  %v2059_v13 = vrot.slane %v1175_v27, 2  ;;  %v13235_v54 = vld [vmem:[#allocation25_spill] sm:$0xff]  ;;  %v13237_v32 = vld [vmem:[#allocation27_spill] sm:$0xff]  ;;  %v13238_v11 = vld [vmem:[#allocation16_spill] sm:$0xff] }
 0x1ae   : > { %v2061_v38 = vrot.slane %v1176_v37, 2  ;;  %v2569_v1 = vmax.f32 %v1173_v57, %v10041_v49  ;;  %v2570_v63 = vmax.f32 %v1174_v41, %v10051_v26  ;;  %v2571_v62 = vmax.f32 %v1175_v27, %v10054_v29 }
 0x1af   : > { %v8280_v28 = vsel %vm2317_vm1, %v8230_v4, 0  ;;  %v1958_v47 = vmax.f32 %v1749_v35, %v1851_v20  ;;  %v1959_v23 = vmax.f32 %v1750_v10, %v1853_v30  ;;  %v2060_v45 = vsel %vm2052_vm5, %v2058_v2, %v2059_v13  ;;  %v13239_v2 = vld [vmem:[#allocation19_spill] sm:$0xff] }
 0x1b0   : > { %8296 = vmatpush.bf16.xpose.msrb.mxu3 %v8280_v28  ;;  %v2062_v53 = vsel %vm2052_vm5, %v2059_v13, %v2061_v38  ;;  %v2572_v44 = vmax.f32 %v1176_v37, %v10132_v61  ;;  %v2765_v51 = vmax.f32 %v2569_v1, %v13234_v48  ;;  %v2766_v57 = vmax.f32 %v2570_v63, %v13235_v54 }
 0x1b1   : > { %v2167_v34 = vmax.f32 %v1958_v47, %v2060_v45  ;;  %v2767_v5 = vmax.f32 %v2571_v62, %v13236_v36  ;;  %v2168_v35 = vmax.f32 %v1959_v23, %v2062_v53  ;;  %v617_v27 = vmax.f32 %v13209_v17, %v13238_v11  ;;  %v13240_v47 = vld [vmem:[#allocation8_spill] sm:$0xff]  ;;  %v13242_v62 = vld [vmem:[#allocation9_spill] sm:$0xff] }
 0x1b2   : > { %v2768_v41 = vmax.f32 %v2572_v44, %v13237_v32  ;;  %v618_v10 = vmax.f32 %v13142_v43, %v13207_v56  ;;  %v2961_v38 = vmax.f32 %v2765_v51, %v10383_v59  ;;  %v2962_v13 = vmax.f32 %v2766_v57, %v10386_v14  ;;  %v13244_v45 = vld [vmem:[#allocation12_spill] sm:$0xff]  ;;  %v13250_v43 = vld [vmem:[#allocation83_spill] sm:$0xff]  ;;  %v13259_v59 = vld [vmem:[#allocation5_spill] sm:$0xff] }
 0x1b3   : > { %v2199_v30 = vpack.c.bf16 %v2167_v34, %v2167_v34  ;;  %v2963_v37 = vmax.f32 %v2767_v5, %v10388_v58  ;;  %v2200_v22 = vpack.c.bf16 %v2168_v35, %v2168_v35  ;;  %v619_v4 = vmax.f32 %v13038_v15, %v13208_v55  ;;  %v13246_v34 = vld [vmem:[#allocation13_spill] sm:$0xff]  ;;  %v13257_v56 = vld [vmem:[#allocation39_spill] sm:$0xff] }
 0x1b4   : > { %v2964_v20 = vmax.f32 %v2768_v41, %v10390_v31  ;;  %v620_v1 = vmax.f32 %v13210_v21, %v13239_v2  ;;  %v10458_v63 = vmax.f32 %v2961_v38, %v13240_v47  ;;  %v10461_v23 = vmax.f32 %v2962_v13, %v13242_v62  ;;  %v13249_v13 = vld [vmem:[#allocation81_spill] sm:$0xff] }
 0x1b5   : > { %v2271_v28 = vunpack.c.l.b16 %v2199_v30  ;;  %v10464_v53 = vmax.f32 %v2963_v37, %v13244_v45  ;;  %v2272_v44 = vunpack.c.l.b16 %v2200_v22  ;;  %v813_v57 = vmax.f32 %v617_v27, %v13141_v7  ;;  %v13248_v30 = vld [vmem:[#allocation80_spill] sm:$0xff]  ;;  %v13251_v7 = vld [vmem:[#allocation14_spill] sm:$0xff] }
 0x1b6   : > { %13241 = vst [vmem:[#allocation99_spill] sm:$0xff] %v10458_v63  ;;  %v10467_v51 = vmax.f32 %v2964_v20, %v13246_v34  ;;  %v814_v5 = vmax.f32 %v618_v10, %v13143_v8  ;;  %v815_v35 = vmax.f32 %v619_v4, %v13144_v9  ;;  %v816_v41 = vmax.f32 %v620_v1, %v13197_v46  ;;  %v13252_v8 = vld [vmem:[#allocation15_spill] sm:$0xff]  ;;  %v13253_v1 = vld [vmem:[#allocation85_spill] sm:$0xff]  ;;  %v13254_v9 = vld [vmem:[#allocation36_spill] sm:$0xff] }
 0x1b7   : > { %13243 = vst [vmem:[#allocation100_spill] sm:$0xff] %v10461_v23  ;;  %v5179_v38 = vmax.f32 %v13248_v30, %v13109_v52  ;;  %v5180_v15 = vmax.f32 %v13249_v13, %v9643_v50  ;;  %v2302_v37 = vpack.c.b16 %v2272_v44, %v2271_v28  ;;  %v1009_v22 = vmax.f32 %v813_v57, %v13072_v42  ;;  %v13255_v44 = vld [vmem:[#allocation37_spill] sm:$0xff]  ;;  %v13256_v13 = vld [vmem:[#allocation38_spill] sm:$0xff] }
 0x1b8   : > { %13245 = vst [vmem:[#allocation110_spill] sm:$0xff] %v10464_v53  ;;  %v1010_v20 = vmax.f32 %v814_v5, %v13073_v39  ;;  %v5181_v27 = vmax.f32 %v13250_v43, %v9648_v16  ;;  %v1011_v10 = vmax.f32 %v815_v35, %v13251_v7  ;;  %v1012_v4 = vmax.f32 %v816_v41, %v13252_v8 }
 0x1b9   : > { %13247 = vst [vmem:[#allocation16_spill] sm:$0xff] %v10467_v51  ;;  %v5182_v46 = vmax.f32 %v13253_v1, %v9650_v60  ;;  %v5375_v30 = vmax.f32 %v5179_v38, %v13254_v9  ;;  %v2325_v55 = vsel %vm2317_vm1, %v2302_v37, 0  ;;  %v1205_v28 = vmax.f32 %v1009_v22, %v13254_v9 }
 0x1ba   : > { %v1206_v57 = vmax.f32 %v1010_v20, %v13255_v44  ;;  %v5376_v5 = vmax.f32 %v5180_v15, %v13255_v44  ;;  %2375 = vmatpush.bf16.xpose.msra.mxu0 %v2325_v55  ;;  %v1207_v43 = vmax.f32 %v1011_v10, %v13256_v13  ;;  %v1208_v35 = vmax.f32 %v1012_v4, %v13257_v56 }
 0x1bb   : > { %v5377_v41 = vmax.f32 %v5181_v27, %v13256_v13  ;;  %v5378_v8 = vmax.f32 %v5182_v46, %v13257_v56  ;;  %v1439_v1 = vrot.slane %v1205_v28, 7  ;;  %v1889_v7 = vrot.slane %v1205_v28, 6 }
 0x1bc   : > { %v1440_v42 = vrot.slane %v1206_v57, 7  ;;  %v1680_v38 = vrot.slane %v1206_v57, 1  ;;  %v1442_v37 = vrot.slane %v1207_v43, 7  ;;  %v1681_v32 = vrot.slane %v1207_v43, 1 }
 0x1bd   : > { %v1683_v22 = vrot.slane %v1208_v35, 1  ;;  %v1890_v9 = vrot.slane %v1206_v57, 6  ;;  %v1892_v15 = vrot.slane %v1207_v43, 6  ;;  %v2098_v55 = vrot.slane %v1206_v57, 2 }
 0x1be   : > { %v1441_v20 = vsel %vm1393_vm2, %v1439_v1, %v1440_v42  ;;  %v2099_v44 = vrot.slane %v1207_v43, 2  ;;  %v1443_v10 = vsel %vm1393_vm2, %v1440_v42, %v1442_v37  ;;  %v1682_v27 = vsel %vm1634_vm3, %v1680_v38, %v1681_v32  ;;  %v13258_v1 = vld [vmem:[#allocation4_spill] sm:$0xff]  ;;  %v13260_v42 = vld [vmem:[#allocation6_spill] sm:$0xff] }
 0x1bf   : > { %v1524_v4 = vmax.f32 %v1206_v57, %v1441_v20  ;;  %v1684_v46 = vsel %vm1634_vm3, %v1681_v32, %v1683_v22  ;;  %v1525_v56 = vmax.f32 %v1207_v43, %v1443_v10  ;;  %v1891_v13 = vsel %vm1843_vm4, %v1889_v7, %v1890_v9  ;;  %v13261_v20 = vld [vmem:[#allocation7_spill] sm:$0xff] }
 0x1c0   : > { %v1893_v36 = vsel %vm1843_vm4, %v1890_v9, %v1892_v15  ;;  %v2100_v54 = vsel %vm2052_vm5, %v2098_v55, %v2099_v44  ;;  %v2101_v48 = vrot.slane %v1208_v35, 2  ;;  %v2601_v31 = vmax.f32 %v1205_v28, %v13258_v1  ;;  %v13262_v10 = vld [vmem:[#allocation59_spill] sm:$0xff]  ;;  %v13263_v15 = vld [vmem:[#allocation60_spill] sm:$0xff]  ;;  %v13265_v28 = vld [vmem:[#allocation62_spill] sm:$0xff] }
 0x1c1   : > { %v1765_v39 = vmax.f32 %v1524_v4, %v1682_v27  ;;  %v2602_v58 = vmax.f32 %v1206_v57, %v13259_v59  ;;  %v1766_v14 = vmax.f32 %v1525_v56, %v1684_v46  ;;  %v2603_v37 = vmax.f32 %v1207_v43, %v13260_v42  ;;  %v13264_v27 = vld [vmem:[#allocation61_spill] sm:$0xff] }
 0x1c2   : > { %v2604_v38 = vmax.f32 %v1208_v35, %v13261_v20  ;;  %v5571_v32 = vmax.f32 %v5375_v30, %v13221_v0  ;;  %v2102_v7 = vsel %vm2052_vm5, %v2099_v44, %v2101_v48  ;;  %v2797_v9 = vmax.f32 %v2601_v31, %v13262_v10  ;;  %v13268_v44 = vld [vmem:[#allocation64_spill] sm:$0xff] }
 0x1c3   : > { %v1974_v22 = vmax.f32 %v1765_v39, %v1891_v13  ;;  %v2798_v55 = vmax.f32 %v2602_v58, %v13263_v15  ;;  %v1975_v4 = vmax.f32 %v1766_v14, %v1893_v36  ;;  %v2799_v61 = vmax.f32 %v2603_v37, %v13264_v27  ;;  %v13266_v36 = vld [vmem:[#allocation63_spill] sm:$0xff]  ;;  %v13270_v37 = vld [vmem:[#allocation65_spill] sm:$0xff] }
 0x1c4   : > { %v2800_v1 = vmax.f32 %v2604_v38, %v13265_v28  ;;  %v5572_v56 = vmax.f32 %v5376_v5, %v13222_v24  ;;  %v2993_v43 = vmax.f32 %v2797_v9, %v13240_v47  ;;  %v5573_v39 = vmax.f32 %v5377_v41, %v13223_v12  ;;  %v13272_v38 = vld [vmem:[#allocation66_spill] sm:$0xff] }
 0x1c5   : > { %v2183_v57 = vmax.f32 %v1974_v22, %v2100_v54  ;;  %v2994_v35 = vmax.f32 %v2798_v55, %v13242_v62  ;;  %v2184_v30 = vmax.f32 %v1975_v4, %v2102_v7  ;;  %v2995_v48 = vmax.f32 %v2799_v61, %v13244_v45 }
 0x1c6   : > { %v2996_v31 = vmax.f32 %v2800_v1, %v13246_v34  ;;  %v5574_v14 = vmax.f32 %v5378_v8, %v13224_v3  ;;  %v10519_v13 = vmax.f32 %v2993_v43, %v13266_v36  ;;  %v10525_v54 = vmax.f32 %v5571_v32, %v13262_v10 }
 0x1c7   : > { %v2215_v58 = vpack.c.bf16 %v2183_v57, %v2183_v57  ;;  %v10522_v5 = vmax.f32 %v2994_v35, %v13268_v44  ;;  %v2216_v46 = vpack.c.bf16 %v2184_v30, %v2184_v30  ;;  %v10528_v41 = vmax.f32 %v2995_v48, %v13270_v37 }
 0x1c8   : > { %13267 = vst [vmem:[#allocation19_spill] sm:$0xff] %v10519_v13  ;;  %v10531_v61 = vmax.f32 %v2996_v31, %v13272_v38  ;;  %v10534_v1 = vmax.f32 %v5572_v56, %v13263_v15  ;;  %v10537_v22 = vmax.f32 %v5573_v39, %v13264_v27  ;;  %v10540_v7 = vmax.f32 %v5574_v14, %v13265_v28 }
 0x1c9   : > { %13269 = vst [vmem:[#allocation9_spill] sm:$0xff] %v10522_v5  ;;  %v2287_v8 = vunpack.c.l.b16 %v2215_v58  ;;  %v5997_v32 = vrot.slane %v10525_v54, 7  ;;  %v2288_v9 = vunpack.c.l.b16 %v2216_v46  ;;  %v6445_v57 = vrot.slane %v10525_v54, 6 }
 0x1ca   : > { %13271 = vst [vmem:[#allocation12_spill] sm:$0xff] %v10528_v41  ;;  %v5998_v55 = vrot.slane %v10534_v1, 7  ;;  %v6237_v4 = vrot.slane %v10534_v1, 1  ;;  %v6000_v43 = vrot.slane %v10537_v22, 7  ;;  %v6238_v56 = vrot.slane %v10537_v22, 1 }
 0x1cb   : > { %13273 = vst [vmem:[#allocation138_spill] sm:$0xff] %v10531_v61  ;;  %v6240_v35 = vrot.slane %v10540_v7, 1  ;;  %v6446_v39 = vrot.slane %v10534_v1, 6  ;;  %v2310_v30 = vpack.c.b16 %v2288_v9, %v2287_v8  ;;  %v6448_v31 = vrot.slane %v10537_v22, 6 }
 0x1cc   : > { %v5999_v48 = vsel %vm1393_vm2, %v5997_v32, %v5998_v55  ;;  %v6653_v14 = vrot.slane %v10534_v1, 2  ;;  %v6001_v58 = vsel %vm1393_vm2, %v5998_v55, %v6000_v43  ;;  %v6239_v38 = vsel %vm1634_vm3, %v6237_v4, %v6238_v56 }
 0x1cd   : > { %v6091_v46 = vmax.f32 %v10534_v1, %v5999_v48  ;;  %v6241_v37 = vsel %vm1634_vm3, %v6238_v56, %v6240_v35  ;;  %v2349_v44 = vsel %vm2317_vm1, %v2310_v30, 0  ;;  %v6092_v36 = vmax.f32 %v10537_v22, %v6001_v58 }
 0x1ce   : > { %v6447_v8 = vsel %vm1843_vm4, %v6445_v57, %v6446_v39  ;;  %v10561_v32 = vsel %vm1843_vm4, %v6446_v39, %v6448_v31  ;;  %2389 = vmatpush.bf16.xpose.msra.mxu1 %v2349_v44  ;;  %v6654_v61 = vrot.slane %v10537_v22, 2  ;;  %v6656_v55 = vrot.slane %v10540_v7, 2 }
 0x1cf   : > { %v6331_v9 = vmax.f32 %v6091_v46, %v6239_v38  ;;  %v6861_v43 = vrot.slane %v10525_v54, 5  ;;  %v6332_v4 = vmax.f32 %v6092_v36, %v6241_v37  ;;  %v6862_v56 = vrot.slane %v10534_v1, 5 }
 0x1d0   : > { %v6864_v35 = vrot.slane %v10537_v22, 5  ;;  %v7069_v30 = vrot.slane %v10534_v1, 3  ;;  %v10570_v57 = vsel %vm2052_vm5, %v6653_v14, %v6654_v61  ;;  %v6657_v44 = vsel %vm2052_vm5, %v6654_v61, %v6656_v55 }
 0x1d1   : > { %v6539_v48 = vmax.f32 %v6331_v9, %v6447_v8  ;;  %v7070_v38 = vrot.slane %v10537_v22, 3  ;;  %v6540_v39 = vmax.f32 %v6332_v4, %v10561_v32  ;;  %v6863_v58 = vsel %vm4241_vm6, %v6861_v43, %v6862_v56 }
 0x1d2   : > { %v6865_v36 = vsel %vm4241_vm6, %v6862_v56, %v6864_v35  ;;  %v7072_v37 = vrot.slane %v10540_v7, 3  ;;  %v7277_v8 = vrot.slane %v10525_v54, 4  ;;  %v7278_v9 = vrot.slane %v10534_v1, 4 }
 0x1d3   : > { %v6747_v46 = vmax.f32 %v6539_v48, %v10570_v57  ;;  %v7071_v41 = vsel %vm4450_vm7, %v7069_v30, %v7070_v38  ;;  %v6748_v5 = vmax.f32 %v6540_v39, %v6657_v44  ;;  %v7280_v55 = vrot.slane %v10537_v22, 4 }
 0x1d4   : > { %v7073_v61 = vsel %vm4450_vm7, %v7070_v38, %v7072_v37  ;;  %v7467_v4 = vrot.slane %v10540_v7, 4  ;;  %v7279_v56 = vsel %vm4659_vm8, %v7277_v8, %v7278_v9  ;;  %v7611_v13 = vrot.slane %v10525_v54, 3 }
 0x1d5   : > { %v6955_v43 = vmax.f32 %v6747_v46, %v6863_v58  ;;  %v7755_v48 = vrot.slane %v10540_v7, 5  ;;  %v6956_v28 = vmax.f32 %v6748_v5, %v6865_v36  ;;  %v7281_v27 = vsel %vm4659_vm8, %v7278_v9, %v7280_v55  ;;  %v13274_v46 = vld [vmem:[#allocation89_spill] sm:$0xff]  ;;  %v13275_v5 = vld [vmem:[#allocation92_spill] sm:$0xff] }
 0x1d6   : > { %v7468_v15 = vsel %vm4659_vm8, %v7280_v55, %v7467_v4  ;;  %v7899_v1 = vrot.slane %v10525_v54, 2  ;;  %v7612_v38 = vsel %vm4450_vm7, %v7611_v13, %v7069_v30  ;;  %v8043_v39 = vrot.slane %v10540_v7, 6  ;;  %v13277_v7 = vld [vmem:[#allocation79_spill] sm:$0xff] }
 0x1d7   : > { %v7163_v44 = vmax.f32 %v6955_v43, %v7071_v41  ;;  %v7756_v22 = vsel %vm4241_vm6, %v6864_v35, %v7755_v48  ;;  %v7164_v58 = vmax.f32 %v6956_v28, %v7073_v61  ;;  %v5211_v8 = vmax.f32 %v13274_v46, %v13209_v17  ;;  %v13276_v35 = vld [vmem:[#allocation56_spill] sm:$0xff] }
 0x1d8   : > { %v7900_v37 = vsel %vm2052_vm5, %v7899_v1, %v6653_v14  ;;  %v5214_v9 = vmax.f32 %v13275_v5, %v13210_v21  ;;  %v8044_v55 = vsel %vm1843_vm4, %v6448_v31, %v8043_v39  ;;  %v6038_v54 = vrot.slane %v10306_v18, 7 }
 0x1d9   : > { %v7371_v10 = vmax.f32 %v7163_v44, %v7279_v56  ;;  %v6040_v13 = vrot.slane %v10310_v40, 7  ;;  %v7372_v30 = vmax.f32 %v7164_v58, %v7281_v27  ;;  %v5407_v4 = vmax.f32 %v5211_v8, %v13276_v35 }
 0x1da   : > { %v5410_v28 = vmax.f32 %v5214_v9, %v13277_v7  ;;  %v6277_v14 = vrot.slane %v10306_v18, 1  ;;  %v6278_v48 = vrot.slane %v10310_v40, 1  ;;  %v6486_v56 = vrot.slane %v10306_v18, 6 }
 0x1db   : > { %v7515_v61 = vmax.f32 %v7371_v10, %v7281_v27  ;;  %v6041_v43 = vsel %vm1393_vm2, %v6038_v54, %v6040_v13  ;;  %v7516_v1 = vmax.f32 %v7372_v30, %v7468_v15  ;;  %v5603_v31 = vmax.f32 %v5407_v4, %v13238_v11 }
 0x1dc   : > { %v5606_v44 = vmax.f32 %v5410_v28, %v13239_v2  ;;  %v6108_v39 = vmax.f32 %v10310_v40, %v6041_v43  ;;  %v6279_v8 = vsel %vm1634_vm3, %v6277_v14, %v6278_v48  ;;  %v12858_v9 = vrot.slane %v10310_v40, 6 }
 0x1dd   : > { %v7659_v58 = vmax.f32 %v7515_v61, %v7612_v38  ;;  %v6693_v10 = vrot.slane %v10306_v18, 2  ;;  %v7660_v27 = vmax.f32 %v7516_v1, %v7071_v41  ;;  %v13278_v13 = vunpack.c.l.bf16 %v10184_v19 }
 0x1de   : > { %v13279_v46 = vunpack.c.h.bf16 %v10191_v6  ;;  %v6694_v30 = vrot.slane %v10310_v40, 2  ;;  %v10624_v38 = vsel %vm1843_vm4, %v6486_v56, %v12858_v9  ;;  %v6902_v28 = vrot.slane %v10306_v18, 5 }
 0x1df   : > { %v5799_v5 = vmax.f32 %v5603_v31, %v13278_v13  ;;  %v7803_v4 = vmax.f32 %v7659_v58, %v6865_v36  ;;  %v6904_v14 = vrot.slane %v10310_v40, 5  ;;  %v7804_v41 = vmax.f32 %v7660_v27, %v7756_v22 }
 0x1e0   : > { %v10618_v15 = vmax.f32 %v5606_v44, %v13279_v46  ;;  %v10630_v46 = vsel %vm2052_vm5, %v6693_v10, %v6694_v30 }
 0x1e1   : > { %v6037_v61 = vrot.slane %v5799_v5, 7  ;;  %v6485_v43 = vrot.slane %v5799_v5, 6  ;;  %v7947_v6 = vmax.f32 %v7803_v4, %v7900_v37  ;;  %v6901_v1 = vrot.slane %v5799_v5, 5 }
 0x1e2   : > { %v6280_v19 = vrot.slane %v10618_v15, 1  ;;  %v6696_v36 = vrot.slane %v10618_v15, 2  ;;  %v7948_v31 = vmax.f32 %v7804_v41, %v10570_v57  ;;  %v10642_v35 = vsel %vm4241_vm6, %v6902_v28, %v6904_v14 }
 0x1e3   : > { %v6039_v44 = vsel %vm1393_vm2, %v6037_v61, %v6038_v54  ;;  %v6487_v13 = vsel %vm1843_vm4, %v6485_v43, %v6486_v56  ;;  %v8091_v22 = vmax.f32 %v7947_v6, %v10561_v32  ;;  %v6903_v7 = vsel %vm4241_vm6, %v6901_v1, %v6902_v28 }
 0x1e4   : > { %v6281_v58 = vsel %vm1634_vm3, %v6278_v48, %v6280_v19  ;;  %v6107_v27 = vmax.f32 %v10306_v18, %v6039_v44  ;;  %v6697_v37 = vsel %vm2052_vm5, %v6694_v30, %v6696_v36  ;;  %v8092_v4 = vmax.f32 %v7948_v31, %v8044_v55 }
 0x1e5   : > { %v6348_v9 = vmax.f32 %v6108_v39, %v6281_v58  ;;  %v7109_v57 = vrot.slane %v10306_v18, 3  ;;  %v8123_v54 = vpack.c.bf16 %v8091_v22, %v8091_v22  ;;  %v7110_v56 = vrot.slane %v10310_v40, 3 }
 0x1e6   : > { %v6347_v41 = vmax.f32 %v6107_v27, %v6279_v8  ;;  %v8124_v32 = vpack.c.bf16 %v8092_v4, %v8092_v4  ;;  %v7112_v61 = vrot.slane %v10618_v15, 3  ;;  %v7317_v39 = vrot.slane %v5799_v5, 4 }
 0x1e7   : > { %v6556_v48 = vmax.f32 %v6348_v9, %v10624_v38  ;;  %v7318_v30 = vrot.slane %v10306_v18, 4  ;;  %v8195_v55 = vunpack.c.l.b16 %v8123_v54  ;;  %v7111_v28 = vsel %vm4450_vm7, %v7109_v57, %v7110_v56 }
 0x1e8   : > { %v6555_v19 = vmax.f32 %v6347_v41, %v6487_v13  ;;  %v8196_v6 = vunpack.c.l.b16 %v8124_v32  ;;  %v7113_v36 = vsel %vm4450_vm7, %v7110_v56, %v7112_v61  ;;  %v7320_v9 = vrot.slane %v10310_v40, 4  ;;  %v8818_v56 = vld [vmem:[#allocation2 + $0x28] sm:$0xff]  }
 0x1e9   : > { %v6764_v43 = vmax.f32 %v6556_v48, %v6697_v37  ;;  %v7319_v8 = vsel %vm4659_vm8, %v7317_v39, %v7318_v30  ;;  %v7483_v44 = vrot.slane %v10618_v15, 4  ;;  %v7627_v58 = vrot.slane %v5799_v5, 3  ;;  %v8817_v37 = vld [vmem:[#allocation2 + $0x20] sm:$0xff]  }
 0x1ea   : > { %v6763_v1 = vmax.f32 %v6555_v19, %v10630_v46  ;;  %v8221_v18 = vpack.c.b16 %v8196_v6, %v8195_v55  ;;  %v7321_v13 = vsel %vm4659_vm8, %v7318_v30, %v7320_v9  ;;  %v7771_v22 = vrot.slane %v10618_v15, 5 }
 0x1eb   : > { %v6972_v31 = vmax.f32 %v6764_v43, %v10642_v35  ;;  %v7915_v27 = vrot.slane %v5799_v5, 2  ;;  %v7484_v41 = vsel %vm4659_vm8, %v7320_v9, %v7483_v44  ;;  %v7628_v48 = vsel %vm4450_vm7, %v7627_v58, %v7109_v57  ;;  %v13284_v44 = vld [vmem:[#allocation114_spill] sm:$0xff] }
 0x1ec   : > { %v6971_v4 = vmax.f32 %v6763_v1, %v6903_v7  ;;  %v8253_v32 = vsel %vm2317_vm1, %v8221_v18, 0  ;;  %v7772_v61 = vsel %vm4241_vm6, %v6904_v14, %v7771_v22  ;;  %v8059_v55 = vrot.slane %v10618_v15, 6  ;;  %v13283_v1 = vld [vmem:[#allocation88_spill] sm:$0xff] }
 0x1ed   : > { %v7180_v54 = vmax.f32 %v6972_v31, %v7113_v36  ;;  %v7916_v39 = vsel %vm2052_vm5, %v7915_v27, %v6693_v10  ;;  %8283 = vmatpush.bf16.xpose.msrb.mxu2 %v8253_v32  ;;  %v10664_v5 = vunpack.c.l.bf16 %v8817_v37  ;;  %v10666_v7 = vunpack.c.h.bf16 %v8817_v37 }
 0x1ee   : > { %v7179_v30 = vmax.f32 %v6971_v4, %v7111_v28  ;;  %v13281_v43 = vrot.slane %v10310_v40, 6  ;;  %v10671_v6 = vunpack.c.l.bf16 %v8818_v56  ;;  %v10673_v36 = vunpack.c.h.bf16 %v8818_v56 }
 0x1ef   : > { %v7388_v19 = vmax.f32 %v7180_v54, %v7321_v13  ;;  %13280 = vst [vmem:[#allocation139_spill] sm:$0xff] %v10664_v5  ;;  %v581_v10 = vmax.f32 %v13221_v0, %v13227_v33  ;;  %v582_v9 = vmax.f32 %v13222_v24, %v9916_v25  ;;  %v583_v31 = vmax.f32 %v13223_v12, %v13283_v1 }
 0x1f0   : > { %v8060_v57 = vsel %vm1843_vm4, %v13281_v43, %v8059_v55  ;;  %13282 = vst [vmem:[#allocation140_spill] sm:$0xff] %v10673_v36  ;;  %v7387_v14 = vmax.f32 %v7179_v30, %v7319_v8  ;;  %v584_v40 = vmax.f32 %v13224_v3, %v13284_v44  ;;  %v13287_v43 = vld [vmem:[#allocation135_spill] sm:$0xff] }
 0x1f1   : > { %v7532_v15 = vmax.f32 %v7388_v19, %v7484_v41  ;;  %v777_v58 = vmax.f32 %v581_v10, %v13109_v52  ;;  %v778_v37 = vmax.f32 %v582_v9, %v9643_v50  ;;  %v779_v4 = vmax.f32 %v583_v31, %v9648_v16  ;;  %v13286_v19 = vld [vmem:[#allocation75_spill] sm:$0xff]  ;;  %v13294_v52 = vld [vmem:[#allocation20_spill] sm:$0xff] }
 0x1f2   : > { %v7531_v27 = vmax.f32 %v7387_v14, %v7321_v13  ;;  %v780_v54 = vmax.f32 %v584_v40, %v9650_v60  ;;  %v13285_v13 = vld [vmem:[#allocation126_spill] sm:$0xff]  ;;  %v13288_v60 = vld [vmem:[#allocation128_spill] sm:$0xff] }
 0x1f3   : > { %v7676_v8 = vmax.f32 %v7532_v15, %v7111_v28  ;;  %v973_v41 = vmax.f32 %v777_v58, %v10041_v49  ;;  %v974_v30 = vmax.f32 %v778_v37, %v10051_v26  ;;  %v975_v28 = vmax.f32 %v779_v4, %v10054_v29  ;;  %v13289_v14 = vld [vmem:[#allocation136_spill] sm:$0xff]  ;;  %v13290_v15 = vld [vmem:[#allocation129_spill] sm:$0xff] }
 0x1f4   : > { %v7675_v32 = vmax.f32 %v7531_v27, %v7628_v48  ;;  %v976_v50 = vmax.f32 %v780_v54, %v13285_v13  ;;  %v5164_v10 = vmax.f32 %v13288_v60, %v13287_v43  ;;  %v13291_v48 = vld [vmem:[#allocation76_spill] sm:$0xff]  ;;  %v13292_v58 = vld [vmem:[#allocation77_spill] sm:$0xff] }
 0x1f5   : > { %v7820_v55 = vmax.f32 %v7676_v8, %v7772_v61  ;;  %v1169_v16 = vmax.f32 %v973_v41, %v13286_v19  ;;  %v1170_v61 = vmax.f32 %v974_v30, %v13291_v48  ;;  %v1171_v27 = vmax.f32 %v975_v28, %v13292_v58  ;;  %v13293_v8 = vld [vmem:[#allocation78_spill] sm:$0xff] }
 0x1f6   : > { %v7819_v31 = vmax.f32 %v7675_v32, %v10642_v35  ;;  %v1172_v37 = vmax.f32 %v976_v50, %v13293_v8 }
 0x1f7   : > { %v7964_v40 = vmax.f32 %v7820_v55, %v10630_v46  ;;  %v1394_v4 = vrot.slane %v1169_v16, 7  ;;  %v1844_v54 = vrot.slane %v1169_v16, 6  ;;  %v2565_v41 = vmax.f32 %v1169_v16, %v13294_v52 }
 0x1f8   : > { %v7963_v18 = vmax.f32 %v7819_v31, %v7916_v39  ;;  %v1395_v22 = vrot.slane %v1170_v61, 7  ;;  %v1397_v19 = vrot.slane %v1171_v27, 7  ;;  %v1635_v60 = vrot.slane %v1170_v61, 1 }
 0x1f9   : > { %v8108_v56 = vmax.f32 %v7964_v40, %v8060_v57  ;;  %v1636_v9 = vrot.slane %v1171_v27, 1  ;;  %v1638_v51 = vrot.slane %v1172_v37, 1  ;;  %v1845_v35 = vrot.slane %v1170_v61, 6 }
 0x1fa   : > { %v8107_v46 = vmax.f32 %v7963_v18, %v10624_v38  ;;  %v1396_v55 = vsel %vm1393_vm2, %v1394_v4, %v1395_v22  ;;  %v1398_v30 = vsel %vm1393_vm2, %v1395_v22, %v1397_v19  ;;  %v1847_v40 = vrot.slane %v1171_v27, 6 }
 0x1fb   : > { %v8140_v32 = vpack.c.bf16 %v8108_v56, %v8108_v56  ;;  %v1506_v28 = vmax.f32 %v1170_v61, %v1396_v55  ;;  %v1507_v50 = vmax.f32 %v1171_v27, %v1398_v30  ;;  %v1637_v8 = vsel %vm1634_vm3, %v1635_v60, %v1636_v9 }
 0x1fc   : > { %v1639_v39 = vsel %vm1634_vm3, %v1636_v9, %v1638_v51  ;;  %v8139_v57 = vpack.c.bf16 %v8107_v46, %v8107_v46  ;;  %v1846_v31 = vsel %vm1843_vm4, %v1844_v54, %v1845_v35  ;;  %v2053_v63 = vrot.slane %v1170_v61, 2  ;;  %v13295_v46 = vld [vmem:[#allocation137_spill] sm:$0xff] }
 0x1fd   : > { %v8212_v16 = vunpack.c.l.b16 %v8140_v32  ;;  %v1747_v58 = vmax.f32 %v1506_v28, %v1637_v8  ;;  %v1748_v48 = vmax.f32 %v1507_v50, %v1639_v39  ;;  %v2054_v38 = vrot.slane %v1171_v27, 2  ;;  %v13296_v32 = vld [vmem:[#allocation32_spill] sm:$0xff]  ;;  %v13297_v39 = vld [vmem:[#allocation33_spill] sm:$0xff] }
 0x1fe   : > { %v8211_v18 = vunpack.c.l.b16 %v8139_v57  ;;  %v1848_v56 = vsel %vm1843_vm4, %v1845_v35, %v1847_v40  ;;  %v2056_v4 = vrot.slane %v1172_v37, 2  ;;  %v2566_v22 = vmax.f32 %v1170_v61, %v13287_v43  ;;  %v13298_v57 = vld [vmem:[#allocation34_spill] sm:$0xff] }
 0x1ff   : > { %v1956_v19 = vmax.f32 %v1747_v58, %v1846_v31  ;;  %v1957_v55 = vmax.f32 %v1748_v48, %v1848_v56  ;;  %v2055_v60 = vsel %vm2052_vm5, %v2053_v63, %v2054_v38  ;;  %v2567_v51 = vmax.f32 %v1171_v27, %v13289_v14  ;;  %v13299_v48 = vld [vmem:[#allocation35_spill] sm:$0xff]  ;;  %v13302_v56 = vld [vmem:[#allocation24_spill] sm:$0xff] }
 0x200   : > { %v8229_v9 = vpack.c.b16 %v8212_v16, %v8211_v18  ;;  %v2057_v54 = vsel %vm2052_vm5, %v2054_v38, %v2056_v4  ;;  %v2568_v8 = vmax.f32 %v1172_v37, %v13295_v46  ;;  %v2761_v30 = vmax.f32 %v2565_v41, %v13296_v32 }
 0x201   : > { %v2165_v28 = vmax.f32 %v1956_v19, %v2055_v60  ;;  %v2166_v50 = vmax.f32 %v1957_v55, %v2057_v54  ;;  %v2762_v35 = vmax.f32 %v2566_v22, %v13297_v39  ;;  %v2763_v40 = vmax.f32 %v2567_v51, %v13298_v57  ;;  %v13306_v55 = vld [vmem:[#allocation11_spill] sm:$0xff]  ;;  %v13307_v54 = vld [vmem:[#allocation25_spill] sm:$0xff] }
 0x202   : > { %v8277_v61 = vsel %vm2317_vm1, %v8229_v9, 0  ;;  %v2764_v58 = vmax.f32 %v2568_v8, %v13299_v48  ;;  %v2957_v63 = vmax.f32 %v2761_v30, %v10664_v5  ;;  %v13300_v27 = vmax.f32 %v10461_v23, %v10666_v7  ;;  %v13309_v30 = vld [vmem:[#allocation26_spill] sm:$0xff] }
 0x203   : > { %8297 = vmatpush.bf16.xpose.msrb.mxu3 %v8277_v61  ;;  %v2197_v37 = vpack.c.bf16 %v2165_v28, %v2165_v28  ;;  %v2198_v41 = vpack.c.bf16 %v2166_v50, %v2166_v50  ;;  %v2958_v31 = vmax.f32 %v2762_v35, %v10666_v7  ;;  %v2959_v38 = vmax.f32 %v2763_v40, %v10671_v6  ;;  %v13311_v50 = vld [vmem:[#allocation27_spill] sm:$0xff]  ;;  %v13313_v40 = vld [vmem:[#allocation14_spill] sm:$0xff] }
 0x204   : > { %v10732_v16 = vmax.f32 %v13300_v27, %v13259_v59  ;;  %v2960_v18 = vmax.f32 %v2764_v58, %v10673_v36  ;;  %v10738_v4 = vmax.f32 %v2957_v63, %v13302_v56  ;;  %v13304_v22 = vmax.f32 %v10464_v53, %v10671_v6  ;;  %v13315_v27 = vld [vmem:[#allocation10_spill] sm:$0xff]  ;;  %v13318_v53 = vld [vmem:[#allocation15_spill] sm:$0xff] }
 0x205   : > { %v5360_v60 = vmax.f32 %v5164_v10, %v13306_v55  ;;  %v2269_v51 = vunpack.c.l.b16 %v2197_v37  ;;  %v2270_v9 = vunpack.c.l.b16 %v2198_v41  ;;  %v10748_v8 = vmax.f32 %v2958_v31, %v13307_v54  ;;  %v13316_v41 = vld [vmem:[#allocation17_spill] sm:$0xff]  ;;  %v13329_v5 = vld [vmem:[#allocation30_spill] sm:$0xff] }
 0x206   : > { %13301 = vst [vmem:[#allocation88_spill] sm:$0xff] %v10732_v16  ;;  %v10744_v19 = vmax.f32 %v13304_v22, %v13260_v42  ;;  %v10751_v28 = vmax.f32 %v2959_v38, %v13309_v30  ;;  %v10754_v35 = vmax.f32 %v2960_v18, %v13311_v50  ;;  %v13314_v61 = vmax.f32 %v13290_v15, %v13289_v14  ;;  %v13317_v38 = vld [vmem:[#allocation18_spill] sm:$0xff] }
 0x207   : > { %13303 = vst [vmem:[#allocation114_spill] sm:$0xff] %v10738_v4  ;;  %v5556_v63 = vmax.f32 %v5360_v60, %v10666_v7  ;;  %v613_v10 = vmax.f32 %v13238_v11, %v13315_v27  ;;  %v2301_v37 = vpack.c.b16 %v2270_v9, %v2269_v51  ;;  %v614_v31 = vmax.f32 %v13316_v41, %v13306_v55  ;;  %v13320_v60 = vld [vmem:[#allocation40_spill] sm:$0xff]  ;;  %v13321_v9 = vld [vmem:[#allocation21_spill] sm:$0xff]  ;;  %v13322_v15 = vld [vmem:[#allocation22_spill] sm:$0xff] }
 0x208   : > { %13305 = vst [vmem:[#allocation141_spill] sm:$0xff] %v10744_v19  ;;  %v5361_v58 = vmax.f32 %v13314_v61, %v13313_v40  ;;  %v615_v22 = vmax.f32 %v13317_v38, %v13313_v40  ;;  %v616_v18 = vmax.f32 %v13239_v2, %v13318_v53  ;;  %v3412_v61 = vrot.slane %v13320_v60, 7  ;;  %v13326_v19 = vld [vmem:[#allocation42_spill] sm:$0xff] }
 0x209   : > { %13308 = vst [vmem:[#allocation142_spill] sm:$0xff] %v10748_v8  ;;  %v809_v7 = vmax.f32 %v613_v10, %v13209_v17  ;;  %v2322_v51 = vsel %vm2317_vm1, %v2301_v37, 0  ;;  %v810_v4 = vmax.f32 %v614_v31, %v13321_v9  ;;  %v3415_v10 = vrot.slane %v13326_v19, 7  ;;  %v13328_v8 = vld [vmem:[#allocation29_spill] sm:$0xff]  ;;  %v13334_v9 = vld [vmem:[#allocation39_spill] sm:$0xff] }
 0x20a   : > { %13310 = vst [vmem:[#allocation143_spill] sm:$0xff] %v10751_v28  ;;  %v5557_v23 = vmax.f32 %v5361_v58, %v10671_v6  ;;  %v811_v48 = vmax.f32 %v615_v22, %v13322_v15  ;;  %v812_v57 = vmax.f32 %v616_v18, %v13210_v21  ;;  %2376 = vmatpush.bf16.xpose.msra.mxu0 %v2322_v51  ;;  %v13324_v6 = vld [vmem:[#allocation4_spill] sm:$0xff] }
 0x20b   : > { %13312 = vst [vmem:[#allocation144_spill] sm:$0xff] %v10754_v35  ;;  %v10771_v35 = vmax.f32 %v5556_v63, %v13316_v41  ;;  %v1005_v58 = vmax.f32 %v809_v7, %v13324_v6  ;;  %v13325_v63 = vld [vmem:[#allocation41_spill] sm:$0xff]  ;;  %v1006_v16 = vmax.f32 %v810_v4, %v13259_v59  ;;  %v13327_v28 = vld [vmem:[#allocation28_spill] sm:$0xff]  ;;  %v3653_v7 = vrot.slane %v13326_v19, 1 }
 0x20c   : > { %v10780_v39 = vmax.f32 %v5557_v23, %v13317_v38  ;;  %v3413_v32 = vrot.slane %v13325_v63, 7  ;;  %v1007_v37 = vmax.f32 %v811_v48, %v13260_v42  ;;  %v1008_v31 = vmax.f32 %v812_v57, %v13261_v20 }
 0x20d   : > { %13319 = vst [vmem:[#allocation17_spill] sm:$0xff] %v10771_v35  ;;  %v3652_v22 = vrot.slane %v13325_v63, 1  ;;  %v1201_v18 = vmax.f32 %v1005_v58, %v13327_v28  ;;  %v1202_v36 = vmax.f32 %v1006_v16, %v13328_v8  ;;  %v13330_v35 = vld [vmem:[#allocation31_spill] sm:$0xff] }
 0x20e   : > { %13323 = vst [vmem:[#allocation18_spill] sm:$0xff] %v10780_v39  ;;  %v3414_v51 = vsel %vm1393_vm2, %v3412_v61, %v3413_v32  ;;  %v3416_v23 = vsel %vm1393_vm2, %v3413_v32, %v3415_v10  ;;  %v1203_v39 = vmax.f32 %v1007_v37, %v13329_v5  ;;  %v1204_v4 = vmax.f32 %v1008_v31, %v13330_v35 }
 0x20f   : > { %v3503_v48 = vmax.f32 %v13325_v63, %v3414_v51  ;;  %v1434_v46 = vrot.slane %v1201_v18, 7  ;;  %v1884_v57 = vrot.slane %v1201_v18, 6  ;;  %v2597_v52 = vmax.f32 %v1201_v18, %v13240_v47 }
 0x210   : > { %v3504_v58 = vmax.f32 %v13326_v19, %v3416_v23  ;;  %v1435_v14 = vrot.slane %v1202_v36, 7  ;;  %v1437_v61 = vrot.slane %v1203_v39, 7  ;;  %v1675_v43 = vrot.slane %v1202_v36, 1 }
 0x211   : > { %v1676_v32 = vrot.slane %v1203_v39, 1  ;;  %v1678_v10 = vrot.slane %v1204_v4, 1  ;;  %v1885_v20 = vrot.slane %v1202_v36, 6  ;;  %v1887_v42 = vrot.slane %v1203_v39, 6 }
 0x212   : > { %v2093_v16 = vrot.slane %v1202_v36, 2  ;;  %v1436_v37 = vsel %vm1393_vm2, %v1434_v46, %v1435_v14  ;;  %v1438_v31 = vsel %vm1393_vm2, %v1435_v14, %v1437_v61  ;;  %v2094_v59 = vrot.slane %v1203_v39, 2 }
 0x213   : > { %v1677_v51 = vsel %vm1634_vm3, %v1675_v43, %v1676_v32  ;;  %v1522_v6 = vmax.f32 %v1202_v36, %v1436_v37  ;;  %v1523_v13 = vmax.f32 %v1203_v39, %v1438_v31  ;;  %v1679_v18 = vsel %vm1634_vm3, %v1676_v32, %v1678_v10  ;;  %v13331_v37 = vld [vmem:[#allocation36_spill] sm:$0xff]  ;;  %v13332_v32 = vld [vmem:[#allocation37_spill] sm:$0xff] }
 0x214   : > { %v1886_v23 = vsel %vm1843_vm4, %v1884_v57, %v1885_v20  ;;  %v1888_v47 = vsel %vm1843_vm4, %v1885_v20, %v1887_v42  ;;  %v2095_v29 = vsel %vm2052_vm5, %v2093_v16, %v2094_v59  ;;  %v2096_v26 = vrot.slane %v1204_v4, 2  ;;  %v13333_v16 = vld [vmem:[#allocation38_spill] sm:$0xff] }
 0x215   : > { %v2598_v49 = vmax.f32 %v1202_v36, %v13242_v62  ;;  %v1763_v21 = vmax.f32 %v1522_v6, %v1677_v51  ;;  %v1764_v46 = vmax.f32 %v1523_v13, %v1679_v18  ;;  %v2599_v14 = vmax.f32 %v1203_v39, %v13244_v45  ;;  %v13335_v6 = vld [vmem:[#allocation43_spill] sm:$0xff] }
 0x216   : > { %v2600_v43 = vmax.f32 %v1204_v4, %v13246_v34  ;;  %v2097_v61 = vsel %vm2052_vm5, %v2094_v59, %v2096_v26  ;;  %v2793_v31 = vmax.f32 %v2597_v52, %v13331_v37  ;;  %v3654_v57 = vsel %vm1634_vm3, %v3652_v22, %v3653_v7  ;;  %v13336_v22 = vld [vmem:[#allocation59_spill] sm:$0xff] }
 0x217   : > { %v2794_v10 = vmax.f32 %v2598_v49, %v13332_v32  ;;  %v1972_v42 = vmax.f32 %v1763_v21, %v1886_v23  ;;  %v1973_v20 = vmax.f32 %v1764_v46, %v1888_v47  ;;  %v2795_v15 = vmax.f32 %v2599_v14, %v13333_v16  ;;  %v13338_v47 = vld [vmem:[#allocation60_spill] sm:$0xff] }
 0x218   : > { %v2796_v36 = vmax.f32 %v2600_v43, %v13334_v9  ;;  %v2989_v13 = vmax.f32 %v2793_v31, %v13302_v56  ;;  %v3655_v4 = vrot.slane %v13335_v6, 1  ;;  %v3743_v51 = vmax.f32 %v3503_v48, %v3654_v57  ;;  %v13340_v31 = vld [vmem:[#allocation61_spill] sm:$0xff] }
 0x219   : > { %v2990_v39 = vmax.f32 %v2794_v10, %v13307_v54  ;;  %v2181_v26 = vmax.f32 %v1972_v42, %v2095_v29  ;;  %v2182_v59 = vmax.f32 %v1973_v20, %v2097_v61  ;;  %v2991_v52 = vmax.f32 %v2795_v15, %v13309_v30  ;;  %v13342_v29 = vld [vmem:[#allocation62_spill] sm:$0xff] }
 0x21a   : > { %v2992_v49 = vmax.f32 %v2796_v36, %v13311_v50  ;;  %v10821_v21 = vmax.f32 %v2989_v13, %v13336_v22  ;;  %v3656_v23 = vsel %vm1634_vm3, %v3653_v7, %v3655_v4  ;;  %v3860_v46 = vrot.slane %v13320_v60, 6 }
 0x21b   : > { %v10824_v18 = vmax.f32 %v2990_v39, %v13338_v47  ;;  %v2213_v14 = vpack.c.bf16 %v2181_v26, %v2181_v26  ;;  %v2214_v43 = vpack.c.bf16 %v2182_v59, %v2182_v59  ;;  %v10829_v48 = vmax.f32 %v2991_v52, %v13340_v31 }
 0x21c   : > { %13337 = vst [vmem:[#allocation40_spill] sm:$0xff] %v10821_v21  ;;  %v10832_v61 = vmax.f32 %v2992_v49, %v13342_v29  ;;  %v3744_v15 = vmax.f32 %v3504_v58, %v3656_v23  ;;  %v3861_v10 = vrot.slane %v13325_v63, 6  ;;  %v3863_v57 = vrot.slane %v13326_v19, 6 }
 0x21d   : > { %13339 = vst [vmem:[#allocation41_spill] sm:$0xff] %v10824_v18  ;;  %v4068_v42 = vrot.slane %v13325_v63, 2  ;;  %v2285_v20 = vunpack.c.l.b16 %v2213_v14  ;;  %v2286_v36 = vunpack.c.l.b16 %v2214_v43  ;;  %v4069_v7 = vrot.slane %v13326_v19, 2 }
 0x21e   : > { %13341 = vst [vmem:[#allocation42_spill] sm:$0xff] %v10829_v48  ;;  %v4071_v13 = vrot.slane %v13335_v6, 2  ;;  %v3862_v39 = vsel %vm1843_vm4, %v3860_v46, %v3861_v10  ;;  %v3864_v4 = vsel %vm1843_vm4, %v3861_v10, %v3863_v57  ;;  %v4277_v26 = vrot.slane %v13320_v60, 5 }
 0x21f   : > { %13343 = vst [vmem:[#allocation28_spill] sm:$0xff] %v10832_v61  ;;  %v4278_v58 = vrot.slane %v13325_v63, 5  ;;  %v2309_v59 = vpack.c.b16 %v2286_v36, %v2285_v20  ;;  %v3951_v52 = vmax.f32 %v3743_v51, %v3862_v39  ;;  %v3952_v49 = vmax.f32 %v3744_v15, %v3864_v4 }
 0x220   : > { %v4070_v22 = vsel %vm2052_vm5, %v4068_v42, %v4069_v7  ;;  %v4072_v47 = vsel %vm2052_vm5, %v4069_v7, %v4071_v13  ;;  %v4280_v14 = vrot.slane %v13326_v19, 5  ;;  %v4486_v43 = vrot.slane %v13325_v63, 3 }
 0x221   : > { %v4279_v23 = vsel %vm4241_vm6, %v4277_v26, %v4278_v58  ;;  %v2346_v46 = vsel %vm2317_vm1, %v2309_v59, 0  ;;  %v4159_v31 = vmax.f32 %v3951_v52, %v4070_v22  ;;  %v4160_v29 = vmax.f32 %v3952_v49, %v4072_v47  ;;  %v13344_v59 = vld [vmem:[#allocation82_spill] sm:$0xff]  ;;  %v13345_v22 = vld [vmem:[#allocation84_spill] sm:$0xff] }
 0x222   : > { %v4487_v10 = vrot.slane %v13326_v19, 3  ;;  %2390 = vmatpush.bf16.xpose.msra.mxu1 %v2346_v46  ;;  %v4281_v51 = vsel %vm4241_vm6, %v4278_v58, %v4280_v14  ;;  %v4489_v15 = vrot.slane %v13335_v6, 3  ;;  %v4695_v57 = vrot.slane %v13320_v60, 4 }
 0x223   : > { %v4696_v42 = vrot.slane %v13325_v63, 4  ;;  %v4368_v20 = vmax.f32 %v4159_v31, %v4279_v23  ;;  %v4369_v36 = vmax.f32 %v4160_v29, %v4281_v51  ;;  %v4698_v13 = vrot.slane %v13326_v19, 4  ;;  %v13346_v23 = vld [vmem:[#allocation86_spill] sm:$0xff]  ;;  %v13347_v29 = vld [vmem:[#allocation87_spill] sm:$0xff] }
 0x224   : > { %v4488_v7 = vsel %vm4450_vm7, %v4486_v43, %v4487_v10  ;;  %v4490_v39 = vsel %vm4450_vm7, %v4487_v10, %v4489_v15  ;;  %v4882_v26 = vrot.slane %v13335_v6, 4  ;;  %v3452_v58 = vrot.slane %v13344_v59, 7 }
 0x225   : > { %v4697_v4 = vsel %vm4659_vm8, %v4695_v57, %v4696_v42  ;;  %v4577_v52 = vmax.f32 %v4368_v20, %v4488_v7  ;;  %v4578_v49 = vmax.f32 %v4369_v36, %v4490_v39  ;;  %v4699_v60 = vsel %vm4659_vm8, %v4696_v42, %v4698_v13 }
 0x226   : > { %v3453_v63 = vrot.slane %v13345_v22, 7  ;;  %v4883_v47 = vsel %vm4659_vm8, %v4698_v13, %v4882_v26  ;;  %v3455_v14 = vrot.slane %v13346_v23, 7  ;;  %v3692_v19 = vrot.slane %v13345_v22, 1 }
 0x227   : > { %v3693_v43 = vrot.slane %v13346_v23, 1  ;;  %v4786_v46 = vmax.f32 %v4577_v52, %v4697_v4  ;;  %v4787_v31 = vmax.f32 %v4578_v49, %v4699_v60  ;;  %v3695_v10 = vrot.slane %v13347_v29, 1 }
 0x228   : > { %v3454_v6 = vsel %vm1393_vm2, %v3452_v58, %v3453_v63  ;;  %v3456_v51 = vsel %vm1393_vm2, %v3453_v63, %v3455_v14  ;;  %v3900_v42 = vrot.slane %v13344_v59, 6  ;;  %v3901_v4 = vrot.slane %v13345_v22, 6 }
 0x229   : > { %v3519_v15 = vmax.f32 %v13345_v22, %v3454_v6  ;;  %v3694_v57 = vsel %vm1634_vm3, %v3692_v19, %v3693_v43  ;;  %v4930_v20 = vmax.f32 %v4786_v46, %v4699_v60  ;;  %v4931_v36 = vmax.f32 %v4787_v31, %v4883_v47 }
 0x22a   : > { %v3520_v7 = vmax.f32 %v13346_v23, %v3456_v51  ;;  %v3696_v13 = vsel %vm1634_vm3, %v3693_v43, %v3695_v10  ;;  %v3903_v26 = vrot.slane %v13346_v23, 6  ;;  %v4108_v58 = vrot.slane %v13345_v22, 2 }
 0x22b   : > { %v3759_v39 = vmax.f32 %v3519_v15, %v3694_v57  ;;  %v4962_v52 = vpack.c.bf16 %v4930_v20, %v4930_v20  ;;  %v4963_v49 = vpack.c.bf16 %v4931_v36, %v4931_v36  ;;  %v4109_v14 = vrot.slane %v13346_v23, 2 }
 0x22c   : > { %v3760_v63 = vmax.f32 %v3520_v7, %v3696_v13  ;;  %v3902_v19 = vsel %vm1843_vm4, %v3900_v42, %v3901_v4  ;;  %v3904_v60 = vsel %vm1843_vm4, %v3901_v4, %v3903_v26  ;;  %v4111_v47 = vrot.slane %v13347_v29, 2 }
 0x22d   : > { %v4317_v43 = vrot.slane %v13344_v59, 5  ;;  %v5034_v46 = vunpack.c.l.b16 %v4962_v52  ;;  %v5035_v31 = vunpack.c.l.b16 %v4963_v49  ;;  %v3967_v6 = vmax.f32 %v3759_v39, %v3902_v19 }
 0x22e   : > { %v3968_v10 = vmax.f32 %v3760_v63, %v3904_v60  ;;  %v4110_v51 = vsel %vm2052_vm5, %v4108_v58, %v4109_v14  ;;  %v4112_v15 = vsel %vm2052_vm5, %v4109_v14, %v4111_v47  ;;  %v4318_v57 = vrot.slane %v13345_v22, 5 }
 0x22f   : > { %v4320_v20 = vrot.slane %v13346_v23, 5  ;;  %v5059_v36 = vpack.c.b16 %v5035_v31, %v5034_v46  ;;  %v4175_v42 = vmax.f32 %v3967_v6, %v4110_v51  ;;  %v4526_v13 = vrot.slane %v13345_v22, 3 }
 0x230   : > { %v4176_v7 = vmax.f32 %v3968_v10, %v4112_v15  ;;  %v4319_v4 = vsel %vm4241_vm6, %v4317_v43, %v4318_v57  ;;  %v4527_v39 = vrot.slane %v13346_v23, 3  ;;  %v4529_v52 = vrot.slane %v13347_v29, 3  ;;  %v13348_v10 = vld [vmem:[#allocation93_spill] sm:$0xff] }
 0x231   : > { %v4321_v26 = vsel %vm4241_vm6, %v4318_v57, %v4320_v20  ;;  %v5093_v58 = vsel %vm2317_vm1, %v5059_v36, 0  ;;  %v4384_v49 = vmax.f32 %v4175_v42, %v4319_v4  ;;  %v4735_v14 = vrot.slane %v13344_v59, 4  ;;  %v13349_v57 = vld [vmem:[#allocation94_spill] sm:$0xff]  ;;  %v13350_v36 = vld [vmem:[#allocation95_spill] sm:$0xff] }
 0x232   : > { %v4385_v63 = vmax.f32 %v4176_v7, %v4321_v26  ;;  %5119 = vmatpush.bf16.xpose.msrb.mxu0 %v5093_v58  ;;  %v4528_v19 = vsel %vm4450_vm7, %v4526_v13, %v4527_v39  ;;  %v4530_v60 = vsel %vm4450_vm7, %v4527_v39, %v4529_v52  ;;  %v4736_v47 = vrot.slane %v13345_v22, 4  ;;  %v13351_v13 = vld [vmem:[#allocation96_spill] sm:$0xff]  ;;  %v13352_v39 = vld [vmem:[#allocation101_spill] sm:$0xff] }
 0x233   : > { %v4738_v43 = vrot.slane %v13346_v23, 4  ;;  %v4593_v46 = vmax.f32 %v4384_v49, %v4528_v19  ;;  %v4898_v6 = vrot.slane %v13347_v29, 4  ;;  %v5175_v51 = vmax.f32 %v13348_v10, %v13221_v0  ;;  %v13353_v49 = vld [vmem:[#allocation102_spill] sm:$0xff] }
 0x234   : > { %v4594_v31 = vmax.f32 %v4385_v63, %v4530_v60  ;;  %v4737_v15 = vsel %vm4659_vm8, %v4735_v14, %v4736_v47  ;;  %v5176_v20 = vmax.f32 %v13349_v57, %v13222_v24  ;;  %v5177_v42 = vmax.f32 %v13350_v36, %v13223_v12  ;;  %v13354_v60 = vld [vmem:[#allocation103_spill] sm:$0xff] }
 0x235   : > { %v4739_v59 = vsel %vm4659_vm8, %v4736_v47, %v4738_v43  ;;  %v4802_v22 = vmax.f32 %v4593_v46, %v4737_v15  ;;  %v4899_v23 = vsel %vm4659_vm8, %v4738_v43, %v4898_v6  ;;  %v5178_v29 = vmax.f32 %v13351_v13, %v13224_v3  ;;  %v13355_v6 = vld [vmem:[#allocation104_spill] sm:$0xff] }
 0x236   : > { %v4803_v7 = vmax.f32 %v4594_v31, %v4739_v59  ;;  %v5371_v4 = vmax.f32 %v5175_v51, %v13327_v28  ;;  %v5372_v0 = vmax.f32 %v5176_v20, %v13328_v8  ;;  %v5373_v26 = vmax.f32 %v5177_v42, %v13329_v5  ;;  %v13356_v20 = vld [vmem:[#allocation52_spill] sm:$0xff] }
 0x237   : > { %v5207_v52 = vmax.f32 %v13352_v39, %v13238_v11  ;;  %v4946_v24 = vmax.f32 %v4802_v22, %v4739_v59  ;;  %v5374_v12 = vmax.f32 %v5178_v29, %v13330_v35  ;;  %v5208_v63 = vmax.f32 %v13353_v49, %v13316_v41  ;;  %v13357_v29 = vld [vmem:[#allocation53_spill] sm:$0xff] }
 0x238   : > { %v4947_v58 = vmax.f32 %v4803_v7, %v4899_v23  ;;  %v5567_v14 = vmax.f32 %v5371_v4, %v13227_v33  ;;  %v5568_v3 = vmax.f32 %v5372_v0, %v9916_v25  ;;  %v5569_v19 = vmax.f32 %v5373_v26, %v13283_v1 }
 0x239   : > { %v4978_v43 = vpack.c.bf16 %v4946_v24, %v4946_v24  ;;  %v5570_v31 = vmax.f32 %v5374_v12, %v13284_v44  ;;  %v10935_v42 = vmax.f32 %v5207_v52, %v13356_v20  ;;  %v10941_v4 = vmax.f32 %v5208_v63, %v13357_v29 }
 0x23a   : > { %v4979_v46 = vpack.c.bf16 %v4947_v58, %v4947_v58  ;;  %v10926_v15 = vmax.f32 %v5567_v14, %v13331_v37  ;;  %v10929_v41 = vmax.f32 %v5568_v3, %v13332_v32  ;;  %v10932_v59 = vmax.f32 %v5569_v19, %v13333_v16 }
 0x23b   : > { %v5050_v22 = vunpack.c.l.b16 %v4978_v43  ;;  %v10938_v23 = vmax.f32 %v5570_v31, %v13334_v9 }
 0x23c   : > { %v5051_v7 = vunpack.c.l.b16 %v4979_v46  ;;  %v5992_v37 = vrot.slane %v10926_v15, 7  ;;  %v5993_v0 = vrot.slane %v10929_v41, 7  ;;  %v5995_v32 = vrot.slane %v10932_v59, 7 }
 0x23d   : > { %v6232_v16 = vrot.slane %v10929_v41, 1  ;;  %v6233_v52 = vrot.slane %v10932_v59, 1  ;;  %v6235_v24 = vrot.slane %v10938_v23, 1  ;;  %v6440_v58 = vrot.slane %v10926_v15, 6 }
 0x23e   : > { %v5067_v26 = vpack.c.b16 %v5051_v7, %v5050_v22  ;;  %v5994_v9 = vsel %vm1393_vm2, %v5992_v37, %v5993_v0  ;;  %v5996_v12 = vsel %vm1393_vm2, %v5993_v0, %v5995_v32  ;;  %v6441_v63 = vrot.slane %v10929_v41, 6 }
 0x23f   : > { %v6443_v14 = vrot.slane %v10932_v59, 6  ;;  %v6089_v19 = vmax.f32 %v10929_v41, %v5994_v9  ;;  %v6090_v43 = vmax.f32 %v10932_v59, %v5996_v12  ;;  %v6234_v46 = vsel %vm1634_vm3, %v6232_v16, %v6233_v52 }
 0x240   : > { %v5117_v3 = vsel %vm2317_vm1, %v5067_v26, 0  ;;  %v6236_v31 = vsel %vm1634_vm3, %v6233_v52, %v6235_v24  ;;  %v6442_v22 = vsel %vm1843_vm4, %v6440_v58, %v6441_v63  ;;  %v6648_v37 = vrot.slane %v10929_v41, 2 }
 0x241   : > { %5133 = vmatpush.bf16.xpose.msrb.mxu1 %v5117_v3  ;;  %v10961_v7 = vsel %vm1843_vm4, %v6441_v63, %v6443_v14  ;;  %v6329_v0 = vmax.f32 %v6089_v19, %v6234_v46  ;;  %v6330_v32 = vmax.f32 %v6090_v43, %v6236_v31  ;;  %v6649_v26 = vrot.slane %v10932_v59, 2 }
 0x242   : > { %v6651_v9 = vrot.slane %v10938_v23, 2  ;;  %v6856_v12 = vrot.slane %v10926_v15, 5  ;;  %v6857_v16 = vrot.slane %v10929_v41, 5  ;;  %v6859_v3 = vrot.slane %v10932_v59, 5 }
 0x243   : > { %v7064_v52 = vrot.slane %v10929_v41, 3  ;;  %v6537_v24 = vmax.f32 %v6329_v0, %v6442_v22  ;;  %v6538_v58 = vmax.f32 %v6330_v32, %v10961_v7  ;;  %v10972_v63 = vsel %vm2052_vm5, %v6648_v37, %v6649_v26 }
 0x244   : > { %v6652_v19 = vsel %vm2052_vm5, %v6649_v26, %v6651_v9  ;;  %v6858_v43 = vsel %vm4241_vm6, %v6856_v12, %v6857_v16  ;;  %v6860_v46 = vsel %vm4241_vm6, %v6857_v16, %v6859_v3  ;;  %v7065_v31 = vrot.slane %v10932_v59, 3 }
 0x245   : > { %v7067_v51 = vrot.slane %v10938_v23, 3  ;;  %v6745_v47 = vmax.f32 %v6537_v24, %v10972_v63  ;;  %v6746_v61 = vmax.f32 %v6538_v58, %v6652_v19  ;;  %v7272_v22 = vrot.slane %v10926_v15, 4 }
 0x246   : > { %v7273_v0 = vrot.slane %v10929_v41, 4  ;;  %v7066_v32 = vsel %vm4450_vm7, %v7064_v52, %v7065_v31  ;;  %v7275_v26 = vrot.slane %v10932_v59, 4  ;;  %v7465_v9 = vrot.slane %v10938_v23, 4 }
 0x247   : > { %v7068_v48 = vsel %vm4450_vm7, %v7065_v31, %v7067_v51  ;;  %v6953_v12 = vmax.f32 %v6745_v47, %v6858_v43  ;;  %v6954_v16 = vmax.f32 %v6746_v61, %v6860_v46  ;;  %v7609_v21 = vrot.slane %v10926_v15, 3  ;;  %v13358_v43 = vld [vmem:[#allocation54_spill] sm:$0xff] }
 0x248   : > { %v7274_v18 = vsel %vm4659_vm8, %v7272_v22, %v7273_v0  ;;  %v7276_v24 = vsel %vm4659_vm8, %v7273_v0, %v7275_v26  ;;  %v7466_v58 = vsel %vm4659_vm8, %v7275_v26, %v7465_v9  ;;  %v7753_v41 = vrot.slane %v10938_v23, 5  ;;  %v13360_v26 = vld [vmem:[#allocation55_spill] sm:$0xff] }
 0x249   : > { %v7897_v19 = vrot.slane %v10926_v15, 2  ;;  %v7161_v50 = vmax.f32 %v6953_v12, %v7066_v32  ;;  %v7162_v51 = vmax.f32 %v6954_v16, %v7068_v48  ;;  %v7610_v59 = vsel %vm4450_vm7, %v7609_v21, %v7064_v52  ;;  %v13362_v52 = vld [vmem:[#allocation80_spill] sm:$0xff] }
 0x24a   : > { %v8041_v31 = vrot.slane %v10938_v23, 6  ;;  %v7754_v61 = vsel %vm4241_vm6, %v6859_v3, %v7753_v41  ;;  %v13359_v22 = vmax.f32 %v13354_v60, %v13317_v38  ;;  %v13361_v9 = vmax.f32 %v13355_v6, %v13239_v2 }
 0x24b   : > { %v7898_v47 = vsel %vm2052_vm5, %v7897_v19, %v6648_v37  ;;  %v7369_v12 = vmax.f32 %v7161_v50, %v7274_v18  ;;  %v7370_v48 = vmax.f32 %v7162_v51, %v7276_v24  ;;  %v5599_v23 = vmax.f32 %v10935_v42, %v13315_v27  ;;  %v13364_v50 = vld [vmem:[#allocation81_spill] sm:$0xff]  ;;  %v13366_v42 = vld [vmem:[#allocation58_spill] sm:$0xff] }
 0x24c   : > { %v5405_v0 = vmax.f32 %v13359_v22, %v13358_v43  ;;  %v5406_v15 = vmax.f32 %v13361_v9, %v13360_v26  ;;  %v8042_v21 = vsel %vm1843_vm4, %v6443_v14, %v8041_v31  ;;  %v5600_v37 = vmax.f32 %v10941_v4, %v13306_v55  ;;  %v13363_v22 = vld [vmem:[#allocation56_spill] sm:$0xff]  ;;  %v13365_v14 = vld [vmem:[#allocation57_spill] sm:$0xff]  ;;  %v13367_v4 = vld [vmem:[#allocation79_spill] sm:$0xff] }
 0x24d   : > { %v7513_v41 = vmax.f32 %v7369_v12, %v7276_v24  ;;  %v7514_v19 = vmax.f32 %v7370_v48, %v7466_v58  ;;  %v11013_v9 = vmax.f32 %v5599_v23, %v13363_v22  ;;  %v3408_v18 = vrot.slane %v13364_v50, 7 }
 0x24e   : > { %v5601_v3 = vmax.f32 %v5405_v0, %v13313_v40  ;;  %v5602_v38 = vmax.f32 %v5406_v15, %v13318_v53  ;;  %v11017_v51 = vmax.f32 %v5600_v37, %v13365_v14  ;;  %v13368_v0 = vld [vmem:[#allocation83_spill] sm:$0xff] }
 0x24f   : > { %v7657_v54 = vmax.f32 %v7513_v41, %v7610_v59  ;;  %v7658_v16 = vmax.f32 %v7514_v19, %v7066_v32  ;;  %v6032_v24 = vrot.slane %v11013_v9, 7  ;;  %v6480_v58 = vrot.slane %v11013_v9, 6 }
 0x250   : > { %v11020_v31 = vmax.f32 %v5601_v3, %v13366_v42  ;;  %v11023_v30 = vmax.f32 %v5602_v38, %v13367_v4  ;;  %v6033_v12 = vrot.slane %v11017_v51, 7  ;;  %v6272_v23 = vrot.slane %v11017_v51, 1 }
 0x251   : > { %v7801_v3 = vmax.f32 %v7657_v54, %v6860_v46  ;;  %v7802_v22 = vmax.f32 %v7658_v16, %v7754_v61  ;;  %v6481_v14 = vrot.slane %v11017_v51, 6 }
 0x252   : > { %v6035_v48 = vrot.slane %v11020_v31, 7  ;;  %v6273_v37 = vrot.slane %v11020_v31, 1  ;;  %v6275_v38 = vrot.slane %v11023_v30, 1  ;;  %v6034_v32 = vsel %vm1393_vm2, %v6032_v24, %v6033_v12 }
 0x253   : > { %v12896_v19 = vrot.slane %v11020_v31, 6  ;;  %v7945_v42 = vmax.f32 %v7801_v3, %v7898_v47  ;;  %v7946_v4 = vmax.f32 %v7802_v22, %v10972_v63  ;;  %v6105_v15 = vmax.f32 %v11017_v51, %v6034_v32 }
 0x254   : > { %v6036_v59 = vsel %vm1393_vm2, %v6033_v12, %v6035_v48  ;;  %v6274_v41 = vsel %vm1634_vm3, %v6272_v23, %v6273_v37  ;;  %v6276_v46 = vsel %vm1634_vm3, %v6273_v37, %v6275_v38  ;;  %v6482_v61 = vsel %vm1843_vm4, %v6480_v58, %v6481_v14 }
 0x255   : > { %v6106_v54 = vmax.f32 %v11020_v31, %v6036_v59  ;;  %v11046_v16 = vsel %vm1843_vm4, %v6481_v14, %v12896_v19  ;;  %v6688_v24 = vrot.slane %v11017_v51, 2  ;;  %v8089_v12 = vmax.f32 %v7945_v42, %v10961_v7 }
 0x256   : > { %v8090_v47 = vmax.f32 %v7946_v4, %v8042_v21  ;;  %v6345_v48 = vmax.f32 %v6105_v15, %v6274_v41  ;;  %v6689_v23 = vrot.slane %v11020_v31, 2  ;;  %v6691_v3 = vrot.slane %v11023_v30, 2 }
 0x257   : > { %v6346_v63 = vmax.f32 %v6106_v54, %v6276_v46  ;;  %v6896_v37 = vrot.slane %v11013_v9, 5  ;;  %v6897_v58 = vrot.slane %v11017_v51, 5  ;;  %v8121_v22 = vpack.c.bf16 %v8089_v12, %v8089_v12 }
 0x258   : > { %v8122_v38 = vpack.c.bf16 %v8090_v47, %v8090_v47  ;;  %v6553_v32 = vmax.f32 %v6345_v48, %v6482_v61  ;;  %v11056_v59 = vsel %vm2052_vm5, %v6688_v24, %v6689_v23  ;;  %v6692_v7 = vsel %vm2052_vm5, %v6689_v23, %v6691_v3 }
 0x259   : > { %v6554_v14 = vmax.f32 %v6346_v63, %v11046_v16  ;;  %v6898_v21 = vsel %vm4241_vm6, %v6896_v37, %v6897_v58  ;;  %v6899_v15 = vrot.slane %v11020_v31, 5  ;;  %v8193_v41 = vunpack.c.l.b16 %v8121_v22 }
 0x25a   : > { %v8194_v42 = vunpack.c.l.b16 %v8122_v38  ;;  %v6761_v4 = vmax.f32 %v6553_v32, %v11056_v59  ;;  %v7104_v61 = vrot.slane %v11017_v51, 3  ;;  %v7105_v12 = vrot.slane %v11020_v31, 3 }
 0x25b   : > { %v6762_v54 = vmax.f32 %v6554_v14, %v6692_v7  ;;  %v6900_v46 = vsel %vm4241_vm6, %v6897_v58, %v6899_v15  ;;  %v7107_v47 = vrot.slane %v11023_v30, 3  ;;  %v7312_v3 = vrot.slane %v11013_v9, 4 }
 0x25c   : > { %v8220_v48 = vpack.c.b16 %v8194_v42, %v8193_v41  ;;  %v6969_v63 = vmax.f32 %v6761_v4, %v6898_v21  ;;  %v7106_v37 = vsel %vm4450_vm7, %v7104_v61, %v7105_v12  ;;  %v7313_v38 = vrot.slane %v11017_v51, 4 }
 0x25d   : > { %v6970_v23 = vmax.f32 %v6762_v54, %v6900_v46  ;;  %v7108_v22 = vsel %vm4450_vm7, %v7105_v12, %v7107_v47  ;;  %v7315_v32 = vrot.slane %v11020_v31, 4  ;;  %v7481_v19 = vrot.slane %v11023_v30, 4 }
 0x25e   : > { %v8250_v58 = vsel %vm2317_vm1, %v8220_v48, 0  ;;  %v7177_v14 = vmax.f32 %v6969_v63, %v7106_v37  ;;  %v7314_v21 = vsel %vm4659_vm8, %v7312_v3, %v7313_v38  ;;  %v7625_v42 = vrot.slane %v11013_v9, 3 }
 0x25f   : > { %v7178_v7 = vmax.f32 %v6970_v23, %v7108_v22  ;;  %8284 = vmatpush.bf16.xpose.msrb.mxu2 %v8250_v58  ;;  %v7316_v41 = vsel %vm4659_vm8, %v7313_v38, %v7315_v32  ;;  %v7769_v4 = vrot.slane %v11023_v30, 5  ;;  %v7482_v51 = vsel %vm4659_vm8, %v7315_v32, %v7481_v19 }
 0x260   : > { %v7385_v54 = vmax.f32 %v7177_v14, %v7314_v21  ;;  %v7913_v47 = vrot.slane %v11013_v9, 2  ;;  %v7626_v48 = vsel %vm4450_vm7, %v7625_v42, %v7104_v61  ;;  %v8057_v23 = vrot.slane %v11023_v30, 6  ;;  %v13372_v42 = vld [vmem:[#allocation85_spill] sm:$0xff] }
 0x261   : > { %v7386_v12 = vmax.f32 %v7178_v7, %v7316_v41  ;;  %v7770_v63 = vsel %vm4241_vm6, %v6899_v15, %v7769_v4  ;;  %v13369_v3 = vrot.slane %v13362_v52, 7  ;;  %v13370_v19 = vrot.slane %v13368_v0, 7 }
 0x262   : > { %v7529_v38 = vmax.f32 %v7385_v54, %v7316_v41  ;;  %v7914_v14 = vsel %vm2052_vm5, %v7913_v47, %v6688_v24  ;;  %v13371_v15 = vrot.slane %v11020_v31, 6  ;;  %v3647_v7 = vrot.slane %v13364_v50, 1 }
 0x263   : > { %v3409_v22 = vsel %vm1393_vm2, %v13369_v3, %v3408_v18  ;;  %v7530_v58 = vmax.f32 %v7386_v12, %v7482_v51  ;;  %v3411_v9 = vsel %vm1393_vm2, %v3408_v18, %v13370_v19  ;;  %v3648_v24 = vrot.slane %v13368_v0, 1 }
 0x264   : > { %v8058_v30 = vsel %vm1843_vm4, %v13371_v15, %v8057_v23  ;;  %v3501_v61 = vmax.f32 %v13364_v50, %v3409_v22  ;;  %v3502_v32 = vmax.f32 %v13368_v0, %v3411_v9  ;;  %v7673_v21 = vmax.f32 %v7529_v38, %v7626_v48 }
 0x265   : > { %v7674_v41 = vmax.f32 %v7530_v58, %v7106_v37  ;;  %v3650_v4 = vrot.slane %v13372_v42, 1  ;;  %v3855_v54 = vrot.slane %v13362_v52, 6  ;;  %v3856_v18 = vrot.slane %v13364_v50, 6 }
 0x266   : > { %v3858_v31 = vrot.slane %v13368_v0, 6  ;;  %v4063_v12 = vrot.slane %v13364_v50, 2  ;;  %v7817_v51 = vmax.f32 %v7673_v21, %v6900_v46  ;;  %v3649_v23 = vsel %vm1634_vm3, %v3647_v7, %v3648_v24 }
 0x267   : > { %v7818_v47 = vmax.f32 %v7674_v41, %v7770_v63  ;;  %v3651_v3 = vsel %vm1634_vm3, %v3648_v24, %v3650_v4  ;;  %v3741_v48 = vmax.f32 %v3501_v61, %v3649_v23  ;;  %v3857_v22 = vsel %vm1843_vm4, %v3855_v54, %v3856_v18 }
 0x268   : > { %v3742_v37 = vmax.f32 %v3502_v32, %v3651_v3  ;;  %v3859_v38 = vsel %vm1843_vm4, %v3856_v18, %v3858_v31  ;;  %v7961_v58 = vmax.f32 %v7817_v51, %v7914_v14  ;;  %v4064_v9 = vrot.slane %v13368_v0, 2 }
 0x269   : > { %v7962_v19 = vmax.f32 %v7818_v47, %v11056_v59  ;;  %v4066_v15 = vrot.slane %v13372_v42, 2  ;;  %v3949_v56 = vmax.f32 %v3741_v48, %v3857_v22  ;;  %v4272_v63 = vrot.slane %v13362_v52, 5 }
 0x26a   : > { %v3950_v46 = vmax.f32 %v3742_v37, %v3859_v38  ;;  %v4273_v7 = vrot.slane %v13364_v50, 5  ;;  %v8105_v61 = vmax.f32 %v7961_v58, %v11046_v16  ;;  %v4065_v21 = vsel %vm2052_vm5, %v4063_v12, %v4064_v9 }
 0x26b   : > { %v8106_v32 = vmax.f32 %v7962_v19, %v8058_v30  ;;  %v4067_v41 = vsel %vm2052_vm5, %v4064_v9, %v4066_v15  ;;  %v4157_v14 = vmax.f32 %v3949_v56, %v4065_v21  ;;  %v4275_v4 = vrot.slane %v13368_v0, 5  ;;  %v13375_v21 = vld [vmem:[#allocation91_spill] sm:$0xff] }
 0x26c   : > { %v4158_v24 = vmax.f32 %v3950_v46, %v4067_v41  ;;  %v4274_v59 = vsel %vm4241_vm6, %v4272_v63, %v4273_v7  ;;  %v8137_v54 = vpack.c.bf16 %v8105_v61, %v8105_v61  ;;  %v4481_v31 = vrot.slane %v13364_v50, 3  ;;  %v13373_v46 = vld [vmem:[#allocation89_spill] sm:$0xff]  ;;  %v13374_v61 = vld [vmem:[#allocation90_spill] sm:$0xff] }
 0x26d   : > { %v8138_v18 = vpack.c.bf16 %v8106_v32, %v8106_v32  ;;  %v4482_v51 = vrot.slane %v13368_v0, 3  ;;  %v4276_v47 = vsel %vm4241_vm6, %v4273_v7, %v4275_v4  ;;  %v4366_v16 = vmax.f32 %v4157_v14, %v4274_v59 }
 0x26e   : > { %v4484_v30 = vrot.slane %v13372_v42, 3  ;;  %v4690_v12 = vrot.slane %v13362_v52, 4  ;;  %v8209_v23 = vunpack.c.l.b16 %v8137_v54  ;;  %v4367_v3 = vmax.f32 %v4158_v24, %v4276_v47 }
 0x26f   : > { %v8210_v56 = vunpack.c.l.b16 %v8138_v18  ;;  %v4483_v48 = vsel %vm4450_vm7, %v4481_v31, %v4482_v51  ;;  %v4691_v38 = vrot.slane %v13364_v50, 4  ;;  %v4693_v58 = vrot.slane %v13368_v0, 4 }
 0x270   : > { %v4485_v37 = vsel %vm4450_vm7, %v4482_v51, %v4484_v30  ;;  %v4575_v22 = vmax.f32 %v4366_v16, %v4483_v48  ;;  %v4880_v15 = vrot.slane %v13372_v42, 4  ;;  %v3447_v63 = vrot.slane %v13373_v46, 7  ;;  %v13376_v30 = vld [vmem:[#allocation92_spill] sm:$0xff] }
 0x271   : > { %v8228_v19 = vpack.c.b16 %v8210_v56, %v8209_v23  ;;  %v4576_v9 = vmax.f32 %v4367_v3, %v4485_v37  ;;  %v4692_v52 = vsel %vm4659_vm8, %v4690_v12, %v4691_v38  ;;  %v4694_v7 = vsel %vm4659_vm8, %v4691_v38, %v4693_v58 }
 0x272   : > { %v3448_v32 = vrot.slane %v13374_v61, 7  ;;  %v3450_v41 = vrot.slane %v13375_v21, 7  ;;  %v4784_v24 = vmax.f32 %v4575_v22, %v4692_v52  ;;  %v4881_v0 = vsel %vm4659_vm8, %v4693_v58, %v4880_v15 }
 0x273   : > { %v8274_v14 = vsel %vm2317_vm1, %v8228_v19, 0  ;;  %v4785_v50 = vmax.f32 %v4576_v9, %v4694_v7  ;;  %v3687_v4 = vrot.slane %v13374_v61, 1  ;;  %v3688_v54 = vrot.slane %v13375_v21, 1 }
 0x274   : > { %8298 = vmatpush.bf16.xpose.msrb.mxu3 %v8274_v14  ;;  %v3449_v59 = vsel %vm1393_vm2, %v3447_v63, %v3448_v32  ;;  %v3451_v42 = vsel %vm1393_vm2, %v3448_v32, %v3450_v41  ;;  %v4928_v18 = vmax.f32 %v4784_v24, %v4694_v7  ;;  %v3690_v12 = vrot.slane %v13376_v30, 1 }
 0x275   : > { %v4929_v31 = vmax.f32 %v4785_v50, %v4881_v0  ;;  %v3517_v51 = vmax.f32 %v13374_v61, %v3449_v59  ;;  %v3518_v47 = vmax.f32 %v13375_v21, %v3451_v42  ;;  %v3689_v16 = vsel %vm1634_vm3, %v3687_v4, %v3688_v54 }
 0x276   : > { %v3895_v23 = vrot.slane %v13373_v46, 6  ;;  %v3896_v56 = vrot.slane %v13374_v61, 6  ;;  %v4960_v3 = vpack.c.bf16 %v4928_v18, %v4928_v18  ;;  %v3898_v22 = vrot.slane %v13375_v21, 6 }
 0x277   : > { %v4961_v48 = vpack.c.bf16 %v4929_v31, %v4929_v31  ;;  %v3757_v37 = vmax.f32 %v3517_v51, %v3689_v16  ;;  %v3691_v38 = vsel %vm1634_vm3, %v3688_v54, %v3690_v12  ;;  %v4103_v19 = vrot.slane %v13374_v61, 2 }
 0x278   : > { %v3897_v58 = vsel %vm1843_vm4, %v3895_v23, %v3896_v56  ;;  %v4104_v9 = vrot.slane %v13375_v21, 2  ;;  %v5032_v15 = vunpack.c.l.b16 %v4960_v3  ;;  %v3758_v52 = vmax.f32 %v3518_v47, %v3691_v38 }
 0x279   : > { %v5033_v63 = vunpack.c.l.b16 %v4961_v48  ;;  %v3899_v7 = vsel %vm1843_vm4, %v3896_v56, %v3898_v22  ;;  %v3965_v32 = vmax.f32 %v3757_v37, %v3897_v58  ;;  %v4106_v14 = vrot.slane %v13376_v30, 2 }
 0x27a   : > { %v4105_v41 = vsel %vm2052_vm5, %v4103_v19, %v4104_v9  ;;  %v4312_v24 = vrot.slane %v13373_v46, 5  ;;  %v3966_v0 = vmax.f32 %v3758_v52, %v3899_v7  ;;  %v4313_v59 = vrot.slane %v13374_v61, 5  ;;  %v13378_v52 = vld [vmem:[#allocation106_spill] sm:$0xff] }
 0x27b   : > { %v5058_v50 = vpack.c.b16 %v5033_v63, %v5032_v15  ;;  %v4315_v42 = vrot.slane %v13375_v21, 5  ;;  %v4107_v4 = vsel %vm2052_vm5, %v4104_v9, %v4106_v14  ;;  %v4173_v54 = vmax.f32 %v3965_v32, %v4105_v41  ;;  %v13377_v15 = vld [vmem:[#allocation105_spill] sm:$0xff] }
 0x27c   : > { %v4521_v18 = vrot.slane %v13374_v61, 3  ;;  %v4522_v31 = vrot.slane %v13375_v21, 3  ;;  %v4174_v47 = vmax.f32 %v3966_v0, %v4107_v4  ;;  %v4314_v16 = vsel %vm4241_vm6, %v4312_v24, %v4313_v59  ;;  %v13380_v24 = vld [vmem:[#allocation108_spill] sm:$0xff] }
 0x27d   : > { %v5090_v51 = vsel %vm2317_vm1, %v5058_v50, 0  ;;  %v4316_v12 = vsel %vm4241_vm6, %v4313_v59, %v4315_v42  ;;  %v4382_v23 = vmax.f32 %v4173_v54, %v4314_v16  ;;  %v4524_v3 = vrot.slane %v13376_v30, 3  ;;  %v13381_v59 = vld [vmem:[#allocation21_spill] sm:$0xff]  ;;  %v13383_v54 = vld [vmem:[#allocation111_spill] sm:$0xff] }
 0x27e   : > { %5120 = vmatpush.bf16.xpose.msrb.mxu0 %v5090_v51  ;;  %v4523_v56 = vsel %vm4450_vm7, %v4521_v18, %v4522_v31  ;;  %v4730_v48 = vrot.slane %v13373_v46, 4  ;;  %v4383_v37 = vmax.f32 %v4174_v47, %v4316_v12  ;;  %v4731_v22 = vrot.slane %v13374_v61, 4  ;;  %v13384_v51 = vld [vmem:[#allocation22_spill] sm:$0xff]  ;;  %v13385_v16 = vld [vmem:[#allocation23_spill] sm:$0xff] }
 0x27f   : > { %v4733_v38 = vrot.slane %v13375_v21, 4  ;;  %v4896_v58 = vrot.slane %v13376_v30, 4  ;;  %v4525_v19 = vsel %vm4450_vm7, %v4522_v31, %v4524_v3  ;;  %v4591_v9 = vmax.f32 %v4382_v23, %v4523_v56  ;;  %v13379_v21 = vld [vmem:[#allocation107_spill] sm:$0xff] }
 0x280   : > { %v5171_v63 = vmax.f32 %v13377_v15, %v13227_v33  ;;  %v5172_v7 = vmax.f32 %v13378_v52, %v9916_v25  ;;  %v4592_v32 = vmax.f32 %v4383_v37, %v4525_v19  ;;  %v4732_v41 = vsel %vm4659_vm8, %v4730_v48, %v4731_v22  ;;  %v13382_v25 = vld [vmem:[#allocation109_spill] sm:$0xff]  ;;  %v13388_v48 = vld [vmem:[#allocation112_spill] sm:$0xff]  ;;  %v13390_v19 = vld [vmem:[#allocation123_spill] sm:$0xff] }
 0x281   : > { %v4734_v46 = vsel %vm4659_vm8, %v4731_v22, %v4733_v38  ;;  %v4897_v61 = vsel %vm4659_vm8, %v4733_v38, %v4896_v58  ;;  %v4800_v14 = vmax.f32 %v4591_v9, %v4732_v41  ;;  %v5173_v30 = vmax.f32 %v13379_v21, %v13283_v1  ;;  %v13386_v1 = vld [vmem:[#allocation119_spill] sm:$0xff]  ;;  %v13389_v22 = vld [vmem:[#allocation113_spill] sm:$0xff] }
 0x282   : > { %v5174_v50 = vmax.f32 %v13380_v24, %v13284_v44  ;;  %v5367_v0 = vmax.f32 %v5171_v63, %v13209_v17  ;;  %v4801_v33 = vmax.f32 %v4592_v32, %v4734_v46  ;;  %v5368_v42 = vmax.f32 %v5172_v7, %v13381_v59  ;;  %v13387_v44 = vld [vmem:[#allocation122_spill] sm:$0xff] }
 0x283   : > { %v5203_v4 = vmax.f32 %v13382_v25, %v13315_v27  ;;  %v5204_v18 = vmax.f32 %v13383_v54, %v13306_v55  ;;  %v4944_v31 = vmax.f32 %v4800_v14, %v4734_v46  ;;  %v5369_v47 = vmax.f32 %v5173_v30, %v13384_v51  ;;  %v13391_v63 = vld [vmem:[#allocation126_spill] sm:$0xff]  ;;  %v13393_v30 = vld [vmem:[#allocation49_spill] sm:$0xff] }
 0x284   : > { %v5370_v12 = vmax.f32 %v5174_v50, %v13385_v16  ;;  %v5563_v23 = vmax.f32 %v5367_v0, %v13386_v1  ;;  %v4945_v56 = vmax.f32 %v4801_v33, %v4897_v61  ;;  %v5564_v3 = vmax.f32 %v5368_v42, %v13387_v44  ;;  %v13392_v61 = vld [vmem:[#allocation48_spill] sm:$0xff] }
 0x285   : > { %v4976_v58 = vpack.c.bf16 %v4944_v31, %v4944_v31  ;;  %v5565_v9 = vmax.f32 %v5369_v47, %v13390_v19  ;;  %v11204_v14 = vmax.f32 %v5203_v4, %v13392_v61  ;;  %v11207_v50 = vmax.f32 %v5204_v18, %v13393_v30 }
 0x286   : > { %v5566_v7 = vmax.f32 %v5370_v12, %v13391_v63  ;;  %v11198_v32 = vmax.f32 %v5563_v23, %v13327_v28  ;;  %v4977_v41 = vpack.c.bf16 %v4945_v56, %v4945_v56  ;;  %v11201_v46 = vmax.f32 %v5564_v3, %v13328_v8 }
 0x287   : > { %v5048_v0 = vunpack.c.l.b16 %v4976_v58  ;;  %v11210_v33 = vmax.f32 %v5565_v9, %v13329_v5 }
 0x288   : > { %v11213_v42 = vmax.f32 %v5566_v7, %v13330_v35  ;;  %v5987_v28 = vrot.slane %v11198_v32, 7  ;;  %v5049_v31 = vunpack.c.l.b16 %v4977_v41  ;;  %v5988_v47 = vrot.slane %v11201_v46, 7 }
 0x289   : > { %v6227_v8 = vrot.slane %v11201_v46, 1  ;;  %v6435_v4 = vrot.slane %v11198_v32, 6  ;;  %v5990_v12 = vrot.slane %v11210_v33, 7  ;;  %v6228_v18 = vrot.slane %v11210_v33, 1 }
 0x28a   : > { %v6230_v23 = vrot.slane %v11213_v42, 1  ;;  %v6436_v5 = vrot.slane %v11201_v46, 6  ;;  %v5066_v56 = vpack.c.b16 %v5049_v31, %v5048_v0  ;;  %v5989_v35 = vsel %vm1393_vm2, %v5987_v28, %v5988_v47 }
 0x28b   : > { %v6438_v44 = vrot.slane %v11210_v33, 6  ;;  %v6643_v3 = vrot.slane %v11201_v46, 2  ;;  %v5991_v58 = vsel %vm1393_vm2, %v5988_v47, %v5990_v12  ;;  %v6087_v19 = vmax.f32 %v11201_v46, %v5989_v35 }
 0x28c   : > { %v6229_v9 = vsel %vm1634_vm3, %v6227_v8, %v6228_v18  ;;  %v6231_v7 = vsel %vm1634_vm3, %v6228_v18, %v6230_v23  ;;  %v5114_v41 = vsel %vm2317_vm1, %v5066_v56, 0  ;;  %v6088_v38 = vmax.f32 %v11210_v33, %v5991_v58 }
 0x28d   : > { %v6437_v0 = vsel %vm1843_vm4, %v6435_v4, %v6436_v5  ;;  %v11234_v28 = vsel %vm1843_vm4, %v6436_v5, %v6438_v44  ;;  %5134 = vmatpush.bf16.xpose.msrb.mxu1 %v5114_v41  ;;  %v6327_v31 = vmax.f32 %v6087_v19, %v6229_v9  ;;  %v6644_v37 = vrot.slane %v11210_v33, 2 }
 0x28e   : > { %v6646_v47 = vrot.slane %v11213_v42, 2  ;;  %v6851_v12 = vrot.slane %v11198_v32, 5  ;;  %v6328_v8 = vmax.f32 %v6088_v38, %v6231_v7  ;;  %v6852_v18 = vrot.slane %v11201_v46, 5 }
 0x28f   : > { %v6854_v23 = vrot.slane %v11210_v33, 5  ;;  %v7059_v56 = vrot.slane %v11201_v46, 3  ;;  %v6535_v35 = vmax.f32 %v6327_v31, %v6437_v0  ;;  %v11243_v4 = vsel %vm2052_vm5, %v6643_v3, %v6644_v37 }
 0x290   : > { %v6647_v5 = vsel %vm2052_vm5, %v6644_v37, %v6646_v47  ;;  %v7060_v58 = vrot.slane %v11210_v33, 3  ;;  %v6536_v19 = vmax.f32 %v6328_v8, %v11234_v28  ;;  %v6853_v9 = vsel %vm4241_vm6, %v6851_v12, %v6852_v18 }
 0x291   : > { %v6855_v38 = vsel %vm4241_vm6, %v6852_v18, %v6854_v23  ;;  %v7062_v7 = vrot.slane %v11213_v42, 3  ;;  %v6743_v41 = vmax.f32 %v6535_v35, %v11243_v4  ;;  %v7267_v0 = vrot.slane %v11198_v32, 4 }
 0x292   : > { %v7061_v55 = vsel %vm4450_vm7, %v7059_v56, %v7060_v58  ;;  %v7268_v31 = vrot.slane %v11201_v46, 4  ;;  %v6744_v27 = vmax.f32 %v6536_v19, %v6647_v5  ;;  %v7270_v47 = vrot.slane %v11210_v33, 4 }
 0x293   : > { %v7063_v37 = vsel %vm4450_vm7, %v7060_v58, %v7062_v7  ;;  %v7463_v8 = vrot.slane %v11213_v42, 4  ;;  %v6951_v12 = vmax.f32 %v6743_v41, %v6853_v9  ;;  %v7607_v54 = vrot.slane %v11198_v32, 3  ;;  %v13394_v41 = vld [vmem:[#allocation50_spill] sm:$0xff] }
 0x294   : > { %v7269_v18 = vsel %vm4659_vm8, %v7267_v0, %v7268_v31  ;;  %v7751_v35 = vrot.slane %v11213_v42, 5  ;;  %v6952_v25 = vmax.f32 %v6744_v27, %v6855_v38  ;;  %v7271_v24 = vsel %vm4659_vm8, %v7268_v31, %v7270_v47  ;;  %v13396_v31 = vld [vmem:[#allocation51_spill] sm:$0xff] }
 0x295   : > { %v7464_v30 = vsel %vm4659_vm8, %v7270_v47, %v7463_v8  ;;  %v7895_v46 = vrot.slane %v11198_v32, 2  ;;  %v7159_v5 = vmax.f32 %v6951_v12, %v7061_v55  ;;  %v7608_v58 = vsel %vm4450_vm7, %v7607_v54, %v7059_v56  ;;  %v13398_v56 = vld [vmem:[#allocation4_spill] sm:$0xff] }
 0x296   : > { %v7752_v33 = vsel %vm4241_vm6, %v6854_v23, %v7751_v35  ;;  %v8039_v19 = vrot.slane %v11213_v42, 6  ;;  %v7160_v9 = vmax.f32 %v6952_v25, %v7063_v37  ;;  %v13395_v27 = vmax.f32 %v13388_v48, %v13313_v40  ;;  %v13399_v42 = vld [vmem:[#allocation5_spill] sm:$0xff]  ;;  %v13400_v37 = vld [vmem:[#allocation6_spill] sm:$0xff]  ;;  %v13401_v35 = vld [vmem:[#allocation7_spill] sm:$0xff] }
 0x297   : > { %v7896_v7 = vsel %vm2052_vm5, %v7895_v46, %v6643_v3  ;;  %v13397_v47 = vmax.f32 %v13389_v22, %v13318_v53  ;;  %v7367_v8 = vmax.f32 %v7159_v5, %v7269_v18  ;;  %v5595_v23 = vmax.f32 %v11204_v14, %v13398_v56 }
 0x298   : > { %v5401_v0 = vmax.f32 %v13395_v27, %v13394_v41  ;;  %v8040_v54 = vsel %vm1843_vm4, %v6438_v44, %v8039_v19  ;;  %v5596_v25 = vmax.f32 %v11207_v50, %v13399_v42  ;;  %v7368_v3 = vmax.f32 %v7160_v9, %v7271_v24 }
 0x299   : > { %v5402_v32 = vmax.f32 %v13397_v47, %v13396_v31  ;;  %v3402_v27 = vrot.slane %v13348_v10, 7  ;;  %v7511_v40 = vmax.f32 %v7367_v8, %v7271_v24  ;;  %v11285_v53 = vmax.f32 %v5595_v23, %v13356_v20 }
 0x29a   : > { %v5597_v12 = vmax.f32 %v5401_v0, %v13400_v37  ;;  %v11288_v18 = vmax.f32 %v5596_v25, %v13357_v29  ;;  %v3403_v44 = vrot.slane %v13349_v57, 7  ;;  %v7512_v14 = vmax.f32 %v7368_v3, %v7464_v30 }
 0x29b   : > { %v5598_v46 = vmax.f32 %v5402_v32, %v13401_v35  ;;  %v3405_v19 = vrot.slane %v13350_v36, 7  ;;  %v7655_v9 = vmax.f32 %v7511_v40, %v7608_v58  ;;  %v6027_v24 = vrot.slane %v11285_v53, 7 }
 0x29c   : > { %v11292_v5 = vmax.f32 %v5597_v12, %v13358_v43  ;;  %v6028_v20 = vrot.slane %v11288_v18, 7  ;;  %v6267_v0 = vrot.slane %v11288_v18, 1  ;;  %v7656_v29 = vmax.f32 %v7512_v14, %v7061_v55 }
 0x29d   : > { %v11295_v50 = vmax.f32 %v5598_v46, %v13360_v26  ;;  %v7799_v32 = vmax.f32 %v7655_v9, %v6855_v38  ;;  %v6475_v8 = vrot.slane %v11285_v53, 6  ;;  %v6476_v40 = vrot.slane %v11288_v18, 6 }
 0x29e   : > { %v6030_v47 = vrot.slane %v11292_v5, 7  ;;  %v6268_v30 = vrot.slane %v11292_v5, 1  ;;  %v6029_v26 = vsel %vm1393_vm2, %v6027_v24, %v6028_v20  ;;  %v7800_v58 = vmax.f32 %v7656_v29, %v7752_v33 }
 0x29f   : > { %v6270_v43 = vrot.slane %v11295_v50, 1  ;;  %v6103_v25 = vmax.f32 %v11288_v18, %v6029_v26  ;;  %v7943_v3 = vmax.f32 %v7799_v32, %v7896_v7  ;;  %v6477_v38 = vsel %vm1843_vm4, %v6475_v8, %v6476_v40 }
 0x2a0   : > { %v6031_v23 = vsel %vm1393_vm2, %v6028_v20, %v6030_v47  ;;  %v6269_v55 = vsel %vm1634_vm3, %v6267_v0, %v6268_v30  ;;  %v7944_v14 = vmax.f32 %v7800_v58, %v11243_v4  ;;  %v6478_v24 = vrot.slane %v11292_v5, 6 }
 0x2a1   : > { %v6104_v12 = vmax.f32 %v11292_v5, %v6031_v23  ;;  %v6271_v46 = vsel %vm1634_vm3, %v6268_v30, %v6270_v43  ;;  %v6343_v9 = vmax.f32 %v6103_v25, %v6269_v55  ;;  %v6683_v33 = vrot.slane %v11288_v18, 2 }
 0x2a2   : > { %v8087_v20 = vmax.f32 %v7943_v3, %v11234_v28  ;;  %v6684_v47 = vrot.slane %v11292_v5, 2  ;;  %v6686_v7 = vrot.slane %v11295_v50, 2  ;;  %v8088_v0 = vmax.f32 %v7944_v14, %v8040_v54 }
 0x2a3   : > { %v6344_v29 = vmax.f32 %v6104_v12, %v6271_v46  ;;  %v11320_v32 = vsel %vm1843_vm4, %v6476_v40, %v6478_v24  ;;  %v6551_v30 = vmax.f32 %v6343_v9, %v6477_v38  ;;  %v6891_v43 = vrot.slane %v11285_v53, 5 }
 0x2a4   : > { %v8119_v4 = vpack.c.bf16 %v8087_v20, %v8087_v20  ;;  %v11325_v8 = vsel %vm2052_vm5, %v6683_v33, %v6684_v47  ;;  %v6687_v28 = vsel %vm2052_vm5, %v6684_v47, %v6686_v7  ;;  %v8120_v58 = vpack.c.bf16 %v8088_v0, %v8088_v0 }
 0x2a5   : > { %v6552_v26 = vmax.f32 %v6344_v29, %v11320_v32  ;;  %v6759_v23 = vmax.f32 %v6551_v30, %v11325_v8  ;;  %v6892_v25 = vrot.slane %v11288_v18, 5  ;;  %v6894_v54 = vrot.slane %v11292_v5, 5 }
 0x2a6   : > { %v8191_v40 = vunpack.c.l.b16 %v8119_v4  ;;  %v7099_v3 = vrot.slane %v11288_v18, 3  ;;  %v7100_v12 = vrot.slane %v11292_v5, 3  ;;  %v8192_v46 = vunpack.c.l.b16 %v8120_v58 }
 0x2a7   : > { %v6760_v55 = vmax.f32 %v6552_v26, %v6687_v28  ;;  %v6893_v38 = vsel %vm4241_vm6, %v6891_v43, %v6892_v25  ;;  %v6895_v14 = vsel %vm4241_vm6, %v6892_v25, %v6894_v54  ;;  %v7102_v9 = vrot.slane %v11295_v50, 3 }
 0x2a8   : > { %v6967_v20 = vmax.f32 %v6759_v23, %v6893_v38  ;;  %v7101_v47 = vsel %vm4450_vm7, %v7099_v3, %v7100_v12  ;;  %v7307_v7 = vrot.slane %v11285_v53, 4  ;;  %v8219_v0 = vpack.c.b16 %v8192_v46, %v8191_v40 }
 0x2a9   : > { %v6968_v29 = vmax.f32 %v6760_v55, %v6895_v14  ;;  %v7103_v30 = vsel %vm4450_vm7, %v7100_v12, %v7102_v9  ;;  %v7308_v4 = vrot.slane %v11288_v18, 4  ;;  %v7310_v26 = vrot.slane %v11292_v5, 4 }
 0x2aa   : > { %v7175_v28 = vmax.f32 %v6967_v20, %v7101_v47  ;;  %v7479_v43 = vrot.slane %v11295_v50, 4  ;;  %v7623_v25 = vrot.slane %v11285_v53, 3  ;;  %v8247_v23 = vsel %vm2317_vm1, %v8219_v0, 0 }
 0x2ab   : > { %v7176_v58 = vmax.f32 %v6968_v29, %v7103_v30  ;;  %v7309_v55 = vsel %vm4659_vm8, %v7307_v7, %v7308_v4  ;;  %v7311_v38 = vsel %vm4659_vm8, %v7308_v4, %v7310_v26  ;;  %v7767_v40 = vrot.slane %v11295_v50, 5  ;;  %8285 = vmatpush.bf16.xpose.msrb.mxu2 %v8247_v23 }
 0x2ac   : > { %v7383_v12 = vmax.f32 %v7175_v28, %v7309_v55  ;;  %v7480_v18 = vsel %vm4659_vm8, %v7310_v26, %v7479_v43  ;;  %v7624_v5 = vsel %vm4450_vm7, %v7623_v25, %v7099_v3  ;;  %v7911_v20 = vrot.slane %v11285_v53, 2 }
 0x2ad   : > { %v7384_v46 = vmax.f32 %v7176_v58, %v7311_v38  ;;  %v7768_v9 = vsel %vm4241_vm6, %v6894_v54, %v7767_v40  ;;  %v8055_v29 = vrot.slane %v11295_v50, 6  ;;  %v3404_v7 = vsel %vm1393_vm2, %v3402_v27, %v3403_v44 }
 0x2ae   : > { %v7527_v0 = vmax.f32 %v7383_v12, %v7311_v38  ;;  %v3406_v3 = vsel %vm1393_vm2, %v3403_v44, %v3405_v19  ;;  %v3499_v54 = vmax.f32 %v13349_v57, %v3404_v7  ;;  %v7912_v53 = vsel %vm2052_vm5, %v7911_v20, %v6683_v33 }
 0x2af   : > { %v7528_v30 = vmax.f32 %v7384_v46, %v7480_v18  ;;  %v8056_v50 = vsel %vm1843_vm4, %v6478_v24, %v8055_v29  ;;  %v3500_v4 = vmax.f32 %v13350_v36, %v3406_v3  ;;  %v3642_v26 = vrot.slane %v13349_v57, 1 }
 0x2b0   : > { %v7671_v28 = vmax.f32 %v7527_v0, %v7624_v5  ;;  %v3643_v58 = vrot.slane %v13350_v36, 1  ;;  %v3645_v43 = vrot.slane %v13351_v13, 1  ;;  %v3850_v25 = vrot.slane %v13348_v10, 6 }
 0x2b1   : > { %v7672_v27 = vmax.f32 %v7528_v30, %v7101_v47  ;;  %v3851_v44 = vrot.slane %v13349_v57, 6  ;;  %v3853_v19 = vrot.slane %v13350_v36, 6  ;;  %v4058_v33 = vrot.slane %v13349_v57, 2 }
 0x2b2   : > { %v7815_v23 = vmax.f32 %v7671_v28, %v6895_v14  ;;  %v3644_v55 = vsel %vm1634_vm3, %v3642_v26, %v3643_v58  ;;  %v3646_v38 = vsel %vm1634_vm3, %v3643_v58, %v3645_v43  ;;  %v4059_v20 = vrot.slane %v13350_v36, 2 }
 0x2b3   : > { %v7816_v24 = vmax.f32 %v7672_v27, %v7768_v9  ;;  %v3739_v40 = vmax.f32 %v3499_v54, %v3644_v55  ;;  %v3740_v47 = vmax.f32 %v3500_v4, %v3646_v38  ;;  %v3852_v12 = vsel %vm1843_vm4, %v3850_v25, %v3851_v44 }
 0x2b4   : > { %v3854_v46 = vsel %vm1843_vm4, %v3851_v44, %v3853_v19  ;;  %v7959_v18 = vmax.f32 %v7815_v23, %v7912_v53  ;;  %v4061_v29 = vrot.slane %v13351_v13, 2  ;;  %v4267_v9 = vrot.slane %v13348_v10, 5 }
 0x2b5   : > { %v7960_v5 = vmax.f32 %v7816_v24, %v11325_v8  ;;  %v3947_v7 = vmax.f32 %v3739_v40, %v3852_v12  ;;  %v3948_v14 = vmax.f32 %v3740_v47, %v3854_v46  ;;  %v4268_v0 = vrot.slane %v13349_v57, 5 }
 0x2b6   : > { %v8103_v30 = vmax.f32 %v7959_v18, %v11320_v32  ;;  %v4060_v54 = vsel %vm2052_vm5, %v4058_v33, %v4059_v20  ;;  %v4062_v4 = vsel %vm2052_vm5, %v4059_v20, %v4061_v29  ;;  %v4270_v28 = vrot.slane %v13350_v36, 5 }
 0x2b7   : > { %v8104_v3 = vmax.f32 %v7960_v5, %v8056_v50  ;;  %v4155_v53 = vmax.f32 %v3947_v7, %v4060_v54  ;;  %v4156_v26 = vmax.f32 %v3948_v14, %v4062_v4  ;;  %v4269_v8 = vsel %vm4241_vm6, %v4267_v9, %v4268_v0 }
 0x2b8   : > { %v8135_v27 = vpack.c.bf16 %v8103_v30, %v8103_v30  ;;  %v4476_v43 = vrot.slane %v13349_v57, 3  ;;  %v4477_v25 = vrot.slane %v13350_v36, 3  ;;  %v4271_v44 = vsel %vm4241_vm6, %v4268_v0, %v4270_v28 }
 0x2b9   : > { %v8136_v58 = vpack.c.bf16 %v8104_v3, %v8104_v3  ;;  %v4364_v32 = vmax.f32 %v4155_v53, %v4269_v8  ;;  %v4479_v50 = vrot.slane %v13351_v13, 3  ;;  %v4685_v19 = vrot.slane %v13348_v10, 4 }
 0x2ba   : > { %v8207_v33 = vunpack.c.l.b16 %v8135_v27  ;;  %v4365_v24 = vmax.f32 %v4156_v26, %v4271_v44  ;;  %v4478_v55 = vsel %vm4450_vm7, %v4476_v43, %v4477_v25  ;;  %v4686_v47 = vrot.slane %v13349_v57, 4 }
 0x2bb   : > { %v8208_v23 = vunpack.c.l.b16 %v8136_v58  ;;  %v4480_v38 = vsel %vm4450_vm7, %v4477_v25, %v4479_v50  ;;  %v4573_v40 = vmax.f32 %v4364_v32, %v4478_v55  ;;  %v4688_v12 = vrot.slane %v13350_v36, 4 }
 0x2bc   : > { %v4574_v18 = vmax.f32 %v4365_v24, %v4480_v38  ;;  %v4878_v5 = vrot.slane %v13351_v13, 4  ;;  %v3442_v20 = vrot.slane %v13352_v39, 7  ;;  %v4687_v10 = vsel %vm4659_vm8, %v4685_v19, %v4686_v47 }
 0x2bd   : > { %v8227_v46 = vpack.c.b16 %v8208_v23, %v8207_v33  ;;  %v4689_v29 = vsel %vm4659_vm8, %v4686_v47, %v4688_v12  ;;  %v3443_v7 = vrot.slane %v13353_v49, 7  ;;  %v3445_v14 = vrot.slane %v13354_v60, 7 }
 0x2be   : > { %v4782_v0 = vmax.f32 %v4573_v40, %v4687_v10  ;;  %v4783_v57 = vmax.f32 %v4574_v18, %v4689_v29  ;;  %v4879_v36 = vsel %vm4659_vm8, %v4688_v12, %v4878_v5  ;;  %v3682_v3 = vrot.slane %v13353_v49, 1 }
 0x2bf   : > { %v8271_v9 = vsel %vm2317_vm1, %v8227_v46, 0  ;;  %v3444_v30 = vsel %vm1393_vm2, %v3442_v20, %v3443_v7  ;;  %v3446_v13 = vsel %vm1393_vm2, %v3443_v7, %v3445_v14  ;;  %v3683_v54 = vrot.slane %v13354_v60, 1 }
 0x2c0   : > { %8299 = vmatpush.bf16.xpose.msrb.mxu3 %v8271_v9  ;;  %v4926_v4 = vmax.f32 %v4782_v0, %v4689_v29  ;;  %v4927_v53 = vmax.f32 %v4783_v57, %v4879_v36  ;;  %v3515_v26 = vmax.f32 %v13353_v49, %v3444_v30  ;;  %v3516_v8 = vmax.f32 %v13354_v60, %v3446_v13 }
 0x2c1   : > { %v3684_v28 = vsel %vm1634_vm3, %v3682_v3, %v3683_v54  ;;  %v3685_v27 = vrot.slane %v13355_v6, 1  ;;  %v3890_v58 = vrot.slane %v13352_v39, 6  ;;  %v3891_v43 = vrot.slane %v13353_v49, 6 }
 0x2c2   : > { %v4958_v25 = vpack.c.bf16 %v4926_v4, %v4926_v4  ;;  %v4959_v44 = vpack.c.bf16 %v4927_v53, %v4927_v53  ;;  %v3755_v32 = vmax.f32 %v3515_v26, %v3684_v28  ;;  %v3893_v50 = vrot.slane %v13354_v60, 6 }
 0x2c3   : > { %v3686_v19 = vsel %vm1634_vm3, %v3683_v54, %v3685_v27  ;;  %v3892_v33 = vsel %vm1843_vm4, %v3890_v58, %v3891_v43  ;;  %v4098_v23 = vrot.slane %v13353_v49, 2  ;;  %v4099_v24 = vrot.slane %v13354_v60, 2 }
 0x2c4   : > { %v5030_v55 = vunpack.c.l.b16 %v4958_v25  ;;  %v5031_v38 = vunpack.c.l.b16 %v4959_v44  ;;  %v3756_v40 = vmax.f32 %v3516_v8, %v3686_v19  ;;  %v3894_v47 = vsel %vm1843_vm4, %v3891_v43, %v3893_v50  ;;  %v13402_v44 = vld [vmem:[#allocation115_spill] sm:$0xff]  ;;  %v13403_v50 = vld [vmem:[#allocation118_spill] sm:$0xff] }
 0x2c5   : > { %v3963_v12 = vmax.f32 %v3755_v32, %v3892_v33  ;;  %v4100_v46 = vsel %vm2052_vm5, %v4098_v23, %v4099_v24  ;;  %v4101_v18 = vrot.slane %v13355_v6, 2  ;;  %v4307_v5 = vrot.slane %v13352_v39, 5 }
 0x2c6   : > { %v5057_v20 = vpack.c.b16 %v5031_v38, %v5030_v55  ;;  %v3964_v10 = vmax.f32 %v3756_v40, %v3894_v47  ;;  %v4308_v29 = vrot.slane %v13353_v49, 5  ;;  %v4310_v7 = vrot.slane %v13354_v60, 5  ;;  %v13404_v55 = vld [vmem:[#allocation97_spill] sm:$0xff]  ;;  %v13405_v38 = vld [vmem:[#allocation135_spill] sm:$0xff] }
 0x2c7   : > { %v4102_v14 = vsel %vm2052_vm5, %v4099_v24, %v4101_v18  ;;  %v4171_v9 = vmax.f32 %v3963_v12, %v4100_v46  ;;  %v4516_v0 = vrot.slane %v13353_v49, 3  ;;  %v4517_v57 = vrot.slane %v13354_v60, 3  ;;  %v13408_v12 = vld [vmem:[#allocation136_spill] sm:$0xff] }
 0x2c8   : > { %v5087_v36 = vsel %vm2317_vm1, %v5057_v20, 0  ;;  %v4172_v30 = vmax.f32 %v3964_v10, %v4102_v14  ;;  %v4309_v13 = vsel %vm4241_vm6, %v4307_v5, %v4308_v29  ;;  %v4311_v3 = vsel %vm4241_vm6, %v4308_v29, %v4310_v7  ;;  %v13410_v5 = vld [vmem:[#allocation120_spill] sm:$0xff]  ;;  %v13411_v10 = vld [vmem:[#allocation121_spill] sm:$0xff] }
 0x2c9   : > { %5121 = vmatpush.bf16.xpose.msrb.mxu0 %v5087_v36  ;;  %v4380_v54 = vmax.f32 %v4171_v9, %v4309_v13  ;;  %v4518_v4 = vsel %vm4450_vm7, %v4516_v0, %v4517_v57  ;;  %v4519_v53 = vrot.slane %v13355_v6, 3  ;;  %v4725_v26 = vrot.slane %v13352_v39, 4  ;;  %v13412_v14 = vld [vmem:[#allocation20_spill] sm:$0xff]  ;;  %v13413_v0 = vld [vmem:[#allocation137_spill] sm:$0xff] }
 0x2ca   : > { %v4381_v8 = vmax.f32 %v4172_v30, %v4311_v3  ;;  %v4726_v28 = vrot.slane %v13353_v49, 4  ;;  %v4728_v27 = vrot.slane %v13354_v60, 4  ;;  %v4894_v58 = vrot.slane %v13355_v6, 4 }
 0x2cb   : > { %v4520_v43 = vsel %vm4450_vm7, %v4517_v57, %v4519_v53  ;;  %v4589_v25 = vmax.f32 %v4380_v54, %v4518_v4  ;;  %v5167_v32 = vmax.f32 %v13402_v44, %v13386_v1  ;;  %v5170_v19 = vmax.f32 %v13403_v50, %v13391_v63  ;;  %v13407_v63 = vld [vmem:[#allocation98_spill] sm:$0xff] }
 0x2cc   : > { %v4590_v33 = vmax.f32 %v4381_v8, %v4520_v43  ;;  %v4727_v23 = vsel %vm4659_vm8, %v4725_v26, %v4726_v28  ;;  %v4729_v39 = vsel %vm4659_vm8, %v4726_v28, %v4728_v27  ;;  %v4895_v49 = vsel %vm4659_vm8, %v4728_v27, %v4894_v58 }
 0x2cd   : > { %v4798_v24 = vmax.f32 %v4589_v25, %v4727_v23  ;;  %v5363_v60 = vmax.f32 %v5167_v32, %v13238_v11  ;;  %v5366_v6 = vmax.f32 %v5170_v19, %v13239_v2  ;;  %v13406_v40 = vmax.f32 %v13404_v55, %v13405_v38 }
 0x2ce   : > { %v4799_v47 = vmax.f32 %v4590_v33, %v4729_v39  ;;  %v13409_v46 = vmax.f32 %v13407_v63, %v13408_v12  ;;  %v5199_v20 = vmax.f32 %v13410_v5, %v13398_v56  ;;  %v5200_v29 = vmax.f32 %v13411_v10, %v13399_v42  ;;  %v13446_v42 = vld [vmem:[#allocation117_spill] sm:$0xff] }
 0x2cf   : > { %v11451_v1 = vmax.f32 %v13406_v40, %v13381_v59  ;;  %v4942_v7 = vmax.f32 %v4798_v24, %v4729_v39  ;;  %v5559_v9 = vmax.f32 %v5363_v60, %v13412_v14  ;;  %v5562_v57 = vmax.f32 %v5366_v6, %v13413_v0 }
 0x2d0   : > { %v11457_v18 = vmax.f32 %v13409_v46, %v13384_v51  ;;  %v4943_v36 = vmax.f32 %v4799_v47, %v4895_v49 }
 0x2d1   : > { %v5983_v59 = vrot.slane %v11451_v1, 7  ;;  %v6222_v13 = vrot.slane %v11451_v1, 1  ;;  %v4974_v3 = vpack.c.bf16 %v4942_v7, %v4942_v7  ;;  %v5755_v54 = vmax.f32 %v5559_v9, %v13209_v17 }
 0x2d2   : > { %v5985_v30 = vrot.slane %v11457_v18, 7  ;;  %v6223_v51 = vrot.slane %v11457_v18, 1  ;;  %v11471_v4 = vmax.f32 %v5562_v57, %v13385_v16  ;;  %v6431_v53 = vrot.slane %v11451_v1, 6 }
 0x2d3   : > { %v4975_v26 = vpack.c.bf16 %v4943_v36, %v4943_v36  ;;  %v6433_v27 = vrot.slane %v11457_v18, 6  ;;  %v5046_v58 = vunpack.c.l.b16 %v4974_v3  ;;  %v5982_v43 = vrot.slane %v5755_v54, 7 }
 0x2d4   : > { %v5986_v8 = vsel %vm1393_vm2, %v5983_v59, %v5985_v30  ;;  %v6224_v28 = vsel %vm1634_vm3, %v6222_v13, %v6223_v51  ;;  %v6225_v32 = vrot.slane %v11471_v4, 1  ;;  %v6430_v17 = vrot.slane %v5755_v54, 6 }
 0x2d5   : > { %v6086_v25 = vmax.f32 %v11457_v18, %v5986_v8  ;;  %v5047_v19 = vunpack.c.l.b16 %v4975_v26  ;;  %v11480_v16 = vsel %vm1843_vm4, %v6431_v53, %v6433_v27  ;;  %v6638_v33 = vrot.slane %v11451_v1, 2 }
 0x2d6   : > { %v5984_v23 = vsel %vm1393_vm2, %v5982_v43, %v5983_v59  ;;  %v6226_v39 = vsel %vm1634_vm3, %v6223_v51, %v6225_v32  ;;  %v6639_v49 = vrot.slane %v11457_v18, 2  ;;  %v6641_v24 = vrot.slane %v11471_v4, 2 }
 0x2d7   : > { %v5065_v60 = vpack.c.b16 %v5047_v19, %v5046_v58  ;;  %v6085_v6 = vmax.f32 %v11451_v1, %v5984_v23  ;;  %v6326_v55 = vmax.f32 %v6086_v25, %v6226_v39  ;;  %v6432_v38 = vsel %vm1843_vm4, %v6430_v17, %v6431_v53 }
 0x2d8   : > { %v11490_v40 = vsel %vm2052_vm5, %v6638_v33, %v6639_v49  ;;  %v6642_v47 = vsel %vm2052_vm5, %v6639_v49, %v6641_v24  ;;  %v6846_v63 = vrot.slane %v5755_v54, 5  ;;  %v6847_v12 = vrot.slane %v11451_v1, 5 }
 0x2d9   : > { %v5111_v46 = vsel %vm2317_vm1, %v5065_v60, 0  ;;  %v6325_v7 = vmax.f32 %v6085_v6, %v6224_v28  ;;  %v6534_v9 = vmax.f32 %v6326_v55, %v11480_v16  ;;  %v6849_v57 = vrot.slane %v11457_v18, 5 }
 0x2da   : > { %5135 = vmatpush.bf16.xpose.msrb.mxu1 %v5111_v46  ;;  %v6848_v59 = vsel %vm4241_vm6, %v6846_v63, %v6847_v12  ;;  %v7054_v36 = vrot.slane %v11451_v1, 3  ;;  %v7055_v30 = vrot.slane %v11457_v18, 3  ;;  %v7057_v13 = vrot.slane %v11471_v4, 3  ;;  %v13414_v63 = vld [vmem:[#allocation124_spill] sm:$0xff] }
 0x2db   : > { %v6533_v51 = vmax.f32 %v6325_v7, %v6432_v38  ;;  %v6742_v3 = vmax.f32 %v6534_v9, %v6642_v47  ;;  %v6850_v53 = vsel %vm4241_vm6, %v6847_v12, %v6849_v57  ;;  %v7262_v26 = vrot.slane %v5755_v54, 4  ;;  %v13415_v9 = vld [vmem:[#allocation125_spill] sm:$0xff] }
 0x2dc   : > { %v7056_v8 = vsel %vm4450_vm7, %v7054_v36, %v7055_v30  ;;  %v7058_v28 = vsel %vm4450_vm7, %v7055_v30, %v7057_v13  ;;  %v7263_v58 = vrot.slane %v11451_v1, 4  ;;  %v7265_v43 = vrot.slane %v11457_v18, 4 }
 0x2dd   : > { %v6741_v25 = vmax.f32 %v6533_v51, %v11490_v40  ;;  %v6950_v32 = vmax.f32 %v6742_v3, %v6850_v53  ;;  %v7461_v19 = vrot.slane %v11471_v4, 4  ;;  %v7605_v17 = vrot.slane %v5755_v54, 3 }
 0x2de   : > { %v7264_v23 = vsel %vm4659_vm8, %v7262_v26, %v7263_v58  ;;  %v7266_v39 = vsel %vm4659_vm8, %v7263_v58, %v7265_v43  ;;  %v7749_v49 = vrot.slane %v11471_v4, 5  ;;  %v7893_v24 = vrot.slane %v5755_v54, 2 }
 0x2df   : > { %v6949_v60 = vmax.f32 %v6741_v25, %v6848_v59  ;;  %v7158_v6 = vmax.f32 %v6950_v32, %v7058_v28  ;;  %v7462_v55 = vsel %vm4659_vm8, %v7265_v43, %v7461_v19  ;;  %v7606_v1 = vsel %vm4450_vm7, %v7605_v17, %v7054_v36  ;;  %v13416_v59 = vld [vmem:[#allocation44_spill] sm:$0xff]  ;;  %v13419_v28 = vld [vmem:[#allocation47_spill] sm:$0xff] }
 0x2e0   : > { %v7750_v18 = vsel %vm4241_vm6, %v6849_v57, %v7749_v49  ;;  %v7894_v38 = vsel %vm2052_vm5, %v7893_v24, %v6638_v33  ;;  %v8037_v47 = vrot.slane %v11471_v4, 6  ;;  %v5201_v12 = vmax.f32 %v13414_v63, %v13400_v37  ;;  %v13417_v57 = vld [vmem:[#allocation45_spill] sm:$0xff]  ;;  %v13418_v33 = vld [vmem:[#allocation46_spill] sm:$0xff]  ;;  %v13420_v43 = vld [vmem:[#allocation8_spill] sm:$0xff] }
 0x2e1   : > { %v7157_v46 = vmax.f32 %v6949_v60, %v7056_v8  ;;  %v7366_v7 = vmax.f32 %v7158_v6, %v7266_v39  ;;  %v5202_v54 = vmax.f32 %v13415_v9, %v13401_v35  ;;  %v5395_v30 = vmax.f32 %v5199_v20, %v13416_v59  ;;  %v13444_v37 = vld [vmem:[#allocation26_spill] sm:$0xff] }
 0x2e2   : > { %v8038_v36 = vsel %vm1843_vm4, %v6433_v27, %v8037_v47  ;;  %v5396_v4 = vmax.f32 %v5200_v29, %v13417_v57  ;;  %v5397_v13 = vmax.f32 %v5201_v12, %v13418_v33  ;;  %v3397_v51 = vrot.slane %v13377_v15, 7 }
 0x2e3   : > { %v7365_v3 = vmax.f32 %v7157_v46, %v7264_v23  ;;  %v7510_v26 = vmax.f32 %v7366_v7, %v7462_v55  ;;  %v5398_v58 = vmax.f32 %v5202_v54, %v13419_v28  ;;  %v5591_v25 = vmax.f32 %v5395_v30, %v13420_v43  ;;  %v13421_v23 = vld [vmem:[#allocation49_spill] sm:$0xff] }
 0x2e4   : > { %v5592_v32 = vmax.f32 %v5396_v4, %v13242_v62  ;;  %v5593_v20 = vmax.f32 %v5397_v13, %v13244_v45  ;;  %v3398_v27 = vrot.slane %v13378_v52, 7  ;;  %v3400_v19 = vrot.slane %v13379_v21, 7 }
 0x2e5   : > { %v7509_v17 = vmax.f32 %v7365_v3, %v7266_v39  ;;  %v7654_v29 = vmax.f32 %v7510_v26, %v7056_v8  ;;  %v5594_v49 = vmax.f32 %v5398_v58, %v13246_v34  ;;  %v11539_v24 = vmax.f32 %v5591_v25, %v13392_v61 }
 0x2e6   : > { %v11542_v60 = vmax.f32 %v5592_v32, %v13421_v23  ;;  %v11545_v6 = vmax.f32 %v5593_v20, %v13394_v41  ;;  %v11548_v55 = vsel %vm1393_vm2, %v3397_v51, %v3398_v27  ;;  %v11551_v47 = vsel %vm1393_vm2, %v3398_v27, %v3400_v19 }
 0x2e7   : > { %v7653_v12 = vmax.f32 %v7509_v17, %v7606_v1  ;;  %v7798_v39 = vmax.f32 %v7654_v29, %v7750_v18  ;;  %v11554_v8 = vmax.f32 %v5594_v49, %v13396_v31  ;;  %v6022_v61 = vrot.slane %v11539_v24, 7 }
 0x2e8   : > { %v6023_v46 = vrot.slane %v11542_v60, 7  ;;  %v6025_v7 = vrot.slane %v11545_v6, 7  ;;  %v6262_v41 = vrot.slane %v11542_v60, 1  ;;  %v6263_v54 = vrot.slane %v11545_v6, 1 }
 0x2e9   : > { %v7797_v30 = vmax.f32 %v7653_v12, %v6850_v53  ;;  %v7942_v4 = vmax.f32 %v7798_v39, %v11490_v40  ;;  %v6265_v13 = vrot.slane %v11554_v8, 1  ;;  %v6470_v1 = vrot.slane %v11539_v24, 6 }
 0x2ea   : > { %v6024_v31 = vsel %vm1393_vm2, %v6022_v61, %v6023_v46  ;;  %v6026_v18 = vsel %vm1393_vm2, %v6023_v46, %v6025_v7  ;;  %v6264_v51 = vsel %vm1634_vm3, %v6262_v41, %v6263_v54  ;;  %v6471_v3 = vrot.slane %v11542_v60, 6 }
 0x2eb   : > { %v7941_v26 = vmax.f32 %v7797_v30, %v7894_v38  ;;  %v8086_v58 = vmax.f32 %v7942_v4, %v8038_v36  ;;  %v6101_v25 = vmax.f32 %v11542_v60, %v6024_v31  ;;  %v6102_v53 = vmax.f32 %v11545_v6, %v6026_v18 }
 0x2ec   : > { %v6266_v40 = vsel %vm1634_vm3, %v6263_v54, %v6265_v13  ;;  %v6472_v32 = vsel %vm1843_vm4, %v6470_v1, %v6471_v3  ;;  %v6473_v20 = vrot.slane %v11545_v6, 6  ;;  %v6678_v27 = vrot.slane %v11542_v60, 2 }
 0x2ed   : > { %v8085_v19 = vmax.f32 %v7941_v26, %v11480_v16  ;;  %v8118_v17 = vpack.c.bf16 %v8086_v58, %v8086_v58  ;;  %v6341_v29 = vmax.f32 %v6101_v25, %v6264_v51  ;;  %v6342_v49 = vmax.f32 %v6102_v53, %v6266_v40 }
 0x2ee   : > { %v11576_v38 = vsel %vm1843_vm4, %v6471_v3, %v6473_v20  ;;  %v6679_v36 = vrot.slane %v11545_v6, 2  ;;  %v6681_v23 = vrot.slane %v11554_v8, 2  ;;  %v6886_v12 = vrot.slane %v11539_v24, 5 }
 0x2ef   : > { %v8117_v39 = vpack.c.bf16 %v8085_v19, %v8085_v19  ;;  %v8190_v61 = vunpack.c.l.b16 %v8118_v17  ;;  %v6549_v46 = vmax.f32 %v6341_v29, %v6472_v32  ;;  %v6550_v7 = vmax.f32 %v6342_v49, %v11576_v38 }
 0x2f0   : > { %v11583_v41 = vsel %vm2052_vm5, %v6678_v27, %v6679_v36  ;;  %v6682_v16 = vsel %vm2052_vm5, %v6679_v36, %v6681_v23  ;;  %v6887_v54 = vrot.slane %v11542_v60, 5  ;;  %v6889_v30 = vrot.slane %v11545_v6, 5 }
 0x2f1   : > { %v8189_v4 = vunpack.c.l.b16 %v8117_v39  ;;  %v6757_v13 = vmax.f32 %v6549_v46, %v11583_v41  ;;  %v6758_v1 = vmax.f32 %v6550_v7, %v6682_v16  ;;  %v7094_v31 = vrot.slane %v11542_v60, 3 }
 0x2f2   : > { %v6888_v18 = vsel %vm4241_vm6, %v6886_v12, %v6887_v54  ;;  %v6890_v51 = vsel %vm4241_vm6, %v6887_v54, %v6889_v30  ;;  %v7095_v3 = vrot.slane %v11545_v6, 3  ;;  %v7097_v26 = vrot.slane %v11554_v8, 3 }
 0x2f3   : > { %v8218_v58 = vpack.c.b16 %v8190_v61, %v8189_v4  ;;  %v6965_v25 = vmax.f32 %v6757_v13, %v6888_v18  ;;  %v6966_v53 = vmax.f32 %v6758_v1, %v6890_v51  ;;  %v7302_v40 = vrot.slane %v11539_v24, 4 }
 0x2f4   : > { %v7096_v32 = vsel %vm4450_vm7, %v7094_v31, %v7095_v3  ;;  %v7098_v19 = vsel %vm4450_vm7, %v7095_v3, %v7097_v26  ;;  %v7303_v17 = vrot.slane %v11542_v60, 4  ;;  %v7305_v29 = vrot.slane %v11545_v6, 4 }
 0x2f5   : > { %v8244_v49 = vsel %vm2317_vm1, %v8218_v58, 0  ;;  %v7173_v36 = vmax.f32 %v6965_v25, %v7096_v32  ;;  %v7174_v23 = vmax.f32 %v6966_v53, %v7098_v19  ;;  %v7477_v12 = vrot.slane %v11554_v8, 4 }
 0x2f6   : > { %8286 = vmatpush.bf16.xpose.msrb.mxu2 %v8244_v49  ;;  %v7304_v39 = vsel %vm4659_vm8, %v7302_v40, %v7303_v17  ;;  %v7306_v61 = vsel %vm4659_vm8, %v7303_v17, %v7305_v29  ;;  %v7621_v46 = vrot.slane %v11539_v24, 3  ;;  %v7765_v7 = vrot.slane %v11554_v8, 5  ;;  %v13422_v40 = vld [vmem:[#allocation108_spill] sm:$0xff] }
 0x2f7   : > { %v7381_v16 = vmax.f32 %v7173_v36, %v7304_v39  ;;  %v7382_v54 = vmax.f32 %v7174_v23, %v7306_v61  ;;  %v7478_v60 = vsel %vm4659_vm8, %v7305_v29, %v7477_v12  ;;  %v7909_v6 = vrot.slane %v11539_v24, 2 }
 0x2f8   : > { %v7622_v4 = vsel %vm4450_vm7, %v7621_v46, %v7094_v31  ;;  %v7766_v13 = vsel %vm4241_vm6, %v6889_v30, %v7765_v7  ;;  %v8053_v1 = vrot.slane %v11554_v8, 6  ;;  %v3497_v18 = vmax.f32 %v13378_v52, %v11548_v55 }
 0x2f9   : > { %v7525_v3 = vmax.f32 %v7381_v16, %v7306_v61  ;;  %v7526_v26 = vmax.f32 %v7382_v54, %v7478_v60  ;;  %v7910_v58 = vsel %vm2052_vm5, %v7909_v6, %v6678_v27  ;;  %v3498_v25 = vmax.f32 %v13379_v21, %v11551_v47 }
 0x2fa   : > { %v8054_v53 = vsel %vm1843_vm4, %v6473_v20, %v8053_v1  ;;  %v3637_v24 = vrot.slane %v13378_v52, 1  ;;  %v3638_v31 = vrot.slane %v13379_v21, 1  ;;  %v3640_v30 = vrot.slane %v13422_v40, 1 }
 0x2fb   : > { %v7669_v19 = vmax.f32 %v7525_v3, %v7622_v4  ;;  %v7670_v8 = vmax.f32 %v7526_v26, %v7096_v32  ;;  %v3845_v17 = vrot.slane %v13377_v15, 6  ;;  %v3846_v55 = vrot.slane %v13378_v52, 6 }
 0x2fc   : > { %v3639_v29 = vsel %vm1634_vm3, %v3637_v24, %v3638_v31  ;;  %v3641_v27 = vsel %vm1634_vm3, %v3638_v31, %v3640_v30  ;;  %v3848_v47 = vrot.slane %v13379_v21, 6  ;;  %v4053_v20 = vrot.slane %v13378_v52, 2 }
 0x2fd   : > { %v7813_v49 = vmax.f32 %v7669_v19, %v6890_v51  ;;  %v7814_v36 = vmax.f32 %v7670_v8, %v7766_v13  ;;  %v3737_v23 = vmax.f32 %v3497_v18, %v3639_v29  ;;  %v3738_v12 = vmax.f32 %v3498_v25, %v3641_v27 }
 0x2fe   : > { %v3847_v39 = vsel %vm1843_vm4, %v3845_v17, %v3846_v55  ;;  %v3849_v32 = vsel %vm1843_vm4, %v3846_v55, %v3848_v47  ;;  %v4054_v61 = vrot.slane %v13379_v21, 2  ;;  %v4056_v46 = vrot.slane %v13422_v40, 2 }
 0x2ff   : > { %v7957_v7 = vmax.f32 %v7813_v49, %v7910_v58  ;;  %v7958_v16 = vmax.f32 %v7814_v36, %v11583_v41  ;;  %v3945_v54 = vmax.f32 %v3737_v23, %v3847_v39  ;;  %v3946_v60 = vmax.f32 %v3738_v12, %v3849_v32 }
 0x300   : > { %v4055_v6 = vsel %vm2052_vm5, %v4053_v20, %v4054_v61  ;;  %v4057_v51 = vsel %vm2052_vm5, %v4054_v61, %v4056_v46  ;;  %v4262_v4 = vrot.slane %v13377_v15, 5  ;;  %v4263_v13 = vrot.slane %v13378_v52, 5  ;;  %v13423_v61 = vld [vmem:[#allocation109_spill] sm:$0xff] }
 0x301   : > { %v8101_v1 = vmax.f32 %v7957_v7, %v11576_v38  ;;  %v8102_v18 = vmax.f32 %v7958_v16, %v8054_v53  ;;  %v4153_v3 = vmax.f32 %v3945_v54, %v4055_v6  ;;  %v4154_v26 = vmax.f32 %v3946_v60, %v4057_v51  ;;  %v13424_v7 = vld [vmem:[#allocation111_spill] sm:$0xff] }
 0x302   : > { %v4264_v25 = vsel %vm4241_vm6, %v4262_v4, %v4263_v13  ;;  %v4265_v58 = vrot.slane %v13379_v21, 5  ;;  %v4471_v41 = vrot.slane %v13378_v52, 3  ;;  %v4472_v24 = vrot.slane %v13379_v21, 3 }
 0x303   : > { %v8133_v31 = vpack.c.bf16 %v8101_v1, %v8101_v1  ;;  %v8134_v30 = vpack.c.bf16 %v8102_v18, %v8102_v18  ;;  %v4362_v19 = vmax.f32 %v4153_v3, %v4264_v25  ;;  %v4474_v8 = vrot.slane %v13422_v40, 3 }
 0x304   : > { %v4266_v17 = vsel %vm4241_vm6, %v4263_v13, %v4265_v58  ;;  %v4473_v38 = vsel %vm4450_vm7, %v4471_v41, %v4472_v24  ;;  %v4680_v53 = vrot.slane %v13377_v15, 4  ;;  %v4681_v55 = vrot.slane %v13378_v52, 4 }
 0x305   : > { %v8205_v29 = vunpack.c.l.b16 %v8133_v31  ;;  %v8206_v27 = vunpack.c.l.b16 %v8134_v30  ;;  %v4363_v47 = vmax.f32 %v4154_v26, %v4266_v17  ;;  %v4475_v20 = vsel %vm4450_vm7, %v4472_v24, %v4474_v8 }
 0x306   : > { %v4571_v49 = vmax.f32 %v4362_v19, %v4473_v38  ;;  %v4682_v36 = vsel %vm4659_vm8, %v4680_v53, %v4681_v55  ;;  %v4683_v23 = vrot.slane %v13379_v21, 4  ;;  %v4876_v12 = vrot.slane %v13422_v40, 4 }
 0x307   : > { %v8226_v39 = vpack.c.b16 %v8206_v27, %v8205_v29  ;;  %v4572_v32 = vmax.f32 %v4363_v47, %v4475_v20  ;;  %v3437_v46 = vrot.slane %v13423_v61, 7  ;;  %v3438_v15 = vrot.slane %v13424_v7, 7 }
 0x308   : > { %v4684_v52 = vsel %vm4659_vm8, %v4681_v55, %v4683_v23  ;;  %v4780_v16 = vmax.f32 %v4571_v49, %v4682_v36  ;;  %v4877_v54 = vsel %vm4659_vm8, %v4683_v23, %v4876_v12  ;;  %v3440_v60 = vrot.slane %v13388_v48, 7 }
 0x309   : > { %v8268_v6 = vsel %vm2317_vm1, %v8226_v39, 0  ;;  %v4781_v51 = vmax.f32 %v4572_v32, %v4684_v52  ;;  %v3439_v21 = vsel %vm1393_vm2, %v3437_v46, %v3438_v15  ;;  %v3677_v40 = vrot.slane %v13424_v7, 1 }
 0x30a   : > { %8300 = vmatpush.bf16.xpose.msrb.mxu3 %v8268_v6  ;;  %v4924_v4 = vmax.f32 %v4780_v16, %v4684_v52  ;;  %v3441_v13 = vsel %vm1393_vm2, %v3438_v15, %v3440_v60  ;;  %v3513_v1 = vmax.f32 %v13424_v7, %v3439_v21  ;;  %v3678_v18 = vrot.slane %v13388_v48, 1 }
 0x30b   : > { %v4925_v3 = vmax.f32 %v4781_v51, %v4877_v54  ;;  %v3514_v26 = vmax.f32 %v13388_v48, %v3441_v13  ;;  %v3680_v25 = vrot.slane %v13389_v22, 1  ;;  %v3885_v58 = vrot.slane %v13423_v61, 6 }
 0x30c   : > { %v4956_v41 = vpack.c.bf16 %v4924_v4, %v4924_v4  ;;  %v3679_v24 = vsel %vm1634_vm3, %v3677_v40, %v3678_v18  ;;  %v3886_v31 = vrot.slane %v13424_v7, 6  ;;  %v3888_v30 = vrot.slane %v13388_v48, 6 }
 0x30d   : > { %v4957_v19 = vpack.c.bf16 %v4925_v3, %v4925_v3  ;;  %v3681_v8 = vsel %vm1634_vm3, %v3678_v18, %v3680_v25  ;;  %v3753_v17 = vmax.f32 %v3513_v1, %v3679_v24  ;;  %v4093_v38 = vrot.slane %v13424_v7, 2  ;;  %v13425_v24 = vld [vmem:[#allocation127_spill] sm:$0xff] }
 0x30e   : > { %v5028_v53 = vunpack.c.l.b16 %v4956_v41  ;;  %v3754_v55 = vmax.f32 %v3514_v26, %v3681_v8  ;;  %v3887_v29 = vsel %vm1843_vm4, %v3885_v58, %v3886_v31  ;;  %v3889_v27 = vsel %vm1843_vm4, %v3886_v31, %v3888_v30 }
 0x30f   : > { %v5029_v47 = vunpack.c.l.b16 %v4957_v19  ;;  %v3961_v20 = vmax.f32 %v3753_v17, %v3887_v29  ;;  %v4094_v49 = vrot.slane %v13388_v48, 2  ;;  %v4096_v36 = vrot.slane %v13389_v22, 2 }
 0x310   : > { %v3962_v23 = vmax.f32 %v3754_v55, %v3889_v27  ;;  %v4302_v12 = vrot.slane %v13423_v61, 5  ;;  %v4303_v39 = vrot.slane %v13424_v7, 5  ;;  %v4305_v32 = vrot.slane %v13388_v48, 5  ;;  %v13428_v55 = vld [vmem:[#allocation17_spill] sm:$0xff] }
 0x311   : > { %v5056_v46 = vpack.c.b16 %v5029_v47, %v5028_v53  ;;  %v4095_v15 = vsel %vm2052_vm5, %v4093_v38, %v4094_v49  ;;  %v4097_v52 = vsel %vm2052_vm5, %v4094_v49, %v4096_v36  ;;  %v4511_v16 = vrot.slane %v13424_v7, 3  ;;  %v13427_v38 = vld [vmem:[#allocation10_spill] sm:$0xff]  ;;  %v13430_v49 = vld [vmem:[#allocation15_spill] sm:$0xff] }
 0x312   : > { %v4169_v54 = vmax.f32 %v3961_v20, %v4095_v15  ;;  %v4170_v60 = vmax.f32 %v3962_v23, %v4097_v52  ;;  %v4304_v6 = vsel %vm4241_vm6, %v4302_v12, %v4303_v39  ;;  %v4306_v51 = vsel %vm4241_vm6, %v4303_v39, %v4305_v32  ;;  %v13429_v47 = vld [vmem:[#allocation18_spill] sm:$0xff]  ;;  %v13431_v23 = vld [vmem:[#allocation139_spill] sm:$0xff] }
 0x313   : > { %v5084_v21 = vsel %vm2317_vm1, %v5056_v46, 0  ;;  %v4512_v40 = vrot.slane %v13388_v48, 3  ;;  %v4514_v4 = vrot.slane %v13389_v22, 3  ;;  %v4720_v13 = vrot.slane %v13423_v61, 4 }
 0x314   : > { %5122 = vmatpush.bf16.xpose.msrb.mxu0 %v5084_v21  ;;  %v4378_v1 = vmax.f32 %v4169_v54, %v4304_v6  ;;  %v4379_v18 = vmax.f32 %v4170_v60, %v4306_v51  ;;  %v4721_v3 = vrot.slane %v13424_v7, 4  ;;  %v4723_v26 = vrot.slane %v13388_v48, 4  ;;  %v13426_v7 = vld [vmem:[#allocation130_spill] sm:$0xff] }
 0x315   : > { %v4513_v25 = vsel %vm4450_vm7, %v4511_v16, %v4512_v40  ;;  %v4515_v58 = vsel %vm4450_vm7, %v4512_v40, %v4514_v4  ;;  %v4892_v41 = vrot.slane %v13389_v22, 4  ;;  %v5163_v31 = vmax.f32 %v13425_v24, %v13412_v14  ;;  %v13432_v16 = vld [vmem:[#allocation140_spill] sm:$0xff] }
 0x316   : > { %v4587_v30 = vmax.f32 %v4378_v1, %v4513_v25  ;;  %v4588_v19 = vmax.f32 %v4379_v18, %v4515_v58  ;;  %v4722_v61 = vsel %vm4659_vm8, %v4720_v13, %v4721_v3  ;;  %v4724_v8 = vsel %vm4659_vm8, %v4721_v3, %v4723_v26 }
 0x317   : > { %v4893_v17 = vsel %vm4659_vm8, %v4723_v26, %v4892_v41  ;;  %v5166_v48 = vmax.f32 %v13426_v7, %v13413_v0  ;;  %v5359_v53 = vmax.f32 %v5163_v31, %v13427_v38  ;;  %v5978_v29 = vrot.slane %v13428_v55, 7 }
 0x318   : > { %v4796_v27 = vmax.f32 %v4587_v30, %v4722_v61  ;;  %v4797_v22 = vmax.f32 %v4588_v19, %v4724_v8  ;;  %v5980_v20 = vrot.slane %v13429_v47, 7  ;;  %v6217_v14 = vrot.slane %v13428_v55, 1 }
 0x319   : > { %v5362_v36 = vmax.f32 %v5166_v48, %v13430_v49  ;;  %v5555_v12 = vmax.f32 %v5359_v53, %v13431_v23  ;;  %v6218_v39 = vrot.slane %v13429_v47, 1  ;;  %v6426_v32 = vrot.slane %v13428_v55, 6 }
 0x31a   : > { %v4940_v46 = vmax.f32 %v4796_v27, %v4724_v8  ;;  %v4941_v0 = vmax.f32 %v4797_v22, %v4893_v17  ;;  %v5981_v15 = vsel %vm1393_vm2, %v5978_v29, %v5980_v20  ;;  %v6428_v52 = vrot.slane %v13429_v47, 6 }
 0x31b   : > { %v5558_v54 = vmax.f32 %v5362_v36, %v13432_v16  ;;  %v5751_v60 = vmax.f32 %v5555_v12, %v13238_v11  ;;  %v6084_v6 = vmax.f32 %v13429_v47, %v5981_v15  ;;  %v6219_v51 = vsel %vm1634_vm3, %v6217_v14, %v6218_v39 }
 0x31c   : > { %v4972_v21 = vpack.c.bf16 %v4940_v46, %v4940_v46  ;;  %v4973_v40 = vpack.c.bf16 %v4941_v0, %v4941_v0  ;;  %v11712_v4 = vsel %vm1843_vm4, %v6426_v32, %v6428_v52  ;;  %v6633_v13 = vrot.slane %v13428_v55, 2 }
 0x31d   : > { %v5754_v1 = vmax.f32 %v5558_v54, %v13239_v2  ;;  %v5977_v18 = vrot.slane %v5751_v60, 7  ;;  %v6425_v3 = vrot.slane %v5751_v60, 6  ;;  %v6634_v26 = vrot.slane %v13429_v47, 2 }
 0x31e   : > { %v5044_v11 = vunpack.c.l.b16 %v4972_v21  ;;  %v5045_v25 = vunpack.c.l.b16 %v4973_v40  ;;  %v6841_v58 = vrot.slane %v5751_v60, 5  ;;  %v6842_v41 = vrot.slane %v13428_v55, 5 }
 0x31f   : > { %v5979_v31 = vsel %vm1393_vm2, %v5977_v18, %v5978_v29  ;;  %v6220_v30 = vrot.slane %v5754_v1, 1  ;;  %v6427_v19 = vsel %vm1843_vm4, %v6425_v3, %v6426_v32  ;;  %v11721_v61 = vsel %vm2052_vm5, %v6633_v13, %v6634_v26 }
 0x320   : > { %v5064_v8 = vpack.c.b16 %v5045_v25, %v5044_v11  ;;  %v6083_v2 = vmax.f32 %v13428_v55, %v5979_v31  ;;  %v6636_v17 = vrot.slane %v5754_v1, 2  ;;  %v6843_v48 = vsel %vm4241_vm6, %v6841_v58, %v6842_v41 }
 0x321   : > { %v6221_v53 = vsel %vm1634_vm3, %v6218_v39, %v6220_v30  ;;  %v6844_v27 = vrot.slane %v13429_v47, 5  ;;  %v7049_v22 = vrot.slane %v13428_v55, 3  ;;  %v7050_v29 = vrot.slane %v13429_v47, 3 }
 0x322   : > { %v5108_v20 = vsel %vm2317_vm1, %v5064_v8, 0  ;;  %v6323_v14 = vmax.f32 %v6083_v2, %v6219_v51  ;;  %v6324_v36 = vmax.f32 %v6084_v6, %v6221_v53  ;;  %v6637_v12 = vsel %vm2052_vm5, %v6634_v26, %v6636_v17  ;;  %v13433_v17 = vld [vmem:[#allocation131_spill] sm:$0xff] }
 0x323   : > { %5136 = vmatpush.bf16.xpose.msrb.mxu1 %v5108_v20  ;;  %v6845_v32 = vsel %vm4241_vm6, %v6842_v41, %v6844_v27  ;;  %v7051_v46 = vsel %vm4450_vm7, %v7049_v22, %v7050_v29  ;;  %v7052_v0 = vrot.slane %v5754_v1, 3  ;;  %v7257_v15 = vrot.slane %v5751_v60, 4  ;;  %v13434_v20 = vld [vmem:[#allocation132_spill] sm:$0xff] }
 0x324   : > { %v6531_v39 = vmax.f32 %v6323_v14, %v6427_v19  ;;  %v6532_v54 = vmax.f32 %v6324_v36, %v11712_v4  ;;  %v7258_v21 = vrot.slane %v13428_v55, 4  ;;  %v7260_v40 = vrot.slane %v13429_v47, 4  ;;  %v13435_v36 = vld [vmem:[#allocation133_spill] sm:$0xff] }
 0x325   : > { %v7053_v18 = vsel %vm4450_vm7, %v7050_v29, %v7052_v0  ;;  %v7459_v51 = vrot.slane %v5754_v1, 4  ;;  %v7603_v6 = vrot.slane %v5751_v60, 3  ;;  %v7747_v3 = vrot.slane %v5754_v1, 5  ;;  %v13436_v0 = vld [vmem:[#allocation134_spill] sm:$0xff] }
 0x326   : > { %v6739_v26 = vmax.f32 %v6531_v39, %v11721_v61  ;;  %v6740_v11 = vmax.f32 %v6532_v54, %v6637_v12  ;;  %v7259_v25 = vsel %vm4659_vm8, %v7257_v15, %v7258_v21  ;;  %v7261_v58 = vsel %vm4659_vm8, %v7258_v21, %v7260_v40  ;;  %v13438_v39 = vld [vmem:[#allocation72_spill] sm:$0xff] }
 0x327   : > { %v7460_v41 = vsel %vm4659_vm8, %v7260_v40, %v7459_v51  ;;  %v7604_v31 = vsel %vm4450_vm7, %v7603_v6, %v7049_v22  ;;  %v7748_v55 = vsel %vm4241_vm6, %v6844_v27, %v7747_v3  ;;  %v7891_v30 = vrot.slane %v5751_v60, 2  ;;  %v13440_v40 = vld [vmem:[#allocation74_spill] sm:$0xff] }
 0x328   : > { %v6947_v19 = vmax.f32 %v6739_v26, %v6843_v48  ;;  %v6948_v8 = vmax.f32 %v6740_v11, %v6845_v32  ;;  %v8035_v2 = vrot.slane %v5754_v1, 6  ;;  %v5195_v53 = vmax.f32 %v13433_v17, %v13420_v43  ;;  %v13437_v1 = vld [vmem:[#allocation71_spill] sm:$0xff]  ;;  %v13441_v11 = vld [vmem:[#allocation24_spill] sm:$0xff] }
 0x329   : > { %v7892_v29 = vsel %vm2052_vm5, %v7891_v30, %v6633_v13  ;;  %v5196_v14 = vmax.f32 %v13434_v20, %v13242_v62  ;;  %v5197_v12 = vmax.f32 %v13435_v36, %v13244_v45  ;;  %v5198_v22 = vmax.f32 %v13436_v0, %v13246_v34  ;;  %v13439_v13 = vld [vmem:[#allocation73_spill] sm:$0xff] }
 0x32a   : > { %v7155_v15 = vmax.f32 %v6947_v19, %v7051_v46  ;;  %v7156_v27 = vmax.f32 %v6948_v8, %v7053_v18  ;;  %v8036_v60 = vsel %vm1843_vm4, %v6428_v52, %v8035_v2  ;;  %v5391_v48 = vmax.f32 %v5195_v53, %v13437_v1  ;;  %v13442_v19 = vld [vmem:[#allocation116_spill] sm:$0xff]  ;;  %v13443_v8 = vld [vmem:[#allocation25_spill] sm:$0xff]  ;;  %v13445_v2 = vld [vmem:[#allocation27_spill] sm:$0xff] }
 0x32b   : > { %v5392_v54 = vmax.f32 %v5196_v14, %v13438_v39  ;;  %v5393_v21 = vmax.f32 %v5197_v12, %v13439_v13  ;;  %v5394_v51 = vmax.f32 %v5198_v22, %v13440_v40  ;;  %v3392_v6 = vrot.slane %v13402_v44, 7 }
 0x32c   : > { %v7363_v3 = vmax.f32 %v7155_v15, %v7259_v25  ;;  %v7364_v26 = vmax.f32 %v7156_v27, %v7261_v58  ;;  %v5587_v30 = vmax.f32 %v5391_v48, %v13441_v11  ;;  %v3393_v18 = vrot.slane %v13442_v19, 7 }
 0x32d   : > { %v5588_v47 = vmax.f32 %v5392_v54, %v13443_v8  ;;  %v5589_v52 = vmax.f32 %v5393_v21, %v13444_v37  ;;  %v5590_v53 = vmax.f32 %v5394_v51, %v13445_v2  ;;  %v3395_v14 = vrot.slane %v13446_v42, 7 }
 0x32e   : > { %v7507_v34 = vmax.f32 %v7363_v3, %v7261_v58  ;;  %v7508_v12 = vmax.f32 %v7364_v26, %v7460_v41  ;;  %v11767_v22 = vmax.f32 %v5587_v30, %v13416_v59  ;;  %v11770_v25 = vsel %vm1393_vm2, %v3392_v6, %v3393_v18 }
 0x32f   : > { %v11773_v15 = vmax.f32 %v5588_v47, %v13417_v57  ;;  %v11776_v27 = vmax.f32 %v5589_v52, %v13418_v33  ;;  %v11779_v48 = vmax.f32 %v5590_v53, %v13419_v28  ;;  %v11782_v54 = vsel %vm1393_vm2, %v3393_v18, %v3395_v14 }
 0x330   : > { %v7651_v58 = vmax.f32 %v7507_v34, %v7604_v31  ;;  %v7652_v41 = vmax.f32 %v7508_v12, %v7051_v46  ;;  %v6017_v59 = vrot.slane %v11767_v22, 7  ;;  %v6465_v21 = vrot.slane %v11767_v22, 6 }
 0x331   : > { %v6018_v51 = vrot.slane %v11773_v15, 7  ;;  %v6020_v57 = vrot.slane %v11776_v27, 7  ;;  %v6257_v6 = vrot.slane %v11773_v15, 1  ;;  %v6258_v33 = vrot.slane %v11776_v27, 1 }
 0x332   : > { %v7795_v3 = vmax.f32 %v7651_v58, %v6845_v32  ;;  %v7796_v28 = vmax.f32 %v7652_v41, %v7748_v55  ;;  %v6260_v26 = vrot.slane %v11779_v48, 1  ;;  %v6466_v30 = vrot.slane %v11773_v15, 6 }
 0x333   : > { %v6019_v34 = vsel %vm1393_vm2, %v6017_v59, %v6018_v51  ;;  %v6021_v46 = vsel %vm1393_vm2, %v6018_v51, %v6020_v57  ;;  %v6259_v31 = vsel %vm1634_vm3, %v6257_v6, %v6258_v33  ;;  %v6468_v18 = vrot.slane %v11776_v27, 6 }
 0x334   : > { %v7939_v47 = vmax.f32 %v7795_v3, %v7892_v29  ;;  %v7940_v52 = vmax.f32 %v7796_v28, %v11721_v61  ;;  %v6099_v53 = vmax.f32 %v11773_v15, %v6019_v34  ;;  %v6100_v32 = vmax.f32 %v11776_v27, %v6021_v46 }
 0x335   : > { %v6261_v55 = vsel %vm1634_vm3, %v6258_v33, %v6260_v26  ;;  %v6467_v14 = vsel %vm1843_vm4, %v6465_v21, %v6466_v30  ;;  %v11804_v12 = vsel %vm1843_vm4, %v6466_v30, %v6468_v18  ;;  %v6673_v58 = vrot.slane %v11773_v15, 2 }
 0x336   : > { %v8083_v41 = vmax.f32 %v7939_v47, %v11712_v4  ;;  %v8084_v29 = vmax.f32 %v7940_v52, %v8036_v60  ;;  %v6339_v59 = vmax.f32 %v6099_v53, %v6259_v31  ;;  %v6340_v61 = vmax.f32 %v6100_v32, %v6261_v55 }
 0x337   : > { %v6674_v51 = vrot.slane %v11776_v27, 2  ;;  %v6676_v57 = vrot.slane %v11779_v48, 2  ;;  %v6881_v6 = vrot.slane %v11767_v22, 5  ;;  %v6882_v21 = vrot.slane %v11773_v15, 5 }
 0x338   : > { %v8115_v33 = vpack.c.bf16 %v8083_v41, %v8083_v41  ;;  %v8116_v3 = vpack.c.bf16 %v8084_v29, %v8084_v29  ;;  %v6547_v28 = vmax.f32 %v6339_v59, %v6467_v14  ;;  %v6548_v26 = vmax.f32 %v6340_v61, %v11804_v12 }
 0x339   : > { %v11814_v30 = vsel %vm2052_vm5, %v6673_v58, %v6674_v51  ;;  %v6677_v4 = vsel %vm2052_vm5, %v6674_v51, %v6676_v57  ;;  %v6883_v60 = vsel %vm4241_vm6, %v6881_v6, %v6882_v21  ;;  %v6884_v34 = vrot.slane %v11776_v27, 5 }
 0x33a   : > { %v8187_v46 = vunpack.c.l.b16 %v8115_v33  ;;  %v8188_v31 = vunpack.c.l.b16 %v8116_v3  ;;  %v6755_v47 = vmax.f32 %v6547_v28, %v11814_v30  ;;  %v6756_v52 = vmax.f32 %v6548_v26, %v6677_v4 }
 0x33b   : > { %v6885_v53 = vsel %vm4241_vm6, %v6882_v21, %v6884_v34  ;;  %v7089_v32 = vrot.slane %v11773_v15, 3  ;;  %v7090_v55 = vrot.slane %v11776_v27, 3  ;;  %v7092_v14 = vrot.slane %v11779_v48, 3 }
 0x33c   : > { %v8217_v41 = vpack.c.b16 %v8188_v31, %v8187_v46  ;;  %v6963_v29 = vmax.f32 %v6755_v47, %v6883_v60  ;;  %v6964_v59 = vmax.f32 %v6756_v52, %v6885_v53  ;;  %v7297_v61 = vrot.slane %v11767_v22, 4 }
 0x33d   : > { %v7091_v51 = vsel %vm4450_vm7, %v7089_v32, %v7090_v55  ;;  %v7093_v57 = vsel %vm4450_vm7, %v7090_v55, %v7092_v14  ;;  %v7298_v6 = vrot.slane %v11773_v15, 4  ;;  %v7300_v33 = vrot.slane %v11776_v27, 4 }
 0x33e   : > { %v8241_v21 = vsel %vm2317_vm1, %v8217_v41, 0  ;;  %v7171_v3 = vmax.f32 %v6963_v29, %v7091_v51  ;;  %v7172_v28 = vmax.f32 %v6964_v59, %v7093_v57  ;;  %v7475_v26 = vrot.slane %v11779_v48, 4 }
 0x33f   : > { %8287 = vmatpush.bf16.xpose.msrb.mxu2 %v8241_v21  ;;  %v7299_v4 = vsel %vm4659_vm8, %v7297_v61, %v7298_v6  ;;  %v7301_v60 = vsel %vm4659_vm8, %v7298_v6, %v7300_v33  ;;  %v7619_v46 = vrot.slane %v11767_v22, 3  ;;  %v7763_v31 = vrot.slane %v11779_v48, 5 }
 0x340   : > { %v7379_v47 = vmax.f32 %v7171_v3, %v7299_v4  ;;  %v7380_v52 = vmax.f32 %v7172_v28, %v7301_v60  ;;  %v7476_v15 = vsel %vm4659_vm8, %v7300_v33, %v7475_v26  ;;  %v7907_v55 = vrot.slane %v11767_v22, 2 }
 0x341   : > { %v7620_v14 = vsel %vm4450_vm7, %v7619_v46, %v7089_v32  ;;  %v7764_v41 = vsel %vm4241_vm6, %v6884_v34, %v7763_v31  ;;  %v8051_v29 = vrot.slane %v11779_v48, 6  ;;  %v3495_v59 = vmax.f32 %v13442_v19, %v11770_v25 }
 0x342   : > { %v7523_v61 = vmax.f32 %v7379_v47, %v7301_v60  ;;  %v7524_v57 = vmax.f32 %v7380_v52, %v7476_v15  ;;  %v7908_v6 = vsel %vm2052_vm5, %v7907_v55, %v6673_v58  ;;  %v3496_v21 = vmax.f32 %v13446_v42, %v11782_v54 }
 0x343   : > { %v8052_v22 = vsel %vm1843_vm4, %v6468_v18, %v8051_v29  ;;  %v3632_v32 = vrot.slane %v13442_v19, 1  ;;  %v3633_v34 = vrot.slane %v13446_v42, 1  ;;  %v3635_v48 = vrot.slane %v13403_v50, 1 }
 0x344   : > { %v7667_v33 = vmax.f32 %v7523_v61, %v7620_v14  ;;  %v7668_v3 = vmax.f32 %v7524_v57, %v7091_v51  ;;  %v3840_v25 = vrot.slane %v13402_v44, 6  ;;  %v3841_v28 = vrot.slane %v13442_v19, 6 }
 0x345   : > { %v3634_v58 = vsel %vm1634_vm3, %v3632_v32, %v3633_v34  ;;  %v3636_v54 = vsel %vm1634_vm3, %v3633_v34, %v3635_v48  ;;  %v3843_v27 = vrot.slane %v13446_v42, 6  ;;  %v4048_v18 = vrot.slane %v13442_v19, 2 }
 0x346   : > { %v7811_v26 = vmax.f32 %v7667_v33, %v6885_v53  ;;  %v7812_v4 = vmax.f32 %v7668_v3, %v7764_v41  ;;  %v3735_v60 = vmax.f32 %v3495_v59, %v3634_v58  ;;  %v3736_v46 = vmax.f32 %v3496_v21, %v3636_v54  ;;  %v8586_v3 = vld [vmem:[%s12579_s1] sm:$0xff] }
 0x347   : > { %v3842_v31 = vsel %vm1843_vm4, %v3840_v25, %v3841_v28  ;;  %v3844_v51 = vsel %vm1843_vm4, %v3841_v28, %v3843_v27  ;;  %v4049_v47 = vrot.slane %v13446_v42, 2  ;;  %v4051_v52 = vrot.slane %v13403_v50, 2  ;;  %8548 = vmatmul.msk.bf16.vlgmr.msra.gmra.mxu2 %vm2317_vm1, %v8586_v3  ;;  %8549 = vmatmul.msk.bf16.vlgmr.msra.gmra.mxu3 %vm2317_vm1, %v8586_v3 }
 0x348   : > { %v7955_v15 = vmax.f32 %v7811_v26, %v7908_v6  ;;  %v7956_v55 = vmax.f32 %v7812_v4, %v11814_v30  ;;  %v3943_v14 = vmax.f32 %v3735_v60, %v3842_v31  ;;  %v3944_v29 = vmax.f32 %v3736_v46, %v3844_v51 }
 0x349   : > { %v4050_v61 = vsel %vm2052_vm5, %v4048_v18, %v4049_v47  ;;  %v4052_v53 = vsel %vm2052_vm5, %v4049_v47, %v4051_v52  ;;  %v4257_v41 = vrot.slane %v13402_v44, 5  ;;  %v4258_v59 = vrot.slane %v13442_v19, 5 }
 0x34a   : > { %v8099_v57 = vmax.f32 %v7955_v15, %v11804_v12  ;;  %v8100_v21 = vmax.f32 %v7956_v55, %v8052_v22  ;;  %v4151_v32 = vmax.f32 %v3943_v14, %v4050_v61  ;;  %v4152_v34 = vmax.f32 %v3944_v29, %v4052_v53 }
 0x34b   : > { %v4259_v48 = vsel %vm4241_vm6, %v4257_v41, %v4258_v59  ;;  %v4260_v6 = vrot.slane %v13446_v42, 5  ;;  %v4466_v30 = vrot.slane %v13442_v19, 3  ;;  %v4467_v33 = vrot.slane %v13446_v42, 3 }
 0x34c   : > { %v8131_v25 = vpack.c.bf16 %v8099_v57, %v8099_v57  ;;  %v8132_v28 = vpack.c.bf16 %v8100_v21, %v8100_v21  ;;  %v4360_v58 = vmax.f32 %v4151_v32, %v4259_v48  ;;  %v4469_v12 = vrot.slane %v13403_v50, 3 }
 0x34d   : > { %v4261_v22 = vsel %vm4241_vm6, %v4258_v59, %v4260_v6  ;;  %v4468_v54 = vsel %vm4450_vm7, %v4466_v30, %v4467_v33  ;;  %v4675_v27 = vrot.slane %v13402_v44, 4  ;;  %v4676_v18 = vrot.slane %v13442_v19, 4 }
 0x34e   : > { %v8203_v26 = vunpack.c.l.b16 %v8131_v25  ;;  %v8204_v4 = vunpack.c.l.b16 %v8132_v28  ;;  %v4361_v60 = vmax.f32 %v4152_v34, %v4261_v22  ;;  %v4470_v46 = vsel %vm4450_vm7, %v4467_v33, %v4469_v12 }
 0x34f   : > { %v4569_v31 = vmax.f32 %v4360_v58, %v4468_v54  ;;  %v4677_v51 = vsel %vm4659_vm8, %v4675_v27, %v4676_v18  ;;  %v4678_v47 = vrot.slane %v13446_v42, 4  ;;  %v4874_v52 = vrot.slane %v13403_v50, 4 }
 0x350   : > { %v8225_v15 = vpack.c.b16 %v8204_v4, %v8203_v26  ;;  %v4570_v44 = vmax.f32 %v4361_v60, %v4470_v46  ;;  %v3432_v19 = vrot.slane %v13410_v5, 7  ;;  %v3433_v55 = vrot.slane %v13411_v10, 7 }
 0x351   : > { %v4679_v14 = vsel %vm4659_vm8, %v4676_v18, %v4678_v47  ;;  %v4778_v29 = vmax.f32 %v4569_v31, %v4677_v51  ;;  %v4875_v61 = vsel %vm4659_vm8, %v4678_v47, %v4874_v52  ;;  %v3435_v53 = vrot.slane %v13414_v63, 7 }
 0x352   : > { %v8265_v41 = vsel %vm2317_vm1, %v8225_v15, 0  ;;  %v4779_v59 = vmax.f32 %v4570_v44, %v4679_v14  ;;  %v3434_v42 = vsel %vm1393_vm2, %v3432_v19, %v3433_v55  ;;  %v3672_v50 = vrot.slane %v13411_v10, 1 }
 0x353   : > { %8301 = vmatpush.bf16.xpose.msrb.mxu3 %v8265_v41  ;;  %v4922_v57 = vmax.f32 %v4778_v29, %v4679_v14  ;;  %v3436_v21 = vsel %vm1393_vm2, %v3433_v55, %v3435_v53  ;;  %v3511_v32 = vmax.f32 %v13411_v10, %v3434_v42  ;;  %v3673_v34 = vrot.slane %v13414_v63, 1 }
 0x354   : > { %v4923_v48 = vmax.f32 %v4779_v59, %v4875_v61  ;;  %v3512_v6 = vmax.f32 %v13414_v63, %v3436_v21  ;;  %v3675_v30 = vrot.slane %v13415_v9, 1  ;;  %v3880_v33 = vrot.slane %v13410_v5, 6 }
 0x355   : > { %v4954_v3 = vpack.c.bf16 %v4922_v57, %v4922_v57  ;;  %v3674_v25 = vsel %vm1634_vm3, %v3672_v50, %v3673_v34  ;;  %v3881_v28 = vrot.slane %v13411_v10, 6  ;;  %v3883_v58 = vrot.slane %v13414_v63, 6  ;;  %v11916_v50 = vld [vmem:[#allocation2 + $0x10] sm:$0xff]  }
 0x356   : > { %v4955_v12 = vpack.c.bf16 %v4923_v48, %v4923_v48  ;;  %v3676_v22 = vsel %vm1634_vm3, %v3673_v34, %v3675_v30  ;;  %v3751_v54 = vmax.f32 %v3511_v32, %v3674_v25  ;;  %v4088_v27 = vrot.slane %v13411_v10, 2 }
 0x357   : > { %v5026_v18 = vunpack.c.l.b16 %v4954_v3  ;;  %v3752_v26 = vmax.f32 %v3512_v6, %v3676_v22  ;;  %v3882_v4 = vsel %vm1843_vm4, %v3880_v33, %v3881_v28  ;;  %v3884_v60 = vsel %vm1843_vm4, %v3881_v28, %v3883_v58  ;;  %v11924_v3 = vld [vmem:[#allocation2 + $0x18] sm:$0xff]  }
 0x358   : > { %v5027_v46 = vunpack.c.l.b16 %v4955_v12  ;;  %v3959_v31 = vmax.f32 %v3751_v54, %v3882_v4  ;;  %v4089_v51 = vrot.slane %v13414_v63, 2  ;;  %v4091_v47 = vrot.slane %v13415_v9, 2 }
 0x359   : > { %v3960_v52 = vmax.f32 %v3752_v26, %v3884_v60  ;;  %v4297_v15 = vrot.slane %v13410_v5, 5  ;;  %v4298_v44 = vrot.slane %v13411_v10, 5  ;;  %v4300_v19 = vrot.slane %v13414_v63, 5 }
 0x35a   : > { %v5055_v55 = vpack.c.b16 %v5027_v46, %v5026_v18  ;;  %v4090_v14 = vsel %vm2052_vm5, %v4088_v27, %v4089_v51  ;;  %v4092_v29 = vsel %vm2052_vm5, %v4089_v51, %v4091_v47  ;;  %v4506_v61 = vrot.slane %v13411_v10, 3  ;;  %v13449_v51 = vld [vmem:[#allocation16_spill] sm:$0xff] }
 0x35b   : > { %v4167_v53 = vmax.f32 %v3959_v31, %v4090_v14  ;;  %v4168_v41 = vmax.f32 %v3960_v52, %v4092_v29  ;;  %v4299_v59 = vsel %vm4241_vm6, %v4297_v15, %v4298_v44  ;;  %v4301_v42 = vsel %vm4241_vm6, %v4298_v44, %v4300_v19  ;;  %v13451_v15 = vld [vmem:[#allocation142_spill] sm:$0xff]  ;;  %v13452_v19 = vld [vmem:[#allocation143_spill] sm:$0xff]  ;;  %v13453_v14 = vld [vmem:[#allocation88_spill] sm:$0xff] }
 0x35c   : > { %v5081_v57 = vsel %vm2317_vm1, %v5055_v55, 0  ;;  %v4507_v21 = vrot.slane %v13414_v63, 3  ;;  %v4509_v32 = vrot.slane %v13415_v9, 3  ;;  %v4715_v34 = vrot.slane %v13410_v5, 4 }
 0x35d   : > { %5123 = vmatpush.bf16.xpose.msrb.mxu0 %v5081_v57  ;;  %v4376_v48 = vmax.f32 %v4167_v53, %v4299_v59  ;;  %v4377_v6 = vmax.f32 %v4168_v41, %v4301_v42  ;;  %v4716_v30 = vrot.slane %v13411_v10, 4  ;;  %v4718_v33 = vrot.slane %v13414_v63, 4 }
 0x35e   : > { %v4508_v25 = vsel %vm4450_vm7, %v4506_v61, %v4507_v21  ;;  %v4510_v28 = vsel %vm4450_vm7, %v4507_v21, %v4509_v32  ;;  %v4890_v58 = vrot.slane %v13415_v9, 4  ;;  %v12906_v12 = vunpack.c.l.bf16 %v11916_v50  ;;  %v13447_v9 = vld [vmem:[#allocation99_spill] sm:$0xff]  ;;  %v13454_v61 = vld [vmem:[#allocation141_spill] sm:$0xff]  ;;  %v13456_v21 = vld [vmem:[#allocation14_spill] sm:$0xff] }
 0x35f   : > { %v4585_v22 = vmax.f32 %v4376_v48, %v4508_v25  ;;  %v4586_v54 = vmax.f32 %v4377_v6, %v4510_v28  ;;  %v4717_v5 = vsel %vm4659_vm8, %v4715_v34, %v4716_v30  ;;  %v4719_v27 = vsel %vm4659_vm8, %v4716_v30, %v4718_v33  ;;  %v13457_v34 = vld [vmem:[#allocation19_spill] sm:$0xff]  ;;  %v13458_v6 = vld [vmem:[#allocation9_spill] sm:$0xff] }
 0x360   : > { %v4891_v10 = vsel %vm4659_vm8, %v4718_v33, %v4890_v58  ;;  %v8601_v63 = vunpack.c.h.bf16 %v11916_v50  ;;  %v8604_v18 = vunpack.c.l.bf16 %v11924_v3  ;;  %v12905_v26 = vunpack.c.h.bf16 %v11924_v3 }
 0x361   : > { %v4794_v4 = vmax.f32 %v4585_v22, %v4717_v5  ;;  %v4795_v60 = vmax.f32 %v4586_v54, %v4719_v27  ;;  %v13448_v46 = vmax.f32 %v13447_v9, %v13431_v23  ;;  %v13450_v47 = vmax.f32 %v13449_v51, %v13432_v16  ;;  %v13455_v16 = vld [vmem:[#allocation11_spill] sm:$0xff] }
 0x362   : > { %v11945_v44 = vmax.f32 %v13451_v15, %v8601_v63  ;;  %v11948_v55 = vmax.f32 %v13452_v19, %v8604_v18  ;;  %v5552_v29 = vmax.f32 %v13453_v14, %v8601_v63  ;;  %v5553_v53 = vmax.f32 %v13454_v61, %v8604_v18 }
 0x363   : > { %v5355_v31 = vmax.f32 %v13448_v46, %v13398_v56  ;;  %v5358_v52 = vmax.f32 %v13450_v47, %v13401_v35  ;;  %v4938_v41 = vmax.f32 %v4794_v4, %v4719_v27  ;;  %v4939_v59 = vmax.f32 %v4795_v60, %v4891_v10 }
 0x364   : > { %v11957_v57 = vmax.f32 %v5552_v29, %v13455_v16  ;;  %v11960_v32 = vmax.f32 %v5553_v53, %v13456_v21  ;;  %v5191_v48 = vmax.f32 %v13457_v34, %v13441_v11  ;;  %v5192_v30 = vmax.f32 %v13458_v6, %v13443_v8  ;;  %v13466_v11 = vld [vmem:[#allocation33_spill] sm:$0xff] }
 0x365   : > { %v5551_v23 = vmax.f32 %v5355_v31, %v12906_v12  ;;  %v5554_v42 = vmax.f32 %v5358_v52, %v12905_v26  ;;  %v4970_v33 = vpack.c.bf16 %v4938_v41, %v4938_v41  ;;  %v4971_v25 = vpack.c.bf16 %v4939_v59, %v4939_v59  ;;  %v13469_v12 = vld [vmem:[#allocation35_spill] sm:$0xff] }
 0x366   : > { %v5973_v22 = vrot.slane %v11957_v57, 7  ;;  %v5975_v54 = vrot.slane %v11960_v32, 7  ;;  %v6212_v5 = vrot.slane %v11957_v57, 1  ;;  %v6213_v27 = vrot.slane %v11960_v32, 1 }
 0x367   : > { %v11967_v28 = vmax.f32 %v5551_v23, %v13427_v38  ;;  %v11970_v58 = vmax.f32 %v5554_v42, %v13430_v49  ;;  %v5042_v10 = vunpack.c.l.b16 %v4970_v33  ;;  %v5043_v63 = vunpack.c.l.b16 %v4971_v25 }
 0x368   : > { %v5976_v38 = vsel %vm1393_vm2, %v5973_v22, %v5975_v54  ;;  %v6214_v60 = vsel %vm1634_vm3, %v6212_v5, %v6213_v27  ;;  %v6421_v46 = vrot.slane %v11957_v57, 6  ;;  %v6423_v53 = vrot.slane %v11960_v32, 6 }
 0x369   : > { %v5972_v18 = vrot.slane %v11967_v28, 7  ;;  %v6215_v4 = vrot.slane %v11970_v58, 1  ;;  %v6420_v49 = vrot.slane %v11967_v28, 6  ;;  %v5063_v31 = vpack.c.b16 %v5043_v63, %v5042_v10 }
 0x36a   : > { %v6082_v52 = vmax.f32 %v11960_v32, %v5976_v38  ;;  %v6628_v41 = vrot.slane %v11957_v57, 2  ;;  %v6629_v42 = vrot.slane %v11960_v32, 2  ;;  %v6631_v16 = vrot.slane %v11970_v58, 2 }
 0x36b   : > { %v5974_v47 = vsel %vm1393_vm2, %v5972_v18, %v5973_v22  ;;  %v6216_v14 = vsel %vm1634_vm3, %v6213_v27, %v6215_v4  ;;  %v6422_v61 = vsel %vm1843_vm4, %v6420_v49, %v6421_v46  ;;  %v5105_v59 = vsel %vm2317_vm1, %v5063_v31, 0 }
 0x36c   : > { %v6081_v29 = vmax.f32 %v11957_v57, %v5974_v47  ;;  %v6322_v23 = vmax.f32 %v6082_v52, %v6216_v14  ;;  %5137 = vmatpush.bf16.xpose.msrb.mxu1 %v5105_v59  ;;  %v11993_v33 = vsel %vm1843_vm4, %v6421_v46, %v6423_v53  ;;  %v6836_v25 = vrot.slane %v11967_v28, 5 }
 0x36d   : > { %v6837_v22 = vrot.slane %v11957_v57, 5  ;;  %v11999_v5 = vsel %vm2052_vm5, %v6628_v41, %v6629_v42  ;;  %v6632_v27 = vsel %vm2052_vm5, %v6629_v42, %v6631_v16  ;;  %v6839_v10 = vrot.slane %v11960_v32, 5 }
 0x36e   : > { %v6321_v21 = vmax.f32 %v6081_v29, %v6214_v60  ;;  %v6530_v54 = vmax.f32 %v6322_v23, %v11993_v33  ;;  %v7044_v4 = vrot.slane %v11957_v57, 3  ;;  %v7045_v38 = vrot.slane %v11960_v32, 3 }
 0x36f   : > { %v6838_v18 = vsel %vm4241_vm6, %v6836_v25, %v6837_v22  ;;  %v6840_v49 = vsel %vm4241_vm6, %v6837_v22, %v6839_v10  ;;  %v7047_v46 = vrot.slane %v11970_v58, 3  ;;  %v7252_v31 = vrot.slane %v11967_v28, 4 }
 0x370   : > { %v6529_v63 = vmax.f32 %v6321_v21, %v6422_v61  ;;  %v6738_v60 = vmax.f32 %v6530_v54, %v6632_v27  ;;  %v7046_v52 = vsel %vm4450_vm7, %v7044_v4, %v7045_v38  ;;  %v7253_v14 = vrot.slane %v11957_v57, 4 }
 0x371   : > { %v7255_v29 = vrot.slane %v11960_v32, 4  ;;  %v7048_v59 = vsel %vm4450_vm7, %v7045_v38, %v7047_v46  ;;  %v7457_v23 = vrot.slane %v11970_v58, 4  ;;  %v7601_v42 = vrot.slane %v11967_v28, 3 }
 0x372   : > { %v6737_v47 = vmax.f32 %v6529_v63, %v11999_v5  ;;  %v6946_v61 = vmax.f32 %v6738_v60, %v6840_v49  ;;  %v7254_v21 = vsel %vm4659_vm8, %v7252_v31, %v7253_v14  ;;  %v7745_v22 = vrot.slane %v11970_v58, 5 }
 0x373   : > { %v7256_v25 = vsel %vm4659_vm8, %v7253_v14, %v7255_v29  ;;  %v7458_v27 = vsel %vm4659_vm8, %v7255_v29, %v7457_v23  ;;  %v7602_v57 = vsel %vm4450_vm7, %v7601_v42, %v7044_v4  ;;  %v7889_v32 = vrot.slane %v11967_v28, 2  ;;  %v13460_v14 = vld [vmem:[#allocation138_spill] sm:$0xff] }
 0x374   : > { %v6945_v16 = vmax.f32 %v6737_v47, %v6838_v18  ;;  %v7154_v54 = vmax.f32 %v6946_v61, %v7048_v59  ;;  %v7746_v38 = vsel %vm4241_vm6, %v6839_v10, %v7745_v22  ;;  %v8033_v60 = vrot.slane %v11970_v58, 6  ;;  %v13459_v18 = vld [vmem:[#allocation12_spill] sm:$0xff]  ;;  %v13461_v59 = vld [vmem:[#allocation67_spill] sm:$0xff] }
 0x375   : > { %v5193_v46 = vmax.f32 %v13459_v18, %v13444_v37  ;;  %v7890_v47 = vsel %vm2052_vm5, %v7889_v32, %v6628_v41  ;;  %v5194_v61 = vmax.f32 %v13460_v14, %v13445_v2  ;;  %v5387_v4 = vmax.f32 %v5191_v48, %v13461_v59  ;;  %v13462_v10 = vld [vmem:[#allocation68_spill] sm:$0xff]  ;;  %v13463_v37 = vld [vmem:[#allocation69_spill] sm:$0xff]  ;;  %v13464_v41 = vld [vmem:[#allocation70_spill] sm:$0xff] }
 0x376   : > { %v7153_v63 = vmax.f32 %v6945_v16, %v7046_v52  ;;  %v7362_v31 = vmax.f32 %v7154_v54, %v7256_v25  ;;  %v8034_v29 = vsel %vm1843_vm4, %v6423_v53, %v8033_v60  ;;  %v5388_v58 = vmax.f32 %v5192_v30, %v13462_v10  ;;  %v13465_v22 = vld [vmem:[#allocation32_spill] sm:$0xff] }
 0x377   : > { %v5389_v23 = vmax.f32 %v5193_v46, %v13463_v37  ;;  %v5390_v16 = vmax.f32 %v5194_v61, %v13464_v41  ;;  %v5583_v2 = vmax.f32 %v5387_v4, %v13465_v22  ;;  %v3387_v54 = vrot.slane %v13425_v24, 7  ;;  %v13468_v53 = vld [vmem:[#allocation128_spill] sm:$0xff] }
 0x378   : > { %v7361_v28 = vmax.f32 %v7153_v63, %v7254_v21  ;;  %v7506_v42 = vmax.f32 %v7362_v31, %v7458_v27  ;;  %v5584_v48 = vmax.f32 %v5388_v58, %v13466_v11  ;;  %v13467_v21 = vld [vmem:[#allocation34_spill] sm:$0xff]  ;;  %v12908_v60 = vrot.slane %v13468_v53, 7  ;;  %v13470_v27 = vld [vmem:[#allocation129_spill] sm:$0xff] }
 0x379   : > { %v5585_v63 = vmax.f32 %v5389_v23, %v13467_v21  ;;  %v5586_v8 = vmax.f32 %v5390_v16, %v13469_v12  ;;  %v12047_v30 = vmax.f32 %v5583_v2, %v13437_v1  ;;  %v3390_v46 = vrot.slane %v13470_v27, 7 }
 0x37a   : > { %v7505_v32 = vmax.f32 %v7361_v28, %v7256_v25  ;;  %v7650_v26 = vmax.f32 %v7506_v42, %v7046_v52  ;;  %v12051_v61 = vmax.f32 %v5584_v48, %v13438_v39  ;;  %v12059_v4 = vsel %vm1393_vm2, %v3387_v54, %v12908_v60 }
 0x37b   : > { %v12054_v25 = vmax.f32 %v5585_v63, %v13439_v13  ;;  %v12062_v28 = vmax.f32 %v5586_v8, %v13440_v40  ;;  %v6012_v1 = vrot.slane %v12047_v30, 7  ;;  %v6460_v58 = vrot.slane %v12047_v30, 6 }
 0x37c   : > { %v7649_v31 = vmax.f32 %v7505_v32, %v7602_v57  ;;  %v7794_v52 = vmax.f32 %v7650_v26, %v7746_v38  ;;  %v6013_v39 = vrot.slane %v12051_v61, 7  ;;  %v6252_v13 = vrot.slane %v12051_v61, 1  ;;  %v8587_v32 = vld [vmem:[%s12579_s1 + $0x8] sm:$0xff] }
 0x37d   : > { %v6015_v23 = vrot.slane %v12054_v25, 7  ;;  %v6253_v16 = vrot.slane %v12054_v25, 1  ;;  %v6255_v26 = vrot.slane %v12062_v28, 1  ;;  %v6461_v40 = vrot.slane %v12051_v61, 6  ;;  %8478 = vmatmul.msk.bf16.vlgmr.msra.gmra.mxu0 %vm2317_vm1, %v8587_v32  ;;  %8479 = vmatmul.msk.bf16.vlgmr.msra.gmra.mxu1 %vm2317_vm1, %v8587_v32 }
 0x37e   : > { %v7793_v57 = vmax.f32 %v7649_v31, %v6840_v49  ;;  %v7938_v42 = vmax.f32 %v7794_v52, %v11999_v5  ;;  %v6014_v2 = vsel %vm1393_vm2, %v6012_v1, %v6013_v39  ;;  %v12907_v49 = vrot.slane %v12054_v25, 6 }
 0x37f   : > { %v6016_v54 = vsel %vm1393_vm2, %v6013_v39, %v6015_v23  ;;  %v6097_v5 = vmax.f32 %v12051_v61, %v6014_v2  ;;  %v6254_v8 = vsel %vm1634_vm3, %v6252_v13, %v6253_v16  ;;  %v6462_v52 = vsel %vm1843_vm4, %v6460_v58, %v6461_v40 }
 0x380   : > { %v7937_v38 = vmax.f32 %v7793_v57, %v7890_v47  ;;  %v8082_v48 = vmax.f32 %v7938_v42, %v8034_v29  ;;  %v6098_v63 = vmax.f32 %v12054_v25, %v6016_v54  ;;  %v6256_v47 = vsel %vm1634_vm3, %v6253_v16, %v6255_v26 }
 0x381   : > { %v12088_v1 = vsel %vm1843_vm4, %v6461_v40, %v12907_v49  ;;  %v6337_v57 = vmax.f32 %v6097_v5, %v6254_v8  ;;  %v6668_v23 = vrot.slane %v12051_v61, 2  ;;  %v6671_v42 = vrot.slane %v12062_v28, 2 }
 0x382   : > { %v8081_v31 = vmax.f32 %v7937_v38, %v11993_v33  ;;  %v8114_v29 = vpack.c.bf16 %v8082_v48, %v8082_v48  ;;  %v6338_v39 = vmax.f32 %v6098_v63, %v6256_v47  ;;  %v6669_v33 = vrot.slane %v12054_v25, 2 }
 0x383   : > { %v6876_v58 = vrot.slane %v12047_v30, 5  ;;  %v6545_v26 = vmax.f32 %v6337_v57, %v6462_v52  ;;  %v6877_v38 = vrot.slane %v12051_v61, 5  ;;  %v6879_v32 = vrot.slane %v12054_v25, 5 }
 0x384   : > { %v8113_v13 = vpack.c.bf16 %v8081_v31, %v8081_v31  ;;  %v8186_v16 = vunpack.c.l.b16 %v8114_v29  ;;  %v6546_v40 = vmax.f32 %v6338_v39, %v12088_v1  ;;  %v12099_v54 = vsel %vm2052_vm5, %v6668_v23, %v6669_v33 }
 0x385   : > { %v6672_v48 = vsel %vm2052_vm5, %v6669_v33, %v6671_v42  ;;  %v6753_v5 = vmax.f32 %v6545_v26, %v12099_v54  ;;  %v6878_v8 = vsel %vm4241_vm6, %v6876_v58, %v6877_v38  ;;  %v7084_v31 = vrot.slane %v12051_v61, 3 }
 0x386   : > { %v8185_v2 = vunpack.c.l.b16 %v8113_v13  ;;  %v6754_v63 = vmax.f32 %v6546_v40, %v6672_v48  ;;  %v6880_v52 = vsel %vm4241_vm6, %v6877_v38, %v6879_v32  ;;  %v7085_v29 = vrot.slane %v12054_v25, 3 }
 0x387   : > { %v7087_v57 = vrot.slane %v12062_v28, 3  ;;  %v6961_v39 = vmax.f32 %v6753_v5, %v6878_v8  ;;  %v7292_v33 = vrot.slane %v12047_v30, 4  ;;  %v7293_v42 = vrot.slane %v12051_v61, 4 }
 0x388   : > { %v8216_v47 = vpack.c.b16 %v8186_v16, %v8185_v2  ;;  %v6962_v13 = vmax.f32 %v6754_v63, %v6880_v52  ;;  %v7086_v40 = vsel %vm4450_vm7, %v7084_v31, %v7085_v29  ;;  %v7295_v16 = vrot.slane %v12054_v25, 4 }
 0x389   : > { %v7088_v58 = vsel %vm4450_vm7, %v7085_v29, %v7087_v57  ;;  %v7169_v38 = vmax.f32 %v6961_v39, %v7086_v40  ;;  %v7294_v48 = vsel %vm4659_vm8, %v7292_v33, %v7293_v42  ;;  %v7473_v5 = vrot.slane %v12062_v28, 4 }
 0x38a   : > { %v8238_v26 = vsel %vm2317_vm1, %v8216_v47, 0  ;;  %v7170_v2 = vmax.f32 %v6962_v13, %v7088_v58  ;;  %v7296_v63 = vsel %vm4659_vm8, %v7293_v42, %v7295_v16  ;;  %v7617_v8 = vrot.slane %v12047_v30, 3 }
 0x38b   : > { %8288 = vmatpush.bf16.xpose.msrb.mxu2 %v8238_v26  ;;  %v7761_v61 = vrot.slane %v12062_v28, 5  ;;  %v7905_v47 = vrot.slane %v12047_v30, 2  ;;  %v7377_v49 = vmax.f32 %v7169_v38, %v7294_v48  ;;  %v7474_v29 = vsel %vm4659_vm8, %v7295_v16, %v7473_v5 }
 0x38c   : > { %v7378_v60 = vmax.f32 %v7170_v2, %v7296_v63  ;;  %v8049_v57 = vrot.slane %v12062_v28, 6  ;;  %v7618_v39 = vsel %vm4450_vm7, %v7617_v8, %v7084_v31  ;;  %v13471_v42 = vrot.slane %v13468_v53, 7 }
 0x38d   : > { %v7762_v13 = vsel %vm4241_vm6, %v6879_v32, %v7761_v61  ;;  %v7906_v33 = vsel %vm2052_vm5, %v7905_v47, %v6668_v23  ;;  %v7521_v58 = vmax.f32 %v7377_v49, %v7296_v63  ;;  %v13472_v38 = vrot.slane %v12054_v25, 6 }
 0x38e   : > { %v3391_v26 = vsel %vm1393_vm2, %v13471_v42, %v3390_v46  ;;  %v7522_v30 = vmax.f32 %v7378_v60, %v7474_v29  ;;  %v3493_v28 = vmax.f32 %v13468_v53, %v12059_v4  ;;  %v3627_v32 = vrot.slane %v13468_v53, 1 }
 0x38f   : > { %v8050_v16 = vsel %vm1843_vm4, %v13472_v38, %v8049_v57  ;;  %v3494_v31 = vmax.f32 %v13470_v27, %v3391_v26  ;;  %v3628_v23 = vrot.slane %v13470_v27, 1  ;;  %v3630_v2 = vrot.slane %v13426_v7, 1 }
 0x390   : > { %v7665_v48 = vmax.f32 %v7521_v58, %v7618_v39  ;;  %v7666_v5 = vmax.f32 %v7522_v30, %v7086_v40  ;;  %v3835_v46 = vrot.slane %v13425_v24, 6  ;;  %v3836_v60 = vrot.slane %v13468_v53, 6 }
 0x391   : > { %v3629_v25 = vsel %vm1634_vm3, %v3627_v32, %v3628_v23  ;;  %v3631_v49 = vsel %vm1634_vm3, %v3628_v23, %v3630_v2  ;;  %v3838_v4 = vrot.slane %v13470_v27, 6  ;;  %v4043_v63 = vrot.slane %v13468_v53, 2 }
 0x392   : > { %v7809_v8 = vmax.f32 %v7665_v48, %v6880_v52  ;;  %v7810_v61 = vmax.f32 %v7666_v5, %v7762_v13  ;;  %v3733_v47 = vmax.f32 %v3493_v28, %v3629_v25  ;;  %v3734_v29 = vmax.f32 %v3494_v31, %v3631_v49 }
 0x393   : > { %v3837_v57 = vsel %vm1843_vm4, %v3835_v46, %v3836_v60  ;;  %v3839_v40 = vsel %vm1843_vm4, %v3836_v60, %v3838_v4  ;;  %v4044_v39 = vrot.slane %v13470_v27, 2  ;;  %v4046_v42 = vrot.slane %v13426_v7, 2 }
 0x394   : > { %v7953_v26 = vmax.f32 %v7809_v8, %v7906_v33  ;;  %v7954_v58 = vmax.f32 %v7810_v61, %v12099_v54  ;;  %v3941_v30 = vmax.f32 %v3733_v47, %v3837_v57  ;;  %v3942_v38 = vmax.f32 %v3734_v29, %v3839_v40 }
 0x395   : > { %v4045_v32 = vsel %vm2052_vm5, %v4043_v63, %v4044_v39  ;;  %v4047_v52 = vsel %vm2052_vm5, %v4044_v39, %v4046_v42  ;;  %v4252_v13 = vrot.slane %v13425_v24, 5  ;;  %v4253_v28 = vrot.slane %v13468_v53, 5 }
 0x396   : > { %v8097_v31 = vmax.f32 %v7953_v26, %v12088_v1  ;;  %v8098_v23 = vmax.f32 %v7954_v58, %v8050_v16  ;;  %v4149_v2 = vmax.f32 %v3941_v30, %v4045_v32  ;;  %v4150_v48 = vmax.f32 %v3942_v38, %v4047_v52 }
 0x397   : > { %v4254_v5 = vsel %vm4241_vm6, %v4252_v13, %v4253_v28  ;;  %v4255_v33 = vrot.slane %v13470_v27, 5  ;;  %v4461_v54 = vrot.slane %v13468_v53, 3  ;;  %v4462_v46 = vrot.slane %v13470_v27, 3 }
 0x398   : > { %v8129_v60 = vpack.c.bf16 %v8097_v31, %v8097_v31  ;;  %v8130_v25 = vpack.c.bf16 %v8098_v23, %v8098_v23  ;;  %v4358_v49 = vmax.f32 %v4149_v2, %v4254_v5  ;;  %v4464_v4 = vrot.slane %v13426_v7, 3 }
 0x399   : > { %v4256_v63 = vsel %vm4241_vm6, %v4253_v28, %v4255_v33  ;;  %v4463_v1 = vsel %vm4450_vm7, %v4461_v54, %v4462_v46  ;;  %v4670_v16 = vrot.slane %v13425_v24, 4  ;;  %v4671_v8 = vrot.slane %v13468_v53, 4 }
 0x39a   : > { %v8201_v61 = vunpack.c.l.b16 %v8129_v60  ;;  %v8202_v47 = vunpack.c.l.b16 %v8130_v25  ;;  %v4359_v29 = vmax.f32 %v4150_v48, %v4256_v63  ;;  %v4465_v57 = vsel %vm4450_vm7, %v4462_v46, %v4464_v4 }
 0x39b   : > { %v4567_v40 = vmax.f32 %v4358_v49, %v4463_v1  ;;  %v4672_v39 = vsel %vm4659_vm8, %v4670_v16, %v4671_v8  ;;  %v4673_v42 = vrot.slane %v13470_v27, 4  ;;  %v4872_v26 = vrot.slane %v13426_v7, 4 }
 0x39c   : > { %v8224_v58 = vpack.c.b16 %v8202_v47, %v8201_v61  ;;  %v4568_v30 = vmax.f32 %v4359_v29, %v4465_v57  ;;  %v3427_v38 = vrot.slane %v13433_v17, 7  ;;  %v3428_v24 = vrot.slane %v13434_v20, 7 }
 0x39d   : > { %v4674_v53 = vsel %vm4659_vm8, %v4671_v8, %v4673_v42  ;;  %v4776_v32 = vmax.f32 %v4567_v40, %v4672_v39  ;;  %v4873_v52 = vsel %vm4659_vm8, %v4673_v42, %v4872_v26  ;;  %v3430_v13 = vrot.slane %v13435_v36, 7 }
 0x39e   : > { %v8262_v28 = vsel %vm2317_vm1, %v8224_v58, 0  ;;  %v4777_v31 = vmax.f32 %v4568_v30, %v4674_v53  ;;  %v3429_v27 = vsel %vm1393_vm2, %v3427_v38, %v3428_v24  ;;  %v3667_v7 = vrot.slane %v13434_v20, 1 }
 0x39f   : > { %8302 = vmatpush.bf16.xpose.msrb.mxu3 %v8262_v28  ;;  %v4920_v23 = vmax.f32 %v4776_v32, %v4674_v53  ;;  %v3431_v2 = vsel %vm1393_vm2, %v3428_v24, %v3430_v13  ;;  %v3509_v48 = vmax.f32 %v13434_v20, %v3429_v27  ;;  %v3668_v5 = vrot.slane %v13435_v36, 1 }
 0x3a0   : > { %v4921_v33 = vmax.f32 %v4777_v31, %v4873_v52  ;;  %v3510_v54 = vmax.f32 %v13435_v36, %v3431_v2  ;;  %v3670_v46 = vrot.slane %v13436_v0, 1  ;;  %v3875_v60 = vrot.slane %v13433_v17, 6  ;;  %v8591_v2 = vld [vmem:[#allocation2] sm:$0xff]  }
 0x3a1   : > { %v4952_v25 = vpack.c.bf16 %v4920_v23, %v4920_v23  ;;  %v3669_v49 = vsel %vm1634_vm3, %v3667_v7, %v3668_v5  ;;  %v3876_v4 = vrot.slane %v13434_v20, 6  ;;  %v3878_v63 = vrot.slane %v13435_v36, 6 }
 0x3a2   : > { %v4953_v1 = vpack.c.bf16 %v4921_v33, %v4921_v33  ;;  %v3671_v16 = vsel %vm1634_vm3, %v3668_v5, %v3670_v46  ;;  %v3749_v8 = vmax.f32 %v3509_v48, %v3669_v49  ;;  %v4083_v61 = vrot.slane %v13434_v20, 2 }
 0x3a3   : > { %v5024_v47 = vunpack.c.l.b16 %v4952_v25  ;;  %v3750_v29 = vmax.f32 %v3510_v54, %v3671_v16  ;;  %v3877_v57 = vsel %vm1843_vm4, %v3875_v60, %v3876_v4  ;;  %v3879_v40 = vsel %vm1843_vm4, %v3876_v4, %v3878_v63  ;;  %v8814_v4 = vld [vmem:[#allocation2 + $0x8] sm:$0xff]  }
 0x3a4   : > { %v5025_v39 = vunpack.c.l.b16 %v4953_v1  ;;  %v3957_v42 = vmax.f32 %v3749_v8, %v3877_v57  ;;  %v4084_v26 = vrot.slane %v13435_v36, 2  ;;  %v4086_v58 = vrot.slane %v13436_v0, 2 }
 0x3a5   : > { %v3958_v30 = vmax.f32 %v3750_v29, %v3879_v40  ;;  %v4292_v38 = vrot.slane %v13433_v17, 5  ;;  %v4293_v24 = vrot.slane %v13434_v20, 5  ;;  %v4295_v53 = vrot.slane %v13435_v36, 5 }
 0x3a6   : > { %v5054_v32 = vpack.c.b16 %v5025_v39, %v5024_v47  ;;  %v4085_v52 = vsel %vm2052_vm5, %v4083_v61, %v4084_v26  ;;  %v4087_v13 = vsel %vm2052_vm5, %v4084_v26, %v4086_v58  ;;  %v4501_v28 = vrot.slane %v13434_v20, 3  ;;  %v13474_v58 = vld [vmem:[#allocation114_spill] sm:$0xff] }
 0x3a7   : > { %v4165_v31 = vmax.f32 %v3957_v42, %v4085_v52  ;;  %v4166_v27 = vmax.f32 %v3958_v30, %v4087_v13  ;;  %v4294_v7 = vsel %vm4241_vm6, %v4292_v38, %v4293_v24  ;;  %v4296_v23 = vsel %vm4241_vm6, %v4293_v24, %v4295_v53  ;;  %v13476_v38 = vld [vmem:[#allocation144_spill] sm:$0xff] }
 0x3a8   : > { %v5078_v48 = vsel %vm2317_vm1, %v5054_v32, 0  ;;  %v4502_v5 = vrot.slane %v13435_v36, 3  ;;  %v4504_v33 = vrot.slane %v13436_v0, 3  ;;  %v4710_v54 = vrot.slane %v13433_v17, 4  ;;  %v13477_v52 = vld [vmem:[#allocation40_spill] sm:$0xff] }
 0x3a9   : > { %5124 = vmatpush.bf16.xpose.msrb.mxu0 %v5078_v48  ;;  %v4374_v46 = vmax.f32 %v4165_v31, %v4294_v7  ;;  %v4375_v60 = vmax.f32 %v4166_v27, %v4296_v23  ;;  %v4711_v25 = vrot.slane %v13434_v20, 4  ;;  %v4713_v49 = vrot.slane %v13435_v36, 4  ;;  %v13479_v23 = vld [vmem:[#allocation13_spill] sm:$0xff] }
 0x3aa   : > { %v4503_v63 = vsel %vm4450_vm7, %v4501_v28, %v4502_v5  ;;  %v4505_v1 = vsel %vm4450_vm7, %v4502_v5, %v4504_v33  ;;  %v4888_v16 = vrot.slane %v13436_v0, 4  ;;  %v8592_v8 = vunpack.c.l.bf16 %v8591_v2  ;;  %v13478_v28 = vld [vmem:[#allocation41_spill] sm:$0xff]  ;;  %v13480_v5 = vld [vmem:[#allocation42_spill] sm:$0xff] }
 0x3ab   : > { %v4583_v61 = vmax.f32 %v4374_v46, %v4503_v63  ;;  %v4584_v47 = vmax.f32 %v4375_v60, %v4505_v1  ;;  %v4712_v29 = vsel %vm4659_vm8, %v4710_v54, %v4711_v25  ;;  %v4714_v17 = vsel %vm4659_vm8, %v4711_v25, %v4713_v49  ;;  %v13482_v46 = vld [vmem:[#allocation5_spill] sm:$0xff]  ;;  %v13483_v60 = vld [vmem:[#allocation6_spill] sm:$0xff] }
 0x3ac   : > { %v4889_v57 = vsel %vm4659_vm8, %v4713_v49, %v4888_v16  ;;  %v8593_v40 = vunpack.c.h.bf16 %v8591_v2  ;;  %v8596_v20 = vunpack.c.l.bf16 %v8814_v4  ;;  %v8597_v39 = vunpack.c.h.bf16 %v8814_v4  ;;  %v13485_v4 = vld [vmem:[#allocation64_spill] sm:$0xff] }
 0x3ad   : > { %v4792_v36 = vmax.f32 %v4583_v61, %v4712_v29  ;;  %v4793_v42 = vmax.f32 %v4584_v47, %v4714_v17  ;;  %v13473_v26 = vunpack.c.l.bf16 %v11916_v50  ;;  %v13475_v0 = vunpack.c.h.bf16 %v11924_v3 }
 0x3ae   : > { %v5352_v53 = vmax.f32 %v11945_v44, %v13242_v62  ;;  %v5353_v32 = vmax.f32 %v11948_v55, %v13244_v45  ;;  %v5187_v13 = vmax.f32 %v13477_v52, %v13465_v22  ;;  %v5188_v31 = vmax.f32 %v13478_v28, %v13466_v11  ;;  %v13481_v44 = vld [vmem:[#allocation28_spill] sm:$0xff] }
 0x3af   : > { %v5155_v30 = vmax.f32 %v13474_v58, %v13473_v26  ;;  %v5158_v24 = vmax.f32 %v13476_v38, %v13475_v0  ;;  %v4936_v27 = vmax.f32 %v4792_v36, %v4714_v17  ;;  %v4937_v50 = vmax.f32 %v4793_v42, %v4889_v57 }
 0x3b0   : > { %v5548_v2 = vmax.f32 %v5352_v53, %v8593_v40  ;;  %v5549_v48 = vmax.f32 %v5353_v32, %v8596_v20  ;;  %v5189_v62 = vmax.f32 %v13480_v5, %v13467_v21  ;;  %v5190_v45 = vmax.f32 %v13481_v44, %v13469_v12 }
 0x3b1   : > { %v5351_v7 = vmax.f32 %v5155_v30, %v13420_v43  ;;  %v5354_v3 = vmax.f32 %v5158_v24, %v13479_v23  ;;  %v4968_v55 = vpack.c.bf16 %v4936_v27, %v4936_v27  ;;  %v4969_v33 = vpack.c.bf16 %v4937_v50, %v4937_v50  ;;  %v13484_v43 = vld [vmem:[#allocation63_spill] sm:$0xff] }
 0x3b2   : > { %v12233_v11 = vmax.f32 %v5548_v2, %v13482_v46  ;;  %v12236_v25 = vmax.f32 %v5549_v48, %v13483_v60  ;;  %v12239_v49 = vmax.f32 %v5187_v13, %v13484_v43  ;;  %v12242_v63 = vmax.f32 %v5188_v31, %v13485_v4 }
 0x3b3   : > { %v5547_v22 = vmax.f32 %v5351_v7, %v8592_v8  ;;  %v5550_v54 = vmax.f32 %v5354_v3, %v8597_v39  ;;  %v5040_v1 = vunpack.c.l.b16 %v4968_v55  ;;  %v5041_v16 = vunpack.c.l.b16 %v4969_v33 }
 0x3b4   : > { %v5968_v8 = vrot.slane %v12233_v11, 7  ;;  %v5970_v29 = vrot.slane %v12236_v25, 7  ;;  %v6207_v17 = vrot.slane %v12233_v11, 1  ;;  %v6208_v57 = vrot.slane %v12236_v25, 1 }
 0x3b5   : > { %v5743_v61 = vmax.f32 %v5547_v22, %v13398_v56  ;;  %v12246_v47 = vmax.f32 %v5550_v54, %v13401_v35  ;;  %v5062_v40 = vpack.c.b16 %v5041_v16, %v5040_v1  ;;  %v6416_v35 = vrot.slane %v12233_v11, 6 }
 0x3b6   : > { %v5971_v42 = vsel %vm1393_vm2, %v5968_v8, %v5970_v29  ;;  %v6209_v56 = vsel %vm1634_vm3, %v6207_v17, %v6208_v57  ;;  %v6418_v26 = vrot.slane %v12236_v25, 6  ;;  %v6623_v27 = vrot.slane %v12233_v11, 2 }
 0x3b7   : > { %v5967_v20 = vrot.slane %v5743_v61, 7  ;;  %v6210_v39 = vrot.slane %v12246_v47, 1  ;;  %v6415_v36 = vrot.slane %v5743_v61, 6  ;;  %v5102_v30 = vsel %vm2317_vm1, %v5062_v40, 0 }
 0x3b8   : > { %v6080_v24 = vmax.f32 %v12236_v25, %v5971_v42  ;;  %5138 = vmatpush.bf16.xpose.msrb.mxu1 %v5102_v30  ;;  %v12264_v31 = vsel %vm1843_vm4, %v6416_v35, %v6418_v26  ;;  %v6624_v7 = vrot.slane %v12236_v25, 2  ;;  %v6626_v23 = vrot.slane %v12246_v47, 2 }
 0x3b9   : > { %v5969_v0 = vsel %vm1393_vm2, %v5967_v20, %v5968_v8  ;;  %v6211_v53 = vsel %vm1634_vm3, %v6208_v57, %v6210_v39  ;;  %v6417_v13 = vsel %vm1843_vm4, %v6415_v36, %v6416_v35  ;;  %v6831_v3 = vrot.slane %v5743_v61, 5 }
 0x3ba   : > { %v6079_v32 = vmax.f32 %v12233_v11, %v5969_v0  ;;  %v6320_v50 = vmax.f32 %v6080_v24, %v6211_v53  ;;  %v6832_v48 = vrot.slane %v12233_v11, 5  ;;  %v6834_v55 = vrot.slane %v12236_v25, 5 }
 0x3bb   : > { %v7039_v33 = vrot.slane %v12233_v11, 3  ;;  %v12274_v54 = vsel %vm2052_vm5, %v6623_v27, %v6624_v7  ;;  %v6627_v46 = vsel %vm2052_vm5, %v6624_v7, %v6626_v23  ;;  %v7040_v60 = vrot.slane %v12236_v25, 3 }
 0x3bc   : > { %v6319_v2 = vmax.f32 %v6079_v32, %v6209_v56  ;;  %v6528_v22 = vmax.f32 %v6320_v50, %v12264_v31  ;;  %v6833_v4 = vsel %vm4241_vm6, %v6831_v3, %v6832_v48  ;;  %v6835_v1 = vsel %vm4241_vm6, %v6832_v48, %v6834_v55  ;;  %v13486_v3 = vld [vmem:[#allocation65_spill] sm:$0xff]  ;;  %v13487_v48 = vld [vmem:[#allocation66_spill] sm:$0xff] }
 0x3bd   : > { %v7042_v16 = vrot.slane %v12246_v47, 3  ;;  %v7041_v29 = vsel %vm4450_vm7, %v7039_v33, %v7040_v60  ;;  %v7247_v17 = vrot.slane %v5743_v61, 4  ;;  %v7248_v57 = vrot.slane %v12233_v11, 4 }
 0x3be   : > { %v6527_v43 = vmax.f32 %v6319_v2, %v6417_v13  ;;  %v6736_v8 = vmax.f32 %v6528_v22, %v6627_v46  ;;  %v7250_v39 = vrot.slane %v12236_v25, 4  ;;  %v7455_v36 = vrot.slane %v12246_v47, 4  ;;  %v13488_v46 = vld [vmem:[#allocation75_spill] sm:$0xff] }
 0x3bf   : > { %v7043_v20 = vsel %vm4450_vm7, %v7040_v60, %v7042_v16  ;;  %v7249_v56 = vsel %vm4659_vm8, %v7247_v17, %v7248_v57  ;;  %v7599_v35 = vrot.slane %v5743_v61, 3  ;;  %v7743_v30 = vrot.slane %v12246_v47, 5  ;;  %v13491_v16 = vld [vmem:[#allocation78_spill] sm:$0xff] }
 0x3c0   : > { %v6735_v40 = vmax.f32 %v6527_v43, %v12274_v54  ;;  %v6944_v42 = vmax.f32 %v6736_v8, %v6835_v1  ;;  %v7251_v24 = vsel %vm4659_vm8, %v7248_v57, %v7250_v39  ;;  %v7456_v53 = vsel %vm4659_vm8, %v7250_v39, %v7455_v36  ;;  %v13490_v43 = vld [vmem:[#allocation77_spill] sm:$0xff] }
 0x3c1   : > { %v7887_v11 = vrot.slane %v5743_v61, 2  ;;  %v7600_v13 = vsel %vm4450_vm7, %v7599_v35, %v7039_v33  ;;  %v7744_v50 = vsel %vm4241_vm6, %v6834_v55, %v7743_v30  ;;  %v8031_v25 = vrot.slane %v12246_v47, 6  ;;  %v13489_v47 = vld [vmem:[#allocation76_spill] sm:$0xff] }
 0x3c2   : > { %v6943_v0 = vmax.f32 %v6735_v40, %v6833_v4  ;;  %v7152_v32 = vmax.f32 %v6944_v42, %v7043_v20  ;;  %v5385_v2 = vmax.f32 %v5189_v62, %v13486_v3  ;;  %v5386_v61 = vmax.f32 %v5190_v45, %v13487_v48  ;;  %v13493_v40 = vld [vmem:[#allocation110_spill] sm:$0xff] }
 0x3c3   : > { %v7888_v23 = vsel %vm2052_vm5, %v7887_v11, %v6623_v27  ;;  %v8032_v33 = vsel %vm1843_vm4, %v6418_v26, %v8031_v25  ;;  %v5579_v55 = vmax.f32 %v12239_v49, %v13488_v46  ;;  %v5580_v60 = vmax.f32 %v12242_v63, %v13489_v47  ;;  %v13492_v26 = vld [vmem:[#allocation100_spill] sm:$0xff] }
 0x3c4   : > { %v7151_v7 = vmax.f32 %v6943_v0, %v7041_v29  ;;  %v7360_v22 = vmax.f32 %v7152_v32, %v7251_v24  ;;  %v5581_v4 = vmax.f32 %v5385_v2, %v13490_v43  ;;  %v5582_v21 = vmax.f32 %v5386_v61, %v13491_v16 }
 0x3c5   : > { %v3382_v62 = vrot.slane %v13447_v9, 7  ;;  %v12312_v12 = vmax.f32 %v5579_v55, %v13461_v59  ;;  %v12315_v45 = vmax.f32 %v5580_v60, %v13462_v10  ;;  %v3383_v17 = vrot.slane %v13492_v26, 7 }
 0x3c6   : > { %v7359_v27 = vmax.f32 %v7151_v7, %v7249_v56  ;;  %v7504_v8 = vmax.f32 %v7360_v22, %v7456_v53  ;;  %v12319_v57 = vmax.f32 %v5581_v4, %v13463_v37  ;;  %v12322_v63 = vmax.f32 %v5582_v21, %v13464_v41 }
 0x3c7   : > { %v3385_v20 = vrot.slane %v13493_v40, 7  ;;  %v6007_v36 = vrot.slane %v12312_v12, 7  ;;  %v6008_v59 = vrot.slane %v12315_v45, 7  ;;  %v6247_v42 = vrot.slane %v12315_v45, 1 }
 0x3c8   : > { %v7503_v49 = vmax.f32 %v7359_v27, %v7251_v24  ;;  %v7648_v39 = vmax.f32 %v7504_v8, %v7041_v29  ;;  %v6010_v56 = vrot.slane %v12319_v57, 7  ;;  %v6248_v35 = vrot.slane %v12319_v57, 1 }
 0x3c9   : > { %v6250_v37 = vrot.slane %v12322_v63, 1  ;;  %v6009_v41 = vsel %vm1393_vm2, %v6007_v36, %v6008_v59  ;;  %v6455_v0 = vrot.slane %v12312_v12, 6  ;;  %v6456_v29 = vrot.slane %v12315_v45, 6 }
 0x3ca   : > { %v7647_v10 = vmax.f32 %v7503_v49, %v7600_v13  ;;  %v7792_v30 = vmax.f32 %v7648_v39, %v7744_v50  ;;  %v6011_v53 = vsel %vm1393_vm2, %v6008_v59, %v6010_v56  ;;  %v6095_v11 = vmax.f32 %v12315_v45, %v6009_v41 }
 0x3cb   : > { %v6249_v32 = vsel %vm1634_vm3, %v6247_v42, %v6248_v35  ;;  %v6096_v25 = vmax.f32 %v12319_v57, %v6011_v53  ;;  %v6251_v7 = vsel %vm1634_vm3, %v6248_v35, %v6250_v37  ;;  %v6457_v50 = vsel %vm1843_vm4, %v6455_v0, %v6456_v29 }
 0x3cc   : > { %v7791_v24 = vmax.f32 %v7647_v10, %v6835_v1  ;;  %v7936_v13 = vmax.f32 %v7792_v30, %v12274_v54  ;;  %v6335_v2 = vmax.f32 %v6095_v11, %v6249_v32  ;;  %v6458_v48 = vrot.slane %v12319_v57, 6 }
 0x3cd   : > { %v6663_v1 = vrot.slane %v12315_v45, 2  ;;  %v6336_v22 = vmax.f32 %v6096_v25, %v6251_v7  ;;  %v6664_v46 = vrot.slane %v12319_v57, 2  ;;  %v6666_v55 = vrot.slane %v12322_v63, 2 }
 0x3ce   : > { %v7935_v3 = vmax.f32 %v7791_v24, %v7888_v23  ;;  %v8080_v61 = vmax.f32 %v7936_v13, %v8032_v33  ;;  %v12347_v47 = vsel %vm1843_vm4, %v6456_v29, %v6458_v48  ;;  %v6543_v60 = vmax.f32 %v6335_v2, %v6457_v50 }
 0x3cf   : > { %v6871_v27 = vrot.slane %v12312_v12, 5  ;;  %v6544_v43 = vmax.f32 %v6336_v22, %v12347_v47  ;;  %v12352_v4 = vsel %vm2052_vm5, %v6663_v1, %v6664_v46  ;;  %v6667_v33 = vsel %vm2052_vm5, %v6664_v46, %v6666_v55 }
 0x3d0   : > { %v8079_v54 = vmax.f32 %v7935_v3, %v12264_v31  ;;  %v8112_v23 = vpack.c.bf16 %v8080_v61, %v8080_v61  ;;  %v6751_v21 = vmax.f32 %v6543_v60, %v12352_v4  ;;  %v6872_v8 = vrot.slane %v12315_v45, 5 }
 0x3d1   : > { %v6874_v31 = vrot.slane %v12319_v57, 5  ;;  %v6752_v39 = vmax.f32 %v6544_v43, %v6667_v33  ;;  %v7079_v36 = vrot.slane %v12315_v45, 3  ;;  %v7080_v59 = vrot.slane %v12319_v57, 3 }
 0x3d2   : > { %v8111_v16 = vpack.c.bf16 %v8079_v54, %v8079_v54  ;;  %v8184_v49 = vunpack.c.l.b16 %v8112_v23  ;;  %v6873_v10 = vsel %vm4241_vm6, %v6871_v27, %v6872_v8  ;;  %v7082_v35 = vrot.slane %v12322_v63, 3 }
 0x3d3   : > { %v6875_v56 = vsel %vm4241_vm6, %v6872_v8, %v6874_v31  ;;  %v6959_v37 = vmax.f32 %v6751_v21, %v6873_v10  ;;  %v7081_v41 = vsel %vm4450_vm7, %v7079_v36, %v7080_v59  ;;  %v7287_v0 = vrot.slane %v12312_v12, 4 }
 0x3d4   : > { %v8183_v42 = vunpack.c.l.b16 %v8111_v16  ;;  %v6960_v30 = vmax.f32 %v6752_v39, %v6875_v56  ;;  %v7083_v24 = vsel %vm4450_vm7, %v7080_v59, %v7082_v35  ;;  %v7288_v53 = vrot.slane %v12315_v45, 4 }
 0x3d5   : > { %v7290_v11 = vrot.slane %v12319_v57, 4  ;;  %v7167_v32 = vmax.f32 %v6959_v37, %v7081_v41  ;;  %v7471_v25 = vrot.slane %v12322_v63, 4  ;;  %v7615_v7 = vrot.slane %v12312_v12, 3 }
 0x3d6   : > { %v8215_v29 = vpack.c.b16 %v8184_v49, %v8183_v42  ;;  %v7168_v13 = vmax.f32 %v6960_v30, %v7083_v24  ;;  %v7289_v3 = vsel %vm4659_vm8, %v7287_v0, %v7288_v53  ;;  %v7759_v61 = vrot.slane %v12322_v63, 5 }
 0x3d7   : > { %v7291_v2 = vsel %vm4659_vm8, %v7288_v53, %v7290_v11  ;;  %v7375_v22 = vmax.f32 %v7167_v32, %v7289_v3  ;;  %v7472_v45 = vsel %vm4659_vm8, %v7290_v11, %v7471_v25  ;;  %v7616_v57 = vsel %vm4450_vm7, %v7615_v7, %v7079_v36 }
 0x3d8   : > { %v8235_v50 = vsel %vm2317_vm1, %v8215_v29, 0  ;;  %v7376_v46 = vmax.f32 %v7168_v13, %v7291_v2  ;;  %v7760_v55 = vsel %vm4241_vm6, %v6874_v31, %v7759_v61  ;;  %v7903_v54 = vrot.slane %v12312_v12, 2 }
 0x3d9   : > { %8289 = vmatpush.bf16.xpose.msrb.mxu2 %v8235_v50  ;;  %v8047_v60 = vrot.slane %v12322_v63, 6  ;;  %v3384_v27 = vsel %vm1393_vm2, %v3382_v62, %v3383_v17  ;;  %v7519_v23 = vmax.f32 %v7375_v22, %v7291_v2  ;;  %v3386_v33 = vsel %vm1393_vm2, %v3383_v17, %v3385_v20 }
 0x3da   : > { %v7520_v43 = vmax.f32 %v7376_v46, %v7472_v45  ;;  %v3491_v16 = vmax.f32 %v13492_v26, %v3384_v27  ;;  %v7904_v12 = vsel %vm2052_vm5, %v7903_v54, %v6663_v1  ;;  %v3492_v21 = vmax.f32 %v13493_v40, %v3386_v33 }
 0x3db   : > { %v8048_v63 = vsel %vm1843_vm4, %v6458_v48, %v8047_v60  ;;  %v3622_v8 = vrot.slane %v13492_v26, 1  ;;  %v7663_v31 = vmax.f32 %v7519_v23, %v7616_v57  ;;  %v3623_v49 = vrot.slane %v13493_v40, 1  ;;  %v8589_v23 = vld [vmem:[%s12579_s1 + $0x18] sm:$0xff] }
 0x3dc   : > { %v7664_v62 = vmax.f32 %v7520_v43, %v7081_v41  ;;  %v3625_v39 = vrot.slane %v13449_v51, 1  ;;  %v3830_v36 = vrot.slane %v13447_v9, 6  ;;  %v3831_v17 = vrot.slane %v13492_v26, 6 }
 0x3dd   : > { %v3833_v20 = vrot.slane %v13493_v40, 6  ;;  %v4038_v1 = vrot.slane %v13492_v26, 2  ;;  %v7807_v59 = vmax.f32 %v7663_v31, %v6875_v56  ;;  %v3624_v42 = vsel %vm1634_vm3, %v3622_v8, %v3623_v49 }
 0x3de   : > { %v7808_v48 = vmax.f32 %v7664_v62, %v7760_v55  ;;  %v3626_v10 = vsel %vm1634_vm3, %v3623_v49, %v3625_v39  ;;  %v3731_v35 = vmax.f32 %v3491_v16, %v3624_v42  ;;  %v3832_v30 = vsel %vm1843_vm4, %v3830_v36, %v3831_v17 }
 0x3df   : > { %v3732_v37 = vmax.f32 %v3492_v21, %v3626_v10  ;;  %v3834_v41 = vsel %vm1843_vm4, %v3831_v17, %v3833_v20  ;;  %v7951_v0 = vmax.f32 %v7807_v59, %v7904_v12  ;;  %v4039_v24 = vrot.slane %v13493_v40, 2 }
 0x3e0   : > { %v7952_v29 = vmax.f32 %v7808_v48, %v12352_v4  ;;  %v4041_v53 = vrot.slane %v13449_v51, 2  ;;  %v3939_v11 = vmax.f32 %v3731_v35, %v3832_v30  ;;  %v4247_v32 = vrot.slane %v13447_v9, 5  ;;  %8564 = vmatmul.msk.bf16.vlgmr.msrb.gmra.mxu2 %vm2317_vm1, %v8589_v23 }
 0x3e1   : > { %v3940_v56 = vmax.f32 %v3732_v37, %v3834_v41  ;;  %v4248_v13 = vrot.slane %v13492_v26, 5  ;;  %v8095_v25 = vmax.f32 %v7951_v0, %v12347_v47  ;;  %v4040_v50 = vsel %vm2052_vm5, %v4038_v1, %v4039_v24 }
 0x3e2   : > { %v8096_v7 = vmax.f32 %v7952_v29, %v8048_v63  ;;  %v4042_v3 = vsel %vm2052_vm5, %v4039_v24, %v4041_v53  ;;  %v4147_v2 = vmax.f32 %v3939_v11, %v4040_v50  ;;  %v4250_v22 = vrot.slane %v13493_v40, 5 }
 0x3e3   : > { %v4148_v61 = vmax.f32 %v3940_v56, %v4042_v3  ;;  %v4249_v4 = vsel %vm4241_vm6, %v4247_v32, %v4248_v13  ;;  %v8127_v46 = vpack.c.bf16 %v8095_v25, %v8095_v25  ;;  %v4456_v57 = vrot.slane %v13492_v26, 3 }
 0x3e4   : > { %v8128_v45 = vpack.c.bf16 %v8096_v7, %v8096_v7  ;;  %v4457_v55 = vrot.slane %v13493_v40, 3  ;;  %v4251_v54 = vsel %vm4241_vm6, %v4248_v13, %v4250_v22  ;;  %v4356_v47 = vmax.f32 %v4147_v2, %v4249_v4 }
 0x3e5   : > { %v4459_v60 = vrot.slane %v13449_v51, 3  ;;  %v4665_v27 = vrot.slane %v13447_v9, 4  ;;  %v8199_v43 = vunpack.c.l.b16 %v8127_v46  ;;  %v4357_v16 = vmax.f32 %v4148_v61, %v4251_v54 }
 0x3e6   : > { %v8200_v33 = vunpack.c.l.b16 %v8128_v45  ;;  %v4458_v12 = vsel %vm4450_vm7, %v4456_v57, %v4457_v55  ;;  %v4666_v8 = vrot.slane %v13492_v26, 4  ;;  %v4668_v31 = vrot.slane %v13493_v40, 4 }
 0x3e7   : > { %v4460_v63 = vsel %vm4450_vm7, %v4457_v55, %v4459_v60  ;;  %v4565_v21 = vmax.f32 %v4356_v47, %v4458_v12  ;;  %v4870_v49 = vrot.slane %v13449_v51, 4  ;;  %v3422_v39 = vrot.slane %v13457_v34, 7 }
 0x3e8   : > { %v8223_v62 = vpack.c.b16 %v8200_v33, %v8199_v43  ;;  %v4566_v9 = vmax.f32 %v4357_v16, %v4460_v63  ;;  %v4667_v36 = vsel %vm4659_vm8, %v4665_v27, %v4666_v8  ;;  %v4669_v17 = vsel %vm4659_vm8, %v4666_v8, %v4668_v31 }
 0x3e9   : > { %v3423_v20 = vrot.slane %v13458_v6, 7  ;;  %v3425_v1 = vrot.slane %v13459_v18, 7  ;;  %v4774_v59 = vmax.f32 %v4565_v21, %v4667_v36  ;;  %v4871_v48 = vsel %vm4659_vm8, %v4668_v31, %v4870_v49 }
 0x3ea   : > { %v8259_v26 = vsel %vm2317_vm1, %v8223_v62, 0  ;;  %v4775_v40 = vmax.f32 %v4566_v9, %v4669_v17  ;;  %v3662_v10 = vrot.slane %v13458_v6, 1  ;;  %v3663_v35 = vrot.slane %v13459_v18, 1 }
 0x3eb   : > { %8303 = vmatpush.bf16.xpose.msrb.mxu3 %v8259_v26  ;;  %v3424_v42 = vsel %vm1393_vm2, %v3422_v39, %v3423_v20  ;;  %v3426_v51 = vsel %vm1393_vm2, %v3423_v20, %v3425_v1  ;;  %v4918_v37 = vmax.f32 %v4774_v59, %v4669_v17  ;;  %v3665_v24 = vrot.slane %v13460_v14, 1 }
 0x3ec   : > { %v4919_v30 = vmax.f32 %v4775_v40, %v4871_v48  ;;  %v3507_v41 = vmax.f32 %v13458_v6, %v3424_v42  ;;  %v3508_v0 = vmax.f32 %v13459_v18, %v3426_v51  ;;  %v3664_v29 = vsel %vm1634_vm3, %v3662_v10, %v3663_v35 }
 0x3ed   : > { %v3870_v53 = vrot.slane %v13457_v34, 6  ;;  %v3871_v11 = vrot.slane %v13458_v6, 6  ;;  %v4950_v56 = vpack.c.bf16 %v4918_v37, %v4918_v37  ;;  %v3873_v25 = vrot.slane %v13459_v18, 6 }
 0x3ee   : > { %v4951_v32 = vpack.c.bf16 %v4919_v30, %v4919_v30  ;;  %v3747_v13 = vmax.f32 %v3507_v41, %v3664_v29  ;;  %v3666_v7 = vsel %vm1634_vm3, %v3663_v35, %v3665_v24  ;;  %v4078_v3 = vrot.slane %v13458_v6, 2 }
 0x3ef   : > { %v3872_v50 = vsel %vm1843_vm4, %v3870_v53, %v3871_v11  ;;  %v4079_v2 = vrot.slane %v13459_v18, 2  ;;  %v5022_v61 = vunpack.c.l.b16 %v4950_v56  ;;  %v3748_v22 = vmax.f32 %v3508_v0, %v3666_v7 }
 0x3f0   : > { %v5023_v4 = vunpack.c.l.b16 %v4951_v32  ;;  %v3874_v46 = vsel %vm1843_vm4, %v3871_v11, %v3873_v25  ;;  %v3955_v45 = vmax.f32 %v3747_v13, %v3872_v50  ;;  %v4081_v55 = vrot.slane %v13460_v14, 2 }
 0x3f1   : > { %v4080_v57 = vsel %vm2052_vm5, %v4078_v3, %v4079_v2  ;;  %v4287_v54 = vrot.slane %v13457_v34, 5  ;;  %v3956_v60 = vmax.f32 %v3748_v22, %v3874_v46  ;;  %v4288_v27 = vrot.slane %v13458_v6, 5 }
 0x3f2   : > { %v5053_v47 = vpack.c.b16 %v5023_v4, %v5022_v61  ;;  %v4290_v43 = vrot.slane %v13459_v18, 5  ;;  %8565 = vmatmul.msk.bf16.vlgmr.msrb.gmra.mxu3 %vm2317_vm1, %v8589_v23  ;;  %v4082_v33 = vsel %vm2052_vm5, %v4079_v2, %v4081_v55  ;;  %v4163_v16 = vmax.f32 %v3955_v45, %v4080_v57 }
 0x3f3   : > { %v4496_v12 = vrot.slane %v13458_v6, 3  ;;  %v4497_v63 = vrot.slane %v13459_v18, 3  ;;  %v4164_v8 = vmax.f32 %v3956_v60, %v4082_v33  ;;  %v4289_v31 = vsel %vm4241_vm6, %v4287_v54, %v4288_v27 }
 0x3f4   : > { %v5075_v21 = vsel %vm2317_vm1, %v5053_v47, 0  ;;  %v4291_v62 = vsel %vm4241_vm6, %v4288_v27, %v4290_v43  ;;  %v4372_v9 = vmax.f32 %v4163_v16, %v4289_v31  ;;  %v4499_v23 = vrot.slane %v13460_v14, 3 }
 0x3f5   : > { %5125 = vmatpush.bf16.xpose.msrb.mxu0 %v5075_v21  ;;  %v4498_v49 = vsel %vm4450_vm7, %v4496_v12, %v4497_v63  ;;  %v4705_v39 = vrot.slane %v13457_v34, 4  ;;  %v4373_v36 = vmax.f32 %v4164_v8, %v4291_v62  ;;  %v4706_v17 = vrot.slane %v13458_v6, 4 }
 0x3f6   : > { %v4708_v20 = vrot.slane %v13459_v18, 4  ;;  %v4886_v1 = vrot.slane %v13460_v14, 4  ;;  %v4500_v26 = vsel %vm4450_vm7, %v4497_v63, %v4499_v23  ;;  %v4581_v59 = vmax.f32 %v4372_v9, %v4498_v49 }
 0x3f7   : > { %v3377_v40 = vrot.slane %v13474_v58, 7  ;;  %v3378_v48 = vrot.slane %v13451_v15, 7  ;;  %v4582_v42 = vmax.f32 %v4373_v36, %v4500_v26  ;;  %v4707_v51 = vsel %vm4659_vm8, %v4705_v39, %v4706_v17 }
 0x3f8   : > { %v4709_v10 = vsel %vm4659_vm8, %v4706_v17, %v4708_v20  ;;  %v4887_v34 = vsel %vm4659_vm8, %v4708_v20, %v4886_v1  ;;  %v4790_v35 = vmax.f32 %v4581_v59, %v4707_v51  ;;  %v3380_v18 = vrot.slane %v13452_v19, 7 }
 0x3f9   : > { %v3379_v6 = vsel %vm1393_vm2, %v3377_v40, %v3378_v48  ;;  %v3617_v14 = vrot.slane %v13451_v15, 1  ;;  %v4791_v37 = vmax.f32 %v4582_v42, %v4709_v10  ;;  %v3618_v41 = vrot.slane %v13452_v19, 1 }
 0x3fa   : > { %v3489_v30 = vmax.f32 %v13451_v15, %v3379_v6  ;;  %v3620_v0 = vrot.slane %v13476_v38, 1  ;;  %v4934_v29 = vmax.f32 %v4790_v35, %v4709_v10  ;;  %v3381_v24 = vsel %vm1393_vm2, %v3378_v48, %v3380_v18 }
 0x3fb   : > { %v3825_v53 = vrot.slane %v13474_v58, 6  ;;  %v3826_v11 = vrot.slane %v13451_v15, 6  ;;  %v4935_v56 = vmax.f32 %v4791_v37, %v4887_v34  ;;  %v3490_v32 = vmax.f32 %v13452_v19, %v3381_v24 }
 0x3fc   : > { %v3619_v13 = vsel %vm1634_vm3, %v3617_v14, %v3618_v41  ;;  %v3621_v25 = vsel %vm1634_vm3, %v3618_v41, %v3620_v0  ;;  %v4966_v7 = vpack.c.bf16 %v4934_v29, %v4934_v29  ;;  %v3828_v2 = vrot.slane %v13452_v19, 6 }
 0x3fd   : > { %v3729_v50 = vmax.f32 %v3489_v30, %v3619_v13  ;;  %v3827_v3 = vsel %vm1843_vm4, %v3825_v53, %v3826_v11  ;;  %v4967_v61 = vpack.c.bf16 %v4935_v56, %v4935_v56  ;;  %v3730_v4 = vmax.f32 %v3490_v32, %v3621_v25 }
 0x3fe   : > { %v4033_v22 = vrot.slane %v13451_v15, 2  ;;  %v4034_v46 = vrot.slane %v13452_v19, 2  ;;  %v5038_v45 = vunpack.c.l.b16 %v4966_v7  ;;  %v3829_v57 = vsel %vm1843_vm4, %v3826_v11, %v3828_v2 }
 0x3ff   : > { %v3937_v55 = vmax.f32 %v3729_v50, %v3827_v3  ;;  %v4036_v54 = vrot.slane %v13476_v38, 2  ;;  %v5039_v47 = vunpack.c.l.b16 %v4967_v61  ;;  %v3938_v60 = vmax.f32 %v3730_v4, %v3829_v57 }
 0x400   : > { %v4035_v27 = vsel %vm2052_vm5, %v4033_v22, %v4034_v46  ;;  %v4242_v43 = vrot.slane %v13474_v58, 5  ;;  %v4243_v12 = vrot.slane %v13451_v15, 5  ;;  %v4245_v63 = vrot.slane %v13452_v19, 5 }
 0x401   : > { %v4037_v33 = vsel %vm2052_vm5, %v4034_v46, %v4036_v54  ;;  %v4145_v16 = vmax.f32 %v3937_v55, %v4035_v27  ;;  %v5061_v21 = vpack.c.b16 %v5039_v47, %v5038_v45  ;;  %v4451_v31 = vrot.slane %v13451_v15, 3 }
 0x402   : > { %v4146_v8 = vmax.f32 %v3938_v60, %v4037_v33  ;;  %v4452_v62 = vrot.slane %v13452_v19, 3  ;;  %v4244_v9 = vsel %vm4241_vm6, %v4242_v43, %v4243_v12  ;;  %v4246_v49 = vsel %vm4241_vm6, %v4243_v12, %v4245_v63 }
 0x403   : > { %v4454_v23 = vrot.slane %v13476_v38, 3  ;;  %v4660_v39 = vrot.slane %v13474_v58, 4  ;;  %v5099_v36 = vsel %vm2317_vm1, %v5061_v21, 0  ;;  %v4354_v17 = vmax.f32 %v4145_v16, %v4244_v9 }
 0x404   : > { %v4355_v20 = vmax.f32 %v4146_v8, %v4246_v49  ;;  %v4453_v1 = vsel %vm4450_vm7, %v4451_v31, %v4452_v62  ;;  %5139 = vmatpush.bf16.xpose.msrb.mxu1 %v5099_v36  ;;  %v4661_v59 = vrot.slane %v13451_v15, 4  ;;  %v4663_v40 = vrot.slane %v13452_v19, 4 }
 0x405   : > { %v4455_v26 = vsel %vm4450_vm7, %v4452_v62, %v4454_v23  ;;  %v4868_v48 = vrot.slane %v13476_v38, 4  ;;  %v4563_v42 = vmax.f32 %v4354_v17, %v4453_v1  ;;  %v3417_v10 = vrot.slane %v13477_v52, 7 }
 0x406   : > { %v4564_v51 = vmax.f32 %v4355_v20, %v4455_v26  ;;  %v3418_v58 = vrot.slane %v13478_v28, 7  ;;  %v4662_v34 = vsel %vm4659_vm8, %v4660_v39, %v4661_v59  ;;  %v4664_v35 = vsel %vm4659_vm8, %v4661_v59, %v4663_v40 }
 0x407   : > { %v4869_v6 = vsel %vm4659_vm8, %v4663_v40, %v4868_v48  ;;  %v3420_v18 = vrot.slane %v13480_v5, 7  ;;  %v4772_v14 = vmax.f32 %v4563_v42, %v4662_v34  ;;  %v3657_v38 = vrot.slane %v13478_v28, 1  ;;  %v8333_v42 = vld [vmem:[%s12580_s2] sm:$0xff] }
 0x408   : > { %v4773_v15 = vmax.f32 %v4564_v51, %v4664_v35  ;;  %v3419_v19 = vsel %vm1393_vm2, %v3417_v10, %v3418_v58  ;;  %v3658_v41 = vrot.slane %v13480_v5, 1  ;;  %v3660_v0 = vrot.slane %v13481_v44, 1 }
 0x409   : > { %v3421_v37 = vsel %vm1393_vm2, %v3418_v58, %v3420_v18  ;;  %v3505_v30 = vmax.f32 %v13478_v28, %v3419_v19  ;;  %v4916_v29 = vmax.f32 %v4772_v14, %v4664_v35  ;;  %v3865_v11 = vrot.slane %v13477_v52, 6  ;;  %v8334_v19 = vld [vmem:[%s12580_s2 + $0x8] sm:$0xff] }
 0x40a   : > { %v4917_v24 = vmax.f32 %v4773_v15, %v4869_v6  ;;  %v3506_v53 = vmax.f32 %v13480_v5, %v3421_v37  ;;  %v3659_v56 = vsel %vm1634_vm3, %v3657_v38, %v3658_v41  ;;  %v3661_v32 = vsel %vm1634_vm3, %v3658_v41, %v3660_v0  ;;  %v2378_v41 = vpop.f32.mrf.mxu0  ;;  %v2542_v0 = vpop.f32.mrf.mxu2 }
 0x40b   : > { %v3866_v13 = vrot.slane %v13478_v28, 6  ;;  %v3868_v25 = vrot.slane %v13480_v5, 6  ;;  %v4948_v7 = vpack.c.bf16 %v4916_v29, %v4916_v29  ;;  %v3745_v3 = vmax.f32 %v3505_v30, %v3659_v56 }
 0x40c   : > { %v4949_v50 = vpack.c.bf16 %v4917_v24, %v4917_v24  ;;  %v3746_v2 = vmax.f32 %v3506_v53, %v3661_v32  ;;  %v4073_v22 = vrot.slane %v13478_v28, 2  ;;  %v4074_v46 = vrot.slane %v13480_v5, 2  ;;  %v2392_v53 = vpop.f32.mrf.mxu1 }
 0x40d   : > { %v3867_v61 = vsel %vm1843_vm4, %v3865_v11, %v3866_v13  ;;  %v3869_v4 = vsel %vm1843_vm4, %v3866_v13, %v3868_v25  ;;  %v5020_v45 = vunpack.c.l.b16 %v4948_v7  ;;  %v4076_v60 = vrot.slane %v13481_v44, 2  ;;  %v2556_v11 = vpop.f32.mrf.mxu3 }
 0x40e   : > { %v5021_v57 = vunpack.c.l.b16 %v4949_v50  ;;  %v3953_v55 = vmax.f32 %v3745_v3, %v3867_v61  ;;  %v3954_v54 = vmax.f32 %v3746_v2, %v3869_v4  ;;  %v4075_v47 = vsel %vm2052_vm5, %v4073_v22, %v4074_v46 }
 0x40f   : > { %v4282_v27 = vrot.slane %v13477_v52, 5  ;;  %v4283_v43 = vrot.slane %v13478_v28, 5  ;;  %v4285_v12 = vrot.slane %v13480_v5, 5  ;;  %v4491_v63 = vrot.slane %v13478_v28, 3 }
 0x410   : > { %v5052_v33 = vpack.c.b16 %v5021_v57, %v5020_v45  ;;  %v4161_v16 = vmax.f32 %v3953_v55, %v4075_v47  ;;  %v4077_v21 = vsel %vm2052_vm5, %v4074_v46, %v4076_v60  ;;  %v4492_v31 = vrot.slane %v13480_v5, 3 }
 0x411   : > { %v4284_v8 = vsel %vm4241_vm6, %v4282_v27, %v4283_v43  ;;  %v4494_v62 = vrot.slane %v13481_v44, 3  ;;  %v4162_v49 = vmax.f32 %v3954_v54, %v4077_v21  ;;  %v4286_v23 = vsel %vm4241_vm6, %v4283_v43, %v4285_v12 }
 0x412   : > { %v5072_v9 = vsel %vm2317_vm1, %v5052_v33, 0  ;;  %v4370_v39 = vmax.f32 %v4161_v16, %v4284_v8  ;;  %v4493_v36 = vsel %vm4450_vm7, %v4491_v63, %v4492_v31  ;;  %v4700_v20 = vrot.slane %v13477_v52, 4  ;;  %v8588_v52 = vld [vmem:[%s12579_s1 + $0x10] sm:$0xff]  ;;  %v2380_v29 = vpop.f32.mrf.mxu0  ;;  %v2544_v24 = vpop.f32.mrf.mxu2 }
 0x413   : > { %5126 = vmatpush.bf16.xpose.msrb.mxu0 %v5072_v9  ;;  %v4495_v17 = vsel %vm4450_vm7, %v4492_v31, %v4494_v62  ;;  %v4701_v1 = vrot.slane %v13478_v28, 4  ;;  %v4371_v26 = vmax.f32 %v4162_v49, %v4286_v23  ;;  %v4703_v40 = vrot.slane %v13480_v5, 4 }
 0x414   : > { %v4579_v59 = vmax.f32 %v4370_v39, %v4493_v36  ;;  %v4884_v48 = vrot.slane %v13481_v44, 4  ;;  %v8937_v28 = vmov 0   ;;  %v2543_v56 = vadd.f32 %v2542_v0, %v2378_v41  ;;  %v2394_v2 = vpop.f32.mrf.mxu1 }
 0x415   : > { %v4702_v51 = vsel %vm4659_vm8, %v4700_v20, %v4701_v1  ;;  %v4580_v10 = vmax.f32 %v4371_v26, %v4495_v17  ;;  %v4704_v58 = vsel %vm4659_vm8, %v4701_v1, %v4703_v40  ;;  %8895 = vset.pattern.permute.xlu0 %v8937_v28  ;;  %v2545_v61 = vadd.f32 %v2544_v24, %v2380_v29  ;;  %v2558_v22 = vpop.f32.mrf.mxu3 }
 0x416   : > { %v4788_v34 = vmax.f32 %v4579_v59, %v4702_v51  ;;  %v4885_v5 = vsel %vm4659_vm8, %v4703_v40, %v4884_v48  ;;  %8337 = vperm.xlu0 %8895, %v8333_v42   ;;  %v2557_v27 = vadd.f32 %v2556_v11, %v2392_v53  ;;  %v2559_v9 = vadd.f32 %v2558_v22, %v2394_v2 }
 0x417   : > { %v4789_v44 = vmax.f32 %v4580_v10, %v4704_v58 }
 0x418   : > { %v4932_v35 = vmax.f32 %v4788_v34, %v4704_v58 }
 0x419   : > { %v4933_v6 = vmax.f32 %v4789_v44, %v4885_v5 }
 0x41a   : > { %v4964_v18 = vpack.c.bf16 %v4932_v35, %v4932_v35  ;;  %8556 = vmatmul.msk.bf16.vlgmr.msrb.gmra.mxu0 %vm2317_vm1, %v8588_v52 }
 0x41b   : > { %v4965_v14 = vpack.c.bf16 %v4933_v6, %v4933_v6 }
 0x41c   : > { %v5036_v15 = vunpack.c.l.b16 %v4964_v18 }
 0x41d   : > { %v5037_v38 = vunpack.c.l.b16 %v4965_v14 }
 0x41e   : > { %8342 = vperm.xlu0 %8895, %v8334_v19  }
 0x41f   : > { %v5060_v37 = vpack.c.b16 %v5037_v38, %v5036_v15 }
 0x421   : > { %v5096_v30 = vsel %vm2317_vm1, %v5060_v37, 0 }
 0x422   : > { %5140 = vmatpush.bf16.xpose.msrb.mxu1 %v5096_v30 }
 0x429   : > { %8557 = vmatmul.msk.bf16.vlgmr.msrb.gmra.mxu1 %vm2317_vm1, %v8588_v52 }
 0x463   : > { %v8291_v32 = vpop.f32.mrf.mxu2 }
 0x46b   : > { %v8293_v55 = vpop.f32.mrf.mxu2 }
 0x475   : > { %v8305_v33 = vpop.f32.mrf.mxu3 }
 0x47d   : > { %v8307_v1 = vpop.f32.mrf.mxu3 }
 0x488   : > { %v8338_v7 = vpop.permute.xlu0 %8337 }
 0x490   : > { %v8343_v47 = vpop.permute.xlu0 %8342 }
 0x497   : > { %v5128_v13 = vpop.f32.mrf.mxu0 }
 0x498   : > { %v5147_v25 = vadd.f32 %v5128_v13, %v2543_v56 }
 0x49a   : > { %v8310_v50 = vadd.f32 %v8291_v32, %v5147_v25 }
 0x49c   : > { %v8345_v3 = vadd.f32 %v8338_v7, %v8310_v50 }
 0x49e   : > { %v8349_v4 = vsub.f32 0.0, %v8345_v3 }
 0x49f   : > { %v5130_v46 = vpop.f32.mrf.mxu0 }
 0x4a0   : > { %v8353_v45 = vmul.f32 1.442695, %v8349_v4  ;;  %v5149_v57 = vadd.f32 %v5130_v46, %v2545_v61 }
 0x4a2   : > { %8896 = vpow2.f32 %v8353_v45  ;;  %v8312_v54 = vadd.f32 %v8293_v55, %v5149_v57 }
 0x4a4   : > { %v8347_v60 = vadd.f32 %v8343_v47, %v8312_v54 }
 0x4a6   : > { %v8351_v43 = vsub.f32 0.0, %v8347_v60  ;;  %v5142_v16 = vpop.f32.mrf.mxu1 }
 0x4a7   : > { %v5148_v63 = vadd.f32 %v5142_v16, %v2557_v27 }
 0x4a8   : > { %v8897_v12 = vpop.eup %8896  ;;  %v8357_v21 = vmul.f32 1.442695, %v8351_v43 }
 0x4a9   : > { %v8361_v8 = vadd.f32 1.0, %v8897_v12  ;;  %v8311_v31 = vadd.f32 %v8305_v33, %v5148_v63 }
 0x4aa   : > { %8898 = vpow2.f32 %v8357_v21 }
 0x4ab   : > { %8900 = vrcp.f32 %v8361_v8  ;;  %v8346_v62 = vadd.f32 %v8338_v7, %v8311_v31 }
 0x4ad   : > { %v8350_v49 = vsub.f32 0.0, %v8346_v62 }
 0x4ae   : > { %v5144_v23 = vpop.f32.mrf.mxu1 }
 0x4af   : > { %v8355_v36 = vmul.f32 1.442695, %v8350_v49  ;;  %v5150_v17 = vadd.f32 %v5144_v23, %v2559_v9 }
 0x4b0   : > { %v8899_v39 = vpop.eup %8898 }
 0x4b1   : > { %v8901_v20 = vpop.eup %8900  ;;  %v8363_v26 = vadd.f32 1.0, %v8899_v39  ;;  %8902 = vpow2.f32 %v8355_v36  ;;  %v8313_v40 = vadd.f32 %v8307_v1, %v5150_v17 }
 0x4b2   : > { %v8369_v59 = vmul.f32 %v8901_v20, %v8345_v3 }
 0x4b3   : > { %8904 = vrcp.f32 %v8363_v26  ;;  %v8348_v48 = vadd.f32 %v8343_v47, %v8313_v40 }
 0x4b4   : > { %8373 = vst [vmem:[%s210_s8] sm:$0xff] %v8369_v59 }
 0x4b5   : > { %v8352_v42 = vsub.f32 0.0, %v8348_v48 }
 0x4b7   : > { %v8903_v51 = vpop.eup %8902  ;;  %v8359_v10 = vmul.f32 1.442695, %v8352_v42 }
 0x4b8   : > { %v8362_v34 = vadd.f32 1.0, %v8903_v51 }
 0x4b9   : > { %v8905_v58 = vpop.eup %8904  ;;  %8906 = vpow2.f32 %v8359_v10 }
 0x4ba   : > { %v8371_v52 = vmul.f32 %v8905_v58, %v8347_v60  ;;  %8908 = vrcp.f32 %v8362_v34 }
 0x4bc   : > { %8375 = vst [vmem:[%s210_s8 + $0x10] sm:$0xff] %v8371_v52 }
 0x4bf   : > { %v8907_v28 = vpop.eup %8906 }
 0x4c0   : > { %v8909_v5 = vpop.eup %8908  ;;  %v8364_v44 = vadd.f32 1.0, %v8907_v28 }
 0x4c1   : > { %v8370_v35 = vmul.f32 %v8909_v5, %v8346_v62 }
 0x4c2   : > { %8910 = vrcp.f32 %v8364_v44 }
 0x4c3   : > { %8374 = vst [vmem:[%s210_s8 + $0x8] sm:$0xff] %v8370_v35 }
 0x4c8   : > { %v8911_v6 = vpop.eup %8910 }
 0x4c9   : > { %v8372_v18 = vmul.f32 %v8911_v6, %v8348_v48 }
 0x4cb   : > { %8376 = vst [vmem:[%s210_s8 + $0x18] sm:$0xff] %v8372_v18 }
 0x4cc PF: > { %s13_s14 = sadd.s32 1, %s8934_s14   ;;  %s13494_s12 = smov %s8930_s13 }
 0x4cd   : > { %p10_p5 = scmp.ge.s32.totalorder %s13_s14, 4   ;;  %s13495_s13 = smov %s13497_s15 }
 0x4cf   :  { %12 = sbr.rel (!%p10_p5) target bundleno = 2 (0x2), region = 78 }

</bundles_post_ra>
